<compile_context>
chip_gen: v5e
topology: v5e:2x2
jax: 0.10.0
libtpu: 0.0.40
codegen_flags: <defaults>
</compile_context>

<pallas_src>
import jax
import jax.numpy as jnp
from jax.experimental import pallas as pl
from jax.experimental.pallas import tpu as pltpu

NEG_SLOPE = 0.1   # nn.LeakyReLU(0.1)
BN_EPS = 1e-5     # nn.BatchNorm2d default eps


def _leaky_relu(x):
    # maximum(x, a*x) == where(x>=0, x, a*x) for 0 < a < 1, one fewer VALU op.
    return jnp.maximum(x, NEG_SLOPE * x)


def _basic_block_kernel(x_ref, w1_ref, g1_ref, b1_ref,
                        w2_ref, g2_ref, b2_ref,
                        w3_ref, g3_ref, b3_ref,
                        o_ref, xpad_ref):
    n, h, w, c = x_ref.shape
    m = n * h * w
    cout = o_ref.shape[-1]
    w_pad = xpad_ref.shape[2]
    inv_m = 1.0 / float(m)

    # In-kernel 1-pixel zero padding: zero ONLY the halo strips (interior is
    # rewritten between stages; columns >= w+2 of the aligned buffer are never
    # read by any 3x3 window).
    zrow = jnp.zeros((n, 1, w_pad, c), xpad_ref.dtype)
    xpad_ref[:, 0:1, :, :] = zrow
    xpad_ref[:, h + 1:h + 2, :, :] = zrow
    zcol = jnp.zeros((n, h + 2, 1, c), xpad_ref.dtype)
    xpad_ref[:, :, 0:1, :] = zcol
    xpad_ref[:, :, w + 1:w + 2, :] = zcol

    # Interior <- input (bf16 conv operand, matches the reference's bf16 cast).
    xpad_ref[:, 1:1 + h, 1:1 + w, :] = x_ref[...].astype(xpad_ref.dtype)

    def conv3x3_bn(w_ref, g_ref, b_ref):
        # 9 accumulating K=C matmuls over shifted windows (no im2col scratch):
        # bf16 operands, f32 accumulation on the MXU.
        acc = jnp.zeros((m, cout), jnp.float32)
        for kh in range(3):
            for kw in range(3):
                patch = xpad_ref[:, kh:kh + h, kw:kw + w, :].reshape(m, c)
                acc = acc + jnp.dot(patch, w_ref[kh * 3 + kw],
                                    preferred_element_type=jnp.float32)
        # BatchNorm2d training-mode stats (biased variance), two-pass form
        # (numerically safer than E[y^2]-E[y]^2), all f32.
        mean = jnp.sum(acc, axis=0, keepdims=True) * inv_m
        centered = acc - mean
        var = jnp.sum(centered * centered, axis=0, keepdims=True) * inv_m
        # Folded affine: per-channel scale, then a single mul+add per element.
        scale = g_ref[...] * jax.lax.rsqrt(var + BN_EPS)          # (1, cout)
        return centered * scale + b_ref[...]

    # conv1 -> bn1 -> lrelu
    y = _leaky_relu(conv3x3_bn(w1_ref, g1_ref, b1_ref))
    xpad_ref[:, 1:1 + h, 1:1 + w, :] = y.reshape(n, h, w, cout).astype(xpad_ref.dtype)

    # conv2 -> bn2 -> lrelu
    y = _leaky_relu(conv3x3_bn(w2_ref, g2_ref, b2_ref))
    xpad_ref[:, 1:1 + h, 1:1 + w, :] = y.reshape(n, h, w, cout).astype(xpad_ref.dtype)

    # conv3 -> bn3 -> +residual -> lrelu
    y = conv3x3_bn(w3_ref, g3_ref, b3_ref)
    y = y + x_ref[...].reshape(m, cout)        # residual = x (downsample=None)
    y = _leaky_relu(y)
    # TODO(synk): nn.MaxPool2d(stride) for stride > 1; with the module default
    # stride=1 it is a 1x1 / stride-1 pool, i.e. the identity.
    o_ref[...] = y.reshape(n, h, w, cout).astype(o_ref.dtype)


def basic_block_forward(x, params):
    """BasicBlock.forward with module defaults (stride=1, downsample=None).

    Note: self.cas_attention (CasBlock) is constructed in __init__ but never
    called in forward (and CasBlock is undefined in the spec), so it is omitted.
    """
    n, h, w, c = x.shape
    cout = params["w1"].shape[-1]
    assert cout == c, "residual add requires inplanes == planes when downsample is None"

    # Padded width rounded up to a 16-sublane multiple (bf16 packing) so the
    # window reads / interior writes avoid most masked sublane accesses.
    w_pad = ((w + 2 + 15) // 16) * 16

    def prep_w(wt):  # (3,3,Cin,Cout) HWIO -> (9, Cin, Cout) bf16 for the MXU
        return wt.reshape(9, wt.shape[2], wt.shape[3]).astype(jnp.bfloat16)

    args = (x,
            prep_w(params["w1"]), params["g1"], params["b1"],
            prep_w(params["w2"]), params["g2"], params["b2"],
            prep_w(params["w3"]), params["g3"], params["b3"])

    m = n * h * w
    bytes_io = (m * c * 4 + m * cout * 4            # x in, out
                + 3 * 9 * c * cout * 2              # bf16 weights
                + 6 * cout * 4)                     # gammas / betas
    bytes_scratch = n * (h + 2) * w_pad * c * 2     # bf16 padded activation
    vmem_limit = int(min(max(2 * (bytes_io + bytes_scratch) + (8 << 20),
                             16 << 20), 48 << 20))

    cost = pl.CostEstimate(
        flops=3 * 2 * m * 9 * c * cout + 3 * 8 * m * cout,
        transcendentals=3 * cout,
        bytes_accessed=bytes_io)

    vmem_spec = lambda: pl.BlockSpec(memory_space=pltpu.MemorySpace.VMEM)
    return pl.pallas_call(
        _basic_block_kernel,
        out_shape=jax.ShapeDtypeStruct((n, h, w, cout), jnp.float32),
        in_specs=[vmem_spec() for _ in args],
        out_specs=vmem_spec(),
        scratch_shapes=[
            pltpu.VMEM((n, h + 2, w_pad, c), jnp.bfloat16),   # padded activation
        ],
        compiler_params=pltpu.CompilerParams(vmem_limit_bytes=vmem_limit),
        cost_estimate=cost,
    )(*args)


def reference_forward(x, params):
    """Pure-JAX reference with matched precision (bf16 conv operands,
    f32 accumulation, f32 BatchNorm/LeakyReLU) for the correctness check."""
    def conv(y, wt):
        return jax.lax.conv_general_dilated(
            y.astype(jnp.bfloat16), wt.astype(jnp.bfloat16),
            window_strides=(1, 1), padding="SAME",
            dimension_numbers=("NHWC", "HWIO", "NHWC"),
            preferred_element_type=jnp.float32)

    def bn(y, g, b):
        mu = jnp.mean(y, axis=(0, 1, 2), keepdims=True)
        var = jnp.mean(jnp.square(y - mu), axis=(0, 1, 2), keepdims=True)
        return ((y - mu) * jax.lax.rsqrt(var + BN_EPS)
                * g.reshape(1, 1, 1, -1) + b.reshape(1, 1, 1, -1))

    out = _leaky_relu(bn(conv(x, params["w1"]), params["g1"], params["b1"]))
    out = _leaky_relu(bn(conv(out, params["w2"]), params["g2"], params["b2"]))
    out = bn(conv(out, params["w3"]), params["g3"], params["b3"])
    out = _leaky_relu(out + x)
    return out


if __name__ == "__main__":
    # inplanes == planes == C (required for the residual add, downsample=None)
    N, H, W, C = 2, 8, 8, 128

    key = jax.random.PRNGKey(0)
    keys = jax.random.split(key, 10)
    x = jax.random.normal(keys[0], (N, H, W, C), dtype=jnp.float32)

    params = {}
    for i, (kw_, kg, kb) in enumerate(((1, 2, 3), (4, 5, 6), (7, 8, 9)), start=1):
        params[f"w{i}"] = 0.05 * jax.random.normal(
            keys[kw_], (3, 3, C, C), dtype=jnp.float32)          # conv3x3, bias=False
        params[f"g{i}"] = 1.0 + 0.1 * jax.random.normal(
            keys[kg], (1, C), dtype=jnp.float32)                 # BN gamma
        params[f"b{i}"] = 0.1 * jax.random.normal(
            keys[kb], (1, C), dtype=jnp.float32)                 # BN beta

    out = jax.block_until_ready(jax.jit(basic_block_forward)(x, params))
    ref = jax.block_until_ready(jax.jit(reference_forward)(x, params))

    err = float(jnp.max(jnp.abs(out - ref)))
    assert out.shape == (N, H, W, C), out.shape
    assert err < 5e-2, f"max abs err too large: {err}"
    print("KERNEL_OK")
</pallas_src>

<mosaic_0001>
module attributes {stable_mosaic.version = 11 : i64} {
  func.func @_basic_block_kernel(%arg0: memref<2x8x8x128xf32, #tpu.memory_space<vmem>>, %arg1: memref<9x128x128xbf16, #tpu.memory_space<vmem>>, %arg2: memref<1x128xf32, #tpu.memory_space<vmem>>, %arg3: memref<1x128xf32, #tpu.memory_space<vmem>>, %arg4: memref<9x128x128xbf16, #tpu.memory_space<vmem>>, %arg5: memref<1x128xf32, #tpu.memory_space<vmem>>, %arg6: memref<1x128xf32, #tpu.memory_space<vmem>>, %arg7: memref<9x128x128xbf16, #tpu.memory_space<vmem>>, %arg8: memref<1x128xf32, #tpu.memory_space<vmem>>, %arg9: memref<1x128xf32, #tpu.memory_space<vmem>>, %arg10: memref<2x8x8x128xf32, #tpu.memory_space<vmem>>, %arg11: memref<2x10x16x128xbf16, #tpu.memory_space<vmem>>) attributes {dimension_semantics = [], scalar_prefetch = 0 : i64, scratch_operands = 1 : i64, tpu.core_type = #tpu.core_type<tc>} {
    %cst = arith.constant 0.000000e+00 : bf16
    %0 = vector.broadcast %cst : bf16 to vector<2x1x16x128xbf16>
    %c0 = arith.constant 0 : index
    %c0_0 = arith.constant 0 : index
    %c0_1 = arith.constant 0 : index
    %c0_2 = arith.constant 0 : index
    %1 = vector.load %arg11[%c0, %c0_0, %c0_1, %c0_2] : memref<2x10x16x128xbf16, #tpu.memory_space<vmem>>, vector<2x1x16x128xbf16>
    tpu.vector_store %arg11[%c0, %c0_0, %c0_1, %c0_2], %0 {strides = array<i32>} : memref<2x10x16x128xbf16, #tpu.memory_space<vmem>>, vector<2x1x16x128xbf16>,
    %c0_3 = arith.constant 0 : index
    %c9 = arith.constant 9 : index
    %c0_4 = arith.constant 0 : index
    %c0_5 = arith.constant 0 : index
    %2 = vector.load %arg11[%c0_3, %c9, %c0_4, %c0_5] : memref<2x10x16x128xbf16, #tpu.memory_space<vmem>>, vector<2x1x16x128xbf16>
    tpu.vector_store %arg11[%c0_3, %c9, %c0_4, %c0_5], %0 {strides = array<i32>} : memref<2x10x16x128xbf16, #tpu.memory_space<vmem>>, vector<2x1x16x128xbf16>,
    %cst_6 = arith.constant 0.000000e+00 : bf16
    %3 = vector.broadcast %cst_6 : bf16 to vector<2x10x1x128xbf16>
    %c0_7 = arith.constant 0 : index
    %c0_8 = arith.constant 0 : index
    %c0_9 = arith.constant 0 : index
    %c0_10 = arith.constant 0 : index
    %4 = vector.load %arg11[%c0_7, %c0_8, %c0_9, %c0_10] : memref<2x10x16x128xbf16, #tpu.memory_space<vmem>>, vector<2x10x1x128xbf16>
    tpu.vector_store %arg11[%c0_7, %c0_8, %c0_9, %c0_10], %3 {strides = array<i32>} : memref<2x10x16x128xbf16, #tpu.memory_space<vmem>>, vector<2x10x1x128xbf16>,
    %c0_11 = arith.constant 0 : index
    %c0_12 = arith.constant 0 : index
    %c9_13 = arith.constant 9 : index
    %c0_14 = arith.constant 0 : index
    %5 = vector.load %arg11[%c0_11, %c0_12, %c9_13, %c0_14] : memref<2x10x16x128xbf16, #tpu.memory_space<vmem>>, vector<2x10x1x128xbf16>
    tpu.vector_store %arg11[%c0_11, %c0_12, %c9_13, %c0_14], %3 {strides = array<i32>} : memref<2x10x16x128xbf16, #tpu.memory_space<vmem>>, vector<2x10x1x128xbf16>,
    %c0_15 = arith.constant 0 : index
    %c0_16 = arith.constant 0 : index
    %c0_17 = arith.constant 0 : index
    %c0_18 = arith.constant 0 : index
    %6 = vector.load %arg0[%c0_15, %c0_16, %c0_17, %c0_18] : memref<2x8x8x128xf32, #tpu.memory_space<vmem>>, vector<2x8x8x128xf32>
    %7 = arith.truncf %6 : vector<2x8x8x128xf32> to vector<2x8x8x128xbf16>
    %c0_19 = arith.constant 0 : index
    %c1 = arith.constant 1 : index
    %c1_20 = arith.constant 1 : index
    %c0_21 = arith.constant 0 : index
    %8 = vector.load %arg11[%c0_19, %c1, %c1_20, %c0_21] : memref<2x10x16x128xbf16, #tpu.memory_space<vmem>>, vector<2x8x8x128xbf16>
    tpu.vector_store %arg11[%c0_19, %c1, %c1_20, %c0_21], %7 {strides = array<i32>} : memref<2x10x16x128xbf16, #tpu.memory_space<vmem>>, vector<2x8x8x128xbf16>,
    %cst_22 = arith.constant 0.000000e+00 : f32
    %9 = vector.broadcast %cst_22 : f32 to vector<128x128xf32>
    %c0_23 = arith.constant 0 : index
    %c0_24 = arith.constant 0 : index
    %c0_25 = arith.constant 0 : index
    %c0_26 = arith.constant 0 : index
    %10 = vector.load %arg11[%c0_23, %c0_24, %c0_25, %c0_26] : memref<2x10x16x128xbf16, #tpu.memory_space<vmem>>, vector<2x8x8x128xbf16>
    %11 = vector.shape_cast %10 : vector<2x8x8x128xbf16> to vector<128x128xbf16>
    %c0_27 = arith.constant 0 : index
    %c0_28 = arith.constant 0 : index
    %c0_29 = arith.constant 0 : index
    %12 = vector.load %arg1[%c0_27, %c0_28, %c0_29] : memref<9x128x128xbf16, #tpu.memory_space<vmem>>, vector<1x128x128xbf16>
    %13 = vector.shape_cast %12 : vector<1x128x128xbf16> to vector<128x128xbf16>
    %cst_30 = arith.constant dense<0.000000e+00> : vector<128x128xf32>
    %14 = tpu.matmul %11, %13, %cst_30 {dimension_numbers = #tpu.dot_dimension_numbers<[1], [0], [0], [1], [0, 0, 1, 1], [], []>} : vector<128x128xbf16>, vector<128x128xbf16>, vector<128x128xf32> -> vector<128x128xf32>
    %15 = arith.addf %9, %14 : vector<128x128xf32>
    %c0_31 = arith.constant 0 : index
    %c0_32 = arith.constant 0 : index
    %c1_33 = arith.constant 1 : index
    %c0_34 = arith.constant 0 : index
    %16 = vector.load %arg11[%c0_31, %c0_32, %c1_33, %c0_34] : memref<2x10x16x128xbf16, #tpu.memory_space<vmem>>, vector<2x8x8x128xbf16>
    %17 = vector.shape_cast %16 : vector<2x8x8x128xbf16> to vector<128x128xbf16>
    %c1_35 = arith.constant 1 : index
    %c0_36 = arith.constant 0 : index
    %c0_37 = arith.constant 0 : index
    %18 = vector.load %arg1[%c1_35, %c0_36, %c0_37] : memref<9x128x128xbf16, #tpu.memory_space<vmem>>, vector<1x128x128xbf16>
    %19 = vector.shape_cast %18 : vector<1x128x128xbf16> to vector<128x128xbf16>
    %cst_38 = arith.constant dense<0.000000e+00> : vector<128x128xf32>
    %20 = tpu.matmul %17, %19, %cst_38 {dimension_numbers = #tpu.dot_dimension_numbers<[1], [0], [0], [1], [0, 0, 1, 1], [], []>} : vector<128x128xbf16>, vector<128x128xbf16>, vector<128x128xf32> -> vector<128x128xf32>
    %21 = arith.addf %15, %20 : vector<128x128xf32>
    %c0_39 = arith.constant 0 : index
    %c0_40 = arith.constant 0 : index
    %c2 = arith.constant 2 : index
    %c0_41 = arith.constant 0 : index
    %22 = vector.load %arg11[%c0_39, %c0_40, %c2, %c0_41] : memref<2x10x16x128xbf16, #tpu.memory_space<vmem>>, vector<2x8x8x128xbf16>
    %23 = vector.shape_cast %22 : vector<2x8x8x128xbf16> to vector<128x128xbf16>
    %c2_42 = arith.constant 2 : index
    %c0_43 = arith.constant 0 : index
    %c0_44 = arith.constant 0 : index
    %24 = vector.load %arg1[%c2_42, %c0_43, %c0_44] : memref<9x128x128xbf16, #tpu.memory_space<vmem>>, vector<1x128x128xbf16>
    %25 = vector.shape_cast %24 : vector<1x128x128xbf16> to vector<128x128xbf16>
    %cst_45 = arith.constant dense<0.000000e+00> : vector<128x128xf32>
    %26 = tpu.matmul %23, %25, %cst_45 {dimension_numbers = #tpu.dot_dimension_numbers<[1], [0], [0], [1], [0, 0, 1, 1], [], []>} : vector<128x128xbf16>, vector<128x128xbf16>, vector<128x128xf32> -> vector<128x128xf32>
    %27 = arith.addf %21, %26 : vector<128x128xf32>
    %c0_46 = arith.constant 0 : index
    %c1_47 = arith.constant 1 : index
    %c0_48 = arith.constant 0 : index
    %c0_49 = arith.constant 0 : index
    %28 = vector.load %arg11[%c0_46, %c1_47, %c0_48, %c0_49] : memref<2x10x16x128xbf16, #tpu.memory_space<vmem>>, vector<2x8x8x128xbf16>
    %29 = vector.shape_cast %28 : vector<2x8x8x128xbf16> to vector<128x128xbf16>
    %c3 = arith.constant 3 : index
    %c0_50 = arith.constant 0 : index
    %c0_51 = arith.constant 0 : index
    %30 = vector.load %arg1[%c3, %c0_50, %c0_51] : memref<9x128x128xbf16, #tpu.memory_space<vmem>>, vector<1x128x128xbf16>
    %31 = vector.shape_cast %30 : vector<1x128x128xbf16> to vector<128x128xbf16>
    %cst_52 = arith.constant dense<0.000000e+00> : vector<128x128xf32>
    %32 = tpu.matmul %29, %31, %cst_52 {dimension_numbers = #tpu.dot_dimension_numbers<[1], [0], [0], [1], [0, 0, 1, 1], [], []>} : vector<128x128xbf16>, vector<128x128xbf16>, vector<128x128xf32> -> vector<128x128xf32>
    %33 = arith.addf %27, %32 : vector<128x128xf32>
    %c0_53 = arith.constant 0 : index
    %c1_54 = arith.constant 1 : index
    %c1_55 = arith.constant 1 : index
    %c0_56 = arith.constant 0 : index
    %34 = vector.load %arg11[%c0_53, %c1_54, %c1_55, %c0_56] : memref<2x10x16x128xbf16, #tpu.memory_space<vmem>>, vector<2x8x8x128xbf16>
    %35 = vector.shape_cast %34 : vector<2x8x8x128xbf16> to vector<128x128xbf16>
    %c4 = arith.constant 4 : index
    %c0_57 = arith.constant 0 : index
    %c0_58 = arith.constant 0 : index
    %36 = vector.load %arg1[%c4, %c0_57, %c0_58] : memref<9x128x128xbf16, #tpu.memory_space<vmem>>, vector<1x128x128xbf16>
    %37 = vector.shape_cast %36 : vector<1x128x128xbf16> to vector<128x128xbf16>
    %cst_59 = arith.constant dense<0.000000e+00> : vector<128x128xf32>
    %38 = tpu.matmul %35, %37, %cst_59 {dimension_numbers = #tpu.dot_dimension_numbers<[1], [0], [0], [1], [0, 0, 1, 1], [], []>} : vector<128x128xbf16>, vector<128x128xbf16>, vector<128x128xf32> -> vector<128x128xf32>
    %39 = arith.addf %33, %38 : vector<128x128xf32>
    %c0_60 = arith.constant 0 : index
    %c1_61 = arith.constant 1 : index
    %c2_62 = arith.constant 2 : index
    %c0_63 = arith.constant 0 : index
    %40 = vector.load %arg11[%c0_60, %c1_61, %c2_62, %c0_63] : memref<2x10x16x128xbf16, #tpu.memory_space<vmem>>, vector<2x8x8x128xbf16>
    %41 = vector.shape_cast %40 : vector<2x8x8x128xbf16> to vector<128x128xbf16>
    %c5 = arith.constant 5 : index
    %c0_64 = arith.constant 0 : index
    %c0_65 = arith.constant 0 : index
    %42 = vector.load %arg1[%c5, %c0_64, %c0_65] : memref<9x128x128xbf16, #tpu.memory_space<vmem>>, vector<1x128x128xbf16>
    %43 = vector.shape_cast %42 : vector<1x128x128xbf16> to vector<128x128xbf16>
    %cst_66 = arith.constant dense<0.000000e+00> : vector<128x128xf32>
    %44 = tpu.matmul %41, %43, %cst_66 {dimension_numbers = #tpu.dot_dimension_numbers<[1], [0], [0], [1], [0, 0, 1, 1], [], []>} : vector<128x128xbf16>, vector<128x128xbf16>, vector<128x128xf32> -> vector<128x128xf32>
    %45 = arith.addf %39, %44 : vector<128x128xf32>
    %c0_67 = arith.constant 0 : index
    %c2_68 = arith.constant 2 : index
    %c0_69 = arith.constant 0 : index
    %c0_70 = arith.constant 0 : index
    %46 = vector.load %arg11[%c0_67, %c2_68, %c0_69, %c0_70] : memref<2x10x16x128xbf16, #tpu.memory_space<vmem>>, vector<2x8x8x128xbf16>
    %47 = vector.shape_cast %46 : vector<2x8x8x128xbf16> to vector<128x128xbf16>
    %c6 = arith.constant 6 : index
    %c0_71 = arith.constant 0 : index
    %c0_72 = arith.constant 0 : index
    %48 = vector.load %arg1[%c6, %c0_71, %c0_72] : memref<9x128x128xbf16, #tpu.memory_space<vmem>>, vector<1x128x128xbf16>
    %49 = vector.shape_cast %48 : vector<1x128x128xbf16> to vector<128x128xbf16>
    %cst_73 = arith.constant dense<0.000000e+00> : vector<128x128xf32>
    %50 = tpu.matmul %47, %49, %cst_73 {dimension_numbers = #tpu.dot_dimension_numbers<[1], [0], [0], [1], [0, 0, 1, 1], [], []>} : vector<128x128xbf16>, vector<128x128xbf16>, vector<128x128xf32> -> vector<128x128xf32>
    %51 = arith.addf %45, %50 : vector<128x128xf32>
    %c0_74 = arith.constant 0 : index
    %c2_75 = arith.constant 2 : index
    %c1_76 = arith.constant 1 : index
    %c0_77 = arith.constant 0 : index
    %52 = vector.load %arg11[%c0_74, %c2_75, %c1_76, %c0_77] : memref<2x10x16x128xbf16, #tpu.memory_space<vmem>>, vector<2x8x8x128xbf16>
    %53 = vector.shape_cast %52 : vector<2x8x8x128xbf16> to vector<128x128xbf16>
    %c7 = arith.constant 7 : index
    %c0_78 = arith.constant 0 : index
    %c0_79 = arith.constant 0 : index
    %54 = vector.load %arg1[%c7, %c0_78, %c0_79] : memref<9x128x128xbf16, #tpu.memory_space<vmem>>, vector<1x128x128xbf16>
    %55 = vector.shape_cast %54 : vector<1x128x128xbf16> to vector<128x128xbf16>
    %cst_80 = arith.constant dense<0.000000e+00> : vector<128x128xf32>
    %56 = tpu.matmul %53, %55, %cst_80 {dimension_numbers = #tpu.dot_dimension_numbers<[1], [0], [0], [1], [0, 0, 1, 1], [], []>} : vector<128x128xbf16>, vector<128x128xbf16>, vector<128x128xf32> -> vector<128x128xf32>
    %57 = arith.addf %51, %56 : vector<128x128xf32>
    %c0_81 = arith.constant 0 : index
    %c2_82 = arith.constant 2 : index
    %c2_83 = arith.constant 2 : index
    %c0_84 = arith.constant 0 : index
    %58 = vector.load %arg11[%c0_81, %c2_82, %c2_83, %c0_84] : memref<2x10x16x128xbf16, #tpu.memory_space<vmem>>, vector<2x8x8x128xbf16>
    %59 = vector.shape_cast %58 : vector<2x8x8x128xbf16> to vector<128x128xbf16>
    %c8 = arith.constant 8 : index
    %c0_85 = arith.constant 0 : index
    %c0_86 = arith.constant 0 : index
    %60 = vector.load %arg1[%c8, %c0_85, %c0_86] : memref<9x128x128xbf16, #tpu.memory_space<vmem>>, vector<1x128x128xbf16>
    %61 = vector.shape_cast %60 : vector<1x128x128xbf16> to vector<128x128xbf16>
    %cst_87 = arith.constant dense<0.000000e+00> : vector<128x128xf32>
    %62 = tpu.matmul %59, %61, %cst_87 {dimension_numbers = #tpu.dot_dimension_numbers<[1], [0], [0], [1], [0, 0, 1, 1], [], []>} : vector<128x128xbf16>, vector<128x128xbf16>, vector<128x128xf32> -> vector<128x128xf32>
    %63 = arith.addf %57, %62 : vector<128x128xf32>
    %cst_88 = arith.constant dense<0.000000e+00> : vector<128xf32>
    %64 = vector.multi_reduction <add>, %63, %cst_88 [0] : vector<128x128xf32> to vector<128xf32>
    %65 = vector.shape_cast %64 : vector<128xf32> to vector<1x128xf32>
    %cst_89 = arith.constant 7.812500e-03 : f32
    %66 = vector.broadcast %cst_89 : f32 to vector<1x128xf32>
    %67 = arith.mulf %65, %66 : vector<1x128xf32>
    %68 = vector.broadcast %67 : vector<1x128xf32> to vector<128x128xf32>
    %69 = arith.subf %63, %68 : vector<128x128xf32>
    %70 = arith.mulf %69, %69 : vector<128x128xf32>
    %cst_90 = arith.constant dense<0.000000e+00> : vector<128xf32>
    %71 = vector.multi_reduction <add>, %70, %cst_90 [0] : vector<128x128xf32> to vector<128xf32>
    %72 = vector.shape_cast %71 : vector<128xf32> to vector<1x128xf32>
    %cst_91 = arith.constant 7.812500e-03 : f32
    %73 = vector.broadcast %cst_91 : f32 to vector<1x128xf32>
    %74 = arith.mulf %72, %73 : vector<1x128xf32>
    %c0_92 = arith.constant 0 : index
    %c0_93 = arith.constant 0 : index
    %75 = vector.load %arg2[%c0_92, %c0_93] : memref<1x128xf32, #tpu.memory_space<vmem>>, vector<1x128xf32>
    %cst_94 = arith.constant 9.99999974E-6 : f32
    %76 = vector.broadcast %cst_94 : f32 to vector<1x128xf32>
    %77 = arith.addf %74, %76 : vector<1x128xf32>
    %78 = math.rsqrt %77 : vector<1x128xf32>
    %79 = arith.mulf %75, %78 : vector<1x128xf32>
    %80 = vector.broadcast %79 : vector<1x128xf32> to vector<128x128xf32>
    %81 = arith.mulf %69, %80 : vector<128x128xf32>
    %c0_95 = arith.constant 0 : index
    %c0_96 = arith.constant 0 : index
    %82 = vector.load %arg3[%c0_95, %c0_96] : memref<1x128xf32, #tpu.memory_space<vmem>>, vector<1x128xf32>
    %83 = vector.broadcast %82 : vector<1x128xf32> to vector<128x128xf32>
    %84 = arith.addf %81, %83 : vector<128x128xf32>
    %cst_97 = arith.constant 1.000000e-01 : f32
    %85 = vector.broadcast %cst_97 : f32 to vector<128x128xf32>
    %86 = arith.mulf %85, %84 : vector<128x128xf32>
    %87 = arith.maximumf %84, %86 : vector<128x128xf32>
    %88 = vector.shape_cast %87 : vector<128x128xf32> to vector<2x8x8x128xf32>
    %89 = arith.truncf %88 : vector<2x8x8x128xf32> to vector<2x8x8x128xbf16>
    %c0_98 = arith.constant 0 : index
    %c1_99 = arith.constant 1 : index
    %c1_100 = arith.constant 1 : index
    %c0_101 = arith.constant 0 : index
    %90 = vector.load %arg11[%c0_98, %c1_99, %c1_100, %c0_101] : memref<2x10x16x128xbf16, #tpu.memory_space<vmem>>, vector<2x8x8x128xbf16>
    tpu.vector_store %arg11[%c0_98, %c1_99, %c1_100, %c0_101], %89 {strides = array<i32>} : memref<2x10x16x128xbf16, #tpu.memory_space<vmem>>, vector<2x8x8x128xbf16>,
    %cst_102 = arith.constant 0.000000e+00 : f32
    %91 = vector.broadcast %cst_102 : f32 to vector<128x128xf32>
    %c0_103 = arith.constant 0 : index
    %c0_104 = arith.constant 0 : index
    %c0_105 = arith.constant 0 : index
    %c0_106 = arith.constant 0 : index
    %92 = vector.load %arg11[%c0_103, %c0_104, %c0_105, %c0_106] : memref<2x10x16x128xbf16, #tpu.memory_space<vmem>>, vector<2x8x8x128xbf16>
    %93 = vector.shape_cast %92 : vector<2x8x8x128xbf16> to vector<128x128xbf16>
    %c0_107 = arith.constant 0 : index
    %c0_108 = arith.constant 0 : index
    %c0_109 = arith.constant 0 : index
    %94 = vector.load %arg4[%c0_107, %c0_108, %c0_109] : memref<9x128x128xbf16, #tpu.memory_space<vmem>>, vector<1x128x128xbf16>
    %95 = vector.shape_cast %94 : vector<1x128x128xbf16> to vector<128x128xbf16>
    %cst_110 = arith.constant dense<0.000000e+00> : vector<128x128xf32>
    %96 = tpu.matmul %93, %95, %cst_110 {dimension_numbers = #tpu.dot_dimension_numbers<[1], [0], [0], [1], [0, 0, 1, 1], [], []>} : vector<128x128xbf16>, vector<128x128xbf16>, vector<128x128xf32> -> vector<128x128xf32>
    %97 = arith.addf %91, %96 : vector<128x128xf32>
    %c0_111 = arith.constant 0 : index
    %c0_112 = arith.constant 0 : index
    %c1_113 = arith.constant 1 : index
    %c0_114 = arith.constant 0 : index
    %98 = vector.load %arg11[%c0_111, %c0_112, %c1_113, %c0_114] : memref<2x10x16x128xbf16, #tpu.memory_space<vmem>>, vector<2x8x8x128xbf16>
    %99 = vector.shape_cast %98 : vector<2x8x8x128xbf16> to vector<128x128xbf16>
    %c1_115 = arith.constant 1 : index
    %c0_116 = arith.constant 0 : index
    %c0_117 = arith.constant 0 : index
    %100 = vector.load %arg4[%c1_115, %c0_116, %c0_117] : memref<9x128x128xbf16, #tpu.memory_space<vmem>>, vector<1x128x128xbf16>
    %101 = vector.shape_cast %100 : vector<1x128x128xbf16> to vector<128x128xbf16>
    %cst_118 = arith.constant dense<0.000000e+00> : vector<128x128xf32>
    %102 = tpu.matmul %99, %101, %cst_118 {dimension_numbers = #tpu.dot_dimension_numbers<[1], [0], [0], [1], [0, 0, 1, 1], [], []>} : vector<128x128xbf16>, vector<128x128xbf16>, vector<128x128xf32> -> vector<128x128xf32>
    %103 = arith.addf %97, %102 : vector<128x128xf32>
    %c0_119 = arith.constant 0 : index
    %c0_120 = arith.constant 0 : index
    %c2_121 = arith.constant 2 : index
    %c0_122 = arith.constant 0 : index
    %104 = vector.load %arg11[%c0_119, %c0_120, %c2_121, %c0_122] : memref<2x10x16x128xbf16, #tpu.memory_space<vmem>>, vector<2x8x8x128xbf16>
    %105 = vector.shape_cast %104 : vector<2x8x8x128xbf16> to vector<128x128xbf16>
    %c2_123 = arith.constant 2 : index
    %c0_124 = arith.constant 0 : index
    %c0_125 = arith.constant 0 : index
    %106 = vector.load %arg4[%c2_123, %c0_124, %c0_125] : memref<9x128x128xbf16, #tpu.memory_space<vmem>>, vector<1x128x128xbf16>
    %107 = vector.shape_cast %106 : vector<1x128x128xbf16> to vector<128x128xbf16>
    %cst_126 = arith.constant dense<0.000000e+00> : vector<128x128xf32>
    %108 = tpu.matmul %105, %107, %cst_126 {dimension_numbers = #tpu.dot_dimension_numbers<[1], [0], [0], [1], [0, 0, 1, 1], [], []>} : vector<128x128xbf16>, vector<128x128xbf16>, vector<128x128xf32> -> vector<128x128xf32>
    %109 = arith.addf %103, %108 : vector<128x128xf32>
    %c0_127 = arith.constant 0 : index
    %c1_128 = arith.constant 1 : index
    %c0_129 = arith.constant 0 : index
    %c0_130 = arith.constant 0 : index
    %110 = vector.load %arg11[%c0_127, %c1_128, %c0_129, %c0_130] : memref<2x10x16x128xbf16, #tpu.memory_space<vmem>>, vector<2x8x8x128xbf16>
    %111 = vector.shape_cast %110 : vector<2x8x8x128xbf16> to vector<128x128xbf16>
    %c3_131 = arith.constant 3 : index
    %c0_132 = arith.constant 0 : index
    %c0_133 = arith.constant 0 : index
    %112 = vector.load %arg4[%c3_131, %c0_132, %c0_133] : memref<9x128x128xbf16, #tpu.memory_space<vmem>>, vector<1x128x128xbf16>
    %113 = vector.shape_cast %112 : vector<1x128x128xbf16> to vector<128x128xbf16>
    %cst_134 = arith.constant dense<0.000000e+00> : vector<128x128xf32>
    %114 = tpu.matmul %111, %113, %cst_134 {dimension_numbers = #tpu.dot_dimension_numbers<[1], [0], [0], [1], [0, 0, 1, 1], [], []>} : vector<128x128xbf16>, vector<128x128xbf16>, vector<128x128xf32> -> vector<128x128xf32>
    %115 = arith.addf %109, %114 : vector<128x128xf32>
    %c0_135 = arith.constant 0 : index
    %c1_136 = arith.constant 1 : index
    %c1_137 = arith.constant 1 : index
    %c0_138 = arith.constant 0 : index
    %116 = vector.load %arg11[%c0_135, %c1_136, %c1_137, %c0_138] : memref<2x10x16x128xbf16, #tpu.memory_space<vmem>>, vector<2x8x8x128xbf16>
    %117 = vector.shape_cast %116 : vector<2x8x8x128xbf16> to vector<128x128xbf16>
    %c4_139 = arith.constant 4 : index
    %c0_140 = arith.constant 0 : index
    %c0_141 = arith.constant 0 : index
    %118 = vector.load %arg4[%c4_139, %c0_140, %c0_141] : memref<9x128x128xbf16, #tpu.memory_space<vmem>>, vector<1x128x128xbf16>
    %119 = vector.shape_cast %118 : vector<1x128x128xbf16> to vector<128x128xbf16>
    %cst_142 = arith.constant dense<0.000000e+00> : vector<128x128xf32>
    %120 = tpu.matmul %117, %119, %cst_142 {dimension_numbers = #tpu.dot_dimension_numbers<[1], [0], [0], [1], [0, 0, 1, 1], [], []>} : vector<128x128xbf16>, vector<128x128xbf16>, vector<128x128xf32> -> vector<128x128xf32>
    %121 = arith.addf %115, %120 : vector<128x128xf32>
    %c0_143 = arith.constant 0 : index
    %c1_144 = arith.constant 1 : index
    %c2_145 = arith.constant 2 : index
    %c0_146 = arith.constant 0 : index
    %122 = vector.load %arg11[%c0_143, %c1_144, %c2_145, %c0_146] : memref<2x10x16x128xbf16, #tpu.memory_space<vmem>>, vector<2x8x8x128xbf16>
    %123 = vector.shape_cast %122 : vector<2x8x8x128xbf16> to vector<128x128xbf16>
    %c5_147 = arith.constant 5 : index
    %c0_148 = arith.constant 0 : index
    %c0_149 = arith.constant 0 : index
    %124 = vector.load %arg4[%c5_147, %c0_148, %c0_149] : memref<9x128x128xbf16, #tpu.memory_space<vmem>>, vector<1x128x128xbf16>
    %125 = vector.shape_cast %124 : vector<1x128x128xbf16> to vector<128x128xbf16>
    %cst_150 = arith.constant dense<0.000000e+00> : vector<128x128xf32>
    %126 = tpu.matmul %123, %125, %cst_150 {dimension_numbers = #tpu.dot_dimension_numbers<[1], [0], [0], [1], [0, 0, 1, 1], [], []>} : vector<128x128xbf16>, vector<128x128xbf16>, vector<128x128xf32> -> vector<128x128xf32>
    %127 = arith.addf %121, %126 : vector<128x128xf32>
    %c0_151 = arith.constant 0 : index
    %c2_152 = arith.constant 2 : index
    %c0_153 = arith.constant 0 : index
    %c0_154 = arith.constant 0 : index
    %128 = vector.load %arg11[%c0_151, %c2_152, %c0_153, %c0_154] : memref<2x10x16x128xbf16, #tpu.memory_space<vmem>>, vector<2x8x8x128xbf16>
    %129 = vector.shape_cast %128 : vector<2x8x8x128xbf16> to vector<128x128xbf16>
    %c6_155 = arith.constant 6 : index
    %c0_156 = arith.constant 0 : index
    %c0_157 = arith.constant 0 : index
    %130 = vector.load %arg4[%c6_155, %c0_156, %c0_157] : memref<9x128x128xbf16, #tpu.memory_space<vmem>>, vector<1x128x128xbf16>
    %131 = vector.shape_cast %130 : vector<1x128x128xbf16> to vector<128x128xbf16>
    %cst_158 = arith.constant dense<0.000000e+00> : vector<128x128xf32>
    %132 = tpu.matmul %129, %131, %cst_158 {dimension_numbers = #tpu.dot_dimension_numbers<[1], [0], [0], [1], [0, 0, 1, 1], [], []>} : vector<128x128xbf16>, vector<128x128xbf16>, vector<128x128xf32> -> vector<128x128xf32>
    %133 = arith.addf %127, %132 : vector<128x128xf32>
    %c0_159 = arith.constant 0 : index
    %c2_160 = arith.constant 2 : index
    %c1_161 = arith.constant 1 : index
    %c0_162 = arith.constant 0 : index
    %134 = vector.load %arg11[%c0_159, %c2_160, %c1_161, %c0_162] : memref<2x10x16x128xbf16, #tpu.memory_space<vmem>>, vector<2x8x8x128xbf16>
    %135 = vector.shape_cast %134 : vector<2x8x8x128xbf16> to vector<128x128xbf16>
    %c7_163 = arith.constant 7 : index
    %c0_164 = arith.constant 0 : index
    %c0_165 = arith.constant 0 : index
    %136 = vector.load %arg4[%c7_163, %c0_164, %c0_165] : memref<9x128x128xbf16, #tpu.memory_space<vmem>>, vector<1x128x128xbf16>
    %137 = vector.shape_cast %136 : vector<1x128x128xbf16> to vector<128x128xbf16>
    %cst_166 = arith.constant dense<0.000000e+00> : vector<128x128xf32>
    %138 = tpu.matmul %135, %137, %cst_166 {dimension_numbers = #tpu.dot_dimension_numbers<[1], [0], [0], [1], [0, 0, 1, 1], [], []>} : vector<128x128xbf16>, vector<128x128xbf16>, vector<128x128xf32> -> vector<128x128xf32>
    %139 = arith.addf %133, %138 : vector<128x128xf32>
    %c0_167 = arith.constant 0 : index
    %c2_168 = arith.constant 2 : index
    %c2_169 = arith.constant 2 : index
    %c0_170 = arith.constant 0 : index
    %140 = vector.load %arg11[%c0_167, %c2_168, %c2_169, %c0_170] : memref<2x10x16x128xbf16, #tpu.memory_space<vmem>>, vector<2x8x8x128xbf16>
    %141 = vector.shape_cast %140 : vector<2x8x8x128xbf16> to vector<128x128xbf16>
    %c8_171 = arith.constant 8 : index
    %c0_172 = arith.constant 0 : index
    %c0_173 = arith.constant 0 : index
    %142 = vector.load %arg4[%c8_171, %c0_172, %c0_173] : memref<9x128x128xbf16, #tpu.memory_space<vmem>>, vector<1x128x128xbf16>
    %143 = vector.shape_cast %142 : vector<1x128x128xbf16> to vector<128x128xbf16>
    %cst_174 = arith.constant dense<0.000000e+00> : vector<128x128xf32>
    %144 = tpu.matmul %141, %143, %cst_174 {dimension_numbers = #tpu.dot_dimension_numbers<[1], [0], [0], [1], [0, 0, 1, 1], [], []>} : vector<128x128xbf16>, vector<128x128xbf16>, vector<128x128xf32> -> vector<128x128xf32>
    %145 = arith.addf %139, %144 : vector<128x128xf32>
    %cst_175 = arith.constant dense<0.000000e+00> : vector<128xf32>
    %146 = vector.multi_reduction <add>, %145, %cst_175 [0] : vector<128x128xf32> to vector<128xf32>
    %147 = vector.shape_cast %146 : vector<128xf32> to vector<1x128xf32>
    %cst_176 = arith.constant 7.812500e-03 : f32
    %148 = vector.broadcast %cst_176 : f32 to vector<1x128xf32>
    %149 = arith.mulf %147, %148 : vector<1x128xf32>
    %150 = vector.broadcast %149 : vector<1x128xf32> to vector<128x128xf32>
    %151 = arith.subf %145, %150 : vector<128x128xf32>
    %152 = arith.mulf %151, %151 : vector<128x128xf32>
    %cst_177 = arith.constant dense<0.000000e+00> : vector<128xf32>
    %153 = vector.multi_reduction <add>, %152, %cst_177 [0] : vector<128x128xf32> to vector<128xf32>
    %154 = vector.shape_cast %153 : vector<128xf32> to vector<1x128xf32>
    %cst_178 = arith.constant 7.812500e-03 : f32
    %155 = vector.broadcast %cst_178 : f32 to vector<1x128xf32>
    %156 = arith.mulf %154, %155 : vector<1x128xf32>
    %c0_179 = arith.constant 0 : index
    %c0_180 = arith.constant 0 : index
    %157 = vector.load %arg5[%c0_179, %c0_180] : memref<1x128xf32, #tpu.memory_space<vmem>>, vector<1x128xf32>
    %cst_181 = arith.constant 9.99999974E-6 : f32
    %158 = vector.broadcast %cst_181 : f32 to vector<1x128xf32>
    %159 = arith.addf %156, %158 : vector<1x128xf32>
    %160 = math.rsqrt %159 : vector<1x128xf32>
    %161 = arith.mulf %157, %160 : vector<1x128xf32>
    %162 = vector.broadcast %161 : vector<1x128xf32> to vector<128x128xf32>
    %163 = arith.mulf %151, %162 : vector<128x128xf32>
    %c0_182 = arith.constant 0 : index
    %c0_183 = arith.constant 0 : index
    %164 = vector.load %arg6[%c0_182, %c0_183] : memref<1x128xf32, #tpu.memory_space<vmem>>, vector<1x128xf32>
    %165 = vector.broadcast %164 : vector<1x128xf32> to vector<128x128xf32>
    %166 = arith.addf %163, %165 : vector<128x128xf32>
    %cst_184 = arith.constant 1.000000e-01 : f32
    %167 = vector.broadcast %cst_184 : f32 to vector<128x128xf32>
    %168 = arith.mulf %167, %166 : vector<128x128xf32>
    %169 = arith.maximumf %166, %168 : vector<128x128xf32>
    %170 = vector.shape_cast %169 : vector<128x128xf32> to vector<2x8x8x128xf32>
    %171 = arith.truncf %170 : vector<2x8x8x128xf32> to vector<2x8x8x128xbf16>
    %c0_185 = arith.constant 0 : index
    %c1_186 = arith.constant 1 : index
    %c1_187 = arith.constant 1 : index
    %c0_188 = arith.constant 0 : index
    %172 = vector.load %arg11[%c0_185, %c1_186, %c1_187, %c0_188] : memref<2x10x16x128xbf16, #tpu.memory_space<vmem>>, vector<2x8x8x128xbf16>
    tpu.vector_store %arg11[%c0_185, %c1_186, %c1_187, %c0_188], %171 {strides = array<i32>} : memref<2x10x16x128xbf16, #tpu.memory_space<vmem>>, vector<2x8x8x128xbf16>,
    %cst_189 = arith.constant 0.000000e+00 : f32
    %173 = vector.broadcast %cst_189 : f32 to vector<128x128xf32>
    %c0_190 = arith.constant 0 : index
    %c0_191 = arith.constant 0 : index
    %c0_192 = arith.constant 0 : index
    %c0_193 = arith.constant 0 : index
    %174 = vector.load %arg11[%c0_190, %c0_191, %c0_192, %c0_193] : memref<2x10x16x128xbf16, #tpu.memory_space<vmem>>, vector<2x8x8x128xbf16>
    %175 = vector.shape_cast %174 : vector<2x8x8x128xbf16> to vector<128x128xbf16>
    %c0_194 = arith.constant 0 : index
    %c0_195 = arith.constant 0 : index
    %c0_196 = arith.constant 0 : index
    %176 = vector.load %arg7[%c0_194, %c0_195, %c0_196] : memref<9x128x128xbf16, #tpu.memory_space<vmem>>, vector<1x128x128xbf16>
    %177 = vector.shape_cast %176 : vector<1x128x128xbf16> to vector<128x128xbf16>
    %cst_197 = arith.constant dense<0.000000e+00> : vector<128x128xf32>
    %178 = tpu.matmul %175, %177, %cst_197 {dimension_numbers = #tpu.dot_dimension_numbers<[1], [0], [0], [1], [0, 0, 1, 1], [], []>} : vector<128x128xbf16>, vector<128x128xbf16>, vector<128x128xf32> -> vector<128x128xf32>
    %179 = arith.addf %173, %178 : vector<128x128xf32>
    %c0_198 = arith.constant 0 : index
    %c0_199 = arith.constant 0 : index
    %c1_200 = arith.constant 1 : index
    %c0_201 = arith.constant 0 : index
    %180 = vector.load %arg11[%c0_198, %c0_199, %c1_200, %c0_201] : memref<2x10x16x128xbf16, #tpu.memory_space<vmem>>, vector<2x8x8x128xbf16>
    %181 = vector.shape_cast %180 : vector<2x8x8x128xbf16> to vector<128x128xbf16>
    %c1_202 = arith.constant 1 : index
    %c0_203 = arith.constant 0 : index
    %c0_204 = arith.constant 0 : index
    %182 = vector.load %arg7[%c1_202, %c0_203, %c0_204] : memref<9x128x128xbf16, #tpu.memory_space<vmem>>, vector<1x128x128xbf16>
    %183 = vector.shape_cast %182 : vector<1x128x128xbf16> to vector<128x128xbf16>
    %cst_205 = arith.constant dense<0.000000e+00> : vector<128x128xf32>
    %184 = tpu.matmul %181, %183, %cst_205 {dimension_numbers = #tpu.dot_dimension_numbers<[1], [0], [0], [1], [0, 0, 1, 1], [], []>} : vector<128x128xbf16>, vector<128x128xbf16>, vector<128x128xf32> -> vector<128x128xf32>
    %185 = arith.addf %179, %184 : vector<128x128xf32>
    %c0_206 = arith.constant 0 : index
    %c0_207 = arith.constant 0 : index
    %c2_208 = arith.constant 2 : index
    %c0_209 = arith.constant 0 : index
    %186 = vector.load %arg11[%c0_206, %c0_207, %c2_208, %c0_209] : memref<2x10x16x128xbf16, #tpu.memory_space<vmem>>, vector<2x8x8x128xbf16>
    %187 = vector.shape_cast %186 : vector<2x8x8x128xbf16> to vector<128x128xbf16>
    %c2_210 = arith.constant 2 : index
    %c0_211 = arith.constant 0 : index
    %c0_212 = arith.constant 0 : index
    %188 = vector.load %arg7[%c2_210, %c0_211, %c0_212] : memref<9x128x128xbf16, #tpu.memory_space<vmem>>, vector<1x128x128xbf16>
    %189 = vector.shape_cast %188 : vector<1x128x128xbf16> to vector<128x128xbf16>
    %cst_213 = arith.constant dense<0.000000e+00> : vector<128x128xf32>
    %190 = tpu.matmul %187, %189, %cst_213 {dimension_numbers = #tpu.dot_dimension_numbers<[1], [0], [0], [1], [0, 0, 1, 1], [], []>} : vector<128x128xbf16>, vector<128x128xbf16>, vector<128x128xf32> -> vector<128x128xf32>
    %191 = arith.addf %185, %190 : vector<128x128xf32>
    %c0_214 = arith.constant 0 : index
    %c1_215 = arith.constant 1 : index
    %c0_216 = arith.constant 0 : index
    %c0_217 = arith.constant 0 : index
    %192 = vector.load %arg11[%c0_214, %c1_215, %c0_216, %c0_217] : memref<2x10x16x128xbf16, #tpu.memory_space<vmem>>, vector<2x8x8x128xbf16>
    %193 = vector.shape_cast %192 : vector<2x8x8x128xbf16> to vector<128x128xbf16>
    %c3_218 = arith.constant 3 : index
    %c0_219 = arith.constant 0 : index
    %c0_220 = arith.constant 0 : index
    %194 = vector.load %arg7[%c3_218, %c0_219, %c0_220] : memref<9x128x128xbf16, #tpu.memory_space<vmem>>, vector<1x128x128xbf16>
    %195 = vector.shape_cast %194 : vector<1x128x128xbf16> to vector<128x128xbf16>
    %cst_221 = arith.constant dense<0.000000e+00> : vector<128x128xf32>
    %196 = tpu.matmul %193, %195, %cst_221 {dimension_numbers = #tpu.dot_dimension_numbers<[1], [0], [0], [1], [0, 0, 1, 1], [], []>} : vector<128x128xbf16>, vector<128x128xbf16>, vector<128x128xf32> -> vector<128x128xf32>
    %197 = arith.addf %191, %196 : vector<128x128xf32>
    %c0_222 = arith.constant 0 : index
    %c1_223 = arith.constant 1 : index
    %c1_224 = arith.constant 1 : index
    %c0_225 = arith.constant 0 : index
    %198 = vector.load %arg11[%c0_222, %c1_223, %c1_224, %c0_225] : memref<2x10x16x128xbf16, #tpu.memory_space<vmem>>, vector<2x8x8x128xbf16>
    %199 = vector.shape_cast %198 : vector<2x8x8x128xbf16> to vector<128x128xbf16>
    %c4_226 = arith.constant 4 : index
    %c0_227 = arith.constant 0 : index
    %c0_228 = arith.constant 0 : index
    %200 = vector.load %arg7[%c4_226, %c0_227, %c0_228] : memref<9x128x128xbf16, #tpu.memory_space<vmem>>, vector<1x128x128xbf16>
    %201 = vector.shape_cast %200 : vector<1x128x128xbf16> to vector<128x128xbf16>
    %cst_229 = arith.constant dense<0.000000e+00> : vector<128x128xf32>
    %202 = tpu.matmul %199, %201, %cst_229 {dimension_numbers = #tpu.dot_dimension_numbers<[1], [0], [0], [1], [0, 0, 1, 1], [], []>} : vector<128x128xbf16>, vector<128x128xbf16>, vector<128x128xf32> -> vector<128x128xf32>
    %203 = arith.addf %197, %202 : vector<128x128xf32>
    %c0_230 = arith.constant 0 : index
    %c1_231 = arith.constant 1 : index
    %c2_232 = arith.constant 2 : index
    %c0_233 = arith.constant 0 : index
    %204 = vector.load %arg11[%c0_230, %c1_231, %c2_232, %c0_233] : memref<2x10x16x128xbf16, #tpu.memory_space<vmem>>, vector<2x8x8x128xbf16>
    %205 = vector.shape_cast %204 : vector<2x8x8x128xbf16> to vector<128x128xbf16>
    %c5_234 = arith.constant 5 : index
    %c0_235 = arith.constant 0 : index
    %c0_236 = arith.constant 0 : index
    %206 = vector.load %arg7[%c5_234, %c0_235, %c0_236] : memref<9x128x128xbf16, #tpu.memory_space<vmem>>, vector<1x128x128xbf16>
    %207 = vector.shape_cast %206 : vector<1x128x128xbf16> to vector<128x128xbf16>
    %cst_237 = arith.constant dense<0.000000e+00> : vector<128x128xf32>
    %208 = tpu.matmul %205, %207, %cst_237 {dimension_numbers = #tpu.dot_dimension_numbers<[1], [0], [0], [1], [0, 0, 1, 1], [], []>} : vector<128x128xbf16>, vector<128x128xbf16>, vector<128x128xf32> -> vector<128x128xf32>
    %209 = arith.addf %203, %208 : vector<128x128xf32>
    %c0_238 = arith.constant 0 : index
    %c2_239 = arith.constant 2 : index
    %c0_240 = arith.constant 0 : index
    %c0_241 = arith.constant 0 : index
    %210 = vector.load %arg11[%c0_238, %c2_239, %c0_240, %c0_241] : memref<2x10x16x128xbf16, #tpu.memory_space<vmem>>, vector<2x8x8x128xbf16>
    %211 = vector.shape_cast %210 : vector<2x8x8x128xbf16> to vector<128x128xbf16>
    %c6_242 = arith.constant 6 : index
    %c0_243 = arith.constant 0 : index
    %c0_244 = arith.constant 0 : index
    %212 = vector.load %arg7[%c6_242, %c0_243, %c0_244] : memref<9x128x128xbf16, #tpu.memory_space<vmem>>, vector<1x128x128xbf16>
    %213 = vector.shape_cast %212 : vector<1x128x128xbf16> to vector<128x128xbf16>
    %cst_245 = arith.constant dense<0.000000e+00> : vector<128x128xf32>
    %214 = tpu.matmul %211, %213, %cst_245 {dimension_numbers = #tpu.dot_dimension_numbers<[1], [0], [0], [1], [0, 0, 1, 1], [], []>} : vector<128x128xbf16>, vector<128x128xbf16>, vector<128x128xf32> -> vector<128x128xf32>
    %215 = arith.addf %209, %214 : vector<128x128xf32>
    %c0_246 = arith.constant 0 : index
    %c2_247 = arith.constant 2 : index
    %c1_248 = arith.constant 1 : index
    %c0_249 = arith.constant 0 : index
    %216 = vector.load %arg11[%c0_246, %c2_247, %c1_248, %c0_249] : memref<2x10x16x128xbf16, #tpu.memory_space<vmem>>, vector<2x8x8x128xbf16>
    %217 = vector.shape_cast %216 : vector<2x8x8x128xbf16> to vector<128x128xbf16>
    %c7_250 = arith.constant 7 : index
    %c0_251 = arith.constant 0 : index
    %c0_252 = arith.constant 0 : index
    %218 = vector.load %arg7[%c7_250, %c0_251, %c0_252] : memref<9x128x128xbf16, #tpu.memory_space<vmem>>, vector<1x128x128xbf16>
    %219 = vector.shape_cast %218 : vector<1x128x128xbf16> to vector<128x128xbf16>
    %cst_253 = arith.constant dense<0.000000e+00> : vector<128x128xf32>
    %220 = tpu.matmul %217, %219, %cst_253 {dimension_numbers = #tpu.dot_dimension_numbers<[1], [0], [0], [1], [0, 0, 1, 1], [], []>} : vector<128x128xbf16>, vector<128x128xbf16>, vector<128x128xf32> -> vector<128x128xf32>
    %221 = arith.addf %215, %220 : vector<128x128xf32>
    %c0_254 = arith.constant 0 : index
    %c2_255 = arith.constant 2 : index
    %c2_256 = arith.constant 2 : index
    %c0_257 = arith.constant 0 : index
    %222 = vector.load %arg11[%c0_254, %c2_255, %c2_256, %c0_257] : memref<2x10x16x128xbf16, #tpu.memory_space<vmem>>, vector<2x8x8x128xbf16>
    %223 = vector.shape_cast %222 : vector<2x8x8x128xbf16> to vector<128x128xbf16>
    %c8_258 = arith.constant 8 : index
    %c0_259 = arith.constant 0 : index
    %c0_260 = arith.constant 0 : index
    %224 = vector.load %arg7[%c8_258, %c0_259, %c0_260] : memref<9x128x128xbf16, #tpu.memory_space<vmem>>, vector<1x128x128xbf16>
    %225 = vector.shape_cast %224 : vector<1x128x128xbf16> to vector<128x128xbf16>
    %cst_261 = arith.constant dense<0.000000e+00> : vector<128x128xf32>
    %226 = tpu.matmul %223, %225, %cst_261 {dimension_numbers = #tpu.dot_dimension_numbers<[1], [0], [0], [1], [0, 0, 1, 1], [], []>} : vector<128x128xbf16>, vector<128x128xbf16>, vector<128x128xf32> -> vector<128x128xf32>
    %227 = arith.addf %221, %226 : vector<128x128xf32>
    %cst_262 = arith.constant dense<0.000000e+00> : vector<128xf32>
    %228 = vector.multi_reduction <add>, %227, %cst_262 [0] : vector<128x128xf32> to vector<128xf32>
    %229 = vector.shape_cast %228 : vector<128xf32> to vector<1x128xf32>
    %cst_263 = arith.constant 7.812500e-03 : f32
    %230 = vector.broadcast %cst_263 : f32 to vector<1x128xf32>
    %231 = arith.mulf %229, %230 : vector<1x128xf32>
    %232 = vector.broadcast %231 : vector<1x128xf32> to vector<128x128xf32>
    %233 = arith.subf %227, %232 : vector<128x128xf32>
    %234 = arith.mulf %233, %233 : vector<128x128xf32>
    %cst_264 = arith.constant dense<0.000000e+00> : vector<128xf32>
    %235 = vector.multi_reduction <add>, %234, %cst_264 [0] : vector<128x128xf32> to vector<128xf32>
    %236 = vector.shape_cast %235 : vector<128xf32> to vector<1x128xf32>
    %cst_265 = arith.constant 7.812500e-03 : f32
    %237 = vector.broadcast %cst_265 : f32 to vector<1x128xf32>
    %238 = arith.mulf %236, %237 : vector<1x128xf32>
    %c0_266 = arith.constant 0 : index
    %c0_267 = arith.constant 0 : index
    %239 = vector.load %arg8[%c0_266, %c0_267] : memref<1x128xf32, #tpu.memory_space<vmem>>, vector<1x128xf32>
    %cst_268 = arith.constant 9.99999974E-6 : f32
    %240 = vector.broadcast %cst_268 : f32 to vector<1x128xf32>
    %241 = arith.addf %238, %240 : vector<1x128xf32>
    %242 = math.rsqrt %241 : vector<1x128xf32>
    %243 = arith.mulf %239, %242 : vector<1x128xf32>
    %244 = vector.broadcast %243 : vector<1x128xf32> to vector<128x128xf32>
    %245 = arith.mulf %233, %244 : vector<128x128xf32>
    %c0_269 = arith.constant 0 : index
    %c0_270 = arith.constant 0 : index
    %246 = vector.load %arg9[%c0_269, %c0_270] : memref<1x128xf32, #tpu.memory_space<vmem>>, vector<1x128xf32>
    %247 = vector.broadcast %246 : vector<1x128xf32> to vector<128x128xf32>
    %248 = arith.addf %245, %247 : vector<128x128xf32>
    %c0_271 = arith.constant 0 : index
    %c0_272 = arith.constant 0 : index
    %c0_273 = arith.constant 0 : index
    %c0_274 = arith.constant 0 : index
    %249 = vector.load %arg0[%c0_271, %c0_272, %c0_273, %c0_274] : memref<2x8x8x128xf32, #tpu.memory_space<vmem>>, vector<2x8x8x128xf32>
    %250 = vector.shape_cast %249 : vector<2x8x8x128xf32> to vector<128x128xf32>
    %251 = arith.addf %248, %250 : vector<128x128xf32>
    %cst_275 = arith.constant 1.000000e-01 : f32
    %252 = vector.broadcast %cst_275 : f32 to vector<128x128xf32>
    %253 = arith.mulf %252, %251 : vector<128x128xf32>
    %254 = arith.maximumf %251, %253 : vector<128x128xf32>
    %255 = vector.shape_cast %254 : vector<128x128xf32> to vector<2x8x8x128xf32>
    %c0_276 = arith.constant 0 : index
    %c0_277 = arith.constant 0 : index
    %c0_278 = arith.constant 0 : index
    %c0_279 = arith.constant 0 : index
    %256 = vector.load %arg10[%c0_276, %c0_277, %c0_278, %c0_279] : memref<2x8x8x128xf32, #tpu.memory_space<vmem>>, vector<2x8x8x128xf32>
    tpu.vector_store %arg10[%c0_276, %c0_277, %c0_278, %c0_279], %255 {strides = array<i32>} : memref<2x8x8x128xf32, #tpu.memory_space<vmem>>, vector<2x8x8x128xf32>,
    return
  }
}

</mosaic_0001>

<bundles_post_ra>
// kernel: basic_block_forward.1
= control target key start
LH: loop header
LB: loop body
LE: loop exit
PB: predicated region body
PF: predicated region fallthrough
CT: control target
= control target key end

     0   :  { %v11430_v3 = vmov 0   ;;  %vm46_vm0 = vcmask 1040384   ;;  %vm47_vm1 = vsmask.f32 256  ;;  %vm109_vm2 = vsmask.f32 7938  ;;  %s14798_s0 = inlined_call_operand.vmem [shape: f32[2,8,8,128], index: 0, kind: input, shape index: {}]   ;;  %s14799_s1 = inlined_call_operand.vmem [shape: bf16[9,128,128], index: 1, kind: input, shape index: {}]   ;;  %s14800_s2 = inlined_call_operand.vmem [shape: f32[1,128], index: 2, kind: input, shape index: {}]   ;;  %s14801_s3 = inlined_call_operand.vmem [shape: f32[1,128], index: 3, kind: input, shape index: {}]   ;;  %s14802_s4 = inlined_call_operand.vmem [shape: bf16[9,128,128], index: 4, kind: input, shape index: {}]   ;;  %s14803_s5 = inlined_call_operand.vmem [shape: f32[1,128], index: 5, kind: input, shape index: {}]   ;;  %s14804_s6 = inlined_call_operand.vmem [shape: f32[1,128], index: 6, kind: input, shape index: {}]   ;;  %s14805_s7 = inlined_call_operand.vmem [shape: bf16[9,128,128], index: 7, kind: input, shape index: {}]   ;;  %s14806_s8 = inlined_call_operand.vmem [shape: f32[1,128], index: 8, kind: input, shape index: {}]   ;;  %s14807_s9 = inlined_call_operand.vmem [shape: f32[1,128], index: 9, kind: input, shape index: {}]   ;;  %s14808_s10 = inlined_call_operand.hbm [shape: f32[2,8,8,128], index: 10, kind: output, shape index: {}]  }
   0x1   :  { %v11087_v0 = vld [vmem:[%s14799_s1 + $0x78] sm:$0xff]  ;;  %37 = vst [vmem:[#allocation2] sm:$0xf] %v11430_v3  ;;  %v11086_v4 = vld [vmem:[%s14799_s1 + $0x70] sm:$0xff]  ;;  %v11085_v7 = vld [vmem:[%s14799_s1 + $0x68] sm:$0xff]  ;;  %v14814_v10 = vmov 0 }
   0x2   :  { %v11495_v1 = vld [vmem:[%s14799_s1 + $0xb8] sm:$0xff]  ;;  %834 = vmatpush.bf16.msra.mxu0 %v11087_v0  ;;  %11352 = vmatpush.bf16.msra.mxu3 %v11087_v0  ;;  %38 = vst [vmem:[#allocation2 + $0x4] sm:$0xf] %v11430_v3  ;;  %v11512_v5 = vld [vmem:[%s14799_s1 + $0xb0] sm:$0xff]  ;;  %v11527_v8 = vld [vmem:[%s14799_s1 + $0xa8] sm:$0xff]  ;;  %vm364_vm4 = vcmask 1043456  }
   0x3   :  { %v11500_v2 = vld [vmem:[%s14799_s1 + $0x38] sm:$0xff]  ;;  %11368 = vmatpush.bf16.msra.mxu2 %v11495_v1  ;;  %v11517_v6 = vld [vmem:[%s14799_s1 + $0x30] sm:$0xff]  ;;  %v11532_v9 = vld [vmem:[%s14799_s1 + $0x28] sm:$0xff]  ;;  %39 = vst [vmem:[#allocation2 + $0x50] sm:$0xf] %v11430_v3  ;;  %v14819_v44 = vmov 0 }
   0x4   :  { %11360 = vmatpush.bf16.msra.mxu1 %v11500_v2  ;;  %vm11535_vm3 = vmand %vm46_vm0, %vm47_vm1  ;;  %v11084_v11 = vld [vmem:[%s14799_s1 + $0x60] sm:$0xff]  ;;  %v52_v13 = vld [vmem:[#allocation2 + $0x8] sm:$0x1]  ;;  %40 = vst [vmem:[#allocation2 + $0x54] sm:$0xf] %v11430_v3  ;;  %vm1076_vm10 = vcmask 1042432  }
   0x5   :  { %v14815_v10 = vsel %vm11535_vm3, 4294967295, %v14814_v10  ;;  %vm11545_vm5 = vmand %vm46_vm0, %vm109_vm2  ;;  %v53_v16 = vsel %vm11535_vm3, 0, %v52_v13  ;;  %v114_v18 = vld [vmem:[#allocation2 + $0xc] sm:$0x1]  ;;  %v171_v21 = vld [vmem:[%s14798_s0] sm:$0xff]  ;;  %vm1077_vm11 = vcmask 1046532  }
   0x6   :  { %835 = vmatpush.bf16.msra.mxu0 %v11086_v4  ;;  %11353 = vmatpush.bf16.msra.mxu3 %v11086_v4  ;;  %14816 = vst [vmem:[#allocation6_spill] sm:$0xff] %v14815_v10  ;;  %v115_v20 = vsel %vm11545_vm5, 0, %v114_v18  ;;  %v174_v22 = vld [vmem:[%s14798_s0 + $0x18] sm:$0xff]  ;;  %v11569_v23 = vld [vmem:[%s14799_s1 + $0xa0] sm:$0xff]  ;;  %v187_v25 = vpack.c.bf16 %v171_v21, %v171_v21  ;;  %v64_v29 = vld [vmem:[#allocation2 + $0x28] sm:$0x1] }
   0x7   :  { %11369 = vmatpush.bf16.msra.mxu2 %v11512_v5  ;;  %v11574_v24 = vld [vmem:[%s14799_s1 + $0x20] sm:$0xff]  ;;  %54 = vst [vmem:[#allocation2 + $0x8] sm:$0x1] %v53_v16  ;;  %v11576_v27 = vpack.c.bf16 %v174_v22, %v174_v22  ;;  %v11083_v28 = vld [vmem:[%s14799_s1 + $0x58] sm:$0xff]  ;;  %v126_v36 = vld [vmem:[#allocation2 + $0x2c] sm:$0x1] }
   0x8   :  { %11361 = vmatpush.bf16.msra.mxu1 %v11517_v6  ;;  %v49_v12 = vld [vmem:[#allocation2] sm:$0x1]  ;;  %v123_v30 = vld [vmem:[#allocation2 + $0x24] sm:$0x1]  ;;  %v11584_v31 = vld [vmem:[%s14799_s1 + $0x98] sm:$0xff]  ;;  %v204_v32 = vshrl.u32 %v187_v25, 16 }
   0x9   :  { %v50_v15 = vsel %vm11535_vm3, 0, %v49_v12  ;;  %v111_v17 = vld [vmem:[#allocation2 + $0x4] sm:$0x1]  ;;  %v61_v26 = vld [vmem:[#allocation2 + $0x20] sm:$0x1]  ;;  %v207_v33 = vshll.u32 %v187_v25, 16  ;;  %vm11612_vm8 = vmand %vm364_vm4, %vm109_vm2 }
   0xa   :  { %836 = vmatpush.bf16.msra.mxu0 %v11085_v7  ;;  %11354 = vmatpush.bf16.msra.mxu3 %v11085_v7  ;;  %51 = vst [vmem:[#allocation2] sm:$0x1] %v50_v15  ;;  %v112_v19 = vsel %vm11545_vm5, 0, %v111_v17  ;;  %v175_v34 = vld [vmem:[%s14798_s0 + $0x20] sm:$0xff]  ;;  %v11592_v35 = vld [vmem:[%s14799_s1 + $0x18] sm:$0xff]  ;;  %v228_v38 = vshrl.u32 %v11576_v27, 16  ;;  %vm11750_vm12 = vmor %vm1076_vm10, %vm1077_vm11 }
   0xb   :  { %11370 = vmatpush.bf16.msra.mxu2 %v11527_v8  ;;  %113 = vst [vmem:[#allocation2 + $0x4] sm:$0x1] %v112_v19  ;;  %v11595_v37 = vpack.c.bf16 %v175_v34, %v175_v34  ;;  %v206_v39 = vrot.slane %v204_v32, 7  ;;  %vm510_vm6 = vsmask.f32 3328  ;;  %v62_v40 = vsel %vm11535_vm3, 0, %v61_v26 }
   0xc   :  { %11362 = vmatpush.bf16.msra.mxu1 %v11532_v9  ;;  %116 = vst [vmem:[#allocation2 + $0xc] sm:$0x1] %v115_v20  ;;  %vm511_vm7 = vsmask.f32 7440  ;;  %v65_v41 = vsel %vm11535_vm3, 0, %v64_v29  ;;  %v124_v42 = vsel %vm11545_vm5, 0, %v123_v30 }
   0xd   :  { %42 = vst [vmem:[#allocation2 + $0x48] sm:$0xf] %v11430_v3  ;;  %v11082_v43 = vld [vmem:[%s14799_s1 + $0x50] sm:$0xff]  ;;  %v14820_v44 = vsel %vm11612_vm8, 4294967295, %v14819_v44  ;;  %v127_v45 = vsel %vm11545_vm5, 0, %v126_v36  ;;  %v11619_v46 = vrot.slane %v228_v38, 7  ;;  %v209_v51 = vor.u32 %v207_v33, %v206_v39  ;;  %vm11695_vm9 = vmor %vm510_vm6, %vm511_vm7 }
   0xe   :  { %837 = vmatpush.bf16.msra.mxu0 %v11084_v11  ;;  %11355 = vmatpush.bf16.msra.mxu3 %v11084_v11  ;;  %43 = vst [vmem:[#allocation2 + $0x4c] sm:$0xf] %v11430_v3  ;;  %v231_v47 = vshll.u32 %v11576_v27, 16  ;;  %v236_v48 = vshrl.u32 %v11595_v37, 16  ;;  %v11626_v49 = vld [vmem:[%s14799_s1 + $0x90] sm:$0xff]  ;;  %v210_v52 = vrot.slane %v206_v39, 4 }
   0xf   :  { %11371 = vmatpush.bf16.msra.mxu2 %v11569_v23  ;;  %14821 = vst [vmem:[#allocation7_spill] sm:$0xff] %v14820_v44  ;;  %v11631_v50 = vld [vmem:[%s14799_s1 + $0x10] sm:$0xff]  ;;  %v172_v54 = vld [vmem:[%s14798_s0 + $0x8] sm:$0xff]  ;;  %v239_v61 = vshll.u32 %v11595_v37, 16  ;;  %v234_v18 = vrot.slane %v11619_v46, 4  ;;  %v11080_v27 = vld [vmem:[%s14799_s1 + $0x40] sm:$0xff] }
  0x10   :  { %11363 = vmatpush.bf16.msra.mxu1 %v11574_v24  ;;  %44 = vst [vmem:[#allocation2 + $0x98] sm:$0xf] %v11430_v3  ;;  %v366_v55 = vld [vmem:[#allocation2 + $0x8] sm:$0xf]  ;;  %v11643_v60 = vrot.slane %v236_v48, 7  ;;  %v173_v13 = vld [vmem:[%s14798_s0 + $0x10] sm:$0xff]  ;;  %v11665_v15 = vpack.c.bf16 %v172_v54, %v172_v54  ;;  %v233_v17 = vor.u32 %v231_v47, %v11619_v46 }
  0x11   :  { %v462_v53 = vld [vmem:[#allocation2] sm:$0xf]  ;;  %45 = vst [vmem:[#allocation2 + $0x9c] sm:$0xf] %v11430_v3  ;;  %v367_v58 = vsel %vm11612_vm8, %v209_v51, %v366_v55  ;;  %v11081_v62 = vld [vmem:[%s14799_s1 + $0x48] sm:$0xff]  ;;  %v11111_v34 = vld [vmem:[%s14799_s1 + $0xf8] sm:$0xff] }
  0x12   :  { %838 = vmatpush.bf16.msra.mxu0 %v11083_v28  ;;  %11356 = vmatpush.bf16.msra.mxu3 %v11083_v28  ;;  %v514_v56 = vshrl.u32 %v462_v53, 16  ;;  %v517_v57 = vshll.u32 %v462_v53, 16  ;;  %63 = vst [vmem:[#allocation2 + $0x20] sm:$0x1] %v62_v40  ;;  %v11641_v59 = vld [vmem:[#allocation2 + $0x4] sm:$0x1]  ;;  %v241_v22 = vor.u32 %v239_v61, %v11643_v60 }
  0x13   :  { %11372 = vmatpush.bf16.msra.mxu2 %v11584_v31  ;;  %66 = vst [vmem:[#allocation2 + $0x28] sm:$0x1] %v65_v41  ;;  %v369_v63 = vld [vmem:[#allocation2 + $0xc] sm:$0x1]  ;;  %v523_v12 = vshll.u32 %v11641_v59, 16  ;;  %v242_v19 = vrot.slane %v11643_v60, 4 }
  0x14   :  { %11364 = vmatpush.bf16.msra.mxu1 %v11592_v35  ;;  %368 = vst [vmem:[#allocation2 + $0x8] sm:$0xf] %v367_v58  ;;  %v516_v0 = vrot.slane %v514_v56, 4  ;;  %v519_v3 = vrot.slane %v517_v57, 5  ;;  %v11652_v4 = vld [vmem:[%s14799_s1 + $0x88] sm:$0xff]  ;;  %v370_v11 = vsel %vm11535_vm3, %v210_v52, %v369_v63  ;;  %v11685_v32 = vld [vmem:[%s14799_s1 + $0x80] sm:$0xff] }
  0x15   :  { %v11657_v7 = vld [vmem:[%s14799_s1 + $0x8] sm:$0xff]  ;;  %125 = vst [vmem:[#allocation2 + $0x24] sm:$0x1] %v124_v42  ;;  %v55_v20 = vld [vmem:[#allocation2 + $0x10] sm:$0x1]  ;;  %v11672_v21 = vrot.slane %v523_v12, 5 }
  0x16   :  { %839 = vmatpush.bf16.msra.mxu0 %v11082_v43  ;;  %11357 = vmatpush.bf16.msra.mxu3 %v11082_v43  ;;  %371 = vst [vmem:[#allocation2 + $0xc] sm:$0x1] %v370_v11  ;;  %v520_v16 = vor.u32 %v519_v3, %v516_v0  ;;  %v56_v25 = vsel %vm11535_vm3, 0, %v55_v20  ;;  %v58_v26 = vld [vmem:[#allocation2 + $0x18] sm:$0x1]  ;;  %v212_v37 = vshrl.u32 %v11665_v15, 16  ;;  %v189_v43 = vpack.c.bf16 %v173_v13, %v173_v13 }
  0x17   :  { %11373 = vmatpush.bf16.msra.mxu2 %v11626_v49  ;;  %128 = vst [vmem:[#allocation2 + $0x2c] sm:$0x1] %v127_v45  ;;  %v59_v29 = vsel %vm11535_vm3, 0, %v58_v26  ;;  %v117_v30 = vld [vmem:[#allocation2 + $0x14] sm:$0x1]  ;;  %v11704_v41 = vld [vmem:[%s14799_s1] sm:$0xff] }
  0x18   :  { %11365 = vmatpush.bf16.msra.mxu1 %v11631_v50  ;;  %v521_v28 = vrot.slane %v520_v16, 4  ;;  %57 = vst [vmem:[#allocation2 + $0x10] sm:$0x1] %v56_v25  ;;  %v118_v36 = vsel %vm11545_vm5, 0, %v117_v30  ;;  %v120_v42 = vld [vmem:[#allocation2 + $0x1c] sm:$0x1] }
  0x19   :  { %v384_v33 = vld [vmem:[#allocation2 + $0x20] sm:$0xf]  ;;  %60 = vst [vmem:[#allocation2 + $0x18] sm:$0x1] %v59_v29  ;;  %v121_v47 = vsel %vm11545_vm5, 0, %v120_v42  ;;  %v214_v48 = vrot.slane %v212_v37, 7 }
  0x1a   :  { %840 = vmatpush.bf16.msra.mxu0 %v11081_v62  ;;  %11358 = vmatpush.bf16.msra.mxu3 %v11081_v62  ;;  %v385_v39 = vsel %vm11612_vm8, %v233_v17, %v384_v33  ;;  %v390_v40 = vld [vmem:[#allocation2 + $0x28] sm:$0xf]  ;;  %119 = vst [vmem:[#allocation2 + $0x14] sm:$0x1] %v118_v36  ;;  %v526_v55 = vsel %vm11695_vm9, %v521_v28, %v11672_v21  ;;  %v11110_v57 = vld [vmem:[%s14799_s1 + $0xf0] sm:$0xff]  ;;  %v215_v58 = vshll.u32 %v11665_v15, 16 }
  0x1b   :  { %11374 = vmatpush.bf16.msra.mxu2 %v11652_v4  ;;  %v463_v45 = vld [vmem:[#allocation2 + $0x8] sm:$0xf]  ;;  %386 = vst [vmem:[#allocation2 + $0x20] sm:$0xf] %v385_v39  ;;  %v391_v46 = vsel %vm11612_vm8, %v241_v22, %v390_v40  ;;  %v218_v61 = vrot.slane %v214_v48, 4  ;;  %v220_v3 = vshrl.u32 %v189_v43, 16  ;;  %v754_v25 = vunpack.c.l.b16 %v526_v55 }
  0x1c   :  { %11366 = vmatpush.bf16.msra.mxu1 %v11657_v7  ;;  %v528_v51 = vshrl.u32 %v463_v45, 16  ;;  %v531_v52 = vshll.u32 %v463_v45, 16  ;;  %v387_v53 = vld [vmem:[#allocation2 + $0x24] sm:$0x1]  ;;  %392 = vst [vmem:[#allocation2 + $0x28] sm:$0xf] %v391_v46  ;;  %v217_v12 = vor.u32 %v215_v58, %v214_v48 }
  0x1d   :  { %v11712_v54 = vld [vmem:[#allocation2 + $0xc] sm:$0x1]  ;;  %v388_v56 = vsel %vm11535_vm3, %v234_v18, %v387_v53  ;;  %122 = vst [vmem:[#allocation2 + $0x1c] sm:$0x1] %v121_v47  ;;  %v223_v13 = vshll.u32 %v189_v43, 16  ;;  %v222_v21 = vrot.slane %v220_v3, 7 }
  0x1e   :  { %841 = vmatpush.bf16.msra.mxu0 %v11080_v27  ;;  %11359 = vmatpush.bf16.msra.mxu3 %v11080_v27  ;;  %v530_v62 = vrot.slane %v528_v51, 4  ;;  %v533_v63 = vrot.slane %v531_v52, 5  ;;  %v537_v0 = vshll.u32 %v11712_v54, 16  ;;  %389 = vst [vmem:[#allocation2 + $0x24] sm:$0x1] %v388_v56  ;;  %v176_v15 = vld [vmem:[%s14798_s0 + $0x28] sm:$0xff] }
  0x1f   :  { %11375 = vmatpush.bf16.msra.mxu2 %v11685_v32  ;;  %v393_v11 = vld [vmem:[#allocation2 + $0x2c] sm:$0x1]  ;;  %v372_v16 = vld [vmem:[#allocation2 + $0x10] sm:$0xf]  ;;  %v226_v30 = vrot.slane %v222_v21, 4  ;;  %v11741_v33 = vpack.c.bf16 %v176_v15, %v176_v15  ;;  %v225_v40 = vor.u32 %v223_v13, %v222_v21 }
  0x20   :  { %v534_v17 = vor.u32 %v533_v63, %v530_v62  ;;  %v539_v18 = vrot.slane %v537_v0, 5  ;;  %v394_v20 = vsel %vm11535_vm3, %v242_v19, %v393_v11  ;;  %11367 = vmatpush.bf16.msra.mxu1 %v11704_v41  ;;  %v11734_v22 = vld [vmem:[#allocation2 + $0x30] sm:$0x1]  ;;  %v378_v19 = vld [vmem:[#allocation2 + $0x18] sm:$0xf] }
  0x21   :  { %395 = vst [vmem:[#allocation2 + $0x2c] sm:$0x1] %v394_v20  ;;  %v375_v26 = vld [vmem:[#allocation2 + $0x14] sm:$0x1]  ;;  %v68_v27 = vsel %vm11535_vm3, 0, %v11734_v22  ;;  %v379_v13 = vsel %vm11612_vm8, %v225_v40, %v378_v19  ;;  %v179_v22 = vld [vmem:[%s14798_s0 + $0x40] sm:$0xff] }
  0x22   :  { %1434 = vmatpush.bf16.msrb.mxu3 %v11111_v34  ;;  %979 = vmatpush.bf16.msrb.mxu0 %v11500_v2  ;;  %v535_v28 = vrot.slane %v534_v17, 4  ;;  %v466_v60 = vld [vmem:[#allocation2 + $0x20] sm:$0xf]  ;;  %v373_v2 = vsel %vm11612_vm8, %v217_v12, %v372_v16  ;;  %v376_v42 = vsel %vm11535_vm3, %v218_v61, %v375_v26  ;;  %v177_v58 = vld [vmem:[%s14798_s0 + $0x30] sm:$0xff]  ;;  %v70_v15 = vld [vmem:[#allocation2 + $0x38] sm:$0x1] }
  0x23   :  { %v1032_v29 = vld [vmem:[#allocation2 + $0x20] sm:$0xe]  ;;  %v467_v34 = vld [vmem:[#allocation2 + $0x28] sm:$0xf]  ;;  %v570_v36 = vshrl.u32 %v466_v60, 16  ;;  %v573_v37 = vshll.u32 %v466_v60, 16 }
  0x24   :  { %v1033_v39 = vld [vmem:[#allocation2 + $0x28] sm:$0xe]  ;;  %v540_v43 = vsel %vm11695_vm9, %v535_v28, %v539_v18  ;;  %v584_v45 = vshrl.u32 %v467_v34, 16  ;;  %v587_v46 = vshll.u32 %v467_v34, 16  ;;  %v9500_v47 = vrot.slane %v1032_v29, 9 }
  0x25   :  { %v9442_v48 = vld [vmem:[#allocation2 + $0x20] sm:$0xf]  ;;  %v755_v51 = vunpack.c.l.b16 %v540_v43  ;;  %v498_v52 = vld [vmem:[#allocation2 + $0x24] sm:$0x1]  ;;  %v572_v53 = vrot.slane %v570_v36, 4  ;;  %v575_v55 = vrot.slane %v573_v37, 5  ;;  %v193_v29 = vpack.c.bf16 %v177_v58, %v177_v58 }
  0x26   :  { %1435 = vmatpush.bf16.msrb.mxu3 %v11110_v57  ;;  %980 = vmatpush.bf16.msrb.mxu0 %v11517_v6  ;;  %v9501_v57 = vrot.slane %v1033_v39, 9  ;;  %v579_v61 = vshll.u32 %v498_v52, 16  ;;  %v586_v62 = vrot.slane %v584_v45, 4  ;;  %v589_v63 = vrot.slane %v587_v46, 5  ;;  %v11066_v0 = vld [vmem:[#allocation2 + $0x24] sm:$0xf0] }
  0x27   :  { %v1097_v6 = vrot.slane %v498_v52, 5  ;;  %v770_v3 = vpack.c.b16 %v755_v51, %v754_v25  ;;  %v576_v11 = vor.u32 %v575_v55, %v572_v53  ;;  %v9443_v12 = vor.u32 %v11066_v0, %v9442_v48  ;;  %374 = vst [vmem:[#allocation2 + $0x10] sm:$0xf] %v373_v2  ;;  %v381_v16 = vld [vmem:[#allocation2 + $0x1c] sm:$0x1] }
  0x28   :  { %v499_v17 = vld [vmem:[#allocation2 + $0x2c] sm:$0x1]  ;;  %v581_v18 = vrot.slane %v579_v61, 5  ;;  %v590_v20 = vor.u32 %v589_v63, %v586_v62  ;;  %377 = vst [vmem:[#allocation2 + $0x14] sm:$0x1] %v376_v42  ;;  %v382_v25 = vsel %vm11535_vm3, %v226_v30, %v381_v16  ;;  %v71_v34 = vsel %vm11535_vm3, 0, %v70_v15 }
  0x29   :  { %v1098_v21 = vsel %vm11750_vm12, %v9500_v47, %v1097_v6  ;;  %842 = vmatmul.bf16.vlgmr.msra.gmra.mxu0 %v770_v3  ;;  %v577_v26 = vrot.slane %v576_v11, 4  ;;  %v593_v28 = vshll.u32 %v499_v17, 16  ;;  %v1101_v60 = vrot.slane %v499_v17, 5  ;;  %997 = vmatmul.bf16.vlgmr.msra.gmra.mxu1 %v9443_v12  ;;  %380 = vst [vmem:[#allocation2 + $0x18] sm:$0xf] %v379_v13  ;;  %v11109_v47 = vld [vmem:[%s14799_s1 + $0xe8] sm:$0xff] }
  0x2a   :  { %981 = vmatpush.bf16.msrb.mxu0 %v11532_v9  ;;  %v591_v2 = vrot.slane %v590_v20, 4  ;;  %v1164_v19 = vunpack.c.l.b16 %v1098_v21  ;;  %383 = vst [vmem:[#allocation2 + $0x1c] sm:$0x1] %v382_v25  ;;  %v129_v36 = vld [vmem:[#allocation2 + $0x34] sm:$0x1]  ;;  %v244_v46 = vshrl.u32 %v11741_v33, 16  ;;  %1436 = vmatpush.bf16.msrb.mxu3 %v11109_v47  ;;  %v11791_v6 = vpack.c.bf16 %v179_v22, %v179_v22 }
  0x2b   :  { %v582_v9 = vsel %vm11695_vm9, %v577_v26, %v581_v18  ;;  %v595_v37 = vrot.slane %v593_v28, 5  ;;  %v1102_v30 = vsel %vm11750_vm12, %v9501_v57, %v1101_v60  ;;  %69 = vst [vmem:[#allocation2 + $0x30] sm:$0x1] %v68_v27  ;;  %v130_v39 = vsel %vm11545_vm5, 0, %v129_v36  ;;  %v132_v40 = vld [vmem:[#allocation2 + $0x3c] sm:$0x1] }
  0x2c   :  { %v758_v42 = vunpack.c.l.b16 %v582_v9  ;;  %v1165_v43 = vunpack.c.l.b16 %v1102_v30  ;;  %72 = vst [vmem:[#allocation2 + $0x38] sm:$0x1] %v71_v34  ;;  %v133_v45 = vsel %vm11545_vm5, 0, %v132_v40  ;;  %v252_v48 = vshrl.u32 %v193_v29, 16  ;;  %v79_v13 = vld [vmem:[#allocation2 + $0x50] sm:$0x1] }
  0x2d   :  { %v596_v27 = vsel %vm11695_vm9, %v591_v2, %v595_v37  ;;  %131 = vst [vmem:[#allocation2 + $0x34] sm:$0x1] %v130_v39  ;;  %v246_v55 = vrot.slane %v244_v46, 7  ;;  %v255_v57 = vshll.u32 %v193_v29, 16  ;;  %v180_v29 = vld [vmem:[%s14798_s0 + $0x48] sm:$0xff]  ;;  %v268_v40 = vshrl.u32 %v11791_v6, 16 }
  0x2e   :  { %982 = vmatpush.bf16.msrb.mxu0 %v11574_v24  ;;  %v247_v24 = vshll.u32 %v11741_v33, 16  ;;  %v759_v51 = vunpack.c.l.b16 %v596_v27  ;;  %v1178_v52 = vpack.c.b16 %v1165_v43, %v1164_v19  ;;  %v464_v53 = vld [vmem:[#allocation2 + $0x10] sm:$0xf]  ;;  %134 = vst [vmem:[#allocation2 + $0x3c] sm:$0x1] %v133_v45  ;;  %v254_v63 = vrot.slane %v252_v48, 7 }
  0x2f   :  { %v11789_v58 = vld [vmem:[#allocation2 + $0x14] sm:$0x1]  ;;  %v542_v61 = vshrl.u32 %v464_v53, 16  ;;  %v545_v62 = vshll.u32 %v464_v53, 16  ;;  %v250_v12 = vrot.slane %v246_v55, 4  ;;  %v80_v47 = vsel %vm11535_vm3, 0, %v79_v13 }
  0x30   :  { %v772_v0 = vpack.c.b16 %v759_v51, %v758_v42  ;;  %1258 = vmatmul.bf16.vlgmr.msra.gmra.mxu2 %v1178_v52  ;;  %v465_v3 = vld [vmem:[#allocation2 + $0x18] sm:$0xf]  ;;  %v551_v33 = vshll.u32 %v11789_v58, 16  ;;  %v249_v11 = vor.u32 %v247_v24, %v246_v55  ;;  %v257_v26 = vor.u32 %v255_v57, %v254_v63  ;;  %v144_v53 = vld [vmem:[#allocation2 + $0x5c] sm:$0x1] }
  0x31   :  { %v11795_v16 = vld [vmem:[#allocation2 + $0x1c] sm:$0x1]  ;;  %v544_v15 = vrot.slane %v542_v61, 4  ;;  %v547_v17 = vrot.slane %v545_v62, 5  ;;  %v556_v18 = vshrl.u32 %v465_v3, 16  ;;  %v559_v20 = vshll.u32 %v465_v3, 16 }
  0x32   :  { %983 = vmatpush.bf16.msrb.mxu0 %v11592_v35  ;;  %852 = vmatmul.bf16.vlgmr.msra.gmra.mxu3 %v772_v0  ;;  %v553_v21 = vrot.slane %v551_v33, 5  ;;  %v565_v25 = vshll.u32 %v11795_v16, 16  ;;  %v258_v28 = vrot.slane %v254_v63, 4  ;;  %v396_v60 = vld [vmem:[#allocation2 + $0x30] sm:$0xf]  ;;  %v11815_v24 = vpack.c.bf16 %v180_v29, %v180_v29 }
  0x33   :  { %v548_v2 = vor.u32 %v547_v17, %v544_v15  ;;  %v558_v35 = vrot.slane %v556_v18, 4  ;;  %v561_v19 = vrot.slane %v559_v20, 5  ;;  %v397_v34 = vsel %vm11612_vm8, %v249_v11, %v396_v60  ;;  %v402_v36 = vld [vmem:[#allocation2 + $0x38] sm:$0xf]  ;;  %81 = vst [vmem:[#allocation2 + $0x50] sm:$0x1] %v80_v47 }
  0x34   :  { %v82_v9 = vld [vmem:[#allocation2 + $0x58] sm:$0x1]  ;;  %v567_v37 = vrot.slane %v565_v25, 5  ;;  %398 = vst [vmem:[#allocation2 + $0x30] sm:$0xf] %v397_v34  ;;  %v403_v39 = vsel %vm11612_vm8, %v257_v26, %v402_v36  ;;  %v11822_v57 = vrot.slane %v268_v40, 7 }
  0x35   :  { %v399_v30 = vld [vmem:[#allocation2 + $0x34] sm:$0x1]  ;;  %v549_v42 = vrot.slane %v548_v2, 4  ;;  %v562_v43 = vor.u32 %v561_v19, %v558_v35  ;;  %404 = vst [vmem:[#allocation2 + $0x38] sm:$0xf] %v403_v39  ;;  %v83_v27 = vsel %vm11535_vm3, 0, %v82_v9 }
  0x36   :  { %984 = vmatpush.bf16.msrb.mxu0 %v11631_v50  ;;  %v400_v45 = vsel %vm11535_vm3, %v250_v12, %v399_v30  ;;  %v405_v46 = vld [vmem:[#allocation2 + $0x3c] sm:$0x1]  ;;  %v141_v50 = vld [vmem:[#allocation2 + $0x54] sm:$0x1]  ;;  %v271_v61 = vshll.u32 %v11791_v6, 16  ;;  %v145_v3 = vsel %vm11545_vm5, 0, %v144_v53 }
  0x37   :  { %401 = vst [vmem:[#allocation2 + $0x34] sm:$0x1] %v400_v45  ;;  %v406_v22 = vsel %vm11535_vm3, %v258_v28, %v405_v46  ;;  %v554_v48 = vsel %vm11695_vm9, %v549_v42, %v553_v21  ;;  %v563_v51 = vrot.slane %v562_v43, 4  ;;  %v142_v52 = vsel %vm11545_vm5, 0, %v141_v50  ;;  %v181_v62 = vld [vmem:[%s14798_s0 + $0x50] sm:$0xff] }
  0x38   :  { %407 = vst [vmem:[#allocation2 + $0x3c] sm:$0x1] %v406_v22  ;;  %v756_v55 = vunpack.c.l.b16 %v554_v48  ;;  %v276_v33 = vshrl.u32 %v11815_v24, 16  ;;  %v11836_v13 = vpack.c.bf16 %v181_v62, %v181_v62  ;;  %v273_v25 = vor.u32 %v271_v61, %v11822_v57  ;;  %v11841_v42 = vld [vmem:[#allocation2 + $0x50] sm:$0xe] }
  0x39   :  { %v568_v63 = vsel %vm11695_vm9, %v563_v51, %v567_v37  ;;  %84 = vst [vmem:[#allocation2 + $0x58] sm:$0x1] %v83_v27 }
  0x3a   :  { %985 = vmatpush.bf16.msrb.mxu0 %v11657_v7  ;;  %v757_v0 = vunpack.c.l.b16 %v568_v63  ;;  %143 = vst [vmem:[#allocation2 + $0x54] sm:$0x1] %v142_v52  ;;  %v11108_v7 = vld [vmem:[%s14799_s1 + $0xe0] sm:$0xff]  ;;  %v470_v51 = vld [vmem:[#allocation2 + $0x50] sm:$0xf] }
  0x3b   :  { %v468_v6 = vld [vmem:[#allocation2 + $0x30] sm:$0xf]  ;;  %1437 = vmatpush.bf16.msrb.mxu3 %v11108_v7  ;;  %146 = vst [vmem:[#allocation2 + $0x5c] sm:$0x1] %v145_v3  ;;  %v626_v62 = vshrl.u32 %v470_v51, 16  ;;  %v274_v7 = vrot.slane %v11822_v57, 4 }
  0x3c   :  { %v1034_v11 = vld [vmem:[#allocation2 + $0x30] sm:$0xe]  ;;  %v771_v15 = vpack.c.b16 %v757_v0, %v756_v55  ;;  %v469_v17 = vld [vmem:[#allocation2 + $0x38] sm:$0xf]  ;;  %v598_v18 = vshrl.u32 %v468_v6, 16  ;;  %v601_v20 = vshll.u32 %v468_v6, 16 }
  0x3d   :  { %v9446_v12 = vld [vmem:[#allocation2 + $0x30] sm:$0xf]  ;;  %v1035_v21 = vld [vmem:[#allocation2 + $0x38] sm:$0xe]  ;;  %v612_v28 = vshrl.u32 %v469_v17, 16  ;;  %v615_v60 = vshll.u32 %v469_v17, 16 }
  0x3e   :  { %986 = vmatpush.bf16.msrb.mxu0 %v11704_v41  ;;  %v500_v26 = vld [vmem:[#allocation2 + $0x34] sm:$0x1]  ;;  %v9502_v29 = vrot.slane %v1034_v11, 9  ;;  %v9503_v2 = vrot.slane %v1035_v21, 9  ;;  %v600_v19 = vrot.slane %v598_v18, 4  ;;  %v603_v34 = vrot.slane %v601_v20, 5 }
  0x3f   :  { %847 = vmatmul.bf16.gmra.mxu0 %v771_v15  ;;  %v501_v35 = vld [vmem:[#allocation2 + $0x3c] sm:$0x1]  ;;  %v607_v36 = vshll.u32 %v500_v26, 16  ;;  %v1105_v9 = vrot.slane %v500_v26, 5  ;;  %v614_v37 = vrot.slane %v612_v28, 4  ;;  %v617_v30 = vrot.slane %v615_v60, 5 }
  0x40   :  { %v621_v39 = vshll.u32 %v501_v35, 16  ;;  %v1109_v41 = vrot.slane %v501_v35, 5  ;;  %v11067_v40 = vld [vmem:[#allocation2 + $0x34] sm:$0xf0]  ;;  %v604_v43 = vor.u32 %v603_v34, %v600_v19  ;;  %v85_v63 = vld [vmem:[#allocation2 + $0x60] sm:$0x1] }
  0x41   :  { %v609_v45 = vrot.slane %v607_v36, 5  ;;  %v1106_v46 = vsel %vm11750_vm12, %v9502_v29, %v1105_v9  ;;  %v9447_v47 = vor.u32 %v11067_v40, %v9446_v12  ;;  %v618_v22 = vor.u32 %v617_v30, %v614_v37  ;;  %v502_v52 = vld [vmem:[#allocation2 + $0x54] sm:$0x1]  ;;  %v88_v0 = vld [vmem:[#allocation2 + $0x68] sm:$0x1]  ;;  %v182_v36 = vld [vmem:[%s14798_s0 + $0x58] sm:$0xff] }
  0x42   :  { %1240 = vmatpush.bf16.msra.mxu0 %v11495_v1  ;;  %v414_v1 = vld [vmem:[#allocation2 + $0x58] sm:$0xf]  ;;  %v623_v27 = vrot.slane %v621_v39, 5  ;;  %v1110_v50 = vsel %vm11750_vm12, %v9503_v2, %v1109_v41  ;;  %v1166_v48 = vunpack.c.l.b16 %v1106_v46  ;;  %v605_v53 = vrot.slane %v604_v43, 4  ;;  %v147_v18 = vld [vmem:[#allocation2 + $0x64] sm:$0x1] }
  0x43   :  { %v1167_v55 = vunpack.c.l.b16 %v1110_v50  ;;  %1002 = vmatmul.bf16.gmra.mxu1 %v9447_v47  ;;  %v415_v61 = vsel %vm11612_vm8, %v273_v25, %v414_v1  ;;  %v619_v3 = vrot.slane %v618_v22, 4  ;;  %v629_v6 = vshll.u32 %v470_v51, 16  ;;  %v150_v20 = vld [vmem:[#allocation2 + $0x6c] sm:$0x1]  ;;  %v9434_v28 = vld [vmem:[#allocation2] sm:$0xf] }
  0x44   :  { %416 = vst [vmem:[#allocation2 + $0x58] sm:$0xf] %v415_v61  ;;  %v635_v11 = vshll.u32 %v502_v52, 16  ;;  %v610_v12 = vsel %vm11695_vm9, %v605_v53, %v609_v45  ;;  %v9504_v17 = vrot.slane %v11841_v42, 9  ;;  %v11064_v60 = vld [vmem:[#allocation2 + $0x4] sm:$0xf0] }
  0x45   :  { %v1179_v15 = vpack.c.b16 %v1167_v55, %v1166_v48  ;;  %v624_v21 = vsel %vm11695_vm9, %v619_v3, %v623_v27  ;;  %v760_v25 = vunpack.c.l.b16 %v610_v12  ;;  %v631_v26 = vrot.slane %v629_v6, 5  ;;  %v91_v34 = vld [vmem:[#allocation2 + $0x70] sm:$0x1]  ;;  %v417_v9 = vld [vmem:[#allocation2 + $0x5c] sm:$0x1]  ;;  %v183_v39 = vld [vmem:[%s14798_s0 + $0x60] sm:$0xff] }
  0x46   :  { %1241 = vmatpush.bf16.msra.mxu0 %v11512_v5  ;;  %v628_v5 = vrot.slane %v626_v62, 4  ;;  %v1113_v57 = vrot.slane %v502_v52, 5  ;;  %v761_v29 = vunpack.c.l.b16 %v624_v21  ;;  %v11857_v2 = vrot.slane %v635_v11, 5  ;;  %v94_v45 = vld [vmem:[#allocation2 + $0x78] sm:$0x1] }
  0x47   :  { %1263 = vmatmul.bf16.gmra.mxu2 %v1179_v15  ;;  %v86_v35 = vsel %vm11535_vm3, 0, %v85_v63  ;;  %v89_v19 = vsel %vm11535_vm3, 0, %v88_v0  ;;  %v151_v30 = vsel %vm11545_vm5, 0, %v150_v20  ;;  %v418_v40 = vsel %vm11535_vm3, %v274_v7, %v417_v9  ;;  %v9450_v47 = vld [vmem:[#allocation2 + $0x50] sm:$0xf] }
  0x48   :  { %v632_v37 = vor.u32 %v631_v26, %v628_v5  ;;  %87 = vst [vmem:[#allocation2 + $0x60] sm:$0x1] %v86_v35  ;;  %v773_v41 = vpack.c.b16 %v761_v29, %v760_v25  ;;  %v11877_v42 = vrot.slane %v276_v33, 7  ;;  %v279_v43 = vshll.u32 %v11815_v24, 16  ;;  %v153_v50 = vld [vmem:[#allocation2 + $0x74] sm:$0x1] }
  0x49   :  { %90 = vst [vmem:[#allocation2 + $0x68] sm:$0x1] %v89_v19  ;;  %v284_v1 = vshrl.u32 %v11836_v13, 16  ;;  %v287_v22 = vshll.u32 %v11836_v13, 16  ;;  %v92_v27 = vsel %vm11535_vm3, 0, %v91_v34  ;;  %v9435_v33 = vor.u32 %v11064_v60, %v9434_v28  ;;  %v11107_v13 = vld [vmem:[%s14799_s1 + $0xd8] sm:$0xff] }
  0x4a   :  { %1242 = vmatpush.bf16.msra.mxu0 %v11527_v8  ;;  %v148_v8 = vsel %vm11545_vm5, 0, %v147_v18  ;;  %419 = vst [vmem:[#allocation2 + $0x5c] sm:$0x1] %v418_v40  ;;  %v633_v46 = vrot.slane %v632_v37, 4  ;;  %857 = vmatmul.bf16.gmra.mxu3 %v773_v41  ;;  %v11887_v24 = vsel %vm11750_vm12, %v9504_v17, %v1113_v57  ;;  %v156_v53 = vld [vmem:[#allocation2 + $0x7c] sm:$0x1]  ;;  %v281_v61 = vor.u32 %v279_v43, %v11877_v42 }
  0x4b   :  { %v471_v48 = vld [vmem:[#allocation2 + $0x58] sm:$0xf]  ;;  %149 = vst [vmem:[#allocation2 + $0x64] sm:$0x1] %v148_v8  ;;  %v198_v62 = vpack.c.bf16 %v182_v36, %v182_v36  ;;  %v282_v0 = vrot.slane %v11877_v42, 4  ;;  %v286_v3 = vrot.slane %v284_v1, 7  ;;  %v199_v7 = vpack.c.bf16 %v183_v39, %v183_v39  ;;  %1438 = vmatpush.bf16.msrb.mxu3 %v11107_v13 }
  0x4c   :  { %v1037_v51 = vld [vmem:[#allocation2 + $0x58] sm:$0xe]  ;;  %v640_v55 = vshrl.u32 %v471_v48, 16  ;;  %152 = vst [vmem:[#allocation2 + $0x6c] sm:$0x1] %v151_v30  ;;  %v638_v6 = vsel %vm11695_vm9, %v633_v46, %v11857_v2  ;;  %v11106_v15 = vld [vmem:[%s14799_s1 + $0xd0] sm:$0xff]  ;;  %v1168_v30 = vunpack.c.l.b16 %v11887_v24 }
  0x4d   :  { %v11068_v52 = vld [vmem:[#allocation2 + $0x54] sm:$0xf0]  ;;  %v9505_v63 = vrot.slane %v1037_v51, 9  ;;  %93 = vst [vmem:[#allocation2 + $0x70] sm:$0x1] %v92_v27  ;;  %v95_v5 = vsel %vm11535_vm3, 0, %v94_v45  ;;  %v289_v18 = vor.u32 %v287_v22, %v286_v3  ;;  %v762_v8 = vunpack.c.l.b16 %v638_v6 }
  0x4e   :  { %1243 = vmatpush.bf16.msra.mxu0 %v11569_v23  ;;  %v643_v23 = vshll.u32 %v471_v48, 16  ;;  %v642_v11 = vrot.slane %v640_v55, 4  ;;  %v9451_v17 = vor.u32 %v11068_v52, %v9450_v47  ;;  %v290_v20 = vrot.slane %v286_v3, 4  ;;  %96 = vst [vmem:[#allocation2 + $0x78] sm:$0x1] %v95_v5 }
  0x4f   :  { %987 = vmatmul.bf16.vlgmr.msrb.gmra.mxu0 %v9435_v33  ;;  %v420_v21 = vld [vmem:[#allocation2 + $0x60] sm:$0xf]  ;;  %v154_v25 = vsel %vm11545_vm5, 0, %v153_v50  ;;  %v157_v60 = vsel %vm11545_vm5, 0, %v156_v53  ;;  %v292_v57 = vshrl.u32 %v198_v62, 16  ;;  %v295_v35 = vshll.u32 %v198_v62, 16  ;;  %1439 = vmatpush.bf16.msrb.mxu3 %v11106_v15 }
  0x50   :  { %v645_v12 = vrot.slane %v643_v23, 5  ;;  %v426_v28 = vld [vmem:[#allocation2 + $0x68] sm:$0xf]  ;;  %155 = vst [vmem:[#allocation2 + $0x74] sm:$0x1] %v154_v25  ;;  %v300_v19 = vshrl.u32 %v199_v7, 16 }
  0x51   :  { %v503_v29 = vld [vmem:[#allocation2 + $0x5c] sm:$0x1]  ;;  %v427_v2 = vsel %vm11612_vm8, %v289_v18, %v426_v28  ;;  %v294_v37 = vrot.slane %v292_v57, 7  ;;  %158 = vst [vmem:[#allocation2 + $0x7c] sm:$0x1] %v157_v60  ;;  %v303_v40 = vshll.u32 %v199_v7, 16 }
  0x52   :  { %1244 = vmatpush.bf16.msra.mxu0 %v11584_v31  ;;  %v646_v26 = vor.u32 %v645_v12, %v642_v11  ;;  %v421_v31 = vsel %vm11612_vm8, %v281_v61, %v420_v21  ;;  %v649_v36 = vshll.u32 %v503_v29, 16  ;;  %v1117_v9 = vrot.slane %v503_v29, 5  ;;  %428 = vst [vmem:[#allocation2 + $0x68] sm:$0xf] %v427_v2  ;;  %v423_v39 = vld [vmem:[#allocation2 + $0x64] sm:$0x1] }
  0x53   :  { %422 = vst [vmem:[#allocation2 + $0x60] sm:$0xf] %v421_v31  ;;  %1007 = vmatmul.bf16.gmra.mxu1 %v9451_v17  ;;  %v302_v41 = vrot.slane %v300_v19, 7  ;;  %v424_v45 = vsel %vm11535_vm3, %v282_v0, %v423_v39  ;;  %v429_v46 = vld [vmem:[#allocation2 + $0x6c] sm:$0x1]  ;;  %v297_v47 = vor.u32 %v295_v35, %v294_v37  ;;  %v298_v27 = vrot.slane %v294_v37, 4 }
  0x54   :  { %v647_v34 = vrot.slane %v646_v26, 4  ;;  %v651_v42 = vrot.slane %v649_v36, 5  ;;  %v1118_v43 = vsel %vm11750_vm12, %v9505_v63, %v1117_v9  ;;  %425 = vst [vmem:[#allocation2 + $0x64] sm:$0x1] %v424_v45  ;;  %v430_v22 = vsel %vm11535_vm3, %v290_v20, %v429_v46  ;;  %v432_v48 = vld [vmem:[#allocation2 + $0x70] sm:$0xf] }
  0x55   :  { %v1169_v1 = vunpack.c.l.b16 %v1118_v43  ;;  %v305_v50 = vor.u32 %v303_v40, %v302_v41  ;;  %v1081_v33 = vrot.slane %v11641_v59, 5  ;;  %431 = vst [vmem:[#allocation2 + $0x6c] sm:$0x1] %v430_v22  ;;  %v9438_v24 = vld [vmem:[#allocation2 + $0x10] sm:$0xf]  ;;  %v433_v53 = vsel %vm11612_vm8, %v297_v47, %v432_v48  ;;  %v184_v23 = vld [vmem:[%s14798_s0 + $0x68] sm:$0xff] }
  0x56   :  { %1245 = vmatpush.bf16.msra.mxu0 %v11626_v49  ;;  %v1028_v49 = vld [vmem:[#allocation2] sm:$0xe]  ;;  %v652_v51 = vsel %vm11695_vm9, %v647_v34, %v651_v42  ;;  %v11065_v52 = vld [vmem:[#allocation2 + $0x14] sm:$0xf0]  ;;  %v306_v62 = vrot.slane %v302_v41, 4  ;;  %v11937_v2 = vpack.c.bf16 %v184_v23, %v184_v23 }
  0x57   :  { %v438_v55 = vld [vmem:[#allocation2 + $0x78] sm:$0xf]  ;;  %v763_v61 = vunpack.c.l.b16 %v652_v51  ;;  %v1180_v13 = vpack.c.b16 %v1169_v1, %v1168_v30  ;;  %434 = vst [vmem:[#allocation2 + $0x70] sm:$0xf] %v433_v53  ;;  %v435_v59 = vld [vmem:[#allocation2 + $0x74] sm:$0x1]  ;;  %v9439_v57 = vor.u32 %v11065_v52, %v9438_v24 }
  0x58   :  { %v9496_v63 = vrot.slane %v1028_v49, 9  ;;  %v439_v17 = vsel %vm11612_vm8, %v305_v50, %v438_v55  ;;  %v11934_v18 = vld [vmem:[#allocation2 + $0x8] sm:$0xe]  ;;  %v441_v29 = vld [vmem:[#allocation2 + $0x7c] sm:$0x1]  ;;  %v185_v50 = vld [vmem:[%s14798_s0 + $0x70] sm:$0xff] }
  0x59   :  { %v774_v6 = vpack.c.b16 %v763_v61, %v762_v8  ;;  %1268 = vmatmul.bf16.gmra.mxu2 %v1180_v13  ;;  %v473_v11 = vld [vmem:[#allocation2 + $0x68] sm:$0xf]  ;;  %440 = vst [vmem:[#allocation2 + $0x78] sm:$0xf] %v439_v17  ;;  %v442_v36 = vsel %vm11535_vm3, %v306_v62, %v441_v29  ;;  %v9497_v45 = vrot.slane %v11934_v18, 9  ;;  %v11119_v46 = vld [vmem:[%s14799_s1 + $0x138] sm:$0xff] }
  0x5a   :  { %1246 = vmatpush.bf16.msra.mxu0 %v11652_v4  ;;  %v472_v0 = vld [vmem:[#allocation2 + $0x60] sm:$0xf]  ;;  %v436_v4 = vsel %vm11535_vm3, %v298_v27, %v435_v59  ;;  %v1039_v5 = vld [vmem:[#allocation2 + $0x68] sm:$0xe]  ;;  %v668_v20 = vshrl.u32 %v473_v11, 16  ;;  %v671_v21 = vshll.u32 %v473_v11, 16  ;;  %v11943_v9 = vsel %vm11750_vm12, %v9496_v63, %v1081_v33 }
  0x5b   :  { %v1038_v3 = vld [vmem:[#allocation2 + $0x60] sm:$0xe]  ;;  %v654_v12 = vshrl.u32 %v472_v0, 16  ;;  %v657_v15 = vshll.u32 %v472_v0, 16  ;;  %v9507_v26 = vrot.slane %v1039_v5, 9  ;;  %862 = vmatmul.bf16.gmra.mxu3 %v774_v6  ;;  %v11118_v52 = vld [vmem:[%s14799_s1 + $0x130] sm:$0xff]  ;;  %v11982_v11 = vpack.c.bf16 %v185_v50, %v185_v50 }
  0x5c   :  { %v11928_v7 = vld [vmem:[#allocation2 + $0x60] sm:$0xf]  ;;  %v9506_v25 = vrot.slane %v1038_v3, 9  ;;  %v11069_v31 = vld [vmem:[#allocation2 + $0x64] sm:$0xf0]  ;;  %v670_v19 = vrot.slane %v668_v20, 4 }
  0x5d   :  { %v656_v28 = vrot.slane %v654_v12, 4  ;;  %v659_v60 = vrot.slane %v657_v15, 5  ;;  %437 = vst [vmem:[#allocation2 + $0x74] sm:$0x1] %v436_v4  ;;  %v504_v35 = vld [vmem:[#allocation2 + $0x64] sm:$0x1]  ;;  %v9455_v39 = vor.u32 %v11069_v31, %v11928_v7  ;;  %v1160_v31 = vunpack.c.l.b16 %v11943_v9 }
  0x5e   :  { %1247 = vmatpush.bf16.msra.mxu0 %v11685_v32  ;;  %v673_v34 = vrot.slane %v671_v21, 5  ;;  %v505_v32 = vld [vmem:[#allocation2 + $0x6c] sm:$0x1]  ;;  %v663_v8 = vshll.u32 %v504_v35, 16  ;;  %v1121_v30 = vrot.slane %v504_v35, 5  ;;  %v11143_v53 = vld [vmem:[%s14799_s1 + $0x1b8] sm:$0xff] }
  0x5f   :  { %v660_v37 = vor.u32 %v659_v60, %v656_v28  ;;  %443 = vst [vmem:[#allocation2 + $0x7c] sm:$0x1] %v442_v36  ;;  %v677_v40 = vshll.u32 %v505_v32, 16  ;;  %v1125_v42 = vrot.slane %v505_v32, 5  ;;  %v474_v43 = vld [vmem:[#allocation2 + $0x70] sm:$0xf]  ;;  %992 = vmatmul.bf16.gmra.mxu0 %v9439_v57  ;;  %2321 = vmatpush.bf16.msrb.mxu2 %v11143_v53 }
  0x60   :  { %v674_v41 = vor.u32 %v673_v34, %v670_v19  ;;  %v665_v49 = vrot.slane %v663_v8, 5  ;;  %v1122_v1 = vsel %vm11750_vm12, %v9506_v25, %v1121_v30  ;;  %v682_v22 = vshrl.u32 %v474_v43, 16  ;;  %v11952_v27 = vld [vmem:[#allocation2 + $0x70] sm:$0xe]  ;;  %v11105_v55 = vld [vmem:[%s14799_s1 + $0xc8] sm:$0xff]  ;;  %v11127_v59 = vld [vmem:[%s14799_s1 + $0x178] sm:$0xff] }
  0x61   :  { %v661_v47 = vrot.slane %v660_v37, 4  ;;  %v679_v33 = vrot.slane %v677_v40, 5  ;;  %v1126_v51 = vsel %vm11750_vm12, %v9507_v26, %v1125_v42  ;;  %v1170_v24 = vunpack.c.l.b16 %v1122_v1  ;;  %1440 = vmatpush.bf16.msrb.mxu3 %v11105_v55  ;;  %v11117_v4 = vld [vmem:[%s14799_s1 + $0x128] sm:$0xff]  ;;  %v11142_v6 = vld [vmem:[%s14799_s1 + $0x1b0] sm:$0xff]  ;;  %v475_v15 = vld [vmem:[#allocation2 + $0x78] sm:$0xf]  ;;  %2126 = vmatpush.bf16.msrb.mxu1 %v11127_v59 }
  0x62   :  { %v675_v48 = vrot.slane %v674_v41, 4  ;;  %1852 = vmatpush.bf16.msrb.mxu0 %v11119_v46  ;;  %v1171_v61 = vunpack.c.l.b16 %v1126_v51  ;;  %v684_v13 = vrot.slane %v682_v22, 4  ;;  %v685_v62 = vshll.u32 %v474_v43, 16  ;;  %v1041_v28 = vld [vmem:[#allocation2 + $0x78] sm:$0xe]  ;;  %v11141_v19 = vld [vmem:[%s14799_s1 + $0x1a8] sm:$0xff] }
  0x63   :  { %v666_v23 = vsel %vm11695_vm9, %v661_v47, %v665_v49  ;;  %v1085_v7 = vrot.slane %v11712_v54, 5  ;;  %1012 = vmatmul.bf16.gmra.mxu1 %v9455_v39  ;;  %v9508_v18 = vrot.slane %v11952_v27, 9  ;;  %v11126_v54 = vld [vmem:[%s14799_s1 + $0x170] sm:$0xff]  ;;  %v696_v21 = vshrl.u32 %v475_v15, 16  ;;  %2322 = vmatpush.bf16.msrb.mxu2 %v11142_v6  ;;  %v11116_v9 = vld [vmem:[%s14799_s1 + $0x120] sm:$0xff]  ;;  %v11115_v53 = vld [vmem:[%s14799_s1 + $0x118] sm:$0xff] }
  0x64   :  { %v680_v63 = vsel %vm11695_vm9, %v675_v48, %v679_v33  ;;  %v764_v0 = vunpack.c.l.b16 %v666_v23  ;;  %v506_v3 = vld [vmem:[#allocation2 + $0x74] sm:$0x1]  ;;  %v687_v5 = vrot.slane %v685_v62, 5  ;;  %v699_v25 = vshll.u32 %v475_v15, 16  ;;  %v97_v8 = vld [vmem:[#allocation2 + $0x80] sm:$0x1] }
  0x65   :  { %v765_v12 = vunpack.c.l.b16 %v680_v63  ;;  %v691_v17 = vshll.u32 %v506_v3, 16  ;;  %v1086_v26 = vsel %vm11750_vm12, %v9497_v45, %v1085_v7  ;;  %v1181_v60 = vpack.c.b16 %v1171_v61, %v1170_v24  ;;  %v100_v30 = vld [vmem:[#allocation2 + $0x88] sm:$0x1]  ;;  %v159_v43 = vld [vmem:[#allocation2 + $0x84] sm:$0x1]  ;;  %2127 = vmatpush.bf16.msrb.mxu1 %v11126_v54 }
  0x66   :  { %v507_v20 = vld [vmem:[#allocation2 + $0x7c] sm:$0x1]  ;;  %1853 = vmatpush.bf16.msrb.mxu0 %v11118_v52  ;;  %v688_v57 = vor.u32 %v687_v5, %v684_v13  ;;  %v1129_v35 = vrot.slane %v506_v3, 5  ;;  %v698_v36 = vrot.slane %v696_v21, 4  ;;  %v701_v32 = vrot.slane %v699_v25, 5  ;;  %v11125_v63 = vld [vmem:[%s14799_s1 + $0x168] sm:$0xff] }
  0x67   :  { %v705_v29 = vshll.u32 %v507_v20, 16  ;;  %v775_v34 = vpack.c.b16 %v765_v12, %v764_v0  ;;  %v1161_v37 = vunpack.c.l.b16 %v1086_v26  ;;  %v11999_v41 = vrot.slane %v691_v17, 5  ;;  %v162_v46 = vld [vmem:[#allocation2 + $0x8c] sm:$0x1]  ;;  %v1030_v47 = vld [vmem:[#allocation2 + $0x10] sm:$0xe]  ;;  %2323 = vmatpush.bf16.msrb.mxu2 %v11141_v19 }
  0x68   :  { %v11997_v39 = vrot.slane %v688_v57, 4  ;;  %v9509_v40 = vrot.slane %v1041_v28, 9  ;;  %v1133_v42 = vrot.slane %v507_v20, 5  ;;  %v702_v45 = vor.u32 %v701_v32, %v698_v36  ;;  %v9458_v1 = vld [vmem:[#allocation2 + $0x70] sm:$0xf]  ;;  %v11140_v0 = vld [vmem:[%s14799_s1 + $0x1a0] sm:$0xff] }
  0x69   :  { %1273 = vmatmul.bf16.gmra.mxu2 %v1181_v60  ;;  %v12003_v49 = vsel %vm11750_vm12, %v9508_v18, %v1129_v35  ;;  %v11070_v22 = vld [vmem:[#allocation2 + $0x74] sm:$0xf0]  ;;  %v98_v27 = vsel %vm11535_vm3, 0, %v97_v8  ;;  %v101_v50 = vsel %vm11535_vm3, 0, %v100_v30  ;;  %v707_v33 = vrot.slane %v705_v29, 5  ;;  %v11104_v6 = vld [vmem:[%s14799_s1 + $0xc0] sm:$0xff]  ;;  %2128 = vmatpush.bf16.msrb.mxu1 %v11125_v63 }
  0x6a   :  { %1854 = vmatpush.bf16.msrb.mxu0 %v11117_v4  ;;  %v703_v48 = vrot.slane %v702_v45, 4  ;;  %v1176_v51 = vpack.c.b16 %v1161_v37, %v1160_v31  ;;  %99 = vst [vmem:[#allocation2 + $0x80] sm:$0x1] %v98_v27  ;;  %v160_v24 = vsel %vm11545_vm5, 0, %v159_v43  ;;  %v1031_v52 = vld [vmem:[#allocation2 + $0x18] sm:$0xe]  ;;  %v1134_v3 = vsel %vm11750_vm12, %v9509_v40, %v1133_v42  ;;  %1441 = vmatpush.bf16.msrb.mxu3 %v11104_v6 }
  0x6b   :  { %867 = vmatmul.bf16.gmra.mxu3 %v775_v34  ;;  %102 = vst [vmem:[#allocation2 + $0x88] sm:$0x1] %v101_v50  ;;  %v163_v55 = vsel %vm11545_vm5, 0, %v162_v46  ;;  %v308_v23 = vshrl.u32 %v11937_v2, 16  ;;  %v311_v61 = vshll.u32 %v11937_v2, 16  ;;  %v316_v13 = vshrl.u32 %v11982_v11, 16  ;;  %2324 = vmatpush.bf16.msrb.mxu2 %v11140_v0 }
  0x6c   :  { %161 = vst [vmem:[#allocation2 + $0x84] sm:$0x1] %v160_v24  ;;  %v319_v62 = vshll.u32 %v11982_v11, 16  ;;  %v9498_v59 = vrot.slane %v1030_v47, 9  ;;  %v1089_v4 = vrot.slane %v11789_v58, 5  ;;  %v1172_v11 = vunpack.c.l.b16 %v12003_v49  ;;  %v11124_v15 = vld [vmem:[%s14799_s1 + $0x160] sm:$0xff] }
  0x6d   :  { %164 = vst [vmem:[#allocation2 + $0x8c] sm:$0x1] %v163_v55  ;;  %v310_v2 = vrot.slane %v308_v23, 7  ;;  %v318_v7 = vrot.slane %v316_v13, 7  ;;  %v9459_v12 = vor.u32 %v11070_v22, %v9458_v1  ;;  %v11139_v5 = vld [vmem:[%s14799_s1 + $0x198] sm:$0xff]  ;;  %v9499_v18 = vrot.slane %v1031_v52, 9  ;;  %2129 = vmatpush.bf16.msrb.mxu1 %v11124_v15 }
  0x6e   :  { %1855 = vmatpush.bf16.msrb.mxu0 %v11116_v9  ;;  %v1093_v54 = vrot.slane %v11795_v16, 5  ;;  %v694_v20 = vsel %vm11695_vm9, %v11997_v39, %v11999_v41  ;;  %v708_v21 = vsel %vm11695_vm9, %v703_v48, %v707_v33  ;;  %v1173_v25 = vunpack.c.l.b16 %v1134_v3  ;;  %v11114_v31 = vld [vmem:[%s14799_s1 + $0x110] sm:$0xff]  ;;  %v11123_v57 = vld [vmem:[%s14799_s1 + $0x158] sm:$0xff]  ;;  %v11113_v34 = vld [vmem:[%s14799_s1 + $0x108] sm:$0xff] }
  0x6f   :  { %1248 = vmatmul.bf16.vlgmr.msra.gmra.mxu0 %v1176_v51  ;;  %v313_v17 = vor.u32 %v311_v61, %v310_v2  ;;  %v321_v58 = vor.u32 %v319_v62, %v318_v7  ;;  %v314_v26 = vrot.slane %v310_v2, 4  ;;  %v322_v28 = vrot.slane %v318_v7, 4  ;;  %v11138_v29 = vld [vmem:[%s14799_s1 + $0x190] sm:$0xff]  ;;  %2325 = vmatpush.bf16.msrb.mxu2 %v11139_v5  ;;  %v1499_v36 = vld [vmem:[#allocation2 + $0x8] sm:$0xf] }
  0x70   :  { %v1090_v16 = vsel %vm11750_vm12, %v9498_v59, %v1089_v4  ;;  %v12062_v32 = vld [vmem:[#allocation2 + $0xc] sm:$0x1]  ;;  %v766_v37 = vunpack.c.l.b16 %v694_v20  ;;  %v767_v9 = vunpack.c.l.b16 %v708_v21  ;;  %v1094_v39 = vsel %vm11750_vm12, %v9499_v18, %v1093_v54  ;;  %v1501_v41 = vld [vmem:[#allocation2 + $0x10] sm:$0xf]  ;;  %v12070_v46 = vld [vmem:[#allocation2 + $0x14] sm:$0x1] }
  0x71   :  { %v444_v60 = vld [vmem:[#allocation2 + $0x80] sm:$0xf]  ;;  %v1182_v40 = vpack.c.b16 %v1173_v25, %v1172_v11  ;;  %v1162_v45 = vunpack.c.l.b16 %v1090_v16  ;;  %v11122_v49 = vld [vmem:[%s14799_s1 + $0x150] sm:$0xff]  ;;  %v1532_v1 = vshrl.u32 %v1499_v36, 16  ;;  %v1535_v22 = vshll.u32 %v1499_v36, 16  ;;  %2130 = vmatpush.bf16.msrb.mxu1 %v11123_v57  ;;  %v11137_v48 = vld [vmem:[%s14799_s1 + $0x188] sm:$0xff] }
  0x72   :  { %1856 = vmatpush.bf16.msrb.mxu0 %v11115_v53  ;;  %v445_v35 = vsel %vm11612_vm8, %v313_v17, %v444_v60  ;;  %v450_v19 = vld [vmem:[#allocation2 + $0x88] sm:$0xf]  ;;  %v1541_v27 = vshll.u32 %v12062_v32, 16  ;;  %v1163_v50 = vunpack.c.l.b16 %v1094_v39  ;;  %v1546_v33 = vshrl.u32 %v1501_v41, 16 }
  0x73   :  { %1017 = vmatmul.bf16.gmra.mxu1 %v9459_v12  ;;  %446 = vst [vmem:[#allocation2 + $0x80] sm:$0xf] %v445_v35  ;;  %v447_v8 = vld [vmem:[#allocation2 + $0x84] sm:$0x1]  ;;  %v451_v30 = vsel %vm11612_vm8, %v321_v58, %v450_v19  ;;  %2326 = vmatpush.bf16.msrb.mxu2 %v11138_v29  ;;  %v1549_v51 = vshll.u32 %v1501_v41, 16  ;;  %v1555_v24 = vshll.u32 %v12070_v46, 16  ;;  %v776_v52 = vpack.c.b16 %v767_v9, %v766_v37 }
  0x74   :  { %v448_v42 = vsel %vm11535_vm3, %v314_v26, %v447_v8  ;;  %452 = vst [vmem:[#allocation2 + $0x88] sm:$0xf] %v451_v30  ;;  %v453_v43 = vld [vmem:[#allocation2 + $0x8c] sm:$0x1]  ;;  %v1534_v53 = vrot.slane %v1532_v1, 4  ;;  %v1537_v55 = vrot.slane %v1535_v22, 5 }
  0x75   :  { %449 = vst [vmem:[#allocation2 + $0x84] sm:$0x1] %v448_v42  ;;  %v454_v47 = vsel %vm11535_vm3, %v322_v28, %v453_v43 }
  0x76   :  { %1857 = vmatpush.bf16.msrb.mxu0 %v11114_v31  ;;  %455 = vst [vmem:[#allocation2 + $0x8c] sm:$0x1] %v454_v47 }
  0x77   :  { %15 = vsyncpa [#allocation4], 0  ;;  %v11112_v23 = vld [vmem:[%s14799_s1 + $0x100] sm:$0xff]  ;;  %v1548_v61 = vrot.slane %v1546_v33, 4  ;;  %v1551_v13 = vrot.slane %v1549_v51, 5  ;;  %v12085_v62 = vrot.slane %v1541_v27, 5  ;;  %v1177_v0 = vpack.c.b16 %v1163_v50, %v1162_v45  ;;  %2131 = vmatpush.bf16.msrb.mxu1 %v11122_v49  ;;  %2327 = vmatpush.bf16.msrb.mxu2 %v11137_v48 }
  0x78   :  { %v12087_v59 = vrot.slane %v1555_v24, 5  ;;  %v1538_v12 = vor.u32 %v1537_v55, %v1534_v53  ;;  %v11151_v37 = vld [vmem:[%s14799_s1 + $0x1f8] sm:$0xff]  ;;  %v11121_v9 = vld [vmem:[%s14799_s1 + $0x148] sm:$0xff]  ;;  %v11136_v8 = vld [vmem:[%s14799_s1 + $0x180] sm:$0xff]  ;;  %v1967_v24 = vrot.slane %v12062_v32, 5  ;;  %s9372_s15 = sshll.u32 %s14808_s10, 4  ;;  %s9373_s15 = int_to_ptr.hbm [resolvable:$true] %s9372_s15 }
  0x79   :  { %1278 = vmatmul.bf16.gmra.mxu2 %v1182_v40  ;;  %v1552_v15 = vor.u32 %v1551_v13, %v1548_v61  ;;  %v11120_v42 = vld [vmem:[%s14799_s1 + $0x140] sm:$0xff]  ;;  %2739 = vmatpush.bf16.msra.mxu3 %v11151_v37  ;;  %v11159_v1 = vld [vmem:[%s14799_s1 + $0x238] sm:$0xff]  ;;  %v1917_v22 = vld [vmem:[#allocation2 + $0x8] sm:$0xe]  ;;  %s11433_s16 = smov 8  }
  0x7a   :  { %1858 = vmatpush.bf16.msrb.mxu0 %v11113_v34  ;;  %v476_v63 = vld [vmem:[#allocation2 + $0x80] sm:$0xf]  ;;  %v1539_v47 = vrot.slane %v1538_v12, 4  ;;  %v1918_v50 = vld [vmem:[#allocation2 + $0x10] sm:$0xe]  ;;  %v9688_v51 = vrot.slane %v1917_v22, 9 }
  0x7b   :  { %v1042_v3 = vld [vmem:[#allocation2 + $0x80] sm:$0xe]  ;;  %872 = vmatmul.bf16.gmra.mxu3 %v776_v52  ;;  %v477_v7 = vld [vmem:[#allocation2 + $0x88] sm:$0xf]  ;;  %v710_v4 = vshrl.u32 %v476_v63, 16  ;;  %v713_v6 = vshll.u32 %v476_v63, 16  ;;  %2132 = vmatpush.bf16.msrb.mxu1 %v11121_v9 }
  0x7c   :  { %v9462_v2 = vld [vmem:[#allocation2 + $0x80] sm:$0xf]  ;;  %v1043_v11 = vld [vmem:[#allocation2 + $0x88] sm:$0xe]  ;;  %v508_v5 = vld [vmem:[#allocation2 + $0x84] sm:$0x1]  ;;  %2328 = vmatpush.bf16.msrb.mxu2 %v11136_v8  ;;  %v1544_v33 = vsel %vm11695_vm9, %v1539_v47, %v12085_v62 }
  0x7d   :  { %v724_v17 = vshrl.u32 %v477_v7, 16  ;;  %v727_v58 = vshll.u32 %v477_v7, 16  ;;  %v9510_v18 = vrot.slane %v1042_v3, 9  ;;  %v9511_v54 = vrot.slane %v1043_v11, 9  ;;  %v509_v20 = vld [vmem:[#allocation2 + $0x8c] sm:$0x1] }
  0x7e   :  { %1859 = vmatpush.bf16.msrb.mxu0 %v11112_v23  ;;  %v712_v21 = vrot.slane %v710_v4, 4  ;;  %v715_v25 = vrot.slane %v713_v6, 5  ;;  %v719_v26 = vshll.u32 %v508_v5, 16  ;;  %v1137_v31 = vrot.slane %v508_v5, 5  ;;  %v11071_v29 = vld [vmem:[#allocation2 + $0x84] sm:$0xf0] }
  0x7f   :  { %v726_v28 = vrot.slane %v724_v17, 4  ;;  %v729_v60 = vrot.slane %v727_v58, 5  ;;  %v733_v16 = vshll.u32 %v509_v20, 16  ;;  %v1141_v57 = vrot.slane %v509_v20, 5  ;;  %1253 = vmatmul.bf16.gmra.mxu0 %v1177_v0  ;;  %v1503_v52 = vld [vmem:[#allocation2 + $0x18] sm:$0xf]  ;;  %2133 = vmatpush.bf16.msrb.mxu1 %v11120_v42 }
  0x80   :  { %v716_v35 = vor.u32 %v715_v25, %v712_v21  ;;  %v721_v19 = vrot.slane %v719_v26, 5  ;;  %v1138_v34 = vsel %vm11750_vm12, %v9510_v18, %v1137_v31  ;;  %v9463_v36 = vor.u32 %v11071_v29, %v9462_v2  ;;  %v1505_v62 = vld [vmem:[#allocation2 + $0x20] sm:$0xf]  ;;  %v1504_v2 = vld [vmem:[#allocation2 + $0x1c] sm:$0x1]  ;;  %v11150_v31 = vld [vmem:[%s14799_s1 + $0x1f0] sm:$0xff] }
  0x81   :  { %v730_v30 = vor.u32 %v729_v60, %v726_v28  ;;  %v735_v39 = vrot.slane %v733_v16, 5  ;;  %v1142_v41 = vsel %vm11750_vm12, %v9511_v54, %v1141_v57  ;;  %v1174_v40 = vunpack.c.l.b16 %v1138_v34  ;;  %v1506_v17 = vld [vmem:[#allocation2 + $0x24] sm:$0x1]  ;;  %v11158_v16 = vld [vmem:[%s14799_s1 + $0x230] sm:$0xff]  ;;  %2740 = vmatpush.bf16.msra.mxu3 %v11150_v31  ;;  %v178_v34 = vld [vmem:[%s14798_s0 + $0x38] sm:$0xff] }
  0x82   :  { %v717_v43 = vrot.slane %v716_v35, 4  ;;  %v1175_v45 = vunpack.c.l.b16 %v1142_v41  ;;  %v1553_v49 = vrot.slane %v1552_v15, 4  ;;  %3013 = vmatpush.bf16.msra.mxu0 %v11159_v1  ;;  %v9689_v63 = vrot.slane %v1918_v50, 9  ;;  %v1919_v35 = vld [vmem:[#allocation2 + $0x18] sm:$0xe] }
  0x83   :  { %v731_v27 = vrot.slane %v730_v30, 4  ;;  %1022 = vmatmul.bf16.gmra.mxu1 %v9463_v36  ;;  %v1971_v0 = vrot.slane %v12070_v46, 5  ;;  %v1772_v3 = vunpack.c.l.b16 %v1544_v33  ;;  %v1560_v32 = vshrl.u32 %v1503_v52, 16  ;;  %v9578_v36 = vld [vmem:[#allocation2 + $0x8] sm:$0xf] }
  0x84   :  { %v722_v48 = vsel %vm11695_vm9, %v717_v43, %v721_v19  ;;  %v1558_v23 = vsel %vm11695_vm9, %v1553_v49, %v12087_v59  ;;  %v1183_v13 = vpack.c.b16 %v1175_v45, %v1174_v40  ;;  %v1968_v6 = vsel %vm11750_vm12, %v9688_v51, %v1967_v24  ;;  %v1920_v19 = vld [vmem:[#allocation2 + $0x20] sm:$0xe]  ;;  %v11096_v37 = vld [vmem:[#allocation2 + $0xc] sm:$0xf0]  ;;  %v11128_v8 = vld [vmem:[#allocation2 + $0x14] sm:$0xf0] }
  0x85   :  { %v736_v53 = vsel %vm11695_vm9, %v731_v27, %v735_v39  ;;  %v768_v55 = vunpack.c.l.b16 %v722_v48  ;;  %v1773_v4 = vunpack.c.l.b16 %v1558_v23  ;;  %v1563_v11 = vshll.u32 %v1503_v52, 16  ;;  %v9770_v9 = vld [vmem:[#allocation2 + $0x10] sm:$0xf]  ;;  %v1507_v39 = vld [vmem:[#allocation2 + $0x28] sm:$0xf] }
  0x86   :  { %v769_v61 = vunpack.c.l.b16 %v736_v53  ;;  %v1972_v59 = vsel %vm11750_vm12, %v9689_v63, %v1971_v0  ;;  %v1562_v12 = vrot.slane %v1560_v32, 4  ;;  %v1574_v15 = vshrl.u32 %v1505_v62, 16  ;;  %3014 = vmatpush.bf16.msra.mxu0 %v11158_v16  ;;  %v1509_v43 = vld [vmem:[#allocation2 + $0x30] sm:$0xf]  ;;  %v73_v1 = vld [vmem:[#allocation2 + $0x40] sm:$0x1] }
  0x87   :  { %v1577_v5 = vshll.u32 %v1505_v62, 16  ;;  %v1565_v58 = vrot.slane %v1563_v11, 5  ;;  %v1569_v46 = vshll.u32 %v1504_v2, 16  ;;  %v1788_v20 = vpack.c.b16 %v1773_v4, %v1772_v3  ;;  %v135_v24 = vld [vmem:[#allocation2 + $0x44] sm:$0x1] }
  0x88   :  { %v777_v7 = vpack.c.b16 %v769_v61, %v768_v55  ;;  %v1576_v18 = vrot.slane %v1574_v15, 4  ;;  %v2046_v21 = vunpack.c.l.b16 %v1968_v6  ;;  %v2047_v25 = vunpack.c.l.b16 %v1972_v59  ;;  %v12143_v62 = vld [vmem:[#allocation2 + $0x2c] sm:$0x1] }
  0x89   :  { %1283 = vmatmul.bf16.gmra.mxu2 %v1183_v13  ;;  %v1579_v54 = vrot.slane %v1577_v5, 5  ;;  %v1566_v26 = vor.u32 %v1565_v58, %v1562_v12  ;;  %v1583_v60 = vshll.u32 %v1506_v17, 16  ;;  %v1571_v57 = vrot.slane %v1569_v46, 5  ;;  %v1510_v12 = vld [vmem:[#allocation2 + $0x34] sm:$0x1] }
  0x8a   :  { %v2062_v30 = vpack.c.b16 %v2047_v25, %v2046_v21  ;;  %v1975_v42 = vrot.slane %v1504_v2, 5  ;;  %v9690_v45 = vrot.slane %v1919_v35, 9  ;;  %v9691_v47 = vrot.slane %v1920_v19, 9  ;;  %v11149_v21 = vld [vmem:[%s14799_s1 + $0x1e8] sm:$0xff] }
  0x8b   :  { %877 = vmatmul.bf16.gmra.mxu3 %v777_v7  ;;  %v1580_v28 = vor.u32 %v1579_v54, %v1576_v18  ;;  %v1567_v29 = vrot.slane %v1566_v26, 4  ;;  %v1585_v40 = vrot.slane %v1583_v60, 5  ;;  %v1979_v49 = vrot.slane %v1506_v17, 5  ;;  %v11157_v26 = vld [vmem:[%s14799_s1 + $0x228] sm:$0xff] }
  0x8c   :  { %v194_v22 = vpack.c.bf16 %v178_v34, %v178_v34  ;;  %v1588_v50 = vshrl.u32 %v1507_v39, 16  ;;  %v1591_v48 = vshll.u32 %v1507_v39, 16  ;;  %v1602_v33 = vshrl.u32 %v1509_v43, 16  ;;  %2741 = vmatpush.bf16.msra.mxu3 %v11149_v21  ;;  %3015 = vmatpush.bf16.msra.mxu0 %v11157_v26  ;;  %v1923_v21 = vld [vmem:[#allocation2 + $0x38] sm:$0xe] }
  0x8d   :  { %v1581_v41 = vrot.slane %v1580_v28, 4  ;;  %v1572_v27 = vsel %vm11695_vm9, %v1567_v29, %v1571_v57  ;;  %v1605_v51 = vshll.u32 %v1509_v43, 16  ;;  %v9579_v52 = vor.u32 %v11096_v37, %v9578_v36  ;;  %v1511_v36 = vld [vmem:[#allocation2 + $0x38] sm:$0xf]  ;;  %v1921_v37 = vld [vmem:[#allocation2 + $0x28] sm:$0xe] }
  0x8e   :  { %v9771_v53 = vor.u32 %v11128_v8, %v9770_v9  ;;  %v74_v23 = vsel %vm11535_vm3, 0, %v73_v1  ;;  %v1774_v61 = vunpack.c.l.b16 %v1572_v27  ;;  %v1976_v13 = vsel %vm11750_vm12, %v9690_v45, %v1975_v42  ;;  %v1922_v9 = vld [vmem:[#allocation2 + $0x30] sm:$0xe]  ;;  %v9774_v8 = vld [vmem:[#allocation2 + $0x20] sm:$0xf] }
  0x8f   :  { %1860 = vmatmul.bf16.vlgmr.msrb.gmra.mxu0 %v1788_v20  ;;  %v1586_v55 = vsel %vm11695_vm9, %v1581_v41, %v1585_v40  ;;  %v1980_v63 = vsel %vm11750_vm12, %v9691_v47, %v1979_v49  ;;  %75 = vst [vmem:[#allocation2 + $0x40] sm:$0x1] %v74_v23  ;;  %v260_v0 = vshrl.u32 %v194_v22, 16  ;;  %v1590_v3 = vrot.slane %v1588_v50, 4  ;;  %v9582_v42 = vld [vmem:[#allocation2 + $0x18] sm:$0xf] }
  0x90   :  { %v1593_v2 = vrot.slane %v1591_v48, 5  ;;  %v263_v32 = vshll.u32 %v194_v22, 16  ;;  %v136_v7 = vsel %vm11545_vm5, 0, %v135_v24  ;;  %v1775_v4 = vunpack.c.l.b16 %v1586_v55  ;;  %v11097_v45 = vld [vmem:[#allocation2 + $0x1c] sm:$0xf0] }
  0x91   :  { %v1604_v6 = vrot.slane %v1602_v33, 4  ;;  %v1607_v11 = vrot.slane %v1605_v51, 5  ;;  %v262_v59 = vrot.slane %v260_v0, 7  ;;  %137 = vst [vmem:[#allocation2 + $0x44] sm:$0x1] %v136_v7  ;;  %v2048_v15 = vunpack.c.l.b16 %v1976_v13 }
  0x92   :  { %v2049_v5 = vunpack.c.l.b16 %v1980_v63  ;;  %v1594_v17 = vor.u32 %v1593_v2, %v1590_v3  ;;  %v1597_v58 = vshll.u32 %v12143_v62, 16  ;;  %v1789_v18 = vpack.c.b16 %v1775_v4, %v1774_v61  ;;  %v76_v48 = vld [vmem:[#allocation2 + $0x48] sm:$0x1]  ;;  %v1512_v23 = vld [vmem:[#allocation2 + $0x3c] sm:$0x1] }
  0x93   :  { %2134 = vmatmul.bf16.vlgmr.msrb.gmra.mxu1 %v2062_v30  ;;  %v265_v46 = vor.u32 %v263_v32, %v262_v59  ;;  %v1608_v54 = vor.u32 %v1607_v11, %v1604_v6  ;;  %v1611_v20 = vshll.u32 %v1510_v12, 16  ;;  %v266_v25 = vrot.slane %v262_v59, 4  ;;  %v11129_v30 = vld [vmem:[#allocation2 + $0x24] sm:$0xf0] }
  0x94   :  { %v1595_v28 = vrot.slane %v1594_v17, 4  ;;  %v1599_v60 = vrot.slane %v1597_v58, 5  ;;  %v2063_v29 = vpack.c.b16 %v2049_v5, %v2048_v15  ;;  %v1616_v41 = vshrl.u32 %v1511_v36, 16  ;;  %v11148_v5 = vld [vmem:[%s14799_s1 + $0x1e0] sm:$0xff]  ;;  %v9586_v26 = vld [vmem:[#allocation2 + $0x28] sm:$0xf] }
  0x95   :  { %v1609_v35 = vrot.slane %v1608_v54, 4  ;;  %v1613_v19 = vrot.slane %v1611_v20, 5  ;;  %v1619_v40 = vshll.u32 %v1511_v36, 16  ;;  %v9692_v47 = vrot.slane %v1921_v37, 9  ;;  %2742 = vmatpush.bf16.msra.mxu3 %v11148_v5 }
  0x96   :  { %v408_v31 = vld [vmem:[#allocation2 + $0x40] sm:$0xf]  ;;  %v1600_v39 = vsel %vm11695_vm9, %v1595_v28, %v1599_v60  ;;  %v1983_v49 = vrot.slane %v12143_v62, 5  ;;  %v9693_v1 = vrot.slane %v1922_v9, 9  ;;  %v1987_v22 = vrot.slane %v1510_v12, 5 }
  0x97   :  { %v409_v16 = vsel %vm11612_vm8, %v265_v46, %v408_v31  ;;  %v1614_v43 = vsel %vm11695_vm9, %v1609_v35, %v1613_v19  ;;  %v9775_v27 = vor.u32 %v11129_v30, %v9774_v8  ;;  %v1776_v50 = vunpack.c.l.b16 %v1600_v39  ;;  %v11098_v31 = vld [vmem:[#allocation2 + $0x2c] sm:$0xf0]  ;;  %v1517_v28 = vld [vmem:[#allocation2 + $0x60] sm:$0xf]  ;;  %v11130_v35 = vld [vmem:[#allocation2 + $0x34] sm:$0xf0] }
  0x98   :  { %v411_v57 = vld [vmem:[#allocation2 + $0x44] sm:$0x1]  ;;  %410 = vst [vmem:[#allocation2 + $0x40] sm:$0xf] %v409_v16  ;;  %v1777_v33 = vunpack.c.l.b16 %v1614_v43  ;;  %v1618_v24 = vrot.slane %v1616_v41, 4  ;;  %v9583_v55 = vor.u32 %v11097_v45, %v9582_v42  ;;  %v1984_v0 = vsel %vm11750_vm12, %v9692_v47, %v1983_v49 }
  0x99   :  { %2329 = vmatmul.bf16.vlgmr.msrb.gmra.mxu2 %v9771_v53  ;;  %v412_v34 = vsel %vm11535_vm3, %v266_v25, %v411_v57  ;;  %v77_v53 = vsel %vm11535_vm3, 0, %v76_v48  ;;  %v1988_v62 = vsel %vm11750_vm12, %v9693_v1, %v1987_v22  ;;  %v1625_v6 = vshll.u32 %v1512_v23, 16  ;;  %v1515_v25 = vld [vmem:[#allocation2 + $0x58] sm:$0xf]  ;;  %v9778_v60 = vld [vmem:[#allocation2 + $0x30] sm:$0xf] }
  0x9a   :  { %413 = vst [vmem:[#allocation2 + $0x44] sm:$0x1] %v412_v34  ;;  %v1790_v7 = vpack.c.b16 %v1777_v33, %v1776_v50  ;;  %v2050_v11 = vunpack.c.l.b16 %v1984_v0  ;;  %v2051_v59 = vunpack.c.l.b16 %v1988_v62  ;;  %v11156_v16 = vld [vmem:[%s14799_s1 + $0x220] sm:$0xff]  ;;  %v9694_v34 = vrot.slane %v1923_v21, 9  ;;  %v12185_v50 = vld [vmem:[#allocation2 + $0x5c] sm:$0x1] }
  0x9b   :  { %1442 = vmatmul.bf16.vlgmr.msrb.gmra.mxu3 %v9579_v52  ;;  %v1621_v52 = vrot.slane %v1619_v40, 5  ;;  %78 = vst [vmem:[#allocation2 + $0x48] sm:$0x1] %v77_v53  ;;  %v1627_v46 = vrot.slane %v1625_v6, 5  ;;  %v1991_v36 = vrot.slane %v1512_v23, 5  ;;  %v1644_v37 = vshrl.u32 %v1515_v25, 16  ;;  %3016 = vmatpush.bf16.msra.mxu0 %v11156_v16 }
  0x9c   :  { %v1647_v8 = vshll.u32 %v1515_v25, 16  ;;  %v1658_v30 = vshrl.u32 %v1517_v28, 16  ;;  %v1661_v39 = vshll.u32 %v1517_v28, 16  ;;  %v9587_v43 = vor.u32 %v11098_v31, %v9586_v26  ;;  %v11155_v25 = vld [vmem:[%s14799_s1 + $0x218] sm:$0xff]  ;;  %v1926_v31 = vld [vmem:[#allocation2 + $0x60] sm:$0xe] }
  0x9d   :  { %v1622_v4 = vor.u32 %v1621_v52, %v1618_v24  ;;  %v9779_v45 = vor.u32 %v11130_v35, %v9778_v60  ;;  %v1646_v48 = vrot.slane %v1644_v37, 4  ;;  %v1925_v26 = vld [vmem:[#allocation2 + $0x58] sm:$0xe] }
  0x9e   :  { %v1649_v24 = vrot.slane %v1647_v8, 5  ;;  %v1660_v52 = vrot.slane %v1658_v30, 4  ;;  %v1663_v53 = vrot.slane %v1661_v39, 5  ;;  %v9696_v8 = vrot.slane %v1925_v26, 9  ;;  %v1525_v26 = vld [vmem:[#allocation2 + $0x80] sm:$0xf] }
  0x9f   :  { %1865 = vmatmul.bf16.gmra.mxu0 %v1789_v18  ;;  %v1513_v51 = vld [vmem:[#allocation2 + $0x40] sm:$0xf]  ;;  %v1623_v58 = vrot.slane %v1622_v4, 4  ;;  %v2064_v18 = vpack.c.b16 %v2051_v59, %v2050_v11  ;;  %v1999_v30 = vrot.slane %v12185_v50, 5  ;;  %v9697_v39 = vrot.slane %v1926_v31, 9 }
  0xa0   :  { %v1630_v61 = vshrl.u32 %v1513_v51, 16  ;;  %v1633_v13 = vshll.u32 %v1513_v51, 16  ;;  %v1924_v57 = vld [vmem:[#allocation2 + $0x40] sm:$0xe]  ;;  %v12187_v51 = vld [vmem:[#allocation2 + $0x64] sm:$0x1]  ;;  %3017 = vmatpush.bf16.msra.mxu0 %v11155_v25 }
  0xa1   :  { %v1514_v3 = vld [vmem:[#allocation2 + $0x44] sm:$0x1]  ;;  %v1628_v19 = vsel %vm11695_vm9, %v1623_v58, %v1627_v46  ;;  %v9695_v40 = vrot.slane %v1924_v57, 9  ;;  %v1667_v0 = vshll.u32 %v12187_v51, 16  ;;  %v1519_v46 = vld [vmem:[#allocation2 + $0x68] sm:$0xf] }
  0xa2   :  { %v1632_v2 = vrot.slane %v1630_v61, 4  ;;  %v1635_v32 = vrot.slane %v1633_v13, 5  ;;  %v1639_v15 = vshll.u32 %v1514_v3, 16  ;;  %v1995_v42 = vrot.slane %v1514_v3, 5  ;;  %v11131_v28 = vld [vmem:[#allocation2 + $0x44] sm:$0xf0] }
  0xa3   :  { %2139 = vmatmul.bf16.gmra.mxu1 %v2063_v29  ;;  %v1778_v1 = vunpack.c.l.b16 %v1628_v19  ;;  %v1653_v13 = vshll.u32 %v12185_v50, 16  ;;  %v1672_v60 = vshrl.u32 %v1519_v46, 16  ;;  %v1675_v16 = vshll.u32 %v1519_v46, 16  ;;  %v9590_v19 = vld [vmem:[#allocation2 + $0x38] sm:$0xf] }
  0xa4   :  { %v1636_v12 = vor.u32 %v1635_v32, %v1632_v2  ;;  %v1641_v20 = vrot.slane %v1639_v15, 5  ;;  %v1650_v2 = vor.u32 %v1649_v24, %v1646_v48  ;;  %v1664_v32 = vor.u32 %v1663_v53, %v1660_v52  ;;  %v11099_v37 = vld [vmem:[#allocation2 + $0x3c] sm:$0xf0]  ;;  %v12215_v48 = vld [vmem:[#allocation2 + $0x74] sm:$0x1] }
  0xa5   :  { %v1655_v59 = vrot.slane %v1653_v13, 5  ;;  %v2000_v50 = vsel %vm11750_vm12, %v9696_v8, %v1999_v30  ;;  %v11100_v8 = vld [vmem:[#allocation2 + $0x5c] sm:$0xf0] }
  0xa6   :  { %v12165_v63 = vpop.f32.mrf.mxu0  ;;  %v998_v17 = vpop.f32.mrf.mxu1  ;;  %v1637_v54 = vrot.slane %v1636_v12, 4  ;;  %v1669_v12 = vrot.slane %v1667_v0, 5  ;;  %v1665_v58 = vrot.slane %v1664_v32, 4  ;;  %v2054_v0 = vunpack.c.l.b16 %v2000_v50 }
  0xa8   :  { %v1642_v9 = vsel %vm11695_vm9, %v1637_v54, %v1641_v20  ;;  %v9782_v20 = vld [vmem:[#allocation2 + $0x40] sm:$0xf] }
  0xa9   :  { %2334 = vmatmul.bf16.gmra.mxu2 %v9775_v27  ;;  %v1779_v22 = vunpack.c.l.b16 %v1642_v9  ;;  %v1992_v27 = vsel %vm11750_vm12, %v9694_v34, %v1991_v36  ;;  %v1670_v36 = vsel %vm11695_vm9, %v1665_v58, %v1669_v12 }
  0xaa   :  { %v2052_v61 = vunpack.c.l.b16 %v1992_v27  ;;  %v12213_v27 = vld [vmem:[#allocation2 + $0x6c] sm:$0x1] }
  0xab   :  { %1447 = vmatmul.bf16.gmra.mxu3 %v9583_v55  ;;  %v1996_v55 = vsel %vm11750_vm12, %v9695_v40, %v1995_v42  ;;  %v1791_v62 = vpack.c.b16 %v1779_v22, %v1778_v1  ;;  %v9783_v40 = vor.u32 %v11131_v28, %v9782_v20  ;;  %v1674_v42 = vrot.slane %v1672_v60, 4  ;;  %v11132_v20 = vld [vmem:[#allocation2 + $0x64] sm:$0xf0] }
  0xac   :  { %v2053_v3 = vunpack.c.l.b16 %v1996_v55  ;;  %v1781_v22 = vunpack.c.l.b16 %v1670_v36  ;;  %v1681_v53 = vshll.u32 %v12213_v27, 16  ;;  %v1927_v60 = vld [vmem:[#allocation2 + $0x68] sm:$0xe] }
  0xae   :  { %v12177_v29 = vpop.f32.mrf.mxu0  ;;  %v1000_v49 = vpop.f32.mrf.mxu1  ;;  %v2065_v5 = vpack.c.b16 %v2053_v3, %v2052_v61  ;;  %v1695_v61 = vshll.u32 %v12215_v48, 16  ;;  %v11146_v3 = vld [vmem:[%s14799_s1 + $0x1d0] sm:$0xff] }
  0xaf   :  { %1870 = vmatmul.bf16.gmra.mxu0 %v1790_v7  ;;  %v11147_v7 = vld [vmem:[%s14799_s1 + $0x1d8] sm:$0xff] }
  0xb0   :  { %2743 = vmatpush.bf16.msra.mxu3 %v11147_v7  ;;  %v1697_v46 = vrot.slane %v1695_v61, 5 }
  0xb3   :  { %2144 = vmatmul.bf16.gmra.mxu1 %v2064_v18  ;;  %v1259_v41 = vpop.f32.mrf.mxu2  ;;  %v1521_v18 = vld [vmem:[#allocation2 + $0x70] sm:$0xf] }
  0xb4   :  { %v1686_v57 = vshrl.u32 %v1521_v18, 16  ;;  %v1689_v35 = vshll.u32 %v1521_v18, 16  ;;  %2744 = vmatpush.bf16.msra.mxu3 %v11146_v3 }
  0xb5   :  { %v853_v47 = vpop.f32.mrf.mxu3 }
  0xb6   :  { %v999_v33 = vadd.f32 %v998_v17, %v853_v47  ;;  %v1651_v17 = vrot.slane %v1650_v2, 4  ;;  %v1691_v47 = vrot.slane %v1689_v35, 5  ;;  %v103_v2 = vld [vmem:[#allocation2 + $0x90] sm:$0x1] }
  0xb7   :  { %v104_v7 = vsel %vm11535_vm3, 0, %v103_v2 }
  0xb8   :  { %v12191_v23 = vadd.f32 %v1259_v41, %v999_v33  ;;  %v1656_v34 = vsel %vm11695_vm9, %v1651_v17, %v1655_v59  ;;  %v2003_v41 = vrot.slane %v12187_v51, 5  ;;  %v1523_v59 = vld [vmem:[#allocation2 + $0x78] sm:$0xf]  ;;  %v1683_v17 = vrot.slane %v1681_v53, 5  ;;  %105 = vst [vmem:[#allocation2 + $0x90] sm:$0x1] %v104_v7 }
  0xb9   :  { %2339 = vmatmul.bf16.gmra.mxu2 %v9779_v45  ;;  %v1688_v45 = vrot.slane %v1686_v57, 4  ;;  %v1780_v1 = vunpack.c.l.b16 %v1656_v34  ;;  %v1703_v57 = vshll.u32 %v1523_v59, 16  ;;  %v1714_v34 = vshrl.u32 %v1525_v26, 16 }
  0xba   :  { %v2004_v51 = vsel %vm11750_vm12, %v9697_v39, %v2003_v41 }
  0xbb   :  { %1452 = vmatmul.bf16.gmra.mxu3 %v9587_v43  ;;  %v1261_v11 = vpop.f32.mrf.mxu2  ;;  %v1677_v43 = vrot.slane %v1675_v16, 5  ;;  %v1692_v55 = vor.u32 %v1691_v47, %v1688_v45  ;;  %v1792_v13 = vpack.c.b16 %v1781_v22, %v1780_v1  ;;  %v1700_v16 = vshrl.u32 %v1523_v59, 16  ;;  %v165_v47 = vld [vmem:[#allocation2 + $0x94] sm:$0x1] }
  0xbc   :  { %v12198_v4 = vpop.f32.mrf.mxu0  ;;  %v2011_v1 = vrot.slane %v12215_v48, 5  ;;  %v1705_v50 = vrot.slane %v1703_v57, 5  ;;  %v1716_v53 = vrot.slane %v1714_v34, 4 }
  0xbd   :  { %v855_v6 = vpop.f32.mrf.mxu3  ;;  %v1678_v52 = vor.u32 %v1677_v43, %v1674_v42  ;;  %v1693_v58 = vrot.slane %v1692_v55, 4  ;;  %v2007_v42 = vrot.slane %v12213_v27, 5  ;;  %v1702_v22 = vrot.slane %v1700_v16, 4  ;;  %v12254_v27 = vld [vmem:[#allocation2 + $0x84] sm:$0x1] }
  0xbe   :  { %v1001_v15 = vadd.f32 %v1000_v49, %v855_v6  ;;  %v9591_v49 = vor.u32 %v11099_v37, %v9590_v19  ;;  %v186_v6 = vld [vmem:[%s14798_s0 + $0x78] sm:$0xff]  ;;  %v11154_v19 = vld [vmem:[%s14799_s1 + $0x210] sm:$0xff] }
  0xbf   :  { %1875 = vmatmul.bf16.gmra.mxu0 %v1791_v62  ;;  %v2055_v62 = vunpack.c.l.b16 %v2004_v51  ;;  %v202_v31 = vpack.c.bf16 %v186_v6, %v186_v6  ;;  %v9594_v37 = vld [vmem:[#allocation2 + $0x58] sm:$0xf]  ;;  %v1698_v41 = vsel %vm11695_vm9, %v1693_v58, %v1697_v46  ;;  %v456_v7 = vld [vmem:[#allocation2 + $0x90] sm:$0xf] }
  0xc0   :  { %v1003_v54 = vpop.f32.mrf.mxu1  ;;  %v12200_v21 = vadd.f32 %v1261_v11, %v1001_v15  ;;  %v9786_v15 = vld [vmem:[#allocation2 + $0x60] sm:$0xf]  ;;  %3018 = vmatpush.bf16.msra.mxu0 %v11154_v19  ;;  %v1783_v2 = vunpack.c.l.b16 %v1698_v41  ;;  %v9598_v41 = vld [vmem:[#allocation2 + $0x68] sm:$0xf] }
  0xc1   :  { %v2066_v25 = vpack.c.b16 %v2055_v62, %v2054_v0  ;;  %v9787_v30 = vor.u32 %v11132_v20, %v9786_v15  ;;  %v324_v45 = vshrl.u32 %v202_v31, 16  ;;  %v327_v51 = vshll.u32 %v202_v31, 16 }
  0xc2   :  { %v9595_v0 = vor.u32 %v11100_v8, %v9594_v37  ;;  %v166_v62 = vsel %vm11545_vm5, 0, %v165_v47  ;;  %v1929_v8 = vld [vmem:[#allocation2 + $0x78] sm:$0xe] }
  0xc3   :  { %2149 = vmatmul.bf16.gmra.mxu1 %v2065_v5  ;;  %v1679_v5 = vrot.slane %v1678_v52, 4  ;;  %v12252_v52 = vld [vmem:[#allocation2 + $0x7c] sm:$0x1]  ;;  %v326_v61 = vrot.slane %v324_v45, 7  ;;  %167 = vst [vmem:[#allocation2 + $0x94] sm:$0x1] %v166_v62 }
  0xc4   :  { %v12209_v9 = vpop.f32.mrf.mxu0  ;;  %v1527_v45 = vld [vmem:[#allocation2 + $0x88] sm:$0xf] }
  0xc5   :  { %v1684_v39 = vsel %vm11695_vm9, %v1679_v5, %v1683_v17  ;;  %v1706_v5 = vor.u32 %v1705_v50, %v1702_v22  ;;  %v1723_v17 = vshll.u32 %v12254_v27, 16  ;;  %v11153_v22 = vld [vmem:[%s14799_s1 + $0x208] sm:$0xff]  ;;  %v9700_v50 = vrot.slane %v1929_v8, 9 }
  0xc6   :  { %v1782_v3 = vunpack.c.l.b16 %v1684_v39  ;;  %3019 = vmatpush.bf16.msra.mxu0 %v11153_v22  ;;  %v11152_v22 = vld [vmem:[%s14799_s1 + $0x200] sm:$0xff] }
  0xc7   :  { %v1707_v57 = vrot.slane %v1706_v5, 4  ;;  %v1725_v34 = vrot.slane %v1723_v17, 5  ;;  %v1528_v17 = vld [vmem:[#allocation2 + $0x8c] sm:$0x1] }
  0xc8   :  { %v12217_v33 = vpop.f32.mrf.mxu1  ;;  %v1793_v46 = vpack.c.b16 %v1783_v2, %v1782_v3 }
  0xc9   :  { %2344 = vmatmul.bf16.gmra.mxu2 %v9783_v40  ;;  %v9698_v40 = vrot.slane %v1927_v60, 9 }
  0xca   :  { %v1264_v24 = vpop.f32.mrf.mxu2  ;;  %v459_v39 = vld [vmem:[#allocation2 + $0x94] sm:$0x1]  ;;  %3020 = vmatpush.bf16.msra.mxu0 %v11152_v22 }
  0xcb   :  { %1457 = vmatmul.bf16.gmra.mxu3 %v9591_v49  ;;  %v2008_v6 = vsel %vm11750_vm12, %v9698_v40, %v2007_v42  ;;  %v11101_v40 = vld [vmem:[#allocation2 + $0x6c] sm:$0xf0] }
  0xcc   :  { %v988_v32 = vpop.f32.mrf.mxu0 }
  0xcd   :  { %v12234_v11 = vadd.f32 %v988_v32, %v12165_v63  ;;  %v858_v12 = vpop.f32.mrf.mxu3  ;;  %v1928_v63 = vld [vmem:[#allocation2 + $0x70] sm:$0xe]  ;;  %v329_v32 = vor.u32 %v327_v51, %v326_v61  ;;  %v2015_v51 = vrot.slane %v12252_v52, 5 }
  0xce   :  { %v1004_v18 = vadd.f32 %v1003_v54, %v858_v12  ;;  %v1717_v54 = vshll.u32 %v1525_v26, 16  ;;  %v9699_v43 = vrot.slane %v1928_v63, 9  ;;  %v1709_v12 = vshll.u32 %v12252_v52, 16  ;;  %v106_v52 = vld [vmem:[#allocation2 + $0x98] sm:$0x1] }
  0xcf   :  { %1880 = vmatmul.bf16.gmra.mxu0 %v1792_v13  ;;  %v457_v58 = vsel %vm11612_vm8, %v329_v32, %v456_v7  ;;  %v330_v63 = vrot.slane %v326_v61, 4  ;;  %v9599_v32 = vor.u32 %v11101_v40, %v9598_v41  ;;  %v2016_v5 = vsel %vm11750_vm12, %v9700_v50, %v2015_v51  ;;  %v1931_v50 = vld [vmem:[#allocation2 + $0x88] sm:$0xe] }
  0xd0   :  { %v12236_v28 = vpop.f32.mrf.mxu1  ;;  %v12238_v35 = vadd.f32 %v1264_v24, %v1004_v18  ;;  %v1719_v55 = vrot.slane %v1717_v54, 5  ;;  %v2012_v59 = vsel %vm11750_vm12, %v9699_v43, %v2011_v1  ;;  %v2056_v18 = vunpack.c.l.b16 %v2008_v6  ;;  %458 = vst [vmem:[#allocation2 + $0x90] sm:$0xf] %v457_v58  ;;  %v9790_v43 = vld [vmem:[#allocation2 + $0x70] sm:$0xf] }
  0xd1   :  { %v2057_v20 = vunpack.c.l.b16 %v2012_v59  ;;  %v1711_v60 = vrot.slane %v1709_v12, 5  ;;  %v107_v58 = vsel %vm11535_vm3, 0, %v106_v52 }
  0xd2   :  { %v1266_v36 = vpop.f32.mrf.mxu2  ;;  %108 = vst [vmem:[#allocation2 + $0x98] sm:$0x1] %v107_v58 }
  0xd3   :  { %2154 = vmatmul.bf16.gmra.mxu1 %v2066_v25  ;;  %v11145_v25 = vld [vmem:[%s14799_s1 + $0x1c8] sm:$0xff]  ;;  %v2067_v37 = vpack.c.b16 %v2057_v20, %v2056_v18  ;;  %v1712_v1 = vsel %vm11695_vm9, %v1707_v57, %v1711_v60 }
  0xd4   :  { %v990_v49 = vpop.f32.mrf.mxu0  ;;  %2745 = vmatpush.bf16.msra.mxu3 %v11145_v25  ;;  %v1784_v59 = vunpack.c.l.b16 %v1712_v1 }
  0xd5   :  { %v12250_v24 = vadd.f32 %v990_v49, %v12177_v29  ;;  %v860_v13 = vpop.f32.mrf.mxu3  ;;  %v11133_v49 = vld [vmem:[#allocation2 + $0x74] sm:$0xf0] }
  0xd6   :  { %v1006_v48 = vadd.f32 %v12217_v33, %v860_v13  ;;  %v1720_v33 = vor.u32 %v1719_v55, %v1716_v53  ;;  %v2019_v55 = vrot.slane %v12254_v27, 5  ;;  %v1728_v13 = vshrl.u32 %v1527_v45, 16 }
  0xd7   :  { %v1529_v61 = vld [vmem:[#allocation2 + $0x90] sm:$0xf]  ;;  %v9791_v6 = vor.u32 %v11133_v49, %v9790_v43 }
  0xd8   :  { %v12259_v29 = vpop.f32.mrf.mxu1  ;;  %v12266_v15 = vadd.f32 %v1266_v36, %v1006_v48  ;;  %v1721_v19 = vrot.slane %v1720_v33, 4  ;;  %v1742_v62 = vshrl.u32 %v1529_v61, 16  ;;  %v1745_v48 = vshll.u32 %v1529_v61, 16  ;;  %v1932_v51 = vld [vmem:[#allocation2 + $0x90] sm:$0xe] }
  0xd9   :  { %2349 = vmatmul.bf16.gmra.mxu2 %v9787_v30  ;;  %v1930_v30 = vld [vmem:[#allocation2 + $0x80] sm:$0xe] }
  0xda   :  { %v9701_v53 = vrot.slane %v1930_v30, 9  ;;  %v1747_v20 = vrot.slane %v1745_v48, 5  ;;  %v9702_v48 = vrot.slane %v1931_v50, 9 }
  0xdb   :  { %1462 = vmatmul.bf16.gmra.mxu3 %v9595_v0  ;;  %v1731_v0 = vshll.u32 %v1527_v45, 16 }
  0xdc   :  { %v1269_v26 = vpop.f32.mrf.mxu2  ;;  %v993_v31 = vpop.f32.mrf.mxu0  ;;  %v2020_v33 = vsel %vm11750_vm12, %v9701_v53, %v2019_v55  ;;  %v11134_v53 = vld [vmem:[#allocation2 + $0x84] sm:$0xf0]  ;;  %v9602_v55 = vld [vmem:[#allocation2 + $0x78] sm:$0xf] }
  0xdd   :  { %v12275_v16 = vadd.f32 %v993_v31, %v12198_v4  ;;  %v460_v4 = vsel %vm11535_vm3, %v330_v63, %v459_v39  ;;  %v1733_v18 = vrot.slane %v1731_v0, 5  ;;  %v2058_v31 = vunpack.c.l.b16 %v2016_v5  ;;  %v11102_v0 = vld [vmem:[#allocation2 + $0x7c] sm:$0xf0] }
  0xde   :  { %v863_v54 = vpop.f32.mrf.mxu3  ;;  %461 = vst [vmem:[#allocation2 + $0x94] sm:$0x1] %v460_v4  ;;  %v2059_v60 = vunpack.c.l.b16 %v2020_v33  ;;  %v1737_v63 = vshll.u32 %v1528_v17, 16  ;;  %v9603_v5 = vor.u32 %v11102_v0, %v9602_v55 }
  0xdf   :  { %v1009_v36 = vadd.f32 %v12236_v28, %v863_v54  ;;  %1885 = vmatmul.bf16.gmra.mxu0 %v1793_v46  ;;  %v1726_v28 = vsel %vm11695_vm9, %v1721_v19, %v1725_v34  ;;  %v1730_v46 = vrot.slane %v1728_v13, 4 }
  0xe0   :  { %v1013_v42 = vpop.f32.mrf.mxu1  ;;  %v1785_v27 = vunpack.c.l.b16 %v1726_v28  ;;  %v2068_v41 = vpack.c.b16 %v2059_v60, %v2058_v31  ;;  %v1739_v40 = vrot.slane %v1737_v63, 5  ;;  %v2388_v63 = vld [vmem:[#allocation2 + $0x18] sm:$0xf] }
  0xe1   :  { %v12280_v47 = vadd.f32 %v1269_v26, %v1009_v36  ;;  %v1734_v19 = vor.u32 %v1733_v18, %v1730_v46  ;;  %v11144_v36 = vld [vmem:[%s14799_s1 + $0x1c0] sm:$0xff] }
  0xe2   :  { %v1794_v57 = vpack.c.b16 %v1785_v27, %v1784_v59  ;;  %2746 = vmatpush.bf16.msra.mxu3 %v11144_v36 }
  0xe3   :  { %2159 = vmatmul.bf16.gmra.mxu1 %v2067_v37  ;;  %v1735_v4 = vrot.slane %v1734_v19, 4  ;;  %v2804_v19 = vld [vmem:[#allocation2 + $0x10] sm:$0xe] }
  0xe4   :  { %v12291_v3 = vpop.f32.mrf.mxu2  ;;  %v995_v2 = vpop.f32.mrf.mxu0 }
  0xe5   :  { %v12294_v7 = vadd.f32 %v995_v2, %v12209_v9  ;;  %v1744_v9 = vrot.slane %v1742_v62, 4  ;;  %v1530_v26 = vld [vmem:[#allocation2 + $0x94] sm:$0x1]  ;;  %v2023_v2 = vrot.slane %v1528_v17, 5 }
  0xe6   :  { %v12296_v12 = vpop.f32.mrf.mxu3  ;;  %v1751_v54 = vshll.u32 %v1530_v26, 16 }
  0xe7   :  { %v1748_v34 = vor.u32 %v1747_v20, %v1744_v9  ;;  %v2024_v46 = vsel %vm11750_vm12, %v9702_v48, %v2023_v2 }
  0xe8   :  { %v12304_v25 = vpop.f32.mrf.mxu1  ;;  %v1753_v49 = vrot.slane %v1751_v54, 5  ;;  %v2060_v20 = vunpack.c.l.b16 %v2024_v46 }
  0xe9   :  { %2354 = vmatmul.bf16.gmra.mxu2 %v9791_v6  ;;  %v1749_v45 = vrot.slane %v1748_v34, 4  ;;  %v2027_v6 = vrot.slane %v1530_v26, 5  ;;  %v2386_v26 = vld [vmem:[#allocation2 + $0x10] sm:$0xf]  ;;  %v2805_v34 = vld [vmem:[#allocation2 + $0x18] sm:$0xe] }
  0xea   :  { %v2419_v36 = vshrl.u32 %v2386_v26, 16  ;;  %v9881_v22 = vrot.slane %v2805_v34, 9 }
  0xeb   :  { %1467 = vmatmul.bf16.gmra.mxu3 %v9599_v32  ;;  %v1754_v61 = vsel %vm11695_vm9, %v1749_v45, %v1753_v49  ;;  %v9703_v32 = vrot.slane %v1932_v51, 9  ;;  %v9880_v45 = vrot.slane %v2804_v19, 9 }
  0xec   :  { %v1274_v37 = vpop.f32.mrf.mxu2  ;;  %v1249_v8 = vpop.f32.mrf.mxu0  ;;  %v1787_v58 = vunpack.c.l.b16 %v1754_v61  ;;  %v11103_v61 = vld [vmem:[#allocation2 + $0x8c] sm:$0xf0] }
  0xed   :  { %v12310_v30 = vadd.f32 %v1249_v8, %v12234_v11  ;;  %v9794_v11 = vld [vmem:[#allocation2 + $0x80] sm:$0xf]  ;;  %v2028_v18 = vsel %vm11750_vm12, %v9703_v32, %v2027_v6 }
  0xee   :  { %v868_v39 = vpop.f32.mrf.mxu3  ;;  %v9795_v52 = vor.u32 %v11134_v53, %v9794_v11  ;;  %v11135_v11 = vld [vmem:[#allocation2 + $0x94] sm:$0xf0]  ;;  %v2421_v53 = vrot.slane %v2419_v36, 4 }
  0xef   :  { %v1014_v43 = vadd.f32 %v1013_v42, %v868_v39  ;;  %1890 = vmatmul.bf16.gmra.mxu0 %v1794_v57  ;;  %v1740_v42 = vsel %vm11695_vm9, %v1735_v4, %v1739_v40  ;;  %v2389_v40 = vld [vmem:[#allocation2 + $0x1c] sm:$0x1]  ;;  %v2436_v4 = vshll.u32 %v2388_v63, 16 }
  0xf0   :  { %v1018_v28 = vpop.f32.mrf.mxu1  ;;  %v1786_v33 = vunpack.c.l.b16 %v1740_v42  ;;  %v2858_v50 = vrot.slane %v2389_v40, 5  ;;  %v9606_v42 = vld [vmem:[#allocation2 + $0x88] sm:$0xf] }
  0xf1   :  { %v12312_v1 = vadd.f32 %v1274_v37, %v1014_v43  ;;  %v2422_v37 = vshll.u32 %v2386_v26, 16  ;;  %v2433_v43 = vshrl.u32 %v2388_v63, 16  ;;  %v2438_v0 = vrot.slane %v2436_v4, 5  ;;  %v2390_v63 = vld [vmem:[#allocation2 + $0x20] sm:$0xf] }
  0xf2   :  { %v1795_v9 = vpack.c.b16 %v1787_v58, %v1786_v33  ;;  %v2859_v32 = vsel %vm11750_vm12, %v9881_v22, %v2858_v50  ;;  %v9607_v33 = vor.u32 %v11103_v61, %v9606_v42  ;;  %v2391_v22 = vld [vmem:[#allocation2 + $0x24] sm:$0x1]  ;;  %v2393_v50 = vld [vmem:[#allocation2 + $0x2c] sm:$0x1] }
  0xf3   :  { %2164 = vmatmul.bf16.gmra.mxu1 %v2068_v41  ;;  %v2387_v41 = vld [vmem:[#allocation2 + $0x14] sm:$0x1]  ;;  %v2424_v55 = vrot.slane %v2422_v37, 5  ;;  %v2934_v26 = vunpack.c.l.b16 %v2859_v32  ;;  %v2392_v37 = vld [vmem:[#allocation2 + $0x28] sm:$0xf]  ;;  %v2862_v42 = vrot.slane %v2391_v22, 5 }
  0xf4   :  { %v12321_v13 = vpop.f32.mrf.mxu2  ;;  %v1251_v62 = vpop.f32.mrf.mxu0  ;;  %v2854_v49 = vrot.slane %v2387_v41, 5 }
  0xf5   :  { %v12324_v59 = vadd.f32 %v1251_v62, %v12250_v24  ;;  %v2061_v24 = vunpack.c.l.b16 %v2028_v18  ;;  %v2425_v46 = vor.u32 %v2424_v55, %v2421_v53  ;;  %v2428_v18 = vshll.u32 %v2387_v41, 16  ;;  %v2807_v41 = vld [vmem:[#allocation2 + $0x28] sm:$0xe] }
  0xf6   :  { %v12326_v27 = vpop.f32.mrf.mxu3  ;;  %v2855_v2 = vsel %vm11750_vm12, %v9880_v45, %v2854_v49  ;;  %v9883_v61 = vrot.slane %v2807_v41, 9 }
  0xf7   :  { %v2069_v39 = vpack.c.b16 %v2061_v24, %v2060_v20  ;;  %v2442_v20 = vshll.u32 %v2389_v40, 16  ;;  %v2933_v24 = vunpack.c.l.b16 %v2855_v2 }
  0xf8   :  { %v12332_v17 = vpop.f32.mrf.mxu1 }
  0xf9   :  { %2359 = vmatmul.bf16.gmra.mxu2 %v9795_v52  ;;  %v2444_v34 = vrot.slane %v2442_v20, 5 }
  0xfb   :  { %1472 = vmatmul.bf16.gmra.mxu3 %v9603_v5 }
  0xfc   :  { %v1279_v31 = vpop.f32.mrf.mxu2  ;;  %v1254_v60 = vpop.f32.mrf.mxu0 }
  0xfd   :  { %v12335_v57 = vadd.f32 %v1254_v60, %v12275_v16  ;;  %v9798_v16 = vld [vmem:[#allocation2 + $0x90] sm:$0xf]  ;;  %v2430_v60 = vrot.slane %v2428_v18, 5 }
  0xfe   :  { %v873_v54 = vpop.f32.mrf.mxu3  ;;  %v9799_v52 = vor.u32 %v11135_v11, %v9798_v16  ;;  %v2461_v16 = vshrl.u32 %v2392_v37, 16  ;;  %v2464_v11 = vshll.u32 %v2392_v37, 16  ;;  %v2394_v37 = vld [vmem:[#allocation2 + $0x30] sm:$0xf] }
  0xff   :  { %v1019_v8 = vadd.f32 %v1018_v28, %v873_v54  ;;  %1895 = vmatmul.bf16.gmra.mxu0 %v1795_v9  ;;  %v2435_v28 = vrot.slane %v2433_v43, 4  ;;  %v2806_v43 = vld [vmem:[#allocation2 + $0x20] sm:$0xe] }
 0x100   :  { %v1023_v58 = vpop.f32.mrf.mxu1  ;;  %v9882_v55 = vrot.slane %v2806_v43, 9 }
 0x101   :  { %v12337_v51 = vadd.f32 %v1279_v31, %v1019_v8  ;;  %v2439_v9 = vor.u32 %v2438_v0, %v2435_v28  ;;  %v2426_v31 = vrot.slane %v2425_v46, 4  ;;  %v2447_v8 = vshrl.u32 %v2390_v63, 16 }
 0x102   :  { %v2866_v28 = vrot.slane %v2393_v50, 5 }
 0x103   :  { %2169 = vmatmul.bf16.gmra.mxu1 %v2069_v39  ;;  %v2440_v19 = vrot.slane %v2439_v9, 4  ;;  %v2450_v39 = vshll.u32 %v2390_v63, 16  ;;  %v2431_v40 = vsel %vm11695_vm9, %v2426_v31, %v2430_v60  ;;  %v2863_v9 = vsel %vm11750_vm12, %v9882_v55, %v2862_v42 }
 0x104   :  { %v12339_v62 = vpop.f32.mrf.mxu2  ;;  %v1256_v48 = vpop.f32.mrf.mxu0  ;;  %v2659_v32 = vunpack.c.l.b16 %v2431_v40  ;;  %v2867_v20 = vsel %vm11750_vm12, %v9883_v61, %v2866_v28  ;;  %v2456_v31 = vshll.u32 %v2391_v22, 16  ;;  %v2470_v60 = vshll.u32 %v2393_v50, 16  ;;  %v2396_v40 = vld [vmem:[#allocation2 + $0x38] sm:$0xf]  ;;  %v2808_v61 = vld [vmem:[#allocation2 + $0x30] sm:$0xe] }
 0x105   :  { %v12346_v6 = vadd.f32 %v1256_v48, %v12294_v7  ;;  %v2949_v7 = vpack.c.b16 %v2934_v26, %v2933_v24  ;;  %v2445_v49 = vsel %vm11695_vm9, %v2440_v19, %v2444_v34  ;;  %v2449_v48 = vrot.slane %v2447_v8, 4  ;;  %v138_v8 = vld [vmem:[#allocation2 + $0x4c] sm:$0x1]  ;;  %v2809_v28 = vld [vmem:[#allocation2 + $0x38] sm:$0xe] }
 0x106   :  { %v12348_v5 = vpop.f32.mrf.mxu3  ;;  %v2452_v2 = vrot.slane %v2450_v39, 5  ;;  %v2935_v34 = vunpack.c.l.b16 %v2863_v9  ;;  %v139_v43 = vsel %vm11545_vm5, 0, %v138_v8  ;;  %v2458_v41 = vrot.slane %v2456_v31, 5 }
 0x107   :  { %140 = vst [vmem:[#allocation2 + $0x4c] sm:$0x1] %v139_v43  ;;  %v2475_v22 = vshrl.u32 %v2394_v37, 16  ;;  %v2478_v50 = vshll.u32 %v2394_v37, 16  ;;  %v2489_v55 = vshrl.u32 %v2396_v40, 16  ;;  %v2492_v42 = vshll.u32 %v2396_v40, 16 }
 0x108   :  { %v12356_v53 = vpop.f32.mrf.mxu1  ;;  %v2453_v24 = vor.u32 %v2452_v2, %v2449_v48 }
 0x109   :  { %2364 = vmatmul.bf16.gmra.mxu2 %v9799_v52  ;;  %v2660_v52 = vunpack.c.l.b16 %v2445_v49  ;;  %v2477_v9 = vrot.slane %v2475_v22, 4 }
 0x10a   :  { %v2454_v39 = vrot.slane %v2453_v24, 4  ;;  %v9884_v24 = vrot.slane %v2808_v61, 9 }
 0x10b   :  { %1477 = vmatmul.bf16.gmra.mxu3 %v9607_v33  ;;  %v2463_v33 = vrot.slane %v2461_v16, 4  ;;  %v2675_v63 = vpack.c.b16 %v2660_v52, %v2659_v32 }
 0x10c   :  { %v1284_v54 = vpop.f32.mrf.mxu2  ;;  %v12350_v36 = vpop.f32.mrf.mxu0  ;;  %v2459_v2 = vsel %vm11695_vm9, %v2454_v39, %v2458_v41 }
 0x10e   :  { %v878_v4 = vpop.f32.mrf.mxu3 }
 0x10f   :  { %v1024_v45 = vadd.f32 %v1023_v58, %v878_v4  ;;  %3021 = vmatmul.bf16.vlgmr.msra.gmra.mxu0 %v2949_v7  ;;  %v2466_v58 = vrot.slane %v2464_v11, 5  ;;  %v2936_v7 = vunpack.c.l.b16 %v2867_v20  ;;  %v2472_v4 = vrot.slane %v2470_v60, 5 }
 0x110   :  { %v2480_v20 = vrot.slane %v2478_v50, 5  ;;  %v9885_v60 = vrot.slane %v2809_v28, 9 }
 0x111   :  { %v12358_v0 = vadd.f32 %v1284_v54, %v1024_v45  ;;  %v2467_v19 = vor.u32 %v2466_v58, %v2463_v33  ;;  %v2135_v54 = vpop.f32.mrf.mxu1  ;;  %v2950_v49 = vpack.c.b16 %v2936_v7, %v2935_v34  ;;  %v2395_v33 = vld [vmem:[#allocation2 + $0x34] sm:$0x1]  ;;  %v2397_v58 = vld [vmem:[#allocation2 + $0x3c] sm:$0x1]  ;;  %v2491_v34 = vrot.slane %v2489_v55, 4 }
 0x112   :  { %v2870_v31 = vrot.slane %v2395_v33, 5  ;;  %v2494_v7 = vrot.slane %v2492_v42, 5  ;;  %v2498_v50 = vshll.u32 %v2397_v58, 16 }
 0x113   :  { %v2468_v45 = vrot.slane %v2467_v19, 4 }
 0x114   :  { %v12360_v46 = vpop.f32.mrf.mxu2  ;;  %v12362_v18 = vpop.f32.mrf.mxu0  ;;  %v2871_v40 = vsel %vm11750_vm12, %v9884_v24, %v2870_v31  ;;  %v2495_v22 = vor.u32 %v2494_v7, %v2491_v34  ;;  %v2400_v24 = vld [vmem:[#allocation2 + $0x48] sm:$0xf] }
 0x115   :  { %v2473_v52 = vsel %vm11695_vm9, %v2468_v45, %v2472_v4  ;;  %v2481_v4 = vor.u32 %v2480_v20, %v2477_v9  ;;  %v2937_v61 = vunpack.c.l.b16 %v2871_v40  ;;  %v2500_v9 = vrot.slane %v2498_v50, 5  ;;  %v2401_v40 = vld [vmem:[#allocation2 + $0x4c] sm:$0x1] }
 0x116   :  { %v12368_v26 = vpop.f32.mrf.mxu3  ;;  %v2662_v39 = vunpack.c.l.b16 %v2473_v52  ;;  %v2496_v52 = vrot.slane %v2495_v22, 4  ;;  %v2882_v50 = vrot.slane %v2401_v40, 5 }
 0x119   :  { %v12380_v37 = vpop.f32.mrf.mxu1 }
 0x11b   :  { %2747 = vmatmul.bf16.vlgmr.msra.gmra.mxu3 %v2675_v63  ;;  %v2874_v63 = vrot.slane %v2397_v58, 5  ;;  %v2501_v58 = vsel %vm11695_vm9, %v2496_v52, %v2500_v9 }
 0x11c   :  { %v2330_v16 = vpop.f32.mrf.mxu2  ;;  %v12372_v11 = vpop.f32.mrf.mxu0 }
 0x11d   :  { %v2875_v45 = vsel %vm11750_vm12, %v9885_v60, %v2874_v63  ;;  %v2810_v60 = vld [vmem:[#allocation2 + $0x40] sm:$0xe]  ;;  %v2811_v63 = vld [vmem:[#allocation2 + $0x48] sm:$0xe] }
 0x11e   :  { %v1443_v48 = vpop.f32.mrf.mxu3  ;;  %v2938_v28 = vunpack.c.l.b16 %v2875_v45  ;;  %v9886_v45 = vrot.slane %v2810_v60, 9  ;;  %v9887_v22 = vrot.slane %v2811_v63, 9 }
 0x11f   :  { %v1483_v32 = vadd.f32 %v1443_v48, %v12310_v30  ;;  %3026 = vmatmul.bf16.gmra.mxu0 %v2950_v49  ;;  %v2661_v30 = vunpack.c.l.b16 %v2459_v2  ;;  %v2482_v48 = vrot.slane %v2481_v4, 4  ;;  %v2399_v4 = vld [vmem:[#allocation2 + $0x44] sm:$0x1] }
 0x120   :  { %v2951_v20 = vpack.c.b16 %v2938_v28, %v2937_v61 }
 0x121   :  { %v1901_v19 = vadd.f32 %v12350_v36, %v1483_v32  ;;  %v2484_v36 = vshll.u32 %v2395_v33, 16  ;;  %v2676_v42 = vpack.c.b16 %v2662_v39, %v2661_v30  ;;  %v2140_v33 = vpop.f32.mrf.mxu1  ;;  %v2520_v30 = vshll.u32 %v2400_v24, 16 }
 0x123   :  { %v2175_v8 = vadd.f32 %v2135_v54, %v1901_v19  ;;  %v2486_v32 = vrot.slane %v2484_v36, 5  ;;  %v2878_v36 = vrot.slane %v2399_v4, 5 }
 0x124   :  { %v12382_v43 = vpop.f32.mrf.mxu2  ;;  %v12384_v41 = vpop.f32.mrf.mxu0 }
 0x125   :  { %v12390_v49 = vadd.f32 %v2330_v16, %v2175_v8  ;;  %v2398_v16 = vld [vmem:[#allocation2 + $0x40] sm:$0xf]  ;;  %v2517_v8 = vshrl.u32 %v2400_v24, 16 }
 0x126   :  { %v1445_v55 = vpop.f32.mrf.mxu3  ;;  %v2503_v34 = vshrl.u32 %v2398_v16, 16  ;;  %v2506_v7 = vshll.u32 %v2398_v16, 16 }
 0x127   :  { %v1484_v54 = vadd.f32 %v1445_v55, %v12324_v59  ;;  %v2487_v59 = vsel %vm11695_vm9, %v2482_v48, %v2486_v32  ;;  %v2519_v48 = vrot.slane %v2517_v8, 4  ;;  %v2522_v32 = vrot.slane %v2520_v30, 5  ;;  %v2402_v30 = vld [vmem:[#allocation2 + $0x60] sm:$0xf] }
 0x128   :  { %v2505_v61 = vrot.slane %v2503_v34, 4  ;;  %v2508_v28 = vrot.slane %v2506_v7, 5 }
 0x129   :  { %v12394_v2 = vadd.f32 %v12362_v18, %v1484_v54  ;;  %v2663_v54 = vunpack.c.l.b16 %v2487_v59  ;;  %v12412_v60 = vpop.f32.mrf.mxu1  ;;  %v2523_v63 = vor.u32 %v2522_v32, %v2519_v48 }
 0x12a   :  { %v2509_v59 = vor.u32 %v2508_v28, %v2505_v61  ;;  %v2812_v61 = vld [vmem:[#allocation2 + $0x60] sm:$0xe]  ;;  %v2813_v28 = vld [vmem:[#allocation2 + $0x68] sm:$0xe] }
 0x12b   :  { %2752 = vmatmul.bf16.gmra.mxu3 %v2676_v42  ;;  %v2664_v42 = vunpack.c.l.b16 %v2501_v58  ;;  %v2512_v58 = vshll.u32 %v2399_v4, 16  ;;  %v2531_v4 = vshrl.u32 %v2402_v30, 16 }
 0x12c   :  { %v12396_v31 = vpop.f32.mrf.mxu0  ;;  %v2335_v19 = vpop.f32.mrf.mxu2 }
 0x12e   :  { %v1448_v18 = vpop.f32.mrf.mxu3 }
 0x12f   :  { %v1485_v39 = vadd.f32 %v1448_v18, %v12335_v57  ;;  %3031 = vmatmul.bf16.gmra.mxu0 %v2951_v20  ;;  %v2879_v57 = vsel %vm11750_vm12, %v9886_v45, %v2878_v36  ;;  %v2883_v20 = vsel %vm11750_vm12, %v9887_v22, %v2882_v50  ;;  %v2514_v45 = vrot.slane %v2512_v58, 5  ;;  %v2404_v22 = vld [vmem:[#allocation2 + $0x68] sm:$0xf] }
 0x130   :  { %v2939_v34 = vunpack.c.l.b16 %v2879_v57  ;;  %v2940_v7 = vunpack.c.l.b16 %v2883_v20  ;;  %v2524_v36 = vrot.slane %v2523_v63, 4  ;;  %v2403_v57 = vld [vmem:[#allocation2 + $0x64] sm:$0x1]  ;;  %v2405_v20 = vld [vmem:[#allocation2 + $0x6c] sm:$0x1]  ;;  %v9888_v58 = vrot.slane %v2812_v61, 9 }
 0x131   :  { %v1903_v55 = vadd.f32 %v12372_v11, %v1485_v39  ;;  %v2677_v11 = vpack.c.b16 %v2664_v42, %v2663_v54  ;;  %v2534_v54 = vshll.u32 %v2402_v30, 16  ;;  %v2886_v63 = vrot.slane %v2403_v57, 5 }
 0x133   :  { %v2177_v52 = vadd.f32 %v2140_v33, %v1903_v55  ;;  %v2526_v33 = vshll.u32 %v2401_v40, 16  ;;  %v2952_v55 = vpack.c.b16 %v2940_v7, %v2939_v34  ;;  %v2548_v40 = vshll.u32 %v2404_v22, 16 }
 0x134   :  { %v12404_v9 = vpop.f32.mrf.mxu0  ;;  %v12415_v8 = vpop.f32.mrf.mxu2 }
 0x135   :  { %v12410_v16 = vadd.f32 %v2335_v19, %v2177_v52  ;;  %v2510_v19 = vrot.slane %v2509_v59, 4  ;;  %v2528_v50 = vrot.slane %v2526_v33, 5  ;;  %v2145_v59 = vpop.f32.mrf.mxu1  ;;  %v2890_v33 = vrot.slane %v2405_v20, 5 }
 0x136   :  { %v1450_v24 = vpop.f32.mrf.mxu3  ;;  %v2550_v30 = vrot.slane %v2548_v40, 5 }
 0x137   :  { %v1486_v18 = vadd.f32 %v1450_v24, %v12346_v6  ;;  %v2545_v6 = vshrl.u32 %v2404_v22, 16  ;;  %v2529_v52 = vsel %vm11695_vm9, %v2524_v36, %v2528_v50  ;;  %v2533_v24 = vrot.slane %v2531_v4, 4 }
 0x138   :  { %v2666_v22 = vunpack.c.l.b16 %v2529_v52  ;;  %v2887_v50 = vsel %vm11750_vm12, %v9888_v58, %v2886_v63 }
 0x139   :  { %v12418_v39 = vadd.f32 %v12384_v41, %v1486_v18  ;;  %v2515_v41 = vsel %vm11695_vm9, %v2510_v19, %v2514_v45  ;;  %v9889_v18 = vrot.slane %v2813_v28, 9  ;;  %v2547_v7 = vrot.slane %v2545_v6, 4 }
 0x13a   :  { %v2554_v28 = vshll.u32 %v2405_v20, 16 }
 0x13b   :  { %2757 = vmatmul.bf16.gmra.mxu3 %v2677_v11  ;;  %v2536_v11 = vrot.slane %v2534_v54, 5  ;;  %v2540_v54 = vshll.u32 %v2403_v57, 16  ;;  %v2551_v61 = vor.u32 %v2550_v30, %v2547_v7  ;;  %v2815_v7 = vld [vmem:[#allocation2 + $0x78] sm:$0xe] }
 0x13c   :  { %v12420_v42 = vpop.f32.mrf.mxu0  ;;  %v2340_v19 = vpop.f32.mrf.mxu2  ;;  %v2556_v58 = vrot.slane %v2554_v28, 5 }
 0x13d   :  { %v2537_v36 = vor.u32 %v2536_v11, %v2533_v24  ;;  %v2542_v11 = vrot.slane %v2540_v54, 5 }
 0x13e   :  { %v1453_v48 = vpop.f32.mrf.mxu3 }
 0x13f   :  { %v1487_v32 = vadd.f32 %v1453_v48, %v12191_v23  ;;  %3036 = vmatmul.bf16.gmra.mxu0 %v2952_v55  ;;  %v2665_v23 = vunpack.c.l.b16 %v2515_v41  ;;  %v2891_v55 = vsel %vm11750_vm12, %v9889_v18, %v2890_v33  ;;  %v2538_v52 = vrot.slane %v2537_v36, 4  ;;  %v2406_v18 = vld [vmem:[#allocation2 + $0x70] sm:$0xf]  ;;  %v2408_v33 = vld [vmem:[#allocation2 + $0x78] sm:$0xf] }
 0x140   :  { %v2942_v41 = vunpack.c.l.b16 %v2891_v55  ;;  %v2407_v36 = vld [vmem:[#allocation2 + $0x74] sm:$0x1] }
 0x141   :  { %v1905_v34 = vadd.f32 %v12396_v31, %v1487_v32  ;;  %v2678_v40 = vpack.c.b16 %v2666_v22, %v2665_v23  ;;  %v2941_v32 = vunpack.c.l.b16 %v2887_v50  ;;  %v2543_v20 = vsel %vm11695_vm9, %v2538_v52, %v2542_v11  ;;  %v2409_v50 = vld [vmem:[#allocation2 + $0x7c] sm:$0x1] }
 0x142   :  { %v2576_v23 = vshll.u32 %v2408_v33, 16  ;;  %v2894_v54 = vrot.slane %v2407_v36, 5  ;;  %v2898_v28 = vrot.slane %v2409_v50, 5 }
 0x143   :  { %v2179_v45 = vadd.f32 %v2145_v59, %v1905_v34  ;;  %v2552_v59 = vrot.slane %v2551_v61, 4  ;;  %v2953_v63 = vpack.c.b16 %v2942_v41, %v2941_v32  ;;  %v2814_v34 = vld [vmem:[#allocation2 + $0x70] sm:$0xe]  ;;  %v9891_v61 = vrot.slane %v2815_v7, 9 }
 0x144   :  { %v1878_v48 = vpop.f32.mrf.mxu0  ;;  %v9890_v55 = vrot.slane %v2814_v34, 9  ;;  %v2578_v11 = vrot.slane %v2576_v23, 5  ;;  %v2568_v34 = vshll.u32 %v2407_v36, 16  ;;  %v2410_v36 = vld [vmem:[#allocation2 + $0x80] sm:$0xf] }
 0x145   :  { %v12432_v4 = vadd.f32 %v2340_v19, %v2179_v45  ;;  %v2562_v19 = vshll.u32 %v2406_v18, 16  ;;  %v2573_v45 = vshrl.u32 %v2408_v33, 16  ;;  %v2590_v14 = vshll.u32 %v2410_v36, 16 }
 0x146   :  { %v1455_v31 = vpop.f32.mrf.mxu3 }
 0x147   :  { %v1488_v6 = vadd.f32 %v1455_v31, %v12200_v21  ;;  %v2557_v21 = vsel %vm11695_vm9, %v2552_v59, %v2556_v58  ;;  %v2564_v41 = vrot.slane %v2562_v19, 5  ;;  %v2575_v52 = vrot.slane %v2573_v45, 4 }
 0x148   :  { %v2899_v58 = vsel %vm11750_vm12, %v9891_v61, %v2898_v28 }
 0x149   :  { %v12436_v24 = vadd.f32 %v12404_v9, %v1488_v6  ;;  %v2559_v9 = vshrl.u32 %v2406_v18, 16  ;;  %v2667_v6 = vunpack.c.l.b16 %v2543_v20 }
 0x14b   :  { %2762 = vmatmul.bf16.gmra.mxu3 %v2678_v40  ;;  %v2668_v40 = vunpack.c.l.b16 %v2557_v21  ;;  %v2561_v32 = vrot.slane %v2559_v9, 4  ;;  %v2582_v21 = vshll.u32 %v2409_v50, 16  ;;  %v168_v9 = vld [vmem:[#allocation2 + $0x9c] sm:$0x1]  ;;  %v2816_v50 = vld [vmem:[#allocation2 + $0x80] sm:$0xe] }
 0x14c   :  { %v12438_v57 = vpop.f32.mrf.mxu0  ;;  %v169_v45 = vsel %vm11545_vm5, 0, %v168_v9  ;;  %v2592_v9 = vrot.slane %v2590_v14, 5 }
 0x14d   :  { %v2679_v18 = vpack.c.b16 %v2668_v40, %v2667_v6  ;;  %v2565_v33 = vor.u32 %v2564_v41, %v2561_v32  ;;  %170 = vst [vmem:[#allocation2 + $0x9c] sm:$0x1] %v169_v45  ;;  %v2817_v6 = vld [vmem:[#allocation2 + $0x88] sm:$0xe]  ;;  %v2587_v32 = vshrl.u32 %v2410_v36, 16 }
 0x14e   :  { %v1458_v30 = vpop.f32.mrf.mxu3 }
 0x14f   :  { %v1489_v22 = vadd.f32 %v1458_v30, %v12238_v35  ;;  %3041 = vmatmul.bf16.gmra.mxu0 %v2953_v63  ;;  %v2895_v35 = vsel %vm11750_vm12, %v9890_v55, %v2894_v54  ;;  %v2944_v30 = vunpack.c.l.b16 %v2899_v58  ;;  %v2566_v23 = vrot.slane %v2565_v33, 4 }
 0x150   :  { %v2943_v7 = vunpack.c.l.b16 %v2895_v35  ;;  %v2584_v54 = vrot.slane %v2582_v21, 5  ;;  %v2413_v35 = vld [vmem:[#allocation2 + $0x8c] sm:$0x1] }
 0x151   :  { %v12446_v31 = vadd.f32 %v12420_v42, %v1489_v22  ;;  %v2579_v42 = vor.u32 %v2578_v11, %v2575_v52  ;;  %v2570_v22 = vrot.slane %v2568_v34, 5  ;;  %v2411_v11 = vld [vmem:[#allocation2 + $0x84] sm:$0x1]  ;;  %v9893_v34 = vrot.slane %v2817_v6, 9 }
 0x152   :  { %v2954_v61 = vpack.c.b16 %v2944_v30, %v2943_v7  ;;  %v2902_v33 = vrot.slane %v2411_v11, 5  ;;  %v2589_v30 = vrot.slane %v2587_v32, 4 }
 0x153   :  { %v2580_v55 = vrot.slane %v2579_v42, 4  ;;  %v2906_v42 = vrot.slane %v2413_v35, 5 }
 0x154   :  { %v12448_v59 = vpop.f32.mrf.mxu0  ;;  %v2593_v36 = vor.u32 %v2592_v9, %v2589_v30  ;;  %v2415_v9 = vld [vmem:[#allocation2 + $0x94] sm:$0x1] }
 0x155   :  { %v2585_v52 = vsel %vm11695_vm9, %v2580_v55, %v2584_v54  ;;  %v2907_v55 = vsel %vm11750_vm12, %v9893_v34, %v2906_v42  ;;  %v2819_v34 = vld [vmem:[#allocation2 + $0x98] sm:$0xe] }
 0x156   :  { %v1460_v63 = vpop.f32.mrf.mxu3  ;;  %v2670_v7 = vunpack.c.l.b16 %v2585_v52 }
 0x157   :  { %v1490_v20 = vadd.f32 %v1460_v63, %v12266_v15  ;;  %v2412_v15 = vld [vmem:[#allocation2 + $0x88] sm:$0xf] }
 0x158   :  { %v2601_v58 = vshrl.u32 %v2412_v15, 16  ;;  %v2604_v63 = vshll.u32 %v2412_v15, 16 }
 0x159   :  { %v12455_v19 = vadd.f32 %v1878_v48, %v1490_v20  ;;  %v2571_v48 = vsel %vm11695_vm9, %v2566_v23, %v2570_v22 }
 0x15a   :  { %v2669_v21 = vunpack.c.l.b16 %v2571_v48  ;;  %v2606_v45 = vrot.slane %v2604_v63, 5  ;;  %v2594_v48 = vrot.slane %v2593_v36, 4  ;;  %v9895_v36 = vrot.slane %v2819_v34, 9 }
 0x15b   :  { %2767 = vmatmul.bf16.gmra.mxu3 %v2679_v18  ;;  %v9892_v18 = vrot.slane %v2816_v50, 9  ;;  %v2610_v50 = vshll.u32 %v2413_v35, 16 }
 0x15c   :  { %v12459_v28 = vpop.f32.mrf.mxu0 }
 0x15d   :  { %v2903_v22 = vsel %vm11750_vm12, %v9892_v18, %v2902_v33  ;;  %v2416_v18 = vld [vmem:[#allocation2 + $0x98] sm:$0xf]  ;;  %v2818_v33 = vld [vmem:[#allocation2 + $0x90] sm:$0xe] }
 0x15e   :  { %v1463_v40 = vpop.f32.mrf.mxu3  ;;  %v2945_v6 = vunpack.c.l.b16 %v2903_v22  ;;  %v2632_v22 = vshll.u32 %v2416_v18, 16 }
 0x15f   :  { %v1491_v41 = vadd.f32 %v1463_v40, %v12280_v47  ;;  %3046 = vmatmul.bf16.gmra.mxu0 %v2954_v61  ;;  %v2603_v47 = vrot.slane %v2601_v58, 4  ;;  %v2680_v61 = vpack.c.b16 %v2670_v7, %v2669_v21  ;;  %v2946_v40 = vunpack.c.l.b16 %v2907_v55  ;;  %v2414_v58 = vld [vmem:[#allocation2 + $0x90] sm:$0xf] }
 0x160   :  { %v2618_v7 = vshll.u32 %v2414_v58, 16  ;;  %v9894_v55 = vrot.slane %v2818_v33, 9 }
 0x161   :  { %v12467_v20 = vadd.f32 %v12438_v57, %v1491_v41  ;;  %v2596_v57 = vshll.u32 %v2411_v11, 16  ;;  %v2607_v15 = vor.u32 %v2606_v45, %v2603_v47  ;;  %v2612_v41 = vrot.slane %v2610_v50, 5  ;;  %v2417_v47 = vld [vmem:[#allocation2 + $0x9c] sm:$0x1] }
 0x162   :  { %v2955_v52 = vpack.c.b16 %v2946_v40, %v2945_v6  ;;  %v2615_v11 = vshrl.u32 %v2414_v58, 16  ;;  %v2629_v45 = vshrl.u32 %v2416_v18, 16 }
 0x163   :  { %v2598_v32 = vrot.slane %v2596_v57, 5  ;;  %v2608_v14 = vrot.slane %v2607_v15, 4  ;;  %v2914_v57 = vrot.slane %v2417_v47, 5 }
 0x164   :  { %v12469_v23 = vpop.f32.mrf.mxu0  ;;  %v2617_v40 = vrot.slane %v2615_v11, 4  ;;  %v2638_v11 = vshll.u32 %v2417_v47, 16 }
 0x165   :  { %v2599_v21 = vsel %vm11695_vm9, %v2594_v48, %v2598_v32  ;;  %v2613_v30 = vsel %vm11695_vm9, %v2608_v14, %v2612_v41  ;;  %v2620_v48 = vrot.slane %v2618_v7, 5  ;;  %v2631_v32 = vrot.slane %v2629_v45, 4 }
 0x166   :  { %v12475_v54 = vpop.f32.mrf.mxu3  ;;  %v2671_v50 = vunpack.c.l.b16 %v2599_v21  ;;  %v2672_v6 = vunpack.c.l.b16 %v2613_v30  ;;  %v2634_v14 = vrot.slane %v2632_v22, 5  ;;  %v2640_v10 = vrot.slane %v2638_v11, 5 }
 0x167   :  { %v2621_v34 = vor.u32 %v2620_v48, %v2617_v40 }
 0x168   :  { %v2681_v18 = vpack.c.b16 %v2672_v6, %v2671_v50  ;;  %v2635_v21 = vor.u32 %v2634_v14, %v2631_v32 }
 0x169   :  { %v2622_v30 = vrot.slane %v2621_v34, 4 }
 0x16a   :  { %v2636_v22 = vrot.slane %v2635_v21, 4 }
 0x16b   :  { %2772 = vmatmul.bf16.gmra.mxu3 %v2680_v61  ;;  %v2910_v61 = vrot.slane %v2415_v9, 5 }
 0x16c   :  { %v1891_v63 = vpop.f32.mrf.mxu0 }
 0x16d   :  { %v2911_v41 = vsel %vm11750_vm12, %v9894_v55, %v2910_v61 }
 0x16e   :  { %v1468_v42 = vpop.f32.mrf.mxu3  ;;  %v2947_v33 = vunpack.c.l.b16 %v2911_v41 }
 0x16f   :  { %v1493_v35 = vadd.f32 %v1468_v42, %v12312_v1  ;;  %3051 = vmatmul.bf16.gmra.mxu0 %v2955_v52  ;;  %v2915_v52 = vsel %vm11750_vm12, %v9895_v36, %v2914_v57  ;;  %v2624_v42 = vshll.u32 %v2415_v9, 16  ;;  %v2641_v57 = vsel %vm11695_vm9, %v2636_v22, %v2640_v10  ;;  %v2342_v22 = vpop.f32.mrf.mxu2 }
 0x170   :  { %v2674_v50 = vunpack.c.l.b16 %v2641_v57 }
 0x171   :  { %v12483_v15 = vadd.f32 %v12459_v28, %v1493_v35  ;;  %v2948_v28 = vunpack.c.l.b16 %v2915_v52  ;;  %v2626_v45 = vrot.slane %v2624_v42, 5 }
 0x173   :  { %v2956_v7 = vpack.c.b16 %v2948_v28, %v2947_v33  ;;  %v2627_v36 = vsel %vm11695_vm9, %v2622_v30, %v2626_v45  ;;  %v2176_v28 = vadd.f32 %v12380_v37, %v12394_v2  ;;  %v2178_v37 = vadd.f32 %v12412_v60, %v12418_v39 }
 0x174   :  { %v12485_v1 = vpop.f32.mrf.mxu0  ;;  %v2673_v47 = vunpack.c.l.b16 %v2627_v36 }
 0x175   :  { %v2371_v21 = vadd.f32 %v12382_v43, %v2176_v28  ;;  %v2373_v57 = vadd.f32 %v12415_v8, %v2178_v37 }
 0x176   :  { %v12491_v58 = vpop.f32.mrf.mxu3  ;;  %v2682_v48 = vpack.c.b16 %v2674_v50, %v2673_v47 }
 0x17b   :  { %2777 = vmatmul.bf16.gmra.mxu3 %v2681_v18 }
 0x17c   :  { %v1896_v35 = vpop.f32.mrf.mxu0 }
 0x17e   :  { %v1473_v55 = vpop.f32.mrf.mxu3 }
 0x17f   :  { %v1495_v61 = vadd.f32 %v1473_v55, %v12337_v51  ;;  %3056 = vmatmul.bf16.gmra.mxu0 %v2956_v7 }
 0x181   :  { %v12498_v9 = vadd.f32 %v1891_v63, %v1495_v61 }
 0x184   :  { %v12500_v6 = vpop.f32.mrf.mxu0 }
 0x186   :  { %v12502_v40 = vpop.f32.mrf.mxu3 }
 0x18b   :  { %2782 = vmatmul.bf16.gmra.mxu3 %v2682_v48  ;;  %v2345_v48 = vpop.f32.mrf.mxu2 }
 0x18c   :  { %v3022_v32 = vpop.f32.mrf.mxu0 }
 0x18e   :  { %v1478_v14 = vpop.f32.mrf.mxu3 }
 0x18f   :  { %v1497_v51 = vadd.f32 %v1478_v14, %v12358_v0  ;;  %v2147_v0 = vpop.f32.mrf.mxu1 }
 0x190   :  { %v2180_v39 = vadd.f32 %v2147_v0, %v12436_v24 }
 0x191   :  { %v12505_v41 = vadd.f32 %v1896_v35, %v1497_v51 }
 0x192   :  { %v2375_v8 = vadd.f32 %v2342_v22, %v2180_v39 }
 0x194   :  { %v3024_v52 = vpop.f32.mrf.mxu0 }
 0x196   :  { %v12507_v18 = vpop.f32.mrf.mxu3 }
 0x197   :  { %v2150_v61 = vpop.f32.mrf.mxu1 }
 0x19c   :  { %v3027_v10 = vpop.f32.mrf.mxu0 }
 0x19e   :  { %v2748_v63 = vpop.f32.mrf.mxu3 }
 0x19f   :  { %v2788_v33 = vadd.f32 %v2748_v63, %v12390_v49  ;;  %v2152_v51 = vpop.f32.mrf.mxu1  ;;  %v2347_v63 = vpop.f32.mrf.mxu2 }
 0x1a0   :  { %v2182_v0 = vadd.f32 %v2152_v51, %v12455_v19 }
 0x1a1   :  { %v12512_v34 = vadd.f32 %v3022_v32, %v2788_v33 }
 0x1a4   :  { %v3029_v42 = vpop.f32.mrf.mxu0 }
 0x1a6   :  { %v2750_v11 = vpop.f32.mrf.mxu3 }
 0x1a7   :  { %v2789_v7 = vadd.f32 %v2750_v11, %v2371_v21  ;;  %v2155_v21 = vpop.f32.mrf.mxu1 }
 0x1a9   :  { %v12515_v35 = vadd.f32 %v3024_v52, %v2789_v7  ;;  %v2181_v7 = vadd.f32 %v2150_v61, %v12446_v31  ;;  %v2377_v31 = vadd.f32 %v2347_v63, %v2182_v0 }
 0x1ab   :  { %v3078_v30 = vadd.f32 %v12515_v35, %v12512_v34 }
 0x1ac   :  { %v3032_v45 = vpop.f32.mrf.mxu0 }
 0x1ae   :  { %v2753_v55 = vpop.f32.mrf.mxu3 }
 0x1af   :  { %v2790_v49 = vadd.f32 %v2753_v55, %v12410_v16 }
 0x1b1   :  { %v12522_v2 = vadd.f32 %v3027_v10, %v2790_v49  ;;  %v2350_v49 = vpop.f32.mrf.mxu2 }
 0x1b3   :  { %v3079_v43 = vadd.f32 %v3078_v30, %v12522_v2 }
 0x1b4   :  { %v3034_v36 = vpop.f32.mrf.mxu0 }
 0x1b6   :  { %v2755_v47 = vpop.f32.mrf.mxu3 }
 0x1b7   :  { %v2791_v50 = vadd.f32 %v2755_v47, %v2373_v57  ;;  %v1011_v57 = vadd.f32 %v12259_v29, %v12296_v12 }
 0x1b9   :  { %v12526_v32 = vadd.f32 %v3029_v42, %v2791_v50  ;;  %v2352_v61 = vpop.f32.mrf.mxu2  ;;  %v1298_v50 = vadd.f32 %v12291_v3, %v1011_v57  ;;  %v1016_v3 = vadd.f32 %v12304_v25, %v12326_v27 }
 0x1bb   :  { %v3080_v14 = vadd.f32 %v3079_v43, %v12526_v32 }
 0x1bc   :  { %v3037_v52 = vpop.f32.mrf.mxu0 }
 0x1be   :  { %v2758_v16 = vpop.f32.mrf.mxu3 }
 0x1bf   :  { %v2792_v60 = vadd.f32 %v2758_v16, %v12432_v4  ;;  %v2376_v4 = vadd.f32 %v2345_v48, %v2181_v7  ;;  %v2183_v48 = vadd.f32 %v2155_v21, %v12467_v20  ;;  %v1492_v16 = vadd.f32 %v12475_v54, %v1298_v50 }
 0x1c0   :  { %v1300_v7 = vadd.f32 %v12321_v13, %v1016_v3  ;;  %v1021_v13 = vadd.f32 %v12332_v17, %v12348_v5 }
 0x1c1   :  { %v12531_v10 = vadd.f32 %v3032_v45, %v2792_v60  ;;  %v2157_v45 = vpop.f32.mrf.mxu1  ;;  %v2378_v39 = vadd.f32 %v2350_v49, %v2183_v48  ;;  %v1910_v29 = vadd.f32 %v12448_v59, %v1492_v16 }
 0x1c2   :  { %v1494_v49 = vadd.f32 %v12491_v58, %v1300_v7  ;;  %v1302_v50 = vadd.f32 %v12339_v62, %v1021_v13  ;;  %v1026_v62 = vadd.f32 %v12356_v53, %v12368_v26 }
 0x1c3   :  { %v3081_v33 = vadd.f32 %v3080_v14, %v12531_v10 }
 0x1c4   :  { %v3039_v42 = vpop.f32.mrf.mxu0  ;;  %v1912_v25 = vadd.f32 %v12469_v23, %v1494_v49  ;;  %v1496_v48 = vadd.f32 %v12502_v40, %v1302_v50 }
 0x1c6   :  { %v2760_v28 = vpop.f32.mrf.mxu3 }
 0x1c7   :  { %v2793_v11 = vadd.f32 %v2760_v28, %v2375_v8  ;;  %v2184_v8 = vadd.f32 %v2157_v45, %v1910_v29  ;;  %v1914_v29 = vadd.f32 %v12485_v1, %v1496_v48 }
 0x1c9   :  { %v12535_v30 = vadd.f32 %v3034_v36, %v2793_v11  ;;  %v2160_v51 = vpop.f32.mrf.mxu1  ;;  %v2379_v54 = vadd.f32 %v2352_v61, %v2184_v8 }
 0x1ca   :  { %v2185_v59 = vadd.f32 %v2160_v51, %v12483_v15 }
 0x1cb   :  { %v3082_v55 = vadd.f32 %v3081_v33, %v12535_v30  ;;  %v2355_v33 = vpop.f32.mrf.mxu2 }
 0x1cc   :  { %v3042_v22 = vpop.f32.mrf.mxu0  ;;  %v2380_v0 = vadd.f32 %v2355_v33, %v2185_v59 }
 0x1ce   :  { %v2763_v37 = vpop.f32.mrf.mxu3 }
 0x1cf   :  { %v2794_v24 = vadd.f32 %v2763_v37, %v2376_v4 }
 0x1d1   :  { %v12539_v43 = vadd.f32 %v3037_v52, %v2794_v24  ;;  %v2162_v21 = vpop.f32.mrf.mxu1 }
 0x1d3   :  { %v3083_v47 = vadd.f32 %v3082_v55, %v12539_v43  ;;  %v2357_v37 = vpop.f32.mrf.mxu2 }
 0x1d4   :  { %v3044_v60 = vpop.f32.mrf.mxu0 }
 0x1d6   :  { %v2765_v36 = vpop.f32.mrf.mxu3 }
 0x1d7   :  { %v2795_v14 = vadd.f32 %v2765_v36, %v2377_v31 }
 0x1d9   :  { %v12547_v19 = vadd.f32 %v3039_v42, %v2795_v14  ;;  %v2165_v45 = vpop.f32.mrf.mxu1 }
 0x1da   :  { %v2187_v23 = vadd.f32 %v2165_v45, %v12498_v9 }
 0x1db   :  { %v3084_v52 = vadd.f32 %v3083_v47, %v12547_v19  ;;  %v2186_v47 = vadd.f32 %v2162_v21, %v1912_v25  ;;  %v2360_v58 = vpop.f32.mrf.mxu2 }
 0x1dc   :  { %v3047_v42 = vpop.f32.mrf.mxu0 }
 0x1dd   :  { %v2381_v61 = vadd.f32 %v2357_v37, %v2186_v47 }
 0x1de   :  { %v2768_v12 = vpop.f32.mrf.mxu3 }
 0x1df   :  { %v2796_v63 = vadd.f32 %v2768_v12, %v2378_v39  ;;  %v2382_v39 = vadd.f32 %v2360_v58, %v2187_v23 }
 0x1e1   :  { %v12551_v28 = vadd.f32 %v3042_v22, %v2796_v63  ;;  %v2167_v16 = vpop.f32.mrf.mxu1 }
 0x1e2   :  { %v2188_v63 = vadd.f32 %v2167_v16, %v1914_v29 }
 0x1e3   :  { %v3085_v20 = vadd.f32 %v3084_v52, %v12551_v28  ;;  %v2362_v17 = vpop.f32.mrf.mxu2 }
 0x1e4   :  { %v3049_v57 = vpop.f32.mrf.mxu0 }
 0x1e6   :  { %v2770_v11 = vpop.f32.mrf.mxu3 }
 0x1e7   :  { %v2797_v55 = vadd.f32 %v2770_v11, %v2379_v54  ;;  %v1304_v54 = vadd.f32 %v12360_v46, %v1026_v62 }
 0x1e9   :  { %v12559_v4 = vadd.f32 %v3044_v60, %v2797_v55  ;;  %v2170_v8 = vpop.f32.mrf.mxu1  ;;  %v1498_v1 = vadd.f32 %v12507_v18, %v1304_v54 }
 0x1eb   :  { %v3086_v24 = vadd.f32 %v3085_v20, %v12559_v4  ;;  %v2383_v20 = vadd.f32 %v2362_v17, %v2188_v63  ;;  %v2365_v11 = vpop.f32.mrf.mxu2  ;;  %v1916_v49 = vadd.f32 %v12500_v6, %v1498_v1 }
 0x1ec   :  { %v3052_v52 = vpop.f32.mrf.mxu0 }
 0x1ee   :  { %v2773_v27 = vpop.f32.mrf.mxu3 }
 0x1ef   :  { %v2798_v22 = vadd.f32 %v2773_v27, %v2380_v0 }
 0x1f1   :  { %v12563_v31 = vadd.f32 %v3047_v42, %v2798_v22  ;;  %v2189_v42 = vadd.f32 %v2170_v8, %v12505_v41  ;;  %v2172_v37 = vpop.f32.mrf.mxu1 }
 0x1f2   :  { %v2190_v0 = vadd.f32 %v2172_v37, %v1916_v49 }
 0x1f3   :  { %v3087_v15 = vadd.f32 %v3086_v24, %v12563_v31  ;;  %v2384_v59 = vadd.f32 %v2365_v11, %v2189_v42  ;;  %v2367_v27 = vpop.f32.mrf.mxu2 }
 0x1f4   :  { %v3054_v9 = vpop.f32.mrf.mxu0  ;;  %v2385_v46 = vadd.f32 %v2367_v27, %v2190_v0 }
 0x1f6   :  { %v2775_v36 = vpop.f32.mrf.mxu3 }
 0x1f7   :  { %v2799_v14 = vadd.f32 %v2775_v36, %v2381_v61 }
 0x1f9   :  { %v3073_v51 = vadd.f32 %v3049_v57, %v2799_v14 }
 0x1fb   :  { %v3088_v60 = vadd.f32 %v3087_v15, %v3073_v51 }
 0x1fc   :  { %v3057_v53 = vpop.f32.mrf.mxu0 }
 0x1fe   :  { %v2778_v5 = vpop.f32.mrf.mxu3 }
 0x1ff   :  { %v2800_v12 = vadd.f32 %v2778_v5, %v2382_v39 }
 0x201   :  { %v3074_v33 = vadd.f32 %v3052_v52, %v2800_v12 }
 0x203   :  { %v3089_v3 = vadd.f32 %v3088_v60, %v3074_v33 }
 0x204   :  { %v3059_v47 = vpop.f32.mrf.mxu0 }
 0x206   :  { %v2780_v40 = vpop.f32.mrf.mxu3 }
 0x207   :  { %v2801_v21 = vadd.f32 %v2780_v40, %v2383_v20 }
 0x209   :  { %v3075_v7 = vadd.f32 %v3054_v9, %v2801_v21 }
 0x20b   :  { %v3090_v55 = vadd.f32 %v3089_v3, %v3075_v7 }
 0x20e   :  { %v2783_v26 = vpop.f32.mrf.mxu3 }
 0x20f   :  { %v2802_v24 = vadd.f32 %v2783_v26, %v2384_v59 }
 0x211   :  { %v3076_v25 = vadd.f32 %v3057_v53, %v2802_v24 }
 0x213   :  { %v3091_v45 = vadd.f32 %v3090_v55, %v3076_v25 }
 0x216   :  { %v2785_v22 = vpop.f32.mrf.mxu3 }
 0x217   :  { %v2803_v57 = vadd.f32 %v2785_v22, %v2385_v46 }
 0x219   :  { %v3077_v41 = vadd.f32 %v3059_v47, %v2803_v57 }
 0x21b   :  { %v3092_v13 = vadd.f32 %v3091_v45, %v3077_v41 }
 0x21d   :  { %v3093_v18 = vrot.slane %v3092_v13, 4 }
 0x21f   :  { %v3094_v15 = vadd.f32 %v3093_v18, %v3092_v13 }
 0x221   :  { %v3095_v58 = vrot.slane %v3094_v15, 2 }
 0x223   :  { %v3096_v61 = vadd.f32 %v3095_v58, %v3094_v15 }
 0x225   :  { %v3097_v36 = vrot.slane %v3096_v61, 1 }
 0x227   :  { %v3098_v6 = vadd.f32 %v3097_v36, %v3096_v61 }
 0x229   :  { %v3099_v50 = vmul.f32 0.0078125, %v3098_v6 }
 0x22b   :  { %v12579_v14 = vsub.f32 %v12512_v34, %v3099_v50  ;;  %v12582_v23 = vsub.f32 %v12515_v35, %v3099_v50  ;;  %v12585_v48 = vsub.f32 %v12522_v2, %v3099_v50  ;;  %v12588_v16 = vsub.f32 %v12526_v32, %v3099_v50 }
 0x22c   :  { %v12591_v52 = vsub.f32 %v12531_v10, %v3099_v50  ;;  %v12594_v60 = vsub.f32 %v12535_v30, %v3099_v50  ;;  %v12597_v39 = vsub.f32 %v12539_v43, %v3099_v50  ;;  %v12600_v34 = vsub.f32 %v12547_v19, %v3099_v50 }
 0x22d   :  { %v12603_v35 = vsub.f32 %v12551_v28, %v3099_v50  ;;  %v12606_v2 = vsub.f32 %v12559_v4, %v3099_v50  ;;  %v12609_v32 = vsub.f32 %v12563_v31, %v3099_v50  ;;  %v12611_v10 = vsub.f32 %v3073_v51, %v3099_v50 }
 0x22e   :  { %v12613_v29 = vsub.f32 %v3074_v33, %v3099_v50  ;;  %v12615_v30 = vsub.f32 %v3075_v7, %v3099_v50  ;;  %v12617_v43 = vsub.f32 %v3076_v25, %v3099_v50  ;;  %v12619_v17 = vsub.f32 %v3077_v41, %v3099_v50  ;;  %v3154_v50 = vld [vmem:[%s14800_s2] sm:$0x1] }
 0x22f   :  { %v3116_v19 = vmul.f32 %v12579_v14, %v12579_v14  ;;  %v3117_v28 = vmul.f32 %v12582_v23, %v12582_v23  ;;  %v3118_v4 = vmul.f32 %v12585_v48, %v12585_v48  ;;  %v3119_v51 = vmul.f32 %v12588_v16, %v12588_v16 }
 0x230   :  { %v3120_v12 = vmul.f32 %v12591_v52, %v12591_v52  ;;  %v3121_v33 = vmul.f32 %v12594_v60, %v12594_v60  ;;  %v3122_v8 = vmul.f32 %v12597_v39, %v12597_v39  ;;  %v3123_v9 = vmul.f32 %v12600_v34, %v12600_v34 }
 0x231   :  { %v3132_v31 = vadd.f32 %v3117_v28, %v3116_v19  ;;  %v3124_v40 = vmul.f32 %v12603_v35, %v12603_v35  ;;  %v3125_v21 = vmul.f32 %v12606_v2, %v12606_v2  ;;  %v3126_v42 = vmul.f32 %v12609_v32, %v12609_v32 }
 0x232   :  { %v3127_v7 = vmul.f32 %v12611_v10, %v12611_v10  ;;  %v3128_v59 = vmul.f32 %v12613_v29, %v12613_v29  ;;  %v3129_v37 = vmul.f32 %v12615_v30, %v12615_v30  ;;  %v3130_v26 = vmul.f32 %v12617_v43, %v12617_v43 }
 0x233   :  { %v3133_v5 = vadd.f32 %v3132_v31, %v3118_v4  ;;  %v3131_v0 = vmul.f32 %v12619_v17, %v12619_v17 }
 0x235   :  { %v3134_v63 = vadd.f32 %v3133_v5, %v3119_v51  ;;  %v11380_v5 = vld [vmem:[%s14801_s3] ss:$0 sm:$0xff] }
 0x237   :  { %v3135_v62 = vadd.f32 %v3134_v63, %v3120_v12 }
 0x239   :  { %v3136_v3 = vadd.f32 %v3135_v62, %v3121_v33 }
 0x23b   :  { %v3137_v20 = vadd.f32 %v3136_v3, %v3122_v8 }
 0x23d   :  { %v3138_v54 = vadd.f32 %v3137_v20, %v3123_v9 }
 0x23f   :  { %v3139_v11 = vadd.f32 %v3138_v54, %v3124_v40 }
 0x241   :  { %v3140_v1 = vadd.f32 %v3139_v11, %v3125_v21 }
 0x243   :  { %v3141_v55 = vadd.f32 %v3140_v1, %v3126_v42 }
 0x245   :  { %v3142_v49 = vadd.f32 %v3141_v55, %v3127_v7 }
 0x247   :  { %v3143_v53 = vadd.f32 %v3142_v49, %v3128_v59 }
 0x249   :  { %v3144_v24 = vadd.f32 %v3143_v53, %v3129_v37 }
 0x24b   :  { %v3145_v25 = vadd.f32 %v3144_v24, %v3130_v26 }
 0x24d   :  { %v3146_v27 = vadd.f32 %v3145_v25, %v3131_v0 }
 0x24f   :  { %v3147_v45 = vrot.slane %v3146_v27, 4 }
 0x251   :  { %v3148_v46 = vadd.f32 %v3147_v45, %v3146_v27 }
 0x253   :  { %v3149_v22 = vrot.slane %v3148_v46, 2 }
 0x255   :  { %v3150_v57 = vadd.f32 %v3149_v22, %v3148_v46 }
 0x257   :  { %v3151_v47 = vrot.slane %v3150_v57, 1 }
 0x259   :  { %v3152_v41 = vadd.f32 %v3151_v47, %v3150_v57 }
 0x25b   :  { %v3153_v13 = vmul.f32 0.0078125, %v3152_v41 }
 0x25d   :  { %v3155_v18 = vadd.f32 1e-05, %v3153_v13 }
 0x25f   :  { %11383 = vrsqrt.f32 %v3155_v18  ;;  %vm3162_vm14 = vweird.f32 %v3155_v18 }
 0x265   :  { %v11384_v15 = vpop.eup %11383 }
 0x266   :  { %v3157_v58 = vmul.f32 %v11384_v15, %v3155_v18  ;;  %vm3163_vm13 = vweird.f32 %v11384_v15 }
 0x267   :  { %vm3164_vm15 = vmor %vm3162_vm14, %vm3163_vm13 }
 0x268   :  { %v3158_v61 = vmul.f32 %v11384_v15, %v3157_v58 }
 0x26a   :  { %v3159_v36 = vmul.f32 0.5, %v3158_v61 }
 0x26c   :  { %v3160_v6 = vsub.f32 1.5, %v3159_v36 }
 0x26e   :  { %v3161_v19 = vmul.f32 %v11384_v15, %v3160_v6 }
 0x270   :  { %v3165_v28 = vsel %vm3164_vm15, %v11384_v15, %v3161_v19 }
 0x271   :  { %v3166_v4 = vmul.f32 %v3165_v28, %v3154_v50 }
 0x273   :  { %v3168_v31 = vperm.slane %v3166_v4, 0 }
 0x275   :  { %v3170_v51 = vmul.f32 %v3168_v31, %v12579_v14  ;;  %v3171_v12 = vmul.f32 %v3168_v31, %v12582_v23  ;;  %v3172_v63 = vmul.f32 %v3168_v31, %v12585_v48  ;;  %v3173_v33 = vmul.f32 %v3168_v31, %v12588_v16 }
 0x276   :  { %v3174_v62 = vmul.f32 %v3168_v31, %v12591_v52  ;;  %v3175_v3 = vmul.f32 %v3168_v31, %v12594_v60  ;;  %v3176_v20 = vmul.f32 %v3168_v31, %v12597_v39  ;;  %v3177_v14 = vmul.f32 %v3168_v31, %v12600_v34 }
 0x277   :  { %v3190_v8 = vadd.f32 %v11380_v5, %v3170_v51  ;;  %v3191_v9 = vadd.f32 %v11380_v5, %v3171_v12  ;;  %v3192_v40 = vadd.f32 %v11380_v5, %v3172_v63  ;;  %v3178_v54 = vmul.f32 %v3168_v31, %v12603_v35 }
 0x278   :  { %v3179_v21 = vmul.f32 %v3168_v31, %v12606_v2  ;;  %v3193_v23 = vadd.f32 %v11380_v5, %v3173_v33  ;;  %v3180_v48 = vmul.f32 %v3168_v31, %v12609_v32  ;;  %v3181_v16 = vmul.f32 %v3168_v31, %v12611_v10 }
 0x279   :  { %v3194_v11 = vadd.f32 %v11380_v5, %v3174_v62  ;;  %v3206_v52 = vmul.f32 0.1, %v3190_v8  ;;  %v3182_v42 = vmul.f32 %v3168_v31, %v12613_v29  ;;  %v3183_v60 = vmul.f32 %v3168_v31, %v12615_v30 }
 0x27a   :  { %v3195_v1 = vadd.f32 %v11380_v5, %v3175_v3  ;;  %v3207_v39 = vmul.f32 0.1, %v3191_v9  ;;  %v3184_v7 = vmul.f32 %v3168_v31, %v12617_v43  ;;  %v3185_v34 = vmul.f32 %v3168_v31, %v12619_v17 }
 0x27b   :  { %v3196_v35 = vadd.f32 %v11380_v5, %v3176_v20  ;;  %v3208_v55 = vmul.f32 0.1, %v3192_v40  ;;  %v3197_v2 = vadd.f32 %v11380_v5, %v3177_v14  ;;  %v3198_v59 = vadd.f32 %v11380_v5, %v3178_v54 }
 0x27c   :  { %v3199_v49 = vadd.f32 %v11380_v5, %v3179_v21  ;;  %v3209_v32 = vmul.f32 0.1, %v3193_v23  ;;  %v3200_v37 = vadd.f32 %v11380_v5, %v3180_v48  ;;  %v3201_v10 = vadd.f32 %v11380_v5, %v3181_v16 }
 0x27d   :  { %v3210_v53 = vmul.f32 0.1, %v3194_v11  ;;  %v3222_v26 = vmax.f32 %v3190_v8, %v3206_v52  ;;  %v3202_v24 = vadd.f32 %v11380_v5, %v3182_v42  ;;  %v3203_v29 = vadd.f32 %v11380_v5, %v3183_v60 }
 0x27e   :  { %v3211_v0 = vmul.f32 0.1, %v3195_v1  ;;  %v3223_v30 = vmax.f32 %v3191_v9, %v3207_v39  ;;  %v3204_v25 = vadd.f32 %v11380_v5, %v3184_v7  ;;  %v3205_v27 = vadd.f32 %v11380_v5, %v3185_v34 }
 0x27f   :  { %v3212_v45 = vmul.f32 0.1, %v3196_v35  ;;  %v3224_v43 = vmax.f32 %v3192_v40, %v3208_v55  ;;  %v3213_v46 = vmul.f32 0.1, %v3197_v2  ;;  %v3214_v17 = vmul.f32 0.1, %v3198_v59 }
 0x280   :  { %v3215_v22 = vmul.f32 0.1, %v3199_v49  ;;  %v3225_v57 = vmax.f32 %v3193_v23, %v3209_v32  ;;  %v3216_v47 = vmul.f32 0.1, %v3200_v37  ;;  %v3217_v41 = vmul.f32 0.1, %v3201_v10 }
 0x281   :  { %v3226_v13 = vmax.f32 %v3194_v11, %v3210_v53  ;;  %v3238_v18 = vpack.c.bf16 %v3222_v26, %v3222_v26  ;;  %v3218_v15 = vmul.f32 0.1, %v3202_v24  ;;  %v3219_v58 = vmul.f32 0.1, %v3203_v29  ;;  %v11175_v40 = vld [vmem:[%s14802_s4 + $0x38] sm:$0xff]  ;;  %v11174_v53 = vld [vmem:[%s14802_s4 + $0x30] sm:$0xff] }
 0x282   :  { %v3227_v61 = vmax.f32 %v3195_v1, %v3211_v0  ;;  %v3239_v36 = vpack.c.bf16 %v3223_v30, %v3223_v30  ;;  %v3220_v6 = vmul.f32 0.1, %v3204_v25  ;;  %v3221_v50 = vmul.f32 0.1, %v3205_v27  ;;  %4023 = vmatpush.bf16.msra.mxu2 %v11175_v40  ;;  %v11191_v26 = vld [vmem:[%s14802_s4 + $0xb8] sm:$0xff] }
 0x283   :  { %v3228_v19 = vmax.f32 %v3196_v35, %v3212_v45  ;;  %v3240_v28 = vpack.c.bf16 %v3224_v43, %v3224_v43  ;;  %v3229_v4 = vmax.f32 %v3197_v2, %v3213_v46  ;;  %v3230_v31 = vmax.f32 %v3198_v59, %v3214_v17  ;;  %v11183_v2 = vld [vmem:[%s14802_s4 + $0x78] sm:$0xff]  ;;  %v11182_v17 = vld [vmem:[%s14802_s4 + $0x70] sm:$0xff]  ;;  %4281 = vmatpush.bf16.msrb.mxu3 %v11191_v26 }
 0x284   :  { %v3231_v51 = vmax.f32 %v3199_v49, %v3215_v22  ;;  %v3241_v5 = vpack.c.bf16 %v3225_v57, %v3225_v57  ;;  %v3232_v12 = vmax.f32 %v3200_v37, %v3216_v47  ;;  %v3233_v63 = vmax.f32 %v3201_v10, %v3217_v41  ;;  %v11207_v59 = vld [vmem:[%s14802_s4 + $0xf8] sm:$0xff]  ;;  %3878 = vmatpush.bf16.msra.mxu1 %v11183_v2  ;;  %v11173_v22 = vld [vmem:[%s14802_s4 + $0x28] sm:$0xff]  ;;  %v11190_v57 = vld [vmem:[%s14802_s4 + $0xb0] sm:$0xff] }
 0x285   :  { %v12675_v33 = vpack.c.bf16 %v3226_v13, %v3226_v13  ;;  %v3255_v62 = vshrl.u32 %v3238_v18, 16  ;;  %v3234_v8 = vmax.f32 %v3202_v24, %v3218_v15  ;;  %v3235_v3 = vmax.f32 %v3203_v29, %v3219_v58  ;;  %4475 = vmatpush.bf16.msrb.mxu0 %v11207_v59 }
 0x286   :  { %v12677_v9 = vpack.c.bf16 %v3227_v61, %v3227_v61  ;;  %v3263_v20 = vshrl.u32 %v3239_v36, 16  ;;  %v3236_v14 = vmax.f32 %v3204_v25, %v3220_v6  ;;  %v3237_v54 = vmax.f32 %v3205_v27, %v3221_v50  ;;  %v11206_v25 = vld [vmem:[%s14802_s4 + $0xf0] sm:$0xff]  ;;  %4024 = vmatpush.bf16.msra.mxu2 %v11174_v53 }
 0x287   :  { %v12682_v21 = vpack.c.bf16 %v3228_v19, %v3228_v19  ;;  %v3271_v23 = vshrl.u32 %v3240_v28, 16  ;;  %v12684_v48 = vpack.c.bf16 %v3229_v4, %v3229_v4  ;;  %v12686_v16 = vpack.c.bf16 %v3230_v31, %v3230_v31  ;;  %v3416_v4 = vld [vmem:[#allocation2 + $0xc] sm:$0x1]  ;;  %4282 = vmatpush.bf16.msrb.mxu3 %v11190_v57 }
 0x288   :  { %v12688_v11 = vpack.c.bf16 %v3231_v51, %v3231_v51  ;;  %v3279_v52 = vshrl.u32 %v3241_v5, 16  ;;  %v12690_v42 = vpack.c.bf16 %v3232_v12, %v3232_v12  ;;  %v12692_v60 = vpack.c.bf16 %v3233_v63, %v3233_v63  ;;  %3879 = vmatpush.bf16.msra.mxu1 %v11182_v17  ;;  %v11205_v31 = vld [vmem:[%s14802_s4 + $0xe8] sm:$0xff]  ;;  %v3434_v17 = vld [vmem:[#allocation2 + $0x24] sm:$0x1] }
 0x289   :  { %v12694_v1 = vrot.slane %v3255_v62, 7  ;;  %v3287_v39 = vshrl.u32 %v12675_v33, 16  ;;  %v12697_v7 = vpack.c.bf16 %v3234_v8, %v3234_v8  ;;  %v12699_v34 = vpack.c.bf16 %v3235_v3, %v3235_v3  ;;  %4476 = vmatpush.bf16.msrb.mxu0 %v11206_v25  ;;  %v11172_v62 = vld [vmem:[%s14802_s4 + $0x20] sm:$0xff]  ;;  %v11189_v8 = vld [vmem:[%s14802_s4 + $0xa8] sm:$0xff] }
 0x28a   :  { %v12701_v35 = vrot.slane %v3263_v20, 7  ;;  %v3295_v55 = vshrl.u32 %v12677_v9, 16  ;;  %v12710_v49 = vpack.c.bf16 %v3236_v14, %v3236_v14  ;;  %v12712_v32 = vpack.c.bf16 %v3237_v54, %v3237_v54  ;;  %4025 = vmatpush.bf16.msra.mxu2 %v11173_v22  ;;  %v3419_v14 = vld [vmem:[#allocation2 + $0x10] sm:$0xf] }
 0x28b   :  { %v3258_v37 = vshll.u32 %v3238_v18, 16  ;;  %v12714_v10 = vrot.slane %v3271_v23, 7  ;;  %v3266_v24 = vshll.u32 %v3239_v36, 16  ;;  %v3274_v29 = vshll.u32 %v3240_v28, 16  ;;  %4283 = vmatpush.bf16.msrb.mxu3 %v11189_v8 }
 0x28c   :  { %v12722_v0 = vrot.slane %v3279_v52, 7  ;;  %v3303_v30 = vshrl.u32 %v12682_v21, 16  ;;  %v3282_v45 = vshll.u32 %v3241_v5, 16  ;;  %v12731_v43 = vrot.slane %v3287_v39, 7  ;;  %v3422_v52 = vld [vmem:[#allocation2 + $0x14] sm:$0x1] }
 0x28d   :  { %v12729_v27 = vor.u32 %v3258_v37, %v12694_v1  ;;  %v3290_v46 = vshll.u32 %v12675_v33, 16  ;;  %v3261_v47 = vrot.slane %v12694_v1, 4  ;;  %v12745_v41 = vor.u32 %v3266_v24, %v12701_v35  ;;  %v11181_v33 = vld [vmem:[%s14802_s4 + $0x68] sm:$0xff]  ;;  %4477 = vmatpush.bf16.msrb.mxu0 %v11205_v31  ;;  %v3428_v24 = vld [vmem:[#allocation2 + $0x1c] sm:$0x1] }
 0x28e   :  { %v3269_v13 = vrot.slane %v12701_v35, 4  ;;  %v12748_v18 = vrot.slane %v3295_v55, 7  ;;  %v12751_v15 = vor.u32 %v3274_v29, %v12714_v10  ;;  %v3277_v58 = vrot.slane %v12714_v10, 4  ;;  %v3425_v55 = vld [vmem:[#allocation2 + $0x18] sm:$0xf]  ;;  %3880 = vmatpush.bf16.msra.mxu1 %v11181_v33  ;;  %4026 = vmatpush.bf16.msra.mxu2 %v11172_v62 }
 0x28f   :  { %v3311_v61 = vshrl.u32 %v12684_v48, 16  ;;  %v3319_v36 = vshrl.u32 %v12686_v16, 16  ;;  %v12757_v6 = vor.u32 %v3282_v45, %v12722_v0  ;;  %v3285_v50 = vrot.slane %v12722_v0, 4  ;;  %v11389_v37 = vld [vmem:[#allocation2 + $0x8] sm:$0xf] }
 0x290   :  { %v3298_v19 = vshll.u32 %v12677_v9, 16  ;;  %v12761_v28 = vrot.slane %v3303_v30, 7  ;;  %v12767_v51 = vor.u32 %v3290_v46, %v12731_v43  ;;  %v3293_v5 = vrot.slane %v12731_v43, 4  ;;  %v3431_v29 = vld [vmem:[#allocation2 + $0x20] sm:$0xf] }
 0x291   :  { %v3306_v12 = vshll.u32 %v12682_v21, 16  ;;  %v3314_v63 = vshll.u32 %v12684_v48, 16  ;;  %v3301_v9 = vrot.slane %v12748_v18, 4  ;;  %v3322_v20 = vshll.u32 %v12686_v16, 16  ;;  %v3506_v33 = vld [vmem:[#allocation2 + $0x94] sm:$0x1] }
 0x292   :  { %v12782_v3 = vor.u32 %v3298_v19, %v12748_v18  ;;  %v3327_v40 = vshrl.u32 %v12688_v11, 16  ;;  %v12787_v54 = vrot.slane %v3311_v61, 7  ;;  %v12789_v21 = vrot.slane %v3319_v36, 7  ;;  %v3437_v61 = vld [vmem:[#allocation2 + $0x28] sm:$0xf] }
 0x293   :  { %v3335_v23 = vshrl.u32 %v12690_v42, 16  ;;  %v3375_v48 = vshrl.u32 %v12712_v32, 16  ;;  %v12794_v1 = vor.u32 %v3306_v12, %v12761_v28  ;;  %v3309_v39 = vrot.slane %v12761_v28, 4 }
 0x294   :  { %v3330_v35 = vshll.u32 %v12688_v11, 16  ;;  %v3343_v16 = vshrl.u32 %v12692_v60, 16  ;;  %v3351_v2 = vshrl.u32 %v12697_v7, 16  ;;  %v3359_v59 = vshrl.u32 %v12699_v34, 16 }
 0x295   :  { %v3414_v10 = vsel %vm11612_vm8, %v12729_v27, %v11389_v37  ;;  %v3417_v26 = vsel %vm11535_vm3, %v3261_v47, %v3416_v4  ;;  %v12806_v30 = vrot.slane %v3327_v40, 7  ;;  %v12808_v25 = vrot.slane %v3375_v48, 7  ;;  %v3440_v4 = vld [vmem:[#allocation2 + $0x2c] sm:$0x1] }
 0x296   :  { %v3420_v45 = vsel %vm11612_vm8, %v12745_v41, %v3419_v14  ;;  %v3423_v46 = vsel %vm11535_vm3, %v3269_v13, %v3422_v52  ;;  %3415 = vst [vmem:[#allocation2 + $0x8] sm:$0xf] %v3414_v10  ;;  %v12816_v27 = vor.u32 %v3314_v63, %v12787_v54  ;;  %v12818_v22 = vrot.slane %v3335_v23, 7  ;;  %v12838_v63 = vld [vmem:[#allocation2 + $0x30] sm:$0xf]  ;;  %v11180_v23 = vld [vmem:[%s14802_s4 + $0x60] sm:$0xff] }
 0x297   :  { %v3338_v57 = vshll.u32 %v12690_v42, 16  ;;  %v3426_v47 = vsel %vm11612_vm8, %v12751_v15, %v3425_v55  ;;  %3418 = vst [vmem:[#allocation2 + $0xc] sm:$0x1] %v3417_v26  ;;  %v3317_v41 = vrot.slane %v12787_v54, 4  ;;  %v3325_v36 = vrot.slane %v12789_v21, 4  ;;  %3881 = vmatpush.bf16.msra.mxu1 %v11180_v23 }
 0x298   :  { %v12826_v13 = vrot.slane %v3343_v16, 7  ;;  %v3429_v19 = vsel %vm11535_vm3, %v3277_v58, %v3428_v24  ;;  %3421 = vst [vmem:[#allocation2 + $0x10] sm:$0xf] %v3420_v45  ;;  %v12830_v31 = vrot.slane %v3351_v2, 7  ;;  %v12832_v42 = vrot.slane %v3359_v59, 7  ;;  %v11204_v58 = vld [vmem:[%s14802_s4 + $0xe0] sm:$0xff] }
 0x299   :  { %v3367_v12 = vshrl.u32 %v12710_v49, 16  ;;  %v3432_v15 = vsel %vm11612_vm8, %v12757_v6, %v3431_v29  ;;  %3424 = vst [vmem:[#allocation2 + $0x14] sm:$0x1] %v3423_v46  ;;  %v12844_v62 = vor.u32 %v3322_v20, %v12789_v21  ;;  %v3333_v8 = vrot.slane %v12806_v30, 4  ;;  %v3446_v14 = vld [vmem:[#allocation2 + $0x34] sm:$0x1]  ;;  %4478 = vmatpush.bf16.msrb.mxu0 %v11204_v58 }
 0x29a   :  { %v3381_v40 = vrot.slane %v12808_v25, 4  ;;  %v3435_v6 = vsel %vm11535_vm3, %v3285_v50, %v3434_v17  ;;  %3427 = vst [vmem:[#allocation2 + $0x18] sm:$0xf] %v3426_v47  ;;  %v11171_v20 = vld [vmem:[%s14802_s4 + $0x18] sm:$0xff]  ;;  %v3341_v48 = vrot.slane %v12818_v22, 4  ;;  %v3346_v52 = vshll.u32 %v12692_v60, 16 }
 0x29b   :  { %v3354_v16 = vshll.u32 %v12697_v7, 16  ;;  %v3438_v0 = vsel %vm11612_vm8, %v12767_v51, %v3437_v61  ;;  %v12864_v50 = vld [vmem:[#allocation2 + $0x38] sm:$0xf]  ;;  %v3452_v55 = vld [vmem:[#allocation2 + $0x3c] sm:$0x1]  ;;  %v11188_v59 = vld [vmem:[%s14802_s4 + $0xa0] sm:$0xff]  ;;  %v3441_v46 = vsel %vm11535_vm3, %v3293_v5, %v3440_v4  ;;  %v12898_v43 = vor.u32 %v3330_v35, %v12806_v30  ;;  %4027 = vmatpush.bf16.msra.mxu2 %v11171_v20 }
 0x29c   :  { %v12866_v2 = vld [vmem:[#allocation2 + $0x40] sm:$0xf]  ;;  %3430 = vst [vmem:[#allocation2 + $0x1c] sm:$0x1] %v3429_v19  ;;  %v3349_v37 = vrot.slane %v12826_v13, 4  ;;  %v3362_v60 = vshll.u32 %v12699_v34, 16  ;;  %v3444_v5 = vsel %vm11612_vm8, %v12782_v3, %v12838_v63  ;;  %v3507_v19 = vsel %vm11535_vm3, %v3381_v40, %v3506_v33  ;;  %4284 = vmatpush.bf16.msrb.mxu3 %v11188_v59 }
 0x29d   :  { %v3370_v7 = vshll.u32 %v12710_v49, 16  ;;  %v3378_v10 = vshll.u32 %v12712_v32, 16  ;;  %v3458_v26 = vld [vmem:[#allocation2 + $0x44] sm:$0x1]  ;;  %3433 = vst [vmem:[#allocation2 + $0x20] sm:$0xf] %v3432_v15  ;;  %v12909_v15 = vor.u32 %v3338_v57, %v12818_v22  ;;  %v12912_v11 = vor.u32 %v3346_v52, %v12826_v13 }
 0x29e   :  { %v11203_v51 = vld [vmem:[%s14802_s4 + $0xd8] sm:$0xff]  ;;  %v3357_v24 = vrot.slane %v12830_v31, 4  ;;  %v3365_v29 = vrot.slane %v12832_v42, 4  ;;  %v12880_v45 = vrot.slane %v3367_v12, 7  ;;  %3436 = vst [vmem:[#allocation2 + $0x24] sm:$0x1] %v3435_v6  ;;  %v3447_v3 = vsel %vm11535_vm3, %v3301_v9, %v3446_v14 }
 0x29f   :  { %v11179_v17 = vld [vmem:[%s14802_s4 + $0x58] sm:$0xff]  ;;  %v11170_v47 = vld [vmem:[%s14802_s4 + $0x10] sm:$0xff]  ;;  %3439 = vst [vmem:[#allocation2 + $0x28] sm:$0xf] %v3438_v0  ;;  %v12906_v4 = vld [vmem:[#allocation2 + $0x4] sm:$0x1]  ;;  %v12925_v57 = vor.u32 %v3354_v16, %v12830_v31  ;;  %v3450_v18 = vsel %vm11612_vm8, %v12794_v1, %v12864_v50  ;;  %v3453_v9 = vsel %vm11535_vm3, %v3309_v39, %v3452_v55  ;;  %v3456_v58 = vsel %vm11612_vm8, %v12816_v27, %v12866_v2 }
 0x2a0   :  { %v11187_v61 = vld [vmem:[%s14802_s4 + $0x98] sm:$0xff]  ;;  %v3509_v12 = vld [vmem:[#allocation2] sm:$0xf]  ;;  %3508 = vst [vmem:[#allocation2 + $0x94] sm:$0x1] %v3507_v19  ;;  %v11178_v6 = vld [vmem:[%s14802_s4 + $0x50] sm:$0xff]  ;;  %v3459_v39 = vsel %vm11535_vm3, %v3317_v41, %v3458_v26  ;;  %3882 = vmatpush.bf16.msra.mxu1 %v11179_v17  ;;  %4479 = vmatpush.bf16.msrb.mxu0 %v11203_v51  ;;  %v3380_v13 = vor.u32 %v3378_v10, %v12808_v25 }
 0x2a1   :  { %v12918_v35 = vld [vmem:[#allocation2 + $0x58] sm:$0xf]  ;;  %v12920_v63 = vld [vmem:[#allocation2 + $0xc] sm:$0x1]  ;;  %v12922_v33 = vld [vmem:[#allocation2] sm:$0xe]  ;;  %4028 = vmatpush.bf16.msra.mxu2 %v11170_v47  ;;  %4285 = vmatpush.bf16.msrb.mxu3 %v11187_v61 }
 0x2a2   :  { %v3464_v40 = vld [vmem:[#allocation2 + $0x5c] sm:$0x1]  ;;  %3442 = vst [vmem:[#allocation2 + $0x2c] sm:$0x1] %v3441_v46  ;;  %v11202_v1 = vld [vmem:[%s14802_s4 + $0xd0] sm:$0xff]  ;;  %v11169_v20 = vld [vmem:[%s14802_s4 + $0x8] sm:$0xff]  ;;  %v3462_v51 = vsel %vm11612_vm8, %v12844_v62, %v12918_v35 }
 0x2a3   :  { %v4073_v14 = vld [vmem:[#allocation2 + $0x8] sm:$0xe]  ;;  %v12949_v23 = vld [vmem:[#allocation2 + $0x60] sm:$0xf]  ;;  %v3470_v27 = vld [vmem:[#allocation2 + $0x64] sm:$0x1]  ;;  %v3465_v47 = vsel %vm11535_vm3, %v3325_v36, %v3464_v40 }
 0x2a4   :  { %v3510_v28 = vld [vmem:[#allocation2 + $0x8] sm:$0xf]  ;;  %3445 = vst [vmem:[#allocation2 + $0x30] sm:$0xf] %v3444_v5  ;;  %v11186_v52 = vld [vmem:[%s14802_s4 + $0x90] sm:$0xff]  ;;  %v3558_v16 = vshrl.u32 %v3509_v12, 16  ;;  %v3468_v62 = vsel %vm11612_vm8, %v12898_v43, %v12949_v23  ;;  %v3471_v35 = vsel %vm11535_vm3, %v3333_v8, %v3470_v27  ;;  %3883 = vmatpush.bf16.msra.mxu1 %v11178_v6  ;;  %4480 = vmatpush.bf16.msrb.mxu0 %v11202_v1 }
 0x2a5   :  { %v3561_v0 = vshll.u32 %v3509_v12, 16  ;;  %v3567_v50 = vshll.u32 %v12906_v4, 16  ;;  %3448 = vst [vmem:[#allocation2 + $0x34] sm:$0x1] %v3447_v3  ;;  %v10056_v54 = vrot.slane %v12922_v33, 9  ;;  %v4122_v41 = vrot.slane %v12906_v4, 5  ;;  %4029 = vmatpush.bf16.msra.mxu2 %v11169_v20  ;;  %4286 = vmatpush.bf16.msrb.mxu3 %v11186_v52 }
 0x2a6   :  { %v3572_v55 = vshrl.u32 %v3510_v28, 16  ;;  %v3575_v2 = vshll.u32 %v3510_v28, 16  ;;  %v12960_v59 = vld [vmem:[#allocation2 + $0x68] sm:$0xf]  ;;  %3451 = vst [vmem:[#allocation2 + $0x38] sm:$0xf] %v3450_v18  ;;  %v13006_v28 = vor.u32 %v3362_v60, %v12832_v42 }
 0x2a7   :  { %v10057_v26 = vrot.slane %v4073_v14, 9  ;;  %v4126_v46 = vrot.slane %v12920_v63, 5  ;;  %v3560_v5 = vrot.slane %v3558_v16, 4  ;;  %v3563_v19 = vrot.slane %v3561_v0, 5  ;;  %v3476_v17 = vld [vmem:[#allocation2 + $0x6c] sm:$0x1] }
 0x2a8   :  { %3454 = vst [vmem:[#allocation2 + $0x3c] sm:$0x1] %v3453_v9  ;;  %v3574_v4 = vrot.slane %v3572_v55, 4  ;;  %v3577_v12 = vrot.slane %v3575_v2, 5  ;;  %v3581_v3 = vshll.u32 %v12920_v63, 16  ;;  %v3373_v33 = vrot.slane %v12880_v45, 4 }
 0x2a9   :  { %v12973_v61 = vld [vmem:[#allocation2 + $0x70] sm:$0xf]  ;;  %3457 = vst [vmem:[#allocation2 + $0x40] sm:$0xf] %v3456_v58  ;;  %v3564_v18 = vor.u32 %v3563_v19, %v3560_v5  ;;  %v3569_v14 = vrot.slane %v3567_v50, 5  ;;  %v11177_v21 = vld [vmem:[%s14802_s4 + $0x48] sm:$0xff]  ;;  %v4123_v40 = vsel %vm11750_vm12, %v10056_v54, %v4122_v41  ;;  %v4127_v6 = vsel %vm11750_vm12, %v10057_v26, %v4126_v46 }
 0x2aa   :  { %v3482_v63 = vld [vmem:[#allocation2 + $0x74] sm:$0x1]  ;;  %3460 = vst [vmem:[#allocation2 + $0x44] sm:$0x1] %v3459_v39  ;;  %v11201_v36 = vld [vmem:[%s14802_s4 + $0xc8] sm:$0xff]  ;;  %v11168_v43 = vld [vmem:[%s14802_s4] sm:$0xff]  ;;  %v3578_v30 = vor.u32 %v3577_v12, %v3574_v4  ;;  %v3474_v39 = vsel %vm11612_vm8, %v12909_v15, %v12960_v59  ;;  %v13015_v16 = vor.u32 %v3370_v7, %v12880_v45  ;;  %v3477_v34 = vsel %vm11535_vm3, %v3341_v48, %v3476_v17 }
 0x2ab   :  { %v12992_v9 = vld [vmem:[#allocation2 + $0x78] sm:$0xf]  ;;  %3463 = vst [vmem:[#allocation2 + $0x58] sm:$0xf] %v3462_v51  ;;  %v11185_v8 = vld [vmem:[%s14802_s4 + $0x88] sm:$0xff]  ;;  %v3565_v1 = vrot.slane %v3564_v18, 4  ;;  %v3480_v60 = vsel %vm11612_vm8, %v12912_v11, %v12973_v61  ;;  %3884 = vmatpush.bf16.msra.mxu1 %v11177_v21  ;;  %4481 = vmatpush.bf16.msrb.mxu0 %v11201_v36  ;;  %v4201_v11 = vunpack.c.l.b16 %v4123_v40  ;;  %v4202_v54 = vunpack.c.l.b16 %v4127_v6 }
 0x2ac   :  { %v12997_v58 = vld [vmem:[#allocation2] sm:$0xf]  ;;  %v3488_v23 = vld [vmem:[#allocation2 + $0x7c] sm:$0x1]  ;;  %3466 = vst [vmem:[#allocation2 + $0x5c] sm:$0x1] %v3465_v47  ;;  %v3483_v59 = vsel %vm11535_vm3, %v3349_v37, %v3482_v63  ;;  %4030 = vmatpush.bf16.msra.mxu2 %v11168_v43  ;;  %4287 = vmatpush.bf16.msrb.mxu3 %v11185_v8  ;;  %v3486_v37 = vsel %vm11612_vm8, %v12925_v57, %v12992_v9 }
 0x2ad   :  { %v11160_v27 = vld [vmem:[#allocation2 + $0x4] sm:$0xf0]  ;;  %v3579_v20 = vrot.slane %v3578_v30, 4  ;;  %v3583_v52 = vrot.slane %v3581_v3, 5  ;;  %v3491_v15 = vld [vmem:[#allocation2 + $0x80] sm:$0xf]  ;;  %v3570_v22 = vsel %vm11695_vm9, %v3565_v1, %v3569_v14  ;;  %v3489_v61 = vsel %vm11535_vm3, %v3357_v24, %v3488_v23 }
 0x2ae   :  { %3469 = vst [vmem:[#allocation2 + $0x60] sm:$0xf] %v3468_v62  ;;  %v11176_v0 = vld [vmem:[%s14802_s4 + $0x40] sm:$0xff]  ;;  %v10138_v7 = vld [vmem:[#allocation2 + $0x8] sm:$0xf]  ;;  %v3798_v55 = vunpack.c.l.b16 %v3570_v22  ;;  %v9995_v46 = vor.u32 %v11160_v27, %v12997_v58  ;;  %v11215_v12 = vld [vmem:[%s14802_s4 + $0x138] sm:$0xff]  ;;  %v3492_v57 = vsel %vm11612_vm8, %v13006_v28, %v3491_v15  ;;  %v4217_v62 = vpack.c.b16 %v4202_v54, %v4201_v11 }
 0x2af   :  { %v11200_v49 = vld [vmem:[%s14802_s4 + $0xc0] sm:$0xff]  ;;  %3472 = vst [vmem:[#allocation2 + $0x64] sm:$0x1] %v3471_v35  ;;  %v11192_v50 = vld [vmem:[#allocation2 + $0xc] sm:$0xf0]  ;;  %v3584_v41 = vsel %vm11695_vm9, %v3579_v20, %v3583_v52  ;;  %3885 = vmatpush.bf16.msra.mxu1 %v11176_v0 }
 0x2b0   :  { %v3494_v48 = vld [vmem:[#allocation2 + $0x84] sm:$0x1]  ;;  %v3511_v2 = vld [vmem:[#allocation2 + $0x10] sm:$0xf]  ;;  %v3497_v26 = vld [vmem:[#allocation2 + $0x88] sm:$0xf]  ;;  %v3799_v19 = vunpack.c.l.b16 %v3584_v41  ;;  %v10139_v25 = vor.u32 %v11192_v50, %v10138_v7  ;;  %4482 = vmatpush.bf16.msrb.mxu0 %v11200_v49  ;;  %4031 = vmatmul.bf16.vlgmr.msra.gmra.mxu2 %v9995_v46 }
 0x2b1   :  { %3475 = vst [vmem:[#allocation2 + $0x68] sm:$0xf] %v3474_v39  ;;  %v11184_v5 = vld [vmem:[%s14802_s4 + $0x80] sm:$0xff]  ;;  %v3512_v51 = vld [vmem:[#allocation2 + $0x18] sm:$0xf]  ;;  %v3586_v17 = vshrl.u32 %v3511_v2, 16  ;;  %v3495_v31 = vsel %vm11535_vm3, %v3365_v29, %v3494_v48  ;;  %v3498_v43 = vsel %vm11612_vm8, %v13015_v16, %v3497_v26 }
 0x2b2   :  { %v3500_v4 = vld [vmem:[#allocation2 + $0x8c] sm:$0x1]  ;;  %3478 = vst [vmem:[#allocation2 + $0x6c] sm:$0x1] %v3477_v34  ;;  %v3589_v3 = vshll.u32 %v3511_v2, 16  ;;  %v3600_v47 = vshrl.u32 %v3512_v51, 16  ;;  %v3814_v10 = vpack.c.b16 %v3799_v19, %v3798_v55  ;;  %4288 = vmatpush.bf16.msrb.mxu3 %v11184_v5 }
 0x2b3   :  { %v3503_v32 = vld [vmem:[#allocation2 + $0x90] sm:$0xf]  ;;  %3481 = vst [vmem:[#allocation2 + $0x70] sm:$0xf] %v3480_v60  ;;  %v3543_v18 = vld [vmem:[#allocation2 + $0x14] sm:$0x1]  ;;  %4893 = vmatpush.bf16.msrb.mxu1 %v11215_v12  ;;  %v3501_v29 = vsel %vm11535_vm3, %v3373_v33, %v3500_v4  ;;  %4483 = vmatmul.bf16.vlgmr.msrb.gmra.mxu0 %v10139_v25 }
 0x2b4   :  { %v3588_v14 = vrot.slane %v3586_v17, 4  ;;  %3484 = vst [vmem:[#allocation2 + $0x74] sm:$0x1] %v3483_v59  ;;  %v3544_v35 = vld [vmem:[#allocation2 + $0x1c] sm:$0x1]  ;;  %v3591_v63 = vrot.slane %v3589_v3, 5  ;;  %3886 = vmatmul.bf16.vlgmr.msra.gmra.mxu1 %v3814_v10  ;;  %v3504_v40 = vsel %vm11612_vm8, %v3380_v13, %v3503_v32 }
 0x2b5   :  { %3487 = vst [vmem:[#allocation2 + $0x78] sm:$0xf] %v3486_v37  ;;  %v4074_v24 = vld [vmem:[#allocation2 + $0x10] sm:$0xe]  ;;  %v3602_v21 = vrot.slane %v3600_v47, 4  ;;  %v3603_v36 = vshll.u32 %v3512_v51, 16  ;;  %4289 = vmatmul.bf16.vlgmr.msrb.gmra.mxu3 %v4217_v62 }
 0x2b6   :  { %3490 = vst [vmem:[#allocation2 + $0x7c] sm:$0x1] %v3489_v61  ;;  %v4075_v30 = vld [vmem:[#allocation2 + $0x18] sm:$0xe]  ;;  %v3592_v9 = vor.u32 %v3591_v63, %v3588_v14  ;;  %v11214_v42 = vld [vmem:[%s14802_s4 + $0x130] sm:$0xff]  ;;  %v3595_v8 = vshll.u32 %v3543_v18, 16 }
 0x2b7   :  { %3493 = vst [vmem:[#allocation2 + $0x80] sm:$0xf] %v3492_v57  ;;  %v3605_v58 = vrot.slane %v3603_v36, 5  ;;  %v10058_v6 = vrot.slane %v4074_v24, 9  ;;  %v4130_v1 = vrot.slane %v3543_v18, 5  ;;  %v3609_v28 = vshll.u32 %v3544_v35, 16  ;;  %4894 = vmatpush.bf16.msrb.mxu1 %v11214_v42 }
 0x2b8   :  { %3496 = vst [vmem:[#allocation2 + $0x84] sm:$0x1] %v3495_v31  ;;  %v10059_v39 = vrot.slane %v4075_v30, 9  ;;  %v4134_v23 = vrot.slane %v3544_v35, 5  ;;  %v3593_v45 = vrot.slane %v3592_v9, 4  ;;  %v11213_v33 = vld [vmem:[%s14802_s4 + $0x128] sm:$0xff] }
 0x2b9   :  { %3499 = vst [vmem:[#allocation2 + $0x88] sm:$0xf] %v3498_v43  ;;  %v3606_v27 = vor.u32 %v3605_v58, %v3602_v21  ;;  %v3597_v20 = vrot.slane %v3595_v8, 5  ;;  %v3513_v16 = vld [vmem:[#allocation2 + $0x20] sm:$0xf]  ;;  %v3611_v34 = vrot.slane %v3609_v28, 5  ;;  %v4131_v15 = vsel %vm11750_vm12, %v10058_v6, %v4130_v1 }
 0x2ba   :  { %3502 = vst [vmem:[#allocation2 + $0x8c] sm:$0x1] %v3501_v29  ;;  %v3514_v60 = vld [vmem:[#allocation2 + $0x28] sm:$0xf]  ;;  %v4135_v0 = vsel %vm11750_vm12, %v10059_v39, %v4134_v23  ;;  %v3614_v22 = vshrl.u32 %v3513_v16, 16  ;;  %v3617_v48 = vshll.u32 %v3513_v16, 16  ;;  %v4203_v2 = vunpack.c.l.b16 %v4131_v15 }
 0x2bb   :  { %3505 = vst [vmem:[#allocation2 + $0x90] sm:$0xf] %v3504_v40  ;;  %v3607_v52 = vrot.slane %v3606_v27, 4  ;;  %v3598_v49 = vsel %vm11695_vm9, %v3593_v45, %v3597_v20  ;;  %v3628_v50 = vshrl.u32 %v3514_v60, 16  ;;  %4895 = vmatpush.bf16.msrb.mxu1 %v11213_v33  ;;  %v3631_v11 = vshll.u32 %v3514_v60, 16  ;;  %v11212_v62 = vld [vmem:[%s14802_s4 + $0x120] sm:$0xff] }
 0x2bc   :  { %v9998_v54 = vld [vmem:[#allocation2 + $0x10] sm:$0xf]  ;;  %v11161_v41 = vld [vmem:[#allocation2 + $0x14] sm:$0xf0]  ;;  %v4204_v59 = vunpack.c.l.b16 %v4135_v0  ;;  %v3800_v26 = vunpack.c.l.b16 %v3598_v49  ;;  %v11193_v5 = vld [vmem:[#allocation2 + $0x1c] sm:$0xf0] }
 0x2bd   :  { %v3612_v7 = vsel %vm11695_vm9, %v3607_v52, %v3611_v34  ;;  %v10142_v55 = vld [vmem:[#allocation2 + $0x18] sm:$0xf]  ;;  %v3616_v19 = vrot.slane %v3614_v22, 4  ;;  %v3619_v51 = vrot.slane %v3617_v48, 5  ;;  %v3630_v17 = vrot.slane %v3628_v50, 4 }
 0x2be   :  { %v3801_v46 = vunpack.c.l.b16 %v3612_v7  ;;  %v3633_v13 = vrot.slane %v3631_v11, 5  ;;  %v9999_v37 = vor.u32 %v11161_v41, %v9998_v54  ;;  %v10143_v4 = vor.u32 %v11193_v5, %v10142_v55  ;;  %v3545_v3 = vld [vmem:[#allocation2 + $0x24] sm:$0x1]  ;;  %v3546_v47 = vld [vmem:[#allocation2 + $0x2c] sm:$0x1] }
 0x2bf   :  { %v4218_v61 = vpack.c.b16 %v4204_v59, %v4203_v2  ;;  %v3620_v32 = vor.u32 %v3619_v51, %v3616_v19  ;;  %v4076_v10 = vld [vmem:[#allocation2 + $0x20] sm:$0xe]  ;;  %v4077_v18 = vld [vmem:[#allocation2 + $0x28] sm:$0xe]  ;;  %v3623_v14 = vshll.u32 %v3545_v3, 16  ;;  %v3637_v57 = vshll.u32 %v3546_v47, 16  ;;  %4896 = vmatpush.bf16.msrb.mxu1 %v11212_v62 }
 0x2c0   :  { %4036 = vmatmul.bf16.gmra.mxu2 %v9999_v37  ;;  %v3815_v12 = vpack.c.b16 %v3801_v46, %v3800_v26  ;;  %v3634_v25 = vor.u32 %v3633_v13, %v3630_v17  ;;  %v3515_v31 = vld [vmem:[#allocation2 + $0x30] sm:$0xf]  ;;  %v10060_v24 = vrot.slane %v4076_v10, 9  ;;  %v4138_v21 = vrot.slane %v3545_v3, 5  ;;  %v3516_v30 = vld [vmem:[#allocation2 + $0x38] sm:$0xf] }
 0x2c1   :  { %v3621_v35 = vrot.slane %v3620_v32, 4  ;;  %v10061_v36 = vrot.slane %v4077_v18, 9  ;;  %v4142_v43 = vrot.slane %v3546_v47, 5  ;;  %v3625_v9 = vrot.slane %v3623_v14, 5  ;;  %v10002_v23 = vld [vmem:[#allocation2 + $0x20] sm:$0xf] }
 0x2c2   :  { %v3635_v63 = vrot.slane %v3634_v25, 4  ;;  %v3639_v42 = vrot.slane %v3637_v57, 5  ;;  %v3642_v29 = vshrl.u32 %v3515_v31, 16  ;;  %v3645_v8 = vshll.u32 %v3515_v31, 16  ;;  %v11162_v45 = vld [vmem:[#allocation2 + $0x24] sm:$0xf0] }
 0x2c3   :  { %4488 = vmatmul.bf16.gmra.mxu0 %v10143_v4  ;;  %v3626_v58 = vsel %vm11695_vm9, %v3621_v35, %v3625_v9  ;;  %v3656_v6 = vshrl.u32 %v3516_v30, 16  ;;  %v3659_v1 = vshll.u32 %v3516_v30, 16  ;;  %v4139_v28 = vsel %vm11750_vm12, %v10060_v24, %v4138_v21  ;;  %v10146_v16 = vld [vmem:[#allocation2 + $0x28] sm:$0xf]  ;;  %v11194_v34 = vld [vmem:[#allocation2 + $0x2c] sm:$0xf0] }
 0x2c4   :  { %3891 = vmatmul.bf16.gmra.mxu1 %v3815_v12  ;;  %v3640_v40 = vsel %vm11695_vm9, %v3635_v63, %v3639_v42  ;;  %v4143_v39 = vsel %vm11750_vm12, %v10061_v36, %v4142_v43  ;;  %v3802_v27 = vunpack.c.l.b16 %v3626_v58  ;;  %v3644_v20 = vrot.slane %v3642_v29, 4  ;;  %v3547_v22 = vld [vmem:[#allocation2 + $0x34] sm:$0x1]  ;;  %v3548_v11 = vld [vmem:[#allocation2 + $0x3c] sm:$0x1] }
 0x2c5   :  { %4294 = vmatmul.bf16.gmra.mxu3 %v4218_v61  ;;  %v3803_v33 = vunpack.c.l.b16 %v3640_v40  ;;  %v3647_v52 = vrot.slane %v3645_v8, 5  ;;  %v4205_v60 = vunpack.c.l.b16 %v4139_v28  ;;  %v4206_v15 = vunpack.c.l.b16 %v4143_v39  ;;  %v4078_v54 = vld [vmem:[#allocation2 + $0x30] sm:$0xe]  ;;  %v4079_v2 = vld [vmem:[#allocation2 + $0x38] sm:$0xe] }
 0x2c6   :  { %v3658_v0 = vrot.slane %v3656_v6, 4  ;;  %v3661_v49 = vrot.slane %v3659_v1, 5  ;;  %v10003_v7 = vor.u32 %v11162_v45, %v10002_v23  ;;  %v10147_v48 = vor.u32 %v11194_v34, %v10146_v16  ;;  %v11211_v19 = vld [vmem:[%s14802_s4 + $0x118] sm:$0xff]  ;;  %v3517_v12 = vld [vmem:[#allocation2 + $0x50] sm:$0xf] }
 0x2c7   :  { %v3816_v50 = vpack.c.b16 %v3803_v33, %v3802_v27  ;;  %v3648_v41 = vor.u32 %v3647_v52, %v3644_v20  ;;  %v4219_v55 = vpack.c.b16 %v4206_v15, %v4205_v60  ;;  %v3651_v26 = vshll.u32 %v3547_v22, 16  ;;  %4897 = vmatpush.bf16.msrb.mxu1 %v11211_v19  ;;  %v3518_v47 = vld [vmem:[#allocation2 + $0x58] sm:$0xf]  ;;  %v10006_v63 = vld [vmem:[#allocation2 + $0x30] sm:$0xf] }
 0x2c8   :  { %v3662_v59 = vor.u32 %v3661_v49, %v3658_v0  ;;  %v10062_v46 = vrot.slane %v4078_v54, 9  ;;  %v3665_v5 = vshll.u32 %v3548_v11, 16  ;;  %v4146_v51 = vrot.slane %v3547_v22, 5  ;;  %v11163_v31 = vld [vmem:[#allocation2 + $0x34] sm:$0xf0]  ;;  %v11210_v34 = vld [vmem:[%s14802_s4 + $0x110] sm:$0xff] }
 0x2c9   :  { %v10063_v17 = vrot.slane %v4079_v2, 9  ;;  %v4150_v13 = vrot.slane %v3548_v11, 5  ;;  %v3649_v37 = vrot.slane %v3648_v41, 4  ;;  %v3653_v3 = vrot.slane %v3651_v26, 5  ;;  %v10150_v24 = vld [vmem:[#allocation2 + $0x38] sm:$0xf] }
 0x2ca   :  { %v3663_v4 = vrot.slane %v3662_v59, 4  ;;  %v3667_v61 = vrot.slane %v3665_v5, 5  ;;  %v4147_v32 = vsel %vm11750_vm12, %v10062_v46, %v4146_v51  ;;  %v3670_v18 = vshrl.u32 %v3517_v12, 16  ;;  %v11195_v9 = vld [vmem:[#allocation2 + $0x3c] sm:$0xf0] }
 0x2cb   :  { %v4151_v25 = vsel %vm11750_vm12, %v10063_v17, %v4150_v13  ;;  %v3654_v10 = vsel %vm11695_vm9, %v3649_v37, %v3653_v3  ;;  %v3673_v57 = vshll.u32 %v3517_v12, 16  ;;  %v3684_v62 = vshrl.u32 %v3518_v47, 16  ;;  %v3549_v28 = vld [vmem:[#allocation2 + $0x54] sm:$0x1]  ;;  %v3550_v39 = vld [vmem:[#allocation2 + $0x5c] sm:$0x1]  ;;  %4898 = vmatpush.bf16.msrb.mxu1 %v11210_v34 }
 0x2cc   :  { %v3668_v14 = vsel %vm11695_vm9, %v3663_v4, %v3667_v61  ;;  %v3687_v35 = vshll.u32 %v3518_v47, 16  ;;  %v4207_v21 = vunpack.c.l.b16 %v4147_v32  ;;  %v4208_v36 = vunpack.c.l.b16 %v4151_v25  ;;  %v4080_v20 = vld [vmem:[#allocation2 + $0x50] sm:$0xe]  ;;  %v4081_v52 = vld [vmem:[#allocation2 + $0x58] sm:$0xe] }
 0x2cd   :  { %v3804_v43 = vunpack.c.l.b16 %v3654_v10  ;;  %v3805_v30 = vunpack.c.l.b16 %v3668_v14  ;;  %v3672_v42 = vrot.slane %v3670_v18, 4  ;;  %v3675_v29 = vrot.slane %v3673_v57, 5  ;;  %v3519_v49 = vld [vmem:[#allocation2 + $0x60] sm:$0xf]  ;;  %v3520_v11 = vld [vmem:[#allocation2 + $0x68] sm:$0xf] }
 0x2ce   :  { %v3686_v8 = vrot.slane %v3684_v62, 4  ;;  %v3689_v58 = vrot.slane %v3687_v35, 5  ;;  %v10007_v40 = vor.u32 %v11163_v31, %v10006_v63  ;;  %v10151_v6 = vor.u32 %v11195_v9, %v10150_v24  ;;  %v10010_v51 = vld [vmem:[#allocation2 + $0x50] sm:$0xf]  ;;  %v11164_v17 = vld [vmem:[#allocation2 + $0x54] sm:$0xf0] }
 0x2cf   :  { %v3817_v1 = vpack.c.b16 %v3805_v30, %v3804_v43  ;;  %v4220_v23 = vpack.c.b16 %v4208_v36, %v4207_v21  ;;  %v3676_v45 = vor.u32 %v3675_v29, %v3672_v42  ;;  %v3679_v27 = vshll.u32 %v3549_v28, 16  ;;  %v10154_v3 = vld [vmem:[#allocation2 + $0x58] sm:$0xf]  ;;  %v11196_v47 = vld [vmem:[#allocation2 + $0x5c] sm:$0xf0] }
 0x2d0   :  { %4041 = vmatmul.bf16.gmra.mxu2 %v10003_v7  ;;  %v3690_v33 = vor.u32 %v3689_v58, %v3686_v8  ;;  %v3693_v16 = vshll.u32 %v3550_v39, 16  ;;  %v10064_v7 = vrot.slane %v4080_v20, 9  ;;  %v4154_v22 = vrot.slane %v3549_v28, 5  ;;  %v3551_v14 = vld [vmem:[#allocation2 + $0x64] sm:$0x1]  ;;  %v11223_v30 = vld [vmem:[%s14802_s4 + $0x178] sm:$0xff] }
 0x2d1   :  { %v3677_v60 = vrot.slane %v3676_v45, 4  ;;  %v3681_v15 = vrot.slane %v3679_v27, 5  ;;  %v3698_v41 = vshrl.u32 %v3519_v49, 16  ;;  %v3712_v26 = vshrl.u32 %v3520_v11, 16  ;;  %v3552_v35 = vld [vmem:[#allocation2 + $0x6c] sm:$0x1]  ;;  %5167 = vmatpush.bf16.msrb.mxu2 %v11223_v30 }
 0x2d2   :  { %v3691_v0 = vrot.slane %v3690_v33, 4  ;;  %v3695_v54 = vrot.slane %v3693_v16, 5  ;;  %v3715_v46 = vshll.u32 %v3520_v11, 16  ;;  %v4155_v5 = vsel %vm11750_vm12, %v10064_v7, %v4154_v22  ;;  %v4082_v63 = vld [vmem:[#allocation2 + $0x60] sm:$0xe]  ;;  %v11247_v9 = vld [vmem:[%s14802_s4 + $0x1f8] sm:$0xff] }
 0x2d3   :  { %4493 = vmatmul.bf16.gmra.mxu0 %v10147_v48  ;;  %v10065_v48 = vrot.slane %v4081_v52, 9  ;;  %v3682_v2 = vsel %vm11695_vm9, %v3677_v60, %v3681_v15  ;;  %v3700_v4 = vrot.slane %v3698_v41, 4  ;;  %v4209_v61 = vunpack.c.l.b16 %v4155_v5  ;;  %v4083_v21 = vld [vmem:[#allocation2 + $0x68] sm:$0xe]  ;;  %v11239_v8 = vld [vmem:[%s14802_s4 + $0x1b8] sm:$0xff]  ;;  %v11222_v28 = vld [vmem:[%s14802_s4 + $0x170] sm:$0xff] }
 0x2d4   :  { %3896 = vmatmul.bf16.gmra.mxu1 %v3816_v50  ;;  %v4158_v50 = vrot.slane %v3550_v39, 5  ;;  %v3696_v59 = vsel %vm11695_vm9, %v3691_v0, %v3695_v54  ;;  %v3806_v13 = vunpack.c.l.b16 %v3682_v2  ;;  %v3714_v25 = vrot.slane %v3712_v26, 4  ;;  %5779 = vmatpush.bf16.msra.mxu0 %v11247_v9  ;;  %v11246_v39 = vld [vmem:[%s14802_s4 + $0x1f0] sm:$0xff]  ;;  %v11209_v33 = vld [vmem:[%s14802_s4 + $0x108] sm:$0xff]  ;;  %v3522_v52 = vld [vmem:[#allocation2 + $0x78] sm:$0xf] }
 0x2d5   :  { %4299 = vmatmul.bf16.gmra.mxu3 %v4219_v55  ;;  %v3701_v55 = vshll.u32 %v3519_v49, 16  ;;  %v3807_v37 = vunpack.c.l.b16 %v3696_v59  ;;  %v3717_v10 = vrot.slane %v3715_v46, 5  ;;  %v10011_v18 = vor.u32 %v11164_v17, %v10010_v51  ;;  %v11238_v45 = vld [vmem:[%s14802_s4 + $0x1b0] sm:$0xff]  ;;  %4899 = vmatpush.bf16.msrb.mxu1 %v11209_v33  ;;  %v11221_v0 = vld [vmem:[%s14802_s4 + $0x168] sm:$0xff]  ;;  %v10014_v41 = vld [vmem:[#allocation2 + $0x60] sm:$0xf] }
 0x2d6   :  { %v4159_v19 = vsel %vm11750_vm12, %v10065_v48, %v4158_v50  ;;  %v10155_v57 = vor.u32 %v11196_v47, %v10154_v3  ;;  %v3707_v43 = vshll.u32 %v3551_v14, 16  ;;  %v10066_v42 = vrot.slane %v4082_v63, 9  ;;  %5361 = vmatpush.bf16.msra.mxu3 %v11239_v8  ;;  %v3521_v27 = vld [vmem:[#allocation2 + $0x70] sm:$0xf]  ;;  %5168 = vmatpush.bf16.msrb.mxu2 %v11222_v28  ;;  %v11245_v49 = vld [vmem:[%s14802_s4 + $0x1e8] sm:$0xff]  ;;  %v11244_v51 = vld [vmem:[%s14802_s4 + $0x1e0] sm:$0xff] }
 0x2d7   :  { %v3703_v12 = vrot.slane %v3701_v55, 5  ;;  %v4210_v32 = vunpack.c.l.b16 %v4159_v19  ;;  %v3818_v62 = vpack.c.b16 %v3807_v37, %v3806_v13  ;;  %v3718_v36 = vor.u32 %v3717_v10, %v3714_v25  ;;  %v11237_v54 = vld [vmem:[%s14802_s4 + $0x1a8] sm:$0xff]  ;;  %v11197_v59 = vld [vmem:[#allocation2 + $0x6c] sm:$0xf0]  ;;  %v3554_v25 = vld [vmem:[#allocation2 + $0x7c] sm:$0x1] }
 0x2d8   :  { %v3721_v29 = vshll.u32 %v3552_v35, 16  ;;  %v4162_v58 = vrot.slane %v3551_v14, 5  ;;  %v3709_v20 = vrot.slane %v3707_v43, 5  ;;  %5780 = vmatpush.bf16.msra.mxu0 %v11246_v39  ;;  %v3726_v7 = vshrl.u32 %v3521_v27, 16  ;;  %v11165_v55 = vld [vmem:[#allocation2 + $0x64] sm:$0xf0] }
 0x2d9   :  { %v3704_v31 = vor.u32 %v3703_v12, %v3700_v4  ;;  %v4221_v24 = vpack.c.b16 %v4210_v32, %v4209_v61  ;;  %v3729_v48 = vshll.u32 %v3521_v27, 16  ;;  %v3740_v50 = vshrl.u32 %v3522_v52, 16  ;;  %v10158_v2 = vld [vmem:[#allocation2 + $0x68] sm:$0xf]  ;;  %v11220_v12 = vld [vmem:[%s14802_s4 + $0x160] sm:$0xff]  ;;  %v11235_v43 = vld [vmem:[%s14802_s4 + $0x198] sm:$0xff] }
 0x2da   :  { %v3723_v16 = vrot.slane %v3721_v29, 5  ;;  %v4163_v34 = vsel %vm11750_vm12, %v10066_v42, %v4162_v58  ;;  %5362 = vmatpush.bf16.msra.mxu3 %v11238_v45  ;;  %v3743_v11 = vshll.u32 %v3522_v52, 16  ;;  %5169 = vmatpush.bf16.msrb.mxu2 %v11221_v0  ;;  %v3728_v17 = vrot.slane %v3726_v7, 4  ;;  %v3553_v32 = vld [vmem:[#allocation2 + $0x74] sm:$0x1]  ;;  %v11208_v58 = vld [vmem:[%s14802_s4 + $0x100] sm:$0xff] }
 0x2db   :  { %v4211_v26 = vunpack.c.l.b16 %v4163_v34  ;;  %v3731_v13 = vrot.slane %v3729_v48, 5  ;;  %v3742_v37 = vrot.slane %v3740_v50, 4  ;;  %v10015_v3 = vor.u32 %v11165_v55, %v10014_v41  ;;  %v4084_v63 = vld [vmem:[#allocation2 + $0x70] sm:$0xe]  ;;  %v3523_v30 = vld [vmem:[#allocation2 + $0x80] sm:$0xf]  ;;  %4900 = vmatpush.bf16.msrb.mxu1 %v11208_v58 }
 0x2dc   :  { %5781 = vmatpush.bf16.msra.mxu0 %v11245_v49  ;;  %v3745_v4 = vrot.slane %v3743_v11, 5  ;;  %v10159_v47 = vor.u32 %v11197_v59, %v10158_v2  ;;  %v11218_v29 = vld [vmem:[%s14802_s4 + $0x150] sm:$0xff]  ;;  %v3524_v8 = vld [vmem:[#allocation2 + $0x88] sm:$0xf]  ;;  %v4174_v28 = vrot.slane %v3554_v25, 5  ;;  %v3754_v45 = vshrl.u32 %v3523_v30, 16 }
 0x2dd   :  { %v3757_v27 = vshll.u32 %v3523_v30, 16  ;;  %v11241_v33 = vld [vmem:[%s14802_s4 + $0x1c8] sm:$0xff]  ;;  %v3768_v52 = vshrl.u32 %v3524_v8, 16  ;;  %v10018_v7 = vld [vmem:[#allocation2 + $0x70] sm:$0xf] }
 0x2de   :  { %5363 = vmatpush.bf16.msra.mxu3 %v11237_v54  ;;  %v3746_v14 = vor.u32 %v3745_v4, %v3742_v37  ;;  %5170 = vmatpush.bf16.msrb.mxu2 %v11220_v12  ;;  %v3756_v48 = vrot.slane %v3754_v45, 4  ;;  %v10162_v2 = vld [vmem:[#allocation2 + $0x78] sm:$0xf]  ;;  %v11198_v59 = vld [vmem:[#allocation2 + $0x7c] sm:$0xf0] }
 0x2df   :  { %v3759_v50 = vrot.slane %v3757_v27, 5  ;;  %v3770_v41 = vrot.slane %v3768_v52, 4  ;;  %v11216_v37 = vld [vmem:[%s14802_s4 + $0x140] sm:$0xff]  ;;  %v10163_v12 = vor.u32 %v11198_v59, %v10162_v2  ;;  %v11167_v45 = vld [vmem:[#allocation2 + $0x84] sm:$0xf0] }
 0x2e0   :  { %4046 = vmatmul.bf16.gmra.mxu2 %v10007_v40  ;;  %v10067_v40 = vrot.slane %v4083_v21, 9  ;;  %5782 = vmatpush.bf16.msra.mxu0 %v11244_v51  ;;  %v3749_v21 = vshll.u32 %v3554_v25, 16  ;;  %v3747_v42 = vrot.slane %v3746_v14, 4  ;;  %v3556_v51 = vld [vmem:[#allocation2 + $0x8c] sm:$0x1]  ;;  %v11240_v4 = vld [vmem:[%s14802_s4 + $0x1c0] sm:$0xff] }
 0x2e1   :  { %v3777_v14 = vshll.u32 %v3556_v51, 16  ;;  %v10166_v27 = vld [vmem:[#allocation2 + $0x88] sm:$0xf]  ;;  %v4973_v53 = vld [vmem:[#allocation2 + $0x90] sm:$0xe] }
 0x2e3   :  { %4498 = vmatmul.bf16.gmra.mxu0 %v10151_v6  ;;  %v4166_v6 = vrot.slane %v3552_v35, 5  ;;  %v11236_v35 = vld [vmem:[%s14802_s4 + $0x1a0] sm:$0xff]  ;;  %v3779_v30 = vrot.slane %v3777_v14, 5 }
 0x2e4   :  { %3901 = vmatmul.bf16.gmra.mxu1 %v3817_v1  ;;  %v3705_v1 = vrot.slane %v3704_v31, 4  ;;  %v4085_v31 = vld [vmem:[#allocation2 + $0x78] sm:$0xe]  ;;  %5364 = vmatpush.bf16.msra.mxu3 %v11236_v35  ;;  %v4182_v35 = vrot.slane %v3556_v51, 5 }
 0x2e5   :  { %4304 = vmatmul.bf16.gmra.mxu3 %v4220_v23  ;;  %v3719_v23 = vrot.slane %v3718_v36, 4  ;;  %v4167_v60 = vsel %vm11750_vm12, %v10067_v40, %v4166_v6  ;;  %v11242_v36 = vld [vmem:[%s14802_s4 + $0x1d0] sm:$0xff]  ;;  %v10068_v40 = vrot.slane %v4084_v63, 9  ;;  %v4170_v6 = vrot.slane %v3553_v32, 5 }
 0x2e6   :  { %v3710_v15 = vsel %vm11695_vm9, %v3705_v1, %v3709_v20  ;;  %v4212_v46 = vunpack.c.l.b16 %v4167_v60  ;;  %v10069_v1 = vrot.slane %v4085_v31, 9  ;;  %v11234_v20 = vld [vmem:[%s14802_s4 + $0x190] sm:$0xff] }
 0x2e7   :  { %v3724_v22 = vsel %vm11695_vm9, %v3719_v23, %v3723_v16  ;;  %v3808_v5 = vunpack.c.l.b16 %v3710_v15  ;;  %v3751_v23 = vrot.slane %v3749_v21, 5  ;;  %v3771_v16 = vshll.u32 %v3524_v8, 16  ;;  %v11217_v15 = vld [vmem:[%s14802_s4 + $0x148] sm:$0xff]  ;;  %v11232_v21 = vld [vmem:[%s14802_s4 + $0x180] sm:$0xff] }
 0x2e8   :  { %v3809_v19 = vunpack.c.l.b16 %v3724_v22  ;;  %v4222_v10 = vpack.c.b16 %v4212_v46, %v4211_v26  ;;  %5365 = vmatpush.bf16.msra.mxu3 %v11235_v43  ;;  %v4171_v0 = vsel %vm11750_vm12, %v10068_v40, %v4170_v6  ;;  %v4175_v49 = vsel %vm11750_vm12, %v10069_v1, %v4174_v28  ;;  %v11166_v22 = vld [vmem:[#allocation2 + $0x74] sm:$0xf0] }
 0x2e9   :  { %v3752_v60 = vsel %vm11695_vm9, %v3747_v42, %v3751_v23  ;;  %v3773_v55 = vrot.slane %v3771_v16, 5  ;;  %v4213_v26 = vunpack.c.l.b16 %v4171_v0  ;;  %v4214_v46 = vunpack.c.l.b16 %v4175_v49  ;;  %v5428_v43 = vld [vmem:[#allocation2 + $0x18] sm:$0xf]  ;;  %v4542_v42 = vld [vmem:[#allocation2 + $0x10] sm:$0xf] }
 0x2ea   :  { %v3819_v61 = vpack.c.b16 %v3809_v19, %v3808_v5  ;;  %v3811_v54 = vunpack.c.l.b16 %v3752_v60  ;;  %v10019_v5 = vor.u32 %v11166_v22, %v10018_v7  ;;  %v3555_v19 = vld [vmem:[#allocation2 + $0x84] sm:$0x1]  ;;  %v5473_v28 = vshrl.u32 %v5428_v43, 16  ;;  %v10022_v23 = vld [vmem:[#allocation2 + $0x80] sm:$0xf] }
 0x2eb   :  { %v4223_v25 = vpack.c.b16 %v4214_v46, %v4213_v26  ;;  %v4587_v52 = vshrl.u32 %v4542_v42, 16  ;;  %v4590_v16 = vshll.u32 %v4542_v42, 16  ;;  %v4541_v60 = vld [vmem:[#allocation2 + $0xc] sm:$0x1]  ;;  %v4958_v22 = vld [vmem:[#allocation2 + $0x8] sm:$0xe] }
 0x2ec   :  { %5366 = vmatpush.bf16.msra.mxu3 %v11234_v20  ;;  %v5475_v2 = vrot.slane %v5473_v28, 4  ;;  %v5429_v26 = vld [vmem:[#allocation2 + $0x1c] sm:$0x1] }
 0x2ed   :  { %v4592_v51 = vrot.slane %v4590_v16, 5 }
 0x2f0   :  { %4051 = vmatmul.bf16.gmra.mxu2 %v10011_v18  ;;  %v3732_v18 = vor.u32 %v3731_v13, %v3728_v17  ;;  %v4086_v17 = vld [vmem:[#allocation2 + $0x80] sm:$0xe]  ;;  %v3760_v13 = vor.u32 %v3759_v50, %v3756_v48  ;;  %v4959_v48 = vld [vmem:[#allocation2 + $0x10] sm:$0xe] }
 0x2f2   :  { %v3733_v9 = vrot.slane %v3732_v18, 4  ;;  %v10070_v18 = vrot.slane %v4086_v17, 9  ;;  %v3761_v63 = vrot.slane %v3760_v13, 4  ;;  %v10023_v17 = vor.u32 %v11167_v45, %v10022_v23 }
 0x2f3   :  { %4503 = vmatmul.bf16.gmra.mxu0 %v10155_v57  ;;  %v11219_v57 = vld [vmem:[%s14802_s4 + $0x158] sm:$0xff] }
 0x2f4   :  { %3906 = vmatmul.bf16.gmra.mxu1 %v3818_v62  ;;  %v11243_v62 = vld [vmem:[%s14802_s4 + $0x1d8] sm:$0xff]  ;;  %5171 = vmatpush.bf16.msrb.mxu2 %v11219_v57  ;;  %v4178_v57 = vrot.slane %v3555_v19, 5 }
 0x2f5   :  { %4309 = vmatmul.bf16.gmra.mxu3 %v4221_v24  ;;  %v3735_v24 = vshll.u32 %v3553_v32, 16  ;;  %5783 = vmatpush.bf16.msra.mxu0 %v11243_v62  ;;  %v11233_v32 = vld [vmem:[%s14802_s4 + $0x188] sm:$0xff] }
 0x2f6   :  { %5367 = vmatpush.bf16.msra.mxu3 %v11233_v32 }
 0x2f7   :  { %v3737_v39 = vrot.slane %v3735_v24, 5  ;;  %v5426_v24 = vld [vmem:[#allocation2 + $0x10] sm:$0xf] }
 0x2f8   :  { %5172 = vmatpush.bf16.msrb.mxu2 %v11218_v29  ;;  %v4179_v29 = vsel %vm11750_vm12, %v10070_v18, %v4178_v57  ;;  %v5459_v40 = vshrl.u32 %v5426_v24, 16  ;;  %v5462_v1 = vshll.u32 %v5426_v24, 16 }
 0x2f9   :  { %5784 = vmatpush.bf16.msra.mxu0 %v11242_v36  ;;  %v3738_v34 = vsel %vm11695_vm9, %v3733_v9, %v3737_v39  ;;  %v4540_v9 = vld [vmem:[#allocation2 + $0x8] sm:$0xf]  ;;  %v5476_v39 = vshll.u32 %v5428_v43, 16  ;;  %v4215_v0 = vunpack.c.l.b16 %v4179_v29 }
 0x2fa   :  { %v3810_v11 = vunpack.c.l.b16 %v3738_v34  ;;  %5368 = vmatpush.bf16.msra.mxu3 %v11232_v21  ;;  %v4576_v20 = vshll.u32 %v4540_v9, 16  ;;  %v11199_v34 = vld [vmem:[#allocation2 + $0x8c] sm:$0xf0]  ;;  %v5461_v50 = vrot.slane %v5459_v40, 4  ;;  %v5432_v21 = vld [vmem:[#allocation2 + $0x28] sm:$0xf] }
 0x2fb   :  { %v5478_v59 = vrot.slane %v5476_v39, 5  ;;  %v10167_v13 = vor.u32 %v11199_v34, %v10166_v27  ;;  %v5504_v28 = vshll.u32 %v5432_v21, 16 }
 0x2fc   :  { %5173 = vmatpush.bf16.msrb.mxu2 %v11217_v15  ;;  %v4543_v15 = vld [vmem:[#allocation2 + $0x14] sm:$0x1] }
 0x2fd   :  { %5785 = vmatpush.bf16.msra.mxu0 %v11241_v33  ;;  %v4573_v33 = vshrl.u32 %v4540_v9, 16  ;;  %v4596_v24 = vshll.u32 %v4543_v15, 16 }
 0x2ff   :  { %v4575_v46 = vrot.slane %v4573_v33, 4 }
 0x300   :  { %4056 = vmatmul.bf16.gmra.mxu2 %v10015_v3  ;;  %v3820_v3 = vpack.c.b16 %v3811_v54, %v3810_v11  ;;  %v11255_v11 = vld [vmem:[%s14802_s4 + $0x238] sm:$0xff] }
 0x301   :  { %5174 = vmatpush.bf16.msrb.mxu2 %v11216_v37  ;;  %5786 = vmatpush.bf16.msra.mxu0 %v11240_v4  ;;  %v10248_v37 = vrot.slane %v4958_v22, 9  ;;  %v5008_v4 = vrot.slane %v4541_v60, 5  ;;  %v10330_v22 = vld [vmem:[#allocation2 + $0x10] sm:$0xf] }
 0x302   :  { %6053 = vmatpush.bf16.msra.mxu1 %v11255_v11 }
 0x303   :  { %4508 = vmatmul.bf16.gmra.mxu0 %v10159_v47  ;;  %v4087_v47 = vld [vmem:[#allocation2 + $0x88] sm:$0xe] }
 0x304   :  { %3911 = vmatmul.bf16.gmra.mxu1 %v3819_v61  ;;  %v3774_v61 = vor.u32 %v3773_v55, %v3770_v41  ;;  %v10071_v62 = vrot.slane %v4087_v47, 9  ;;  %v5427_v41 = vld [vmem:[#allocation2 + $0x14] sm:$0x1]  ;;  %v5464_v55 = vrot.slane %v5462_v1, 5  ;;  %v5501_v1 = vshrl.u32 %v5432_v21, 16 }
 0x305   :  { %4314 = vmatmul.bf16.gmra.mxu3 %v4222_v10  ;;  %v3763_v10 = vshll.u32 %v3555_v19, 16  ;;  %v4589_v19 = vrot.slane %v4587_v52, 4  ;;  %v5468_v47 = vshll.u32 %v5427_v41, 16 }
 0x306   :  { %v3775_v31 = vrot.slane %v3774_v61, 4  ;;  %v4183_v8 = vsel %vm11750_vm12, %v10071_v62, %v4182_v35  ;;  %v5465_v32 = vor.u32 %v5464_v55, %v5461_v50  ;;  %v5430_v62 = vld [vmem:[#allocation2 + $0x20] sm:$0xf]  ;;  %v5009_v35 = vsel %vm11750_vm12, %v10248_v37, %v5008_v4  ;;  %v5433_v4 = vld [vmem:[#allocation2 + $0x2c] sm:$0x1] }
 0x307   :  { %v3765_v36 = vrot.slane %v3763_v10, 5  ;;  %v4216_v49 = vunpack.c.l.b16 %v4183_v8  ;;  %v5482_v10 = vshll.u32 %v5429_v26, 16  ;;  %v4593_v57 = vor.u32 %v4592_v51, %v4589_v19  ;;  %v11254_v26 = vld [vmem:[%s14802_s4 + $0x230] sm:$0xff]  ;;  %v5431_v51 = vld [vmem:[#allocation2 + $0x24] sm:$0x1] }
 0x308   :  { %v3780_v6 = vsel %vm11695_vm9, %v3775_v31, %v3779_v30  ;;  %v4582_v31 = vshll.u32 %v4541_v60, 16  ;;  %v5466_v43 = vrot.slane %v5465_v32, 4  ;;  %v5470_v30 = vrot.slane %v5468_v47, 5  ;;  %6054 = vmatpush.bf16.msra.mxu1 %v11254_v26  ;;  %v4961_v47 = vld [vmem:[#allocation2 + $0x20] sm:$0xe] }
 0x309   :  { %v3766_v58 = vsel %vm11695_vm9, %v3761_v63, %v3765_v36  ;;  %v3813_v54 = vunpack.c.l.b16 %v3780_v6  ;;  %v4224_v18 = vpack.c.b16 %v4216_v49, %v4215_v0  ;;  %v4544_v36 = vld [vmem:[#allocation2 + $0x18] sm:$0xf]  ;;  %v5484_v42 = vrot.slane %v5482_v10, 5  ;;  %v4546_v6 = vld [vmem:[#allocation2 + $0x20] sm:$0xf] }
 0x30a   :  { %v3812_v7 = vunpack.c.l.b16 %v3766_v58  ;;  %v4594_v8 = vrot.slane %v4593_v57, 4  ;;  %v5487_v58 = vshrl.u32 %v5430_v62, 16  ;;  %v5490_v40 = vshll.u32 %v5430_v62, 16 }
 0x30b   :  { %v4601_v39 = vshrl.u32 %v4544_v36, 16  ;;  %v4604_v23 = vshll.u32 %v4544_v36, 16  ;;  %v5087_v45 = vunpack.c.l.b16 %v5009_v35  ;;  %v4584_v33 = vrot.slane %v4582_v31, 5 }
 0x30c   :  { %v3821_v61 = vpack.c.b16 %v3813_v54, %v3812_v7  ;;  %v5471_v52 = vsel %vm11695_vm9, %v5466_v43, %v5470_v30  ;;  %v4615_v34 = vshrl.u32 %v4546_v6, 16  ;;  %v4618_v60 = vshll.u32 %v4546_v6, 16  ;;  %v5436_v6 = vld [vmem:[#allocation2 + $0x38] sm:$0xf] }
 0x30d   :  { %v5489_v49 = vrot.slane %v5487_v58, 4  ;;  %v5492_v7 = vrot.slane %v5490_v40, 5  ;;  %v5506_v50 = vrot.slane %v5504_v28, 5  ;;  %v4603_v11 = vrot.slane %v4601_v39, 4  ;;  %v5434_v40 = vld [vmem:[#allocation2 + $0x30] sm:$0xf] }
 0x30e   :  { %v4606_v54 = vrot.slane %v4604_v23, 5  ;;  %v5699_v41 = vunpack.c.l.b16 %v5471_v52  ;;  %v5496_v62 = vshll.u32 %v5431_v51, 16  ;;  %v10251_v21 = vrot.slane %v4961_v47, 9 }
 0x310   :  { %4061 = vmatmul.bf16.gmra.mxu2 %v10019_v5  ;;  %v4578_v5 = vrot.slane %v4576_v20, 5  ;;  %v4598_v20 = vrot.slane %v4596_v24, 5  ;;  %v4607_v10 = vor.u32 %v4606_v54, %v4603_v11  ;;  %v5498_v58 = vrot.slane %v5496_v62, 5 }
 0x311   :  { %v5529_v11 = vshrl.u32 %v5436_v6, 16  ;;  %v5532_v54 = vshll.u32 %v5436_v6, 16 }
 0x312   :  { %v4579_v14 = vor.u32 %v4578_v5, %v4575_v46  ;;  %v4599_v0 = vsel %vm11695_vm9, %v4594_v8, %v4598_v20  ;;  %v11224_v46 = vld [vmem:[#allocation2 + $0x14] sm:$0xf0] }
 0x313   :  { %4513 = vmatmul.bf16.gmra.mxu0 %v10163_v12  ;;  %v10249_v12 = vrot.slane %v4959_v48, 9  ;;  %v5503_v48 = vrot.slane %v5501_v1, 4  ;;  %v4814_v19 = vunpack.c.l.b16 %v4599_v0  ;;  %v13250_v0 = vld [vmem:[#allocation2 + $0x2c] sm:$0x1] }
 0x314   :  { %3916 = vmatmul.bf16.gmra.mxu1 %v3820_v3  ;;  %v5012_v3 = vrot.slane %v4543_v15, 5  ;;  %v4580_v29 = vrot.slane %v4579_v14, 4  ;;  %v10331_v14 = vor.u32 %v11224_v46, %v10330_v22  ;;  %v5518_v22 = vshll.u32 %v5434_v40, 16 }
 0x315   :  { %4319 = vmatmul.bf16.gmra.mxu3 %v4223_v25  ;;  %v5479_v25 = vor.u32 %v5478_v59, %v5475_v2  ;;  %v4545_v2 = vld [vmem:[#allocation2 + $0x1c] sm:$0x1]  ;;  %v4960_v59 = vld [vmem:[#allocation2 + $0x18] sm:$0xe]  ;;  %v5024_v51 = vrot.slane %v13250_v0, 5 }
 0x316   :  { %v5013_v63 = vsel %vm11750_vm12, %v10249_v12, %v5012_v3  ;;  %v4585_v15 = vsel %vm11695_vm9, %v4580_v29, %v4584_v33  ;;  %v5493_v12 = vor.u32 %v5492_v7, %v5489_v49  ;;  %v4547_v3 = vld [vmem:[#allocation2 + $0x24] sm:$0x1]  ;;  %v5016_v32 = vrot.slane %v4545_v2, 5  ;;  %v4962_v49 = vld [vmem:[#allocation2 + $0x28] sm:$0xe] }
 0x317   :  { %v5480_v9 = vrot.slane %v5479_v25, 4  ;;  %v5088_v27 = vunpack.c.l.b16 %v5013_v63  ;;  %v4813_v5 = vunpack.c.l.b16 %v4585_v15  ;;  %v5507_v25 = vor.u32 %v5506_v50, %v5503_v48 }
 0x318   :  { %v5510_v63 = vshll.u32 %v5433_v4, 16  ;;  %v4610_v31 = vshll.u32 %v4545_v2, 16  ;;  %v5020_v36 = vrot.slane %v4547_v3, 5  ;;  %v5494_v43 = vrot.slane %v5493_v12, 4 }
 0x319   :  { %v5485_v16 = vsel %vm11695_vm9, %v5480_v9, %v5484_v42  ;;  %v5103_v37 = vpack.c.b16 %v5088_v27, %v5087_v45  ;;  %v4829_v35 = vpack.c.b16 %v4814_v19, %v4813_v5  ;;  %v4624_v30 = vshll.u32 %v4547_v3, 16  ;;  %v4548_v45 = vld [vmem:[#allocation2 + $0x28] sm:$0xf] }
 0x31a   :  { %v5700_v55 = vunpack.c.l.b16 %v5485_v16  ;;  %v5508_v42 = vrot.slane %v5507_v25, 4  ;;  %v4608_v29 = vrot.slane %v4607_v10, 4  ;;  %v5512_v28 = vrot.slane %v5510_v63, 5  ;;  %v4550_v16 = vld [vmem:[#allocation2 + $0x30] sm:$0xf] }
 0x31b   :  { %v4612_v39 = vrot.slane %v4610_v31, 5  ;;  %v5021_v27 = vsel %vm11750_vm12, %v10251_v21, %v5020_v36  ;;  %v5499_v20 = vsel %vm11695_vm9, %v5494_v43, %v5498_v58  ;;  %v4626_v52 = vrot.slane %v4624_v30, 5  ;;  %v10334_v63 = vld [vmem:[#allocation2 + $0x20] sm:$0xf]  ;;  %v11225_v31 = vld [vmem:[#allocation2 + $0x24] sm:$0xf0] }
 0x31c   :  { %v5515_v7 = vshrl.u32 %v5434_v40, 16  ;;  %v4632_v2 = vshll.u32 %v4548_v45, 16  ;;  %v4646_v26 = vshll.u32 %v4550_v16, 16  ;;  %v5090_v46 = vunpack.c.l.b16 %v5021_v27  ;;  %v5435_v30 = vld [vmem:[#allocation2 + $0x34] sm:$0x1] }
 0x31d   :  { %v4613_v15 = vsel %vm11695_vm9, %v4608_v29, %v4612_v39  ;;  %v5701_v5 = vunpack.c.l.b16 %v5499_v20  ;;  %v10252_v19 = vrot.slane %v4962_v49, 9  ;;  %v5520_v12 = vrot.slane %v5518_v22, 5 }
 0x31e   :  { %v5517_v4 = vrot.slane %v5515_v7, 4  ;;  %v5534_v25 = vrot.slane %v5532_v54, 5  ;;  %v5524_v27 = vshll.u32 %v5435_v30, 16 }
 0x320   :  { %4066 = vmatmul.bf16.gmra.mxu2 %v10023_v17  ;;  %v4617_v17 = vrot.slane %v4615_v34, 4  ;;  %v5521_v58 = vor.u32 %v5520_v12, %v5517_v4 }
 0x322   :  { %v5522_v49 = vrot.slane %v5521_v58, 4  ;;  %v13277_v58 = vld [vmem:[#allocation2 + $0x4c] sm:$0x1] }
 0x323   :  { %4518 = vmatmul.bf16.gmra.mxu0 %v10167_v13  ;;  %v4620_v13 = vrot.slane %v4618_v60, 5  ;;  %v5513_v60 = vsel %vm11695_vm9, %v5508_v42, %v5512_v28 }
 0x324   :  { %3921 = vmatmul.bf16.gmra.mxu1 %v3821_v61  ;;  %v10250_v61 = vrot.slane %v4960_v59, 9  ;;  %v4643_v59 = vshrl.u32 %v4550_v16, 16 }
 0x325   :  { %4324 = vmatmul.bf16.gmra.mxu3 %v4224_v18  ;;  %v5715_v18 = vpack.c.b16 %v5700_v55, %v5699_v41  ;;  %v4621_v24 = vor.u32 %v4620_v13, %v4617_v17  ;;  %v4629_v41 = vshrl.u32 %v4548_v45, 16  ;;  %v5702_v17 = vunpack.c.l.b16 %v5513_v60 }
 0x326   :  { %v5017_v9 = vsel %vm11750_vm12, %v10250_v61, %v5016_v32  ;;  %v4815_v13 = vunpack.c.l.b16 %v4613_v15  ;;  %v4963_v61 = vld [vmem:[#allocation2 + $0x30] sm:$0xe]  ;;  %v5531_v32 = vrot.slane %v5529_v11, 4  ;;  %v4645_v62 = vrot.slane %v4643_v59, 4 }
 0x327   :  { %v4622_v23 = vrot.slane %v4621_v24, 4  ;;  %v5089_v33 = vunpack.c.l.b16 %v5017_v9  ;;  %v4631_v10 = vrot.slane %v4629_v41, 4  ;;  %v10253_v36 = vrot.slane %v4963_v61, 9  ;;  %v5437_v9 = vld [vmem:[#allocation2 + $0x3c] sm:$0x1] }
 0x328   :  { %v5535_v40 = vor.u32 %v5534_v25, %v5531_v32  ;;  %v5716_v6 = vpack.c.b16 %v5702_v17, %v5701_v5  ;;  %v10335_v45 = vor.u32 %v11225_v31, %v10334_v63  ;;  %v4553_v31 = vld [vmem:[#allocation2 + $0x3c] sm:$0x1] }
 0x329   :  { %v4627_v55 = vsel %vm11695_vm9, %v4622_v23, %v4626_v52  ;;  %v5104_v21 = vpack.c.b16 %v5090_v46, %v5089_v33  ;;  %v5438_v23 = vld [vmem:[#allocation2 + $0x40] sm:$0xf]  ;;  %v5538_v33 = vshll.u32 %v5437_v9, 16  ;;  %v4638_v52 = vshll.u32 %v13250_v0, 16 }
 0x32a   :  { %v4816_v47 = vunpack.c.l.b16 %v4627_v55  ;;  %v5536_v7 = vrot.slane %v5535_v40, 4  ;;  %v5543_v22 = vshrl.u32 %v5438_v23, 16  ;;  %v5546_v55 = vshll.u32 %v5438_v23, 16  ;;  %v11252_v40 = vld [vmem:[%s14802_s4 + $0x220] sm:$0xff] }
 0x32b   :  { %v5540_v59 = vrot.slane %v5538_v33, 5  ;;  %v13282_v23 = vld [vmem:[#allocation2 + $0x44] sm:$0x1] }
 0x32c   :  { %v5545_v25 = vrot.slane %v5543_v22, 4 }
 0x330   :  { %5175 = vmatmul.bf16.vlgmr.msrb.gmra.mxu2 %v5103_v37  ;;  %v4551_v37 = vld [vmem:[#allocation2 + $0x34] sm:$0x1] }
 0x331   :  { %v3887_v57 = vpop.f32.mrf.mxu1  ;;  %v5028_v43 = vrot.slane %v4551_v37, 5  ;;  %v4652_v16 = vshll.u32 %v4551_v37, 16 }
 0x333   :  { %5787 = vmatmul.bf16.vlgmr.msra.gmra.mxu0 %v5715_v18  ;;  %v4032_v8 = vpop.f32.mrf.mxu2  ;;  %v11253_v18 = vld [vmem:[%s14802_s4 + $0x228] sm:$0xff]  ;;  %v5029_v20 = vsel %vm11750_vm12, %v10253_v36, %v5028_v43  ;;  %v4654_v0 = vrot.slane %v4652_v16, 5 }
 0x334   :  { %4901 = vmatmul.bf16.vlgmr.msrb.gmra.mxu1 %v4829_v35  ;;  %v4033_v1 = vadd.f32 %v4032_v8, %v3887_v57  ;;  %v4634_v57 = vrot.slane %v4632_v2, 5  ;;  %v4648_v35 = vrot.slane %v4646_v26, 5  ;;  %v5025_v8 = vsel %vm11750_vm12, %v10252_v19, %v5024_v51  ;;  %v4554_v51 = vld [vmem:[#allocation2 + $0x40] sm:$0xf] }
 0x335   :  { %5369 = vmatmul.bf16.vlgmr.msra.gmra.mxu3 %v10331_v14  ;;  %6055 = vmatpush.bf16.msra.mxu1 %v11253_v18  ;;  %v5091_v15 = vunpack.c.l.b16 %v5025_v8  ;;  %v5526_v2 = vrot.slane %v5524_v27, 5  ;;  %v4640_v19 = vrot.slane %v4638_v52, 5  ;;  %v5092_v12 = vunpack.c.l.b16 %v5029_v20  ;;  %v10338_v18 = vld [vmem:[#allocation2 + $0x30] sm:$0xf]  ;;  %v4964_v8 = vld [vmem:[#allocation2 + $0x38] sm:$0xe] }
 0x336   :  { %v4635_v28 = vor.u32 %v4634_v57, %v4631_v10  ;;  %v4649_v39 = vor.u32 %v4648_v35, %v4645_v62  ;;  %v5548_v10 = vrot.slane %v5546_v55, 5  ;;  %v4671_v35 = vshrl.u32 %v4554_v51, 16 }
 0x337   :  { %v4674_v63 = vshll.u32 %v4554_v51, 16  ;;  %v5105_v30 = vpack.c.b16 %v5092_v12, %v5091_v15  ;;  %v5032_v15 = vrot.slane %v4553_v31, 5 }
 0x338   :  { %v4290_v34 = vpop.f32.mrf.mxu3  ;;  %v4636_v54 = vrot.slane %v4635_v28, 4  ;;  %v4650_v41 = vrot.slane %v4649_v39, 4  ;;  %v4965_v39 = vld [vmem:[#allocation2 + $0x40] sm:$0xe]  ;;  %v5549_v27 = vor.u32 %v5548_v10, %v5545_v25  ;;  %v4673_v20 = vrot.slane %v4671_v35, 4 }
 0x339   :  { %v13252_v48 = vadd.f32 %v4290_v34, %v4033_v1  ;;  %v3889_v50 = vpop.f32.mrf.mxu1  ;;  %v4830_v1 = vpack.c.b16 %v4816_v47, %v4815_v13  ;;  %v5440_v34 = vld [vmem:[#allocation2 + $0x48] sm:$0xf]  ;;  %v5541_v47 = vsel %vm11695_vm9, %v5536_v7, %v5540_v59  ;;  %v4676_v52 = vrot.slane %v4674_v63, 5  ;;  %6056 = vmatpush.bf16.msra.mxu1 %v11252_v40 }
 0x33a   :  { %v5557_v26 = vshrl.u32 %v5440_v34, 16  ;;  %v5560_v46 = vshll.u32 %v5440_v34, 16  ;;  %v4641_v61 = vsel %vm11695_vm9, %v4636_v54, %v4640_v19  ;;  %v4655_v32 = vsel %vm11695_vm9, %v4650_v41, %v4654_v0 }
 0x33b   :  { %v4034_v3 = vpop.f32.mrf.mxu2  ;;  %v4818_v28 = vunpack.c.l.b16 %v4655_v32  ;;  %v5552_v54 = vshll.u32 %v13282_v23, 16  ;;  %v4666_v59 = vshll.u32 %v4553_v31, 16  ;;  %v4556_v32 = vld [vmem:[#allocation2 + $0x58] sm:$0xf] }
 0x33c   :  { %v4035_v14 = vadd.f32 %v4034_v3, %v3889_v50  ;;  %v4552_v50 = vld [vmem:[#allocation2 + $0x38] sm:$0xf]  ;;  %v5527_v3 = vsel %vm11695_vm9, %v5522_v49, %v5526_v2  ;;  %v5559_v57 = vrot.slane %v5557_v26, 4  ;;  %v5562_v62 = vrot.slane %v5560_v46, 5 }
 0x33d   :  { %v4657_v17 = vshrl.u32 %v4552_v50, 16  ;;  %v4660_v13 = vshll.u32 %v4552_v50, 16  ;;  %v5703_v9 = vunpack.c.l.b16 %v5527_v3  ;;  %v10255_v50 = vrot.slane %v4965_v39, 9 }
 0x33e   :  { %v5563_v33 = vor.u32 %v5562_v62, %v5559_v57  ;;  %v5550_v26 = vrot.slane %v5549_v27, 4  ;;  %v4558_v57 = vld [vmem:[#allocation2 + $0x60] sm:$0xf]  ;;  %v13302_v27 = vld [vmem:[#allocation2 + $0x64] sm:$0x1] }
 0x33f   :  { %v4662_v36 = vrot.slane %v4660_v13, 5  ;;  %v5442_v13 = vld [vmem:[#allocation2 + $0x60] sm:$0xf] }
 0x340   :  { %v4292_v24 = vpop.f32.mrf.mxu3  ;;  %5180 = vmatmul.bf16.gmra.mxu2 %v5104_v21  ;;  %v4659_v21 = vrot.slane %v4657_v17, 4  ;;  %v5564_v46 = vrot.slane %v5563_v33, 4  ;;  %v5554_v17 = vrot.slane %v5552_v54, 5  ;;  %v5571_v63 = vshrl.u32 %v5442_v13, 16  ;;  %v11227_v54 = vld [vmem:[#allocation2 + $0x44] sm:$0xf0] }
 0x341   :  { %v13260_v42 = vadd.f32 %v4292_v24, %v4035_v14  ;;  %v3892_v29 = vpop.f32.mrf.mxu1  ;;  %v11226_v14 = vld [vmem:[#allocation2 + $0x34] sm:$0xf0]  ;;  %v4555_v24 = vld [vmem:[#allocation2 + $0x44] sm:$0x1]  ;;  %v5574_v31 = vshll.u32 %v5442_v13, 16 }
 0x342   :  { %v10339_v34 = vor.u32 %v11226_v14, %v10338_v18  ;;  %v4663_v49 = vor.u32 %v4662_v36, %v4659_v21  ;;  %v4680_v19 = vshll.u32 %v4555_v24, 16  ;;  %v5555_v25 = vsel %vm11695_vm9, %v5550_v26, %v5554_v17  ;;  %v4966_v26 = vld [vmem:[#allocation2 + $0x58] sm:$0xe] }
 0x343   :  { %5792 = vmatmul.bf16.gmra.mxu0 %v5716_v6  ;;  %v4037_v60 = vpop.f32.mrf.mxu2  ;;  %v5573_v33 = vrot.slane %v5571_v63, 4  ;;  %v5580_v17 = vshll.u32 %v13302_v27, 16 }
 0x344   :  { %4906 = vmatmul.bf16.gmra.mxu1 %v4830_v1  ;;  %v4038_v11 = vadd.f32 %v4037_v60, %v3892_v29  ;;  %v5704_v29 = vunpack.c.l.b16 %v5541_v47  ;;  %v4817_v1 = vunpack.c.l.b16 %v4641_v61  ;;  %v10254_v60 = vrot.slane %v4964_v8, 9 }
 0x345   :  { %5374 = vmatmul.bf16.gmra.mxu3 %v10335_v45  ;;  %v5566_v45 = vshll.u32 %v13277_v58, 16  ;;  %v4664_v0 = vrot.slane %v4663_v49, 4  ;;  %v4668_v61 = vrot.slane %v4666_v59, 5  ;;  %v4682_v14 = vrot.slane %v4680_v19, 5  ;;  %v11251_v49 = vld [vmem:[%s14802_s4 + $0x218] sm:$0xff] }
 0x346   :  { %v5717_v41 = vpack.c.b16 %v5704_v29, %v5703_v9  ;;  %v4831_v55 = vpack.c.b16 %v4818_v28, %v4817_v1  ;;  %v5033_v3 = vsel %vm11750_vm12, %v10254_v60, %v5032_v15  ;;  %v4688_v9 = vshll.u32 %v4556_v32, 16  ;;  %v4557_v59 = vld [vmem:[#allocation2 + $0x5c] sm:$0x1]  ;;  %6057 = vmatpush.bf16.msra.mxu1 %v11251_v49  ;;  %v4967_v19 = vld [vmem:[#allocation2 + $0x60] sm:$0xe] }
 0x347   :  { %v5568_v2 = vrot.slane %v5566_v45, 5  ;;  %v4669_v35 = vsel %vm11695_vm9, %v4664_v0, %v4668_v61  ;;  %v4699_v29 = vshrl.u32 %v4558_v57, 16  ;;  %v4702_v8 = vshll.u32 %v4558_v57, 16  ;;  %v13309_v0 = vld [vmem:[#allocation2 + $0x6c] sm:$0x1] }
 0x348   :  { %v4295_v5 = vpop.f32.mrf.mxu3  ;;  %v5093_v40 = vunpack.c.l.b16 %v5033_v3  ;;  %v5705_v1 = vunpack.c.l.b16 %v5555_v25  ;;  %v4819_v45 = vunpack.c.l.b16 %v4669_v35  ;;  %v4690_v15 = vrot.slane %v4688_v9, 5  ;;  %v4559_v3 = vld [vmem:[#allocation2 + $0x64] sm:$0x1] }
 0x349   :  { %v13267_v37 = vadd.f32 %v4295_v5, %v4038_v11  ;;  %v3894_v4 = vpop.f32.mrf.mxu1  ;;  %v5036_v11 = vrot.slane %v4555_v24, 5  ;;  %v4677_v5 = vor.u32 %v4676_v52, %v4673_v20  ;;  %v5569_v10 = vsel %vm11695_vm9, %v5564_v46, %v5568_v2 }
 0x34a   :  { %v5706_v39 = vunpack.c.l.b16 %v5569_v10  ;;  %v5576_v20 = vrot.slane %v5574_v31, 5  ;;  %v4704_v2 = vrot.slane %v4702_v8, 5  ;;  %v10256_v10 = vrot.slane %v4966_v26, 9  ;;  %v5448_v31 = vld [vmem:[#allocation2 + $0x78] sm:$0xf] }
 0x34b   :  { %v4039_v43 = vpop.f32.mrf.mxu2  ;;  %v5037_v47 = vsel %vm11750_vm12, %v10255_v50, %v5036_v11  ;;  %v4678_v18 = vrot.slane %v4677_v5, 4  ;;  %v10342_v11 = vld [vmem:[#allocation2 + $0x40] sm:$0xf]  ;;  %v5040_v57 = vrot.slane %v4557_v59, 5  ;;  %v5594_v35 = vshll.u32 %v13309_v0, 16 }
 0x34c   :  { %v4040_v6 = vadd.f32 %v4039_v43, %v3894_v4  ;;  %v5444_v4 = vld [vmem:[#allocation2 + $0x68] sm:$0xf]  ;;  %v4694_v63 = vshll.u32 %v4557_v59, 16 }
 0x34d   :  { %v5585_v24 = vshrl.u32 %v5444_v4, 16  ;;  %v5588_v43 = vshll.u32 %v5444_v4, 16  ;;  %v4683_v28 = vsel %vm11695_vm9, %v4678_v18, %v4682_v14  ;;  %v10343_v4 = vor.u32 %v11227_v54, %v10342_v11  ;;  %v5446_v14 = vld [vmem:[#allocation2 + $0x70] sm:$0xf] }
 0x34e   :  { %v4562_v11 = vld [vmem:[#allocation2 + $0x70] sm:$0xf] }
 0x350   :  { %v4297_v16 = vpop.f32.mrf.mxu3  ;;  %5185 = vmatmul.bf16.gmra.mxu2 %v5105_v30  ;;  %v4685_v30 = vshrl.u32 %v4556_v32, 16  ;;  %v5718_v32 = vpack.c.b16 %v5706_v39, %v5705_v1  ;;  %v5613_v39 = vshrl.u32 %v5448_v31, 16 }
 0x351   :  { %v13285_v7 = vadd.f32 %v4297_v16, %v4040_v6  ;;  %v3897_v22 = vpop.f32.mrf.mxu1  ;;  %v5094_v6 = vunpack.c.l.b16 %v5037_v47  ;;  %v5587_v16 = vrot.slane %v5585_v24, 4  ;;  %v5044_v24 = vrot.slane %v4559_v3, 5 }
 0x352   :  { %v4687_v60 = vrot.slane %v4685_v30, 4  ;;  %v4708_v30 = vshll.u32 %v4559_v3, 16 }
 0x353   :  { %5797 = vmatmul.bf16.gmra.mxu0 %v5717_v41  ;;  %v4042_v51 = vpop.f32.mrf.mxu2  ;;  %v4820_v41 = vunpack.c.l.b16 %v4683_v28  ;;  %v5106_v5 = vpack.c.b16 %v5094_v6, %v5093_v40  ;;  %v5599_v40 = vshrl.u32 %v5446_v14, 16  ;;  %v5602_v6 = vshll.u32 %v5446_v14, 16 }
 0x354   :  { %4911 = vmatmul.bf16.gmra.mxu1 %v4831_v55  ;;  %v4043_v12 = vadd.f32 %v4042_v51, %v3897_v22  ;;  %v13307_v22 = vpop.f32.mrf.mxu0  ;;  %v4701_v55 = vrot.slane %v4699_v29, 4  ;;  %v5577_v51 = vor.u32 %v5576_v20, %v5573_v33  ;;  %v4691_v61 = vor.u32 %v4690_v15, %v4687_v60 }
 0x355   :  { %5379 = vmatmul.bf16.gmra.mxu3 %v10339_v34  ;;  %v5590_v34 = vrot.slane %v5588_v43, 5  ;;  %v4832_v25 = vpack.c.b16 %v4820_v41, %v4819_v45  ;;  %v5582_v43 = vrot.slane %v5580_v17, 5  ;;  %v5616_v45 = vshll.u32 %v5448_v31, 16 }
 0x356   :  { %v4705_v18 = vor.u32 %v4704_v2, %v4701_v55  ;;  %v4692_v8 = vrot.slane %v4691_v61, 4  ;;  %v5596_v33 = vrot.slane %v5594_v35, 5  ;;  %v4696_v20 = vrot.slane %v4694_v63, 5  ;;  %v10346_v61 = vld [vmem:[#allocation2 + $0x60] sm:$0xf]  ;;  %v11250_v35 = vld [vmem:[%s14802_s4 + $0x210] sm:$0xff] }
 0x357   :  { %v5591_v47 = vor.u32 %v5590_v34, %v5587_v16  ;;  %v5041_v34 = vsel %vm11750_vm12, %v10256_v10, %v5040_v57  ;;  %v4710_v49 = vrot.slane %v4708_v30, 5  ;;  %v5601_v59 = vrot.slane %v5599_v40, 4  ;;  %v4968_v57 = vld [vmem:[#allocation2 + $0x68] sm:$0xe]  ;;  %6058 = vmatpush.bf16.msra.mxu1 %v11250_v35 }
 0x358   :  { %v4300_v62 = vpop.f32.mrf.mxu3  ;;  %v4706_v28 = vrot.slane %v4705_v18, 4  ;;  %v4697_v2 = vsel %vm11695_vm9, %v4692_v8, %v4696_v20  ;;  %v5095_v3 = vunpack.c.l.b16 %v5041_v34 }
 0x359   :  { %v13298_v21 = vadd.f32 %v4300_v62, %v4043_v12  ;;  %v3899_v36 = vpop.f32.mrf.mxu1  ;;  %v10257_v62 = vrot.slane %v4967_v19, 9  ;;  %v5592_v29 = vrot.slane %v5591_v47, 4  ;;  %v5618_v19 = vrot.slane %v5616_v45, 5 }
 0x35a   :  { %v4711_v26 = vsel %vm11695_vm9, %v4706_v28, %v4710_v49  ;;  %v4821_v14 = vunpack.c.l.b16 %v4697_v2 }
 0x35b   :  { %v4044_v52 = vpop.f32.mrf.mxu2  ;;  %v5045_v60 = vsel %vm11750_vm12, %v10257_v62, %v5044_v24  ;;  %v5597_v55 = vsel %vm11695_vm9, %v5592_v29, %v5596_v33  ;;  %v13331_v62 = vld [vmem:[#allocation2 + $0x74] sm:$0x1]  ;;  %v4822_v31 = vunpack.c.l.b16 %v4711_v26  ;;  %v4561_v24 = vld [vmem:[#allocation2 + $0x6c] sm:$0x1]  ;;  %v10258_v33 = vrot.slane %v4968_v57, 9 }
 0x35c   :  { %v4045_v50 = vadd.f32 %v4044_v52, %v3899_v36  ;;  %v5578_v36 = vrot.slane %v5577_v51, 4  ;;  %v13315_v52 = vpop.f32.mrf.mxu0  ;;  %v5096_v47 = vunpack.c.l.b16 %v5045_v60  ;;  %v5708_v18 = vunpack.c.l.b16 %v5597_v55  ;;  %v4563_v29 = vld [vmem:[#allocation2 + $0x74] sm:$0x1] }
 0x35d   :  { %v5608_v20 = vshll.u32 %v13331_v62, 16  ;;  %v5048_v60 = vrot.slane %v4561_v24, 5  ;;  %v5052_v55 = vrot.slane %v4563_v29, 5 }
 0x35e   :  { %v5583_v15 = vsel %vm11695_vm9, %v5578_v36, %v5582_v43  ;;  %v4969_v36 = vld [vmem:[#allocation2 + $0x70] sm:$0xe]  ;;  %v13336_v43 = vld [vmem:[#allocation2 + $0x7c] sm:$0x1] }
 0x35f   :  { %v5707_v10 = vunpack.c.l.b16 %v5583_v15  ;;  %v10259_v15 = vrot.slane %v4969_v36, 9  ;;  %v5622_v49 = vshll.u32 %v13336_v43, 16 }
 0x360   :  { %v4302_v46 = vpop.f32.mrf.mxu3  ;;  %5190 = vmatmul.bf16.gmra.mxu2 %v5106_v5  ;;  %v5615_v5 = vrot.slane %v5613_v39, 4  ;;  %v5107_v39 = vpack.c.b16 %v5096_v47, %v5095_v3  ;;  %v5452_v3 = vld [vmem:[#allocation2 + $0x88] sm:$0xf] }
 0x361   :  { %v13312_v13 = vadd.f32 %v4302_v46, %v4045_v50  ;;  %v3902_v12 = vpop.f32.mrf.mxu1  ;;  %v4560_v50 = vld [vmem:[#allocation2 + $0x68] sm:$0xf]  ;;  %v5604_v46 = vrot.slane %v5602_v6, 5 }
 0x362   :  { %v4713_v51 = vshrl.u32 %v4560_v50, 16  ;;  %v4716_v17 = vshll.u32 %v4560_v50, 16 }
 0x363   :  { %5802 = vmatmul.bf16.gmra.mxu0 %v5718_v32  ;;  %v4047_v9 = vpop.f32.mrf.mxu2  ;;  %v11228_v32 = vld [vmem:[#allocation2 + $0x64] sm:$0xf0]  ;;  %v5605_v30 = vor.u32 %v5604_v46, %v5601_v59  ;;  %v4722_v46 = vshll.u32 %v4561_v24, 16 }
 0x364   :  { %4916 = vmatmul.bf16.gmra.mxu1 %v4832_v25  ;;  %v4048_v1 = vadd.f32 %v4047_v9, %v3902_v12  ;;  %v4730_v12 = vshll.u32 %v4562_v11, 16  ;;  %v5619_v9 = vor.u32 %v5618_v19, %v5615_v5  ;;  %v4715_v8 = vrot.slane %v4713_v51, 4  ;;  %v13342_v50 = vpop.f32.mrf.mxu0 }
 0x365   :  { %5384 = vmatmul.bf16.gmra.mxu3 %v10343_v4  ;;  %v4727_v4 = vshrl.u32 %v4562_v11, 16  ;;  %v4718_v40 = vrot.slane %v4716_v17, 5  ;;  %v10347_v45 = vor.u32 %v11228_v32, %v10346_v61  ;;  %v5719_v11 = vpack.c.b16 %v5708_v18, %v5707_v10  ;;  %v4564_v10 = vld [vmem:[#allocation2 + $0x78] sm:$0xf] }
 0x366   :  { %v5606_v2 = vrot.slane %v5605_v30, 4  ;;  %v5620_v59 = vrot.slane %v5619_v9, 4  ;;  %v5610_v19 = vrot.slane %v5608_v20, 5  ;;  %v4736_v51 = vshll.u32 %v4563_v29, 16 }
 0x367   :  { %v4729_v6 = vrot.slane %v4727_v4, 4  ;;  %v4719_v26 = vor.u32 %v4718_v40, %v4715_v8  ;;  %v5624_v4 = vrot.slane %v5622_v49, 5  ;;  %v5049_v61 = vsel %vm11750_vm12, %v10258_v33, %v5048_v60 }
 0x368   :  { %v4305_v16 = vpop.f32.mrf.mxu3  ;;  %v5053_v32 = vsel %vm11750_vm12, %v10259_v15, %v5052_v55  ;;  %v4724_v57 = vrot.slane %v4722_v46, 5  ;;  %v4738_v24 = vrot.slane %v4736_v51, 5  ;;  %v5641_v9 = vshrl.u32 %v5452_v3, 16  ;;  %v11229_v51 = vld [vmem:[#allocation2 + $0x74] sm:$0xf0] }
 0x369   :  { %v13323_v54 = vadd.f32 %v4305_v16, %v4048_v1  ;;  %v3904_v41 = vpop.f32.mrf.mxu1  ;;  %v4732_v1 = vrot.slane %v4730_v12, 5  ;;  %v5450_v12 = vld [vmem:[#allocation2 + $0x80] sm:$0xf]  ;;  %v5625_v18 = vsel %vm11695_vm9, %v5620_v59, %v5624_v4  ;;  %v5644_v40 = vshll.u32 %v5452_v3, 16 }
 0x36a   :  { %v5627_v36 = vshrl.u32 %v5450_v12, 16  ;;  %v5630_v30 = vshll.u32 %v5450_v12, 16  ;;  %v5098_v33 = vunpack.c.l.b16 %v5053_v32  ;;  %v5710_v49 = vunpack.c.l.b16 %v5625_v18  ;;  %v13371_v18 = vld [vmem:[#allocation2 + $0x8c] sm:$0x1] }
 0x36b   :  { %v4049_v25 = vpop.f32.mrf.mxu2  ;;  %v4733_v5 = vor.u32 %v4732_v1, %v4729_v6  ;;  %v4741_v6 = vshrl.u32 %v4564_v10, 16  ;;  %v4744_v1 = vshll.u32 %v4564_v10, 16  ;;  %v5646_v59 = vrot.slane %v5644_v40, 5  ;;  %v4970_v10 = vld [vmem:[#allocation2 + $0x78] sm:$0xe] }
 0x36c   :  { %v4050_v63 = vadd.f32 %v4049_v25, %v3904_v41  ;;  %v4833_v41 = vpack.c.b16 %v4822_v31, %v4821_v14  ;;  %v5611_v25 = vsel %vm11695_vm9, %v5606_v2, %v5610_v19  ;;  %v4720_v14 = vrot.slane %v4719_v26, 4  ;;  %v13360_v60 = vpop.f32.mrf.mxu0  ;;  %v10350_v19 = vld [vmem:[#allocation2 + $0x70] sm:$0xf] }
 0x36d   :  { %v4734_v35 = vrot.slane %v4733_v5, 4  ;;  %v5709_v15 = vunpack.c.l.b16 %v5611_v25  ;;  %v5643_v2 = vrot.slane %v5641_v9, 4  ;;  %v4743_v26 = vrot.slane %v4741_v6, 4  ;;  %v11249_v5 = vld [vmem:[%s14802_s4 + $0x208] sm:$0xff]  ;;  %v4565_v25 = vld [vmem:[#allocation2 + $0x7c] sm:$0x1] }
 0x36e   :  { %v4725_v20 = vsel %vm11695_vm9, %v4720_v14, %v4724_v57  ;;  %v4746_v46 = vrot.slane %v4744_v1, 5  ;;  %6059 = vmatpush.bf16.msra.mxu1 %v11249_v5  ;;  %v10351_v57 = vor.u32 %v11229_v51, %v10350_v19  ;;  %v10260_v1 = vrot.slane %v4970_v10, 9  ;;  %v5454_v5 = vld [vmem:[#allocation2 + $0x90] sm:$0xf]  ;;  %v4568_v10 = vld [vmem:[#allocation2 + $0x88] sm:$0xf] }
 0x370   :  { %v4307_v28 = vpop.f32.mrf.mxu3  ;;  %5195 = vmatmul.bf16.gmra.mxu2 %v5107_v39 }
 0x371   :  { %v13339_v16 = vadd.f32 %v4307_v28, %v4050_v63  ;;  %v3907_v34 = vpop.f32.mrf.mxu1  ;;  %v4566_v63 = vld [vmem:[#allocation2 + $0x80] sm:$0xf] }
 0x372   :  { %v4755_v28 = vshrl.u32 %v4566_v63, 16  ;;  %v4758_v39 = vshll.u32 %v4566_v63, 16  ;;  %v4567_v63 = vld [vmem:[#allocation2 + $0x84] sm:$0x1] }
 0x373   :  { %5807 = vmatmul.bf16.gmra.mxu0 %v5719_v11  ;;  %v4052_v17 = vpop.f32.mrf.mxu2  ;;  %v5629_v11 = vrot.slane %v5627_v36, 4  ;;  %v4747_v36 = vor.u32 %v4746_v46, %v4743_v26 }
 0x374   :  { %4921 = vmatmul.bf16.gmra.mxu1 %v4833_v41  ;;  %v4053_v47 = vadd.f32 %v4052_v17, %v3907_v34  ;;  %v4739_v34 = vsel %vm11695_vm9, %v4734_v35, %v4738_v24  ;;  %v5632_v41 = vrot.slane %v5630_v30, 5  ;;  %v4823_v17 = vunpack.c.l.b16 %v4725_v20 }
 0x375   :  { %5389 = vmatmul.bf16.gmra.mxu3 %v10347_v45  ;;  %v5097_v45 = vunpack.c.l.b16 %v5049_v61  ;;  %v4824_v4 = vunpack.c.l.b16 %v4739_v34  ;;  %v4757_v12 = vrot.slane %v4755_v28, 4  ;;  %v4760_v3 = vrot.slane %v4758_v39, 5 }
 0x376   :  { %v5633_v14 = vor.u32 %v5632_v41, %v5629_v11  ;;  %v5647_v24 = vor.u32 %v5646_v59, %v5643_v2  ;;  %v5720_v30 = vpack.c.b16 %v5710_v49, %v5709_v15  ;;  %v5056_v28 = vrot.slane %v4565_v25, 5  ;;  %v13375_v15 = vpop.f32.mrf.mxu0 }
 0x377   :  { %v5108_v32 = vpack.c.b16 %v5098_v33, %v5097_v45  ;;  %v4834_v9 = vpack.c.b16 %v4824_v4, %v4823_v17  ;;  %v4761_v6 = vor.u32 %v4760_v3, %v4757_v12  ;;  %v5650_v39 = vshll.u32 %v13371_v18, 16  ;;  %v5456_v17 = vld [vmem:[#allocation2 + $0x98] sm:$0xf] }
 0x378   :  { %v4310_v31 = vpop.f32.mrf.mxu3  ;;  %v4750_v45 = vshll.u32 %v4565_v25, 16  ;;  %v5060_v20 = vrot.slane %v4567_v63, 5  ;;  %v5634_v34 = vrot.slane %v5633_v14, 4  ;;  %v4764_v11 = vshll.u32 %v4567_v63, 16  ;;  %v4570_v14 = vld [vmem:[#allocation2 + $0x90] sm:$0xf] }
 0x379   :  { %v13352_v29 = vadd.f32 %v4310_v31, %v4053_v47  ;;  %v13354_v8 = vpop.f32.mrf.mxu1  ;;  %v13367_v47 = vld [vmem:[#allocation2 + $0x84] sm:$0x1]  ;;  %v4971_v31 = vld [vmem:[#allocation2 + $0x80] sm:$0xe]  ;;  %v5648_v2 = vrot.slane %v5647_v24, 4  ;;  %v4748_v59 = vrot.slane %v4747_v36, 4  ;;  %v5057_v12 = vsel %vm11750_vm12, %v10260_v1, %v5056_v28 }
 0x37a   :  { %v5636_v40 = vshll.u32 %v13367_v47, 16  ;;  %v10261_v33 = vrot.slane %v4971_v31, 9  ;;  %v4762_v46 = vrot.slane %v4761_v6, 4  ;;  %v5652_v19 = vrot.slane %v5650_v39, 5 }
 0x37b   :  { %v13362_v55 = vpop.f32.mrf.mxu2  ;;  %v4752_v51 = vrot.slane %v4750_v45, 5  ;;  %v4766_v25 = vrot.slane %v4764_v11, 5  ;;  %v5655_v24 = vshrl.u32 %v5454_v5, 16  ;;  %v4769_v6 = vshrl.u32 %v4568_v10, 16 }
 0x37c   :  { %v5638_v26 = vrot.slane %v5636_v40, 5  ;;  %v5061_v3 = vsel %vm11750_vm12, %v10261_v33, %v5060_v20  ;;  %v5653_v63 = vsel %vm11695_vm9, %v5648_v2, %v5652_v19  ;;  %v5672_v40 = vshll.u32 %v5456_v17, 16 }
 0x37d   :  { %v4753_v31 = vsel %vm11695_vm9, %v4748_v59, %v4752_v51  ;;  %v4767_v36 = vsel %vm11695_vm9, %v4762_v46, %v4766_v25  ;;  %v4772_v1 = vshll.u32 %v4568_v10, 16  ;;  %v4783_v28 = vshrl.u32 %v4570_v14, 16  ;;  %v11248_v59 = vld [vmem:[%s14802_s4 + $0x200] sm:$0xff]  ;;  %v11230_v51 = vld [vmem:[#allocation2 + $0x84] sm:$0xf0]  ;;  %s11432_s4 = smov 128  }
 0x37e   :  { %v4786_v39 = vshll.u32 %v4570_v14, 16  ;;  %v5099_v45 = vunpack.c.l.b16 %v5057_v12  ;;  %v5100_v33 = vunpack.c.l.b16 %v5061_v3  ;;  %v5712_v11 = vunpack.c.l.b16 %v5653_v63  ;;  %6060 = vmatpush.bf16.msra.mxu1 %v11248_v59  ;;  %v13398_v25 = vpop.f32.mrf.mxu0  ;;  %v4569_v14 = vld [vmem:[#allocation2 + $0x8c] sm:$0x1] }
 0x37f   :  { %v4826_v2 = vunpack.c.l.b16 %v4767_v36  ;;  %v5674_v19 = vrot.slane %v5672_v40, 5  ;;  %v4785_v12 = vrot.slane %v4783_v28, 4  ;;  %v4972_v36 = vld [vmem:[#allocation2 + $0x88] sm:$0xe]  ;;  %v13402_v40 = vld [vmem:[#allocation2 + $0x94] sm:$0x1] }
 0x380   :  { %v13369_v61 = vpop.f32.mrf.mxu3  ;;  %5200 = vmatmul.bf16.gmra.mxu2 %v5108_v32  ;;  %v5639_v32 = vsel %vm11695_vm9, %v5634_v34, %v5638_v26  ;;  %v5657_v26 = vrot.slane %v5655_v24, 4  ;;  %v4788_v3 = vrot.slane %v4786_v39, 5  ;;  %v5109_v10 = vpack.c.b16 %v5100_v33, %v5099_v45 }
 0x381   :  { %v3912_v35 = vpop.f32.mrf.mxu1  ;;  %v5711_v34 = vunpack.c.l.b16 %v5639_v32  ;;  %v10262_v45 = vrot.slane %v4972_v36, 9  ;;  %v5064_v33 = vrot.slane %v4569_v14, 5 }
 0x382   :  { %v4789_v44 = vor.u32 %v4788_v3, %v4785_v12 }
 0x383   :  { %5812 = vmatmul.bf16.gmra.mxu0 %v5720_v30  ;;  %v4057_v41 = vpop.f32.mrf.mxu2  ;;  %v5658_v30 = vshll.u32 %v5454_v5, 16  ;;  %v5721_v24 = vpack.c.b16 %v5712_v11, %v5711_v34  ;;  %v5664_v34 = vshll.u32 %v13402_v40, 16  ;;  %v4778_v11 = vshll.u32 %v4569_v14, 16 }
 0x384   :  { %4926 = vmatmul.bf16.gmra.mxu1 %v4834_v9  ;;  %v4058_v49 = vadd.f32 %v4057_v41, %v3912_v35  ;;  %v5669_v9 = vshrl.u32 %v5456_v17, 16  ;;  %v4825_v41 = vunpack.c.l.b16 %v4753_v31  ;;  %v4771_v17 = vrot.slane %v4769_v6, 4  ;;  %v4571_v31 = vld [vmem:[#allocation2 + $0x94] sm:$0x1]  ;;  %v13404_v6 = vld [vmem:[#allocation2 + $0x9c] sm:$0x1] }
 0x385   :  { %5394 = vmatmul.bf16.gmra.mxu3 %v10351_v57  ;;  %v5660_v46 = vrot.slane %v5658_v30, 5  ;;  %v5678_v39 = vshll.u32 %v13404_v6, 16  ;;  %v5666_v3 = vrot.slane %v5664_v34, 5  ;;  %v4780_v14 = vrot.slane %v4778_v11, 5  ;;  %v11231_v34 = vld [vmem:[#allocation2 + $0x94] sm:$0xf0] }
 0x386   :  { %v5671_v5 = vrot.slane %v5669_v9, 4  ;;  %v4835_v9 = vpack.c.b16 %v4826_v2, %v4825_v41  ;;  %v4792_v41 = vshll.u32 %v4571_v31, 16 }
 0x388   :  { %v4315_v4 = vpop.f32.mrf.mxu3  ;;  %v5675_v28 = vor.u32 %v5674_v19, %v5671_v5  ;;  %v4790_v19 = vrot.slane %v4789_v44, 4 }
 0x389   :  { %v13383_v57 = vadd.f32 %v4315_v4, %v4058_v49  ;;  %v13385_v35 = vpop.f32.mrf.mxu1  ;;  %v10354_v49 = vld [vmem:[#allocation2 + $0x80] sm:$0xf]  ;;  %v4774_v4 = vrot.slane %v4772_v1, 5  ;;  %v5661_v1 = vor.u32 %v5660_v46, %v5657_v26  ;;  %v5680_v46 = vrot.slane %v5678_v39, 5 }
 0x38a   :  { %v10355_v30 = vor.u32 %v11230_v51, %v10354_v49  ;;  %v5676_v26 = vrot.slane %v5675_v28, 4 }
 0x38b   :  { %v13393_v20 = vpop.f32.mrf.mxu2  ;;  %v4775_v59 = vor.u32 %v4774_v4, %v4771_v17  ;;  %v5662_v49 = vrot.slane %v5661_v1, 4  ;;  %v5065_v17 = vsel %vm11750_vm12, %v10262_v45, %v5064_v33 }
 0x38c   :  { %14827 = vst [vmem:[#allocation8_spill] sm:$0xff] %v13393_v20  ;;  %v5068_v20 = vrot.slane %v4571_v31, 5  ;;  %v4794_v31 = vrot.slane %v4792_v41, 5  ;;  %v5681_v44 = vsel %vm11695_vm9, %v5676_v26, %v5680_v46  ;;  %v5844_v46 = vld [vmem:[#allocation2 + $0x10] sm:$0xe] }
 0x38d   :  { %v4776_v5 = vrot.slane %v4775_v59, 4  ;;  %v5667_v36 = vsel %vm11695_vm9, %v5662_v49, %v5666_v3  ;;  %v5714_v28 = vunpack.c.l.b16 %v5681_v44 }
 0x38e   :  { %v5713_v1 = vunpack.c.l.b16 %v5667_v36 }
 0x390   :  { %v13400_v32 = vpop.f32.mrf.mxu3  ;;  %5205 = vmatmul.bf16.gmra.mxu2 %v5109_v10  ;;  %v5722_v41 = vpack.c.b16 %v5714_v28, %v5713_v1 }
 0x391   :  { %14828 = vst [vmem:[#allocation9_spill] sm:$0xff] %v13400_v32  ;;  %v3917_v63 = vpop.f32.mrf.mxu1  ;;  %v10263_v32 = vrot.slane %v4973_v53, 9 }
 0x393   :  { %5817 = vmatmul.bf16.gmra.mxu0 %v5721_v24  ;;  %v4062_v10 = vpop.f32.mrf.mxu2  ;;  %v5069_v53 = vsel %vm11750_vm12, %v10263_v32, %v5068_v20  ;;  %v4781_v24 = vsel %vm11695_vm9, %v4776_v5, %v4780_v14  ;;  %v4795_v20 = vsel %vm11695_vm9, %v4790_v19, %v4794_v31  ;;  %v5101_v32 = vunpack.c.l.b16 %v5065_v17  ;;  %v5845_v5 = vld [vmem:[#allocation2 + $0x18] sm:$0xe]  ;;  %v11391_v31 = vld [vmem:[#allocation2 + $0x1c] sm:$0x1] }
 0x394   :  { %4931 = vmatmul.bf16.gmra.mxu1 %v4835_v9  ;;  %v4063_v2 = vadd.f32 %v4062_v10, %v3917_v63  ;;  %v13416_v63 = vpop.f32.mrf.mxu0  ;;  %v4827_v39 = vunpack.c.l.b16 %v4781_v24  ;;  %v4828_v59 = vunpack.c.l.b16 %v4795_v20  ;;  %v10358_v10 = vld [vmem:[#allocation2 + $0x90] sm:$0xf]  ;;  %v10440_v17 = vrot.slane %v5844_v46, 9 }
 0x395   :  { %5399 = vmatmul.bf16.gmra.mxu3 %v10355_v30  ;;  %v5102_v30 = vunpack.c.l.b16 %v5069_v53  ;;  %v10359_v49 = vor.u32 %v11231_v34, %v10358_v10  ;;  %v11390_v53 = vld [vmem:[#allocation2 + $0x14] sm:$0x1]  ;;  %v10441_v14 = vrot.slane %v5845_v5, 9  ;;  %v5898_v36 = vrot.slane %v11391_v31, 5 }
 0x396   :  { %v5894_v3 = vrot.slane %v11390_v53, 5 }
 0x397   :  { %v5110_v33 = vpack.c.b16 %v5102_v30, %v5101_v32  ;;  %v5899_v30 = vsel %vm11750_vm12, %v10441_v14, %v5898_v36 }
 0x398   :  { %v4320_v51 = vpop.f32.mrf.mxu3  ;;  %v5895_v32 = vsel %vm11750_vm12, %v10440_v17, %v5894_v3  ;;  %v11393_v3 = vld [vmem:[#allocation2 + $0x2c] sm:$0x1] }
 0x399   :  { %v13412_v4 = vadd.f32 %v4320_v51, %v4063_v2  ;;  %v13414_v12 = vpop.f32.mrf.mxu1  ;;  %v4836_v2 = vpack.c.b16 %v4828_v59, %v4827_v39  ;;  %v5973_v28 = vunpack.c.l.b16 %v5895_v32  ;;  %v5974_v39 = vunpack.c.l.b16 %v5899_v30 }
 0x39a   :  { %v5906_v14 = vrot.slane %v11393_v3, 5 }
 0x39b   :  { %v13426_v9 = vpop.f32.mrf.mxu2 }
 0x39c   :  { %v13430_v26 = vpop.f32.mrf.mxu0 }
 0x3a0   :  { %v13428_v45 = vpop.f32.mrf.mxu3  ;;  %5210 = vmatmul.bf16.gmra.mxu2 %v5110_v33  ;;  %v4524_v33 = vadd.f32 %v13307_v22, %v13252_v48  ;;  %v4525_v48 = vadd.f32 %v13315_v52, %v13260_v42  ;;  %v4526_v42 = vadd.f32 %v13342_v50, %v13267_v37  ;;  %v4527_v37 = vadd.f32 %v13360_v60, %v13285_v7 }
 0x3a1   :  { %v3922_v11 = vpop.f32.mrf.mxu1  ;;  %v4528_v7 = vadd.f32 %v13375_v15, %v13298_v21  ;;  %v4529_v21 = vadd.f32 %v13398_v25, %v13312_v13  ;;  %v5852_v25 = vld [vmem:[#allocation2 + $0x60] sm:$0xe] }
 0x3a3   :  { %5822 = vmatmul.bf16.gmra.mxu0 %v5722_v41  ;;  %v4067_v19 = vpop.f32.mrf.mxu2 }
 0x3a4   :  { %4936 = vmatmul.bf16.gmra.mxu1 %v4836_v2  ;;  %v4068_v51 = vadd.f32 %v4067_v19, %v3922_v11  ;;  %v5989_v11 = vpack.c.b16 %v5974_v39, %v5973_v28  ;;  %v13446_v41 = vpop.f32.mrf.mxu0  ;;  %v5846_v2 = vld [vmem:[#allocation2 + $0x20] sm:$0xe] }
 0x3a5   :  { %5404 = vmatmul.bf16.gmra.mxu3 %v10359_v49  ;;  %v5847_v49 = vld [vmem:[#allocation2 + $0x28] sm:$0xe]  ;;  %v10442_v19 = vrot.slane %v5846_v2, 9 }
 0x3a6   :  { %v10443_v53 = vrot.slane %v5847_v49, 9  ;;  %v5848_v49 = vld [vmem:[#allocation2 + $0x30] sm:$0xe] }
 0x3a8   :  { %v4325_v44 = vpop.f32.mrf.mxu3  ;;  %v5907_v30 = vsel %vm11750_vm12, %v10443_v53, %v5906_v14  ;;  %v11394_v53 = vld [vmem:[#allocation2 + $0x34] sm:$0x1] }
 0x3a9   :  { %v13432_v24 = vadd.f32 %v4325_v44, %v4068_v51  ;;  %v13434_v20 = vpop.f32.mrf.mxu1  ;;  %v11392_v51 = vld [vmem:[#allocation2 + $0x24] sm:$0x1]  ;;  %v5910_v3 = vrot.slane %v11394_v53, 5 }
 0x3aa   :  { %v5902_v17 = vrot.slane %v11392_v51, 5 }
 0x3ab   :  { %v13440_v1 = vpop.f32.mrf.mxu2 }
 0x3ac   :  { %v5903_v32 = vsel %vm11750_vm12, %v10442_v19, %v5902_v17  ;;  %v13458_v28 = vpop.f32.mrf.mxu0  ;;  %v10444_v17 = vrot.slane %v5848_v49, 9 }
 0x3b0   :  { %v13442_v59 = vpop.f32.mrf.mxu3 }
 0x3b1   :  { %v4902_v10 = vpop.f32.mrf.mxu1 }
 0x3b2   :  { %v4942_v34 = vadd.f32 %v4902_v10, %v4524_v33  ;;  %v5975_v33 = vunpack.c.l.b16 %v5903_v32  ;;  %v5976_v10 = vunpack.c.l.b16 %v5907_v30 }
 0x3b3   :  { %v5176_v46 = vpop.f32.mrf.mxu2 }
 0x3b4   :  { %6061 = vmatmul.bf16.vlgmr.msra.gmra.mxu1 %v5989_v11  ;;  %v5216_v5 = vadd.f32 %v5176_v46, %v4942_v34  ;;  %v5990_v2 = vpack.c.b16 %v5976_v10, %v5975_v33  ;;  %v5849_v46 = vld [vmem:[#allocation2 + $0x38] sm:$0xe]  ;;  %v13466_v51 = vpop.f32.mrf.mxu0  ;;  %v5911_v33 = vsel %vm11750_vm12, %v10444_v17, %v5910_v3  ;;  %v5851_v17 = vld [vmem:[#allocation2 + $0x48] sm:$0xe] }
 0x3b5   :  { %v10445_v14 = vrot.slane %v5849_v46, 9 }
 0x3b8   :  { %v5370_v31 = vpop.f32.mrf.mxu3 }
 0x3b9   :  { %v13450_v22 = vadd.f32 %v5370_v31, %v5216_v5  ;;  %v4904_v36 = vpop.f32.mrf.mxu1  ;;  %v11395_v31 = vld [vmem:[#allocation2 + $0x3c] sm:$0x1] }
 0x3ba   :  { %v13452_v44 = vadd.f32 %v4904_v36, %v4525_v48  ;;  %v5914_v48 = vrot.slane %v11395_v31, 5  ;;  %v5918_v31 = vrot.slane %v13282_v23, 5 }
 0x3bb   :  { %v13460_v39 = vpop.f32.mrf.mxu2 }
 0x3bc   :  { %v5915_v10 = vsel %vm11750_vm12, %v10445_v14, %v5914_v48  ;;  %v13484_v60 = vpop.f32.mrf.mxu0  ;;  %v10447_v48 = vrot.slane %v5851_v17, 9  ;;  %v10448_v17 = vrot.slane %v5852_v25, 9 }
 0x3c0   :  { %v13462_v34 = vpop.f32.mrf.mxu3 }
 0x3c1   :  { %v4907_v52 = vpop.f32.mrf.mxu1 }
 0x3c2   :  { %v4944_v11 = vadd.f32 %v4907_v52, %v4526_v42  ;;  %v5977_v52 = vunpack.c.l.b16 %v5911_v33 }
 0x3c3   :  { %v5181_v5 = vpop.f32.mrf.mxu2 }
 0x3c4   :  { %6066 = vmatmul.bf16.gmra.mxu1 %v5990_v2  ;;  %v5218_v19 = vadd.f32 %v5181_v5, %v4944_v11  ;;  %v5978_v11 = vunpack.c.l.b16 %v5915_v10  ;;  %v4514_v10 = vpop.f32.mrf.mxu0 }
 0x3c6   :  { %v5991_v5 = vpack.c.b16 %v5978_v11, %v5977_v52 }
 0x3c8   :  { %v5375_v36 = vpop.f32.mrf.mxu3 }
 0x3c9   :  { %v13470_v50 = vadd.f32 %v5375_v36, %v5218_v19  ;;  %v4909_v32 = vpop.f32.mrf.mxu1  ;;  %v5850_v19 = vld [vmem:[#allocation2 + $0x40] sm:$0xe]  ;;  %v5922_v36 = vrot.slane %v13277_v58, 5  ;;  %v4530_v58 = vadd.f32 %v13416_v63, %v13323_v54 }
 0x3ca   :  { %v13472_v30 = vadd.f32 %v4909_v32, %v4527_v37  ;;  %v10446_v14 = vrot.slane %v5850_v19, 9 }
 0x3cb   :  { %v13478_v42 = vpop.f32.mrf.mxu2  ;;  %v5923_v11 = vsel %vm11750_vm12, %v10447_v48, %v5922_v36 }
 0x3cc   :  { %v5919_v52 = vsel %vm11750_vm12, %v10446_v14, %v5918_v31  ;;  %v13502_v19 = vpop.f32.mrf.mxu0  ;;  %v5930_v14 = vrot.slane %v13309_v0, 5  ;;  %v4531_v31 = vadd.f32 %v13430_v26, %v13339_v16  ;;  %v5854_v16 = vld [vmem:[#allocation2 + $0x70] sm:$0xe]  ;;  %v5855_v26 = vld [vmem:[#allocation2 + $0x78] sm:$0xe] }
 0x3cd   :  { %v5979_v23 = vunpack.c.l.b16 %v5919_v52 }
 0x3d0   :  { %v13480_v2 = vpop.f32.mrf.mxu3 }
 0x3d1   :  { %v4912_v49 = vpop.f32.mrf.mxu1 }
 0x3d2   :  { %v4946_v46 = vadd.f32 %v4912_v49, %v4528_v7  ;;  %v5980_v7 = vunpack.c.l.b16 %v5923_v11 }
 0x3d3   :  { %v5186_v53 = vpop.f32.mrf.mxu2 }
 0x3d4   :  { %6071 = vmatmul.bf16.gmra.mxu1 %v5991_v5  ;;  %v5220_v3 = vadd.f32 %v5186_v53, %v4946_v46  ;;  %v5992_v13 = vpack.c.b16 %v5980_v7, %v5979_v23  ;;  %v5853_v5 = vld [vmem:[#allocation2 + $0x68] sm:$0xe]  ;;  %v5926_v53 = vrot.slane %v13302_v27, 5  ;;  %v4532_v27 = vadd.f32 %v13446_v41, %v13352_v29 }
 0x3d5   :  { %v10450_v23 = vrot.slane %v5854_v16, 9  ;;  %v5934_v7 = vrot.slane %v13331_v62, 5 }
 0x3d6   :  { %v5927_v63 = vsel %vm11750_vm12, %v10448_v17, %v5926_v53  ;;  %v4534_v53 = vadd.f32 %v13466_v51, %v13383_v57 }
 0x3d7   :  { %v5935_v29 = vsel %vm11750_vm12, %v10450_v23, %v5934_v7 }
 0x3d8   :  { %v5380_v37 = vpop.f32.mrf.mxu3 }
 0x3d9   :  { %v13490_v15 = vadd.f32 %v5380_v37, %v5220_v3  ;;  %v4914_v32 = vpop.f32.mrf.mxu1  ;;  %v10449_v3 = vrot.slane %v5853_v5, 9  ;;  %v5981_v37 = vunpack.c.l.b16 %v5927_v63  ;;  %v5983_v5 = vunpack.c.l.b16 %v5935_v29 }
 0x3da   :  { %v13492_v33 = vadd.f32 %v4914_v32, %v4529_v21  ;;  %v4519_v32 = vpop.f32.mrf.mxu0 }
 0x3db   :  { %v5931_v36 = vsel %vm11750_vm12, %v10449_v3, %v5930_v14 }
 0x3dc   :  { %v5982_v21 = vunpack.c.l.b16 %v5931_v36  ;;  %v5942_v36 = vrot.slane %v13367_v47, 5 }
 0x3de   :  { %v5993_v11 = vpack.c.b16 %v5982_v21, %v5981_v37  ;;  %v5946_v21 = vrot.slane %v13371_v18, 5  ;;  %v5859_v18 = vld [vmem:[#allocation2 + $0x98] sm:$0xe] }
 0x3e1   :  { %v4917_v49 = vpop.f32.mrf.mxu1 }
 0x3e2   :  { %v13500_v46 = vadd.f32 %v4917_v49, %v4530_v58  ;;  %v10451_v58 = vrot.slane %v5855_v26, 9  ;;  %v5938_v49 = vrot.slane %v13336_v43, 5  ;;  %v4536_v26 = vadd.f32 %v4514_v10, %v13412_v4 }
 0x3e4   :  { %6076 = vmatmul.bf16.gmra.mxu1 %v5992_v13  ;;  %v13520_v13 = vpop.f32.mrf.mxu0  ;;  %v5939_v41 = vsel %vm11750_vm12, %v10451_v58, %v5938_v49  ;;  %v5858_v58 = vld [vmem:[#allocation2 + $0x90] sm:$0xe] }
 0x3e5   :  { %v5984_v17 = vunpack.c.l.b16 %v5939_v41  ;;  %v10454_v29 = vrot.slane %v5858_v58, 9  ;;  %v5950_v41 = vrot.slane %v13402_v40, 5 }
 0x3e7   :  { %v5994_v14 = vpack.c.b16 %v5984_v17, %v5983_v5  ;;  %v10455_v5 = vrot.slane %v5859_v18, 9  ;;  %v5954_v17 = vrot.slane %v13404_v6, 5  ;;  %v5382_v18 = vpop.f32.mrf.mxu3 }
 0x3e9   :  { %v4919_v48 = vpop.f32.mrf.mxu1  ;;  %v5955_v4 = vsel %vm11750_vm12, %v10455_v5, %v5954_v17 }
 0x3ea   :  { %v13508_v54 = vadd.f32 %v4919_v48, %v4531_v31  ;;  %v5856_v31 = vld [vmem:[#allocation2 + $0x80] sm:$0xe]  ;;  %v5857_v48 = vld [vmem:[#allocation2 + $0x88] sm:$0xe] }
 0x3eb   :  { %v10452_v63 = vrot.slane %v5856_v31, 9  ;;  %v10453_v37 = vrot.slane %v5857_v48, 9  ;;  %v4538_v31 = vadd.f32 %v4519_v32, %v13432_v24 }
 0x3ec   :  { %v5788_v43 = vpop.f32.mrf.mxu0 }
 0x3ed   :  { %v5947_v57 = vsel %vm11750_vm12, %v10453_v37, %v5946_v21 }
 0x3ee   :  { %v5986_v16 = vunpack.c.l.b16 %v5947_v57  ;;  %v5828_v57 = vadd.f32 %v5788_v43, %v13450_v22 }
 0x3ef   :  { %v5385_v5 = vpop.f32.mrf.mxu3 }
 0x3f1   :  { %v4922_v52 = vpop.f32.mrf.mxu1 }
 0x3f2   :  { %v13516_v0 = vadd.f32 %v4922_v52, %v4532_v27  ;;  %v5943_v52 = vsel %vm11750_vm12, %v10452_v63, %v5942_v36 }
 0x3f4   :  { %6081 = vmatmul.bf16.gmra.mxu1 %v5993_v11  ;;  %v5790_v51 = vpop.f32.mrf.mxu0  ;;  %v5985_v11 = vunpack.c.l.b16 %v5943_v52  ;;  %v5217_v52 = vadd.f32 %v13460_v39, %v13452_v44 }
 0x3f6   :  { %v5995_v47 = vpack.c.b16 %v5986_v16, %v5985_v11  ;;  %v5411_v24 = vadd.f32 %v13462_v34, %v5217_v52 }
 0x3f8   :  { %v5829_v32 = vadd.f32 %v5790_v51, %v5411_v24 }
 0x3f9   :  { %v13522_v25 = vpop.f32.mrf.mxu1 }
 0x3fc   :  { %v5793_v49 = vpop.f32.mrf.mxu0 }
 0x3fd   :  { %v5830_v44 = vadd.f32 %v5793_v49, %v13470_v50 }
 0x401   :  { %v4927_v3 = vpop.f32.mrf.mxu1 }
 0x402   :  { %v13530_v62 = vadd.f32 %v4927_v3, %v4534_v53  ;;  %v5951_v3 = vsel %vm11750_vm12, %v10454_v29, %v5950_v41 }
 0x403   :  { %v5987_v10 = vunpack.c.l.b16 %v5951_v3 }
 0x404   :  { %6086 = vmatmul.bf16.gmra.mxu1 %v5994_v14  ;;  %v5988_v14 = vunpack.c.l.b16 %v5955_v4  ;;  %v5795_v48 = vpop.f32.mrf.mxu0 }
 0x406   :  { %v5996_v40 = vpack.c.b16 %v5988_v14, %v5987_v10  ;;  %v5387_v14 = vpop.f32.mrf.mxu3 }
 0x409   :  { %v13534_v27 = vpop.f32.mrf.mxu1 }
 0x40c   :  { %v5798_v6 = vpop.f32.mrf.mxu0 }
 0x40d   :  { %v5832_v21 = vadd.f32 %v5798_v6, %v13490_v15  ;;  %v5219_v15 = vadd.f32 %v13478_v42, %v13472_v30 }
 0x40f   :  { %v5413_v34 = vadd.f32 %v13480_v2, %v5219_v15 }
 0x411   :  { %v4932_v23 = vpop.f32.mrf.mxu1  ;;  %v5831_v41 = vadd.f32 %v5795_v48, %v5413_v34 }
 0x412   :  { %v13541_v7 = vadd.f32 %v4932_v23, %v4536_v26 }
 0x414   :  { %6091 = vmatmul.bf16.gmra.mxu1 %v5995_v47  ;;  %v5188_v47 = vpop.f32.mrf.mxu2  ;;  %v5800_v43 = vpop.f32.mrf.mxu0 }
 0x415   :  { %v5221_v50 = vadd.f32 %v5188_v47, %v13492_v33 }
 0x419   :  { %v13545_v53 = vpop.f32.mrf.mxu1 }
 0x41c   :  { %v5191_v29 = vpop.f32.mrf.mxu2  ;;  %v5803_v10 = vpop.f32.mrf.mxu0 }
 0x41d   :  { %v5222_v48 = vadd.f32 %v5191_v29, %v13500_v46 }
 0x421   :  { %v4937_v63 = vpop.f32.mrf.mxu1 }
 0x422   :  { %v13552_v36 = vadd.f32 %v4937_v63, %v4538_v31  ;;  %v5415_v31 = vadd.f32 %v5382_v18, %v5221_v50 }
 0x424   :  { %6096 = vmatmul.bf16.gmra.mxu1 %v5996_v40  ;;  %v5193_v30 = vpop.f32.mrf.mxu2  ;;  %v5805_v63 = vpop.f32.mrf.mxu0  ;;  %v5833_v40 = vadd.f32 %v5800_v43, %v5415_v31 }
 0x425   :  { %v5223_v33 = vadd.f32 %v5193_v30, %v13508_v54 }
 0x427   :  { %v5417_v15 = vadd.f32 %v5387_v14, %v5223_v33 }
 0x429   :  { %v13554_v37 = vpop.f32.mrf.mxu1 }
 0x42c   :  { %v5196_v6 = vpop.f32.mrf.mxu2 }
 0x42d   :  { %v5224_v34 = vadd.f32 %v5196_v6, %v13516_v0 }
 0x431   :  { %v6062_v11 = vpop.f32.mrf.mxu1 }
 0x432   :  { %v13560_v16 = vadd.f32 %v6062_v11, %v5828_v57  ;;  %v5416_v11 = vadd.f32 %v5385_v5, %v5222_v48 }
 0x434   :  { %v5198_v46 = vpop.f32.mrf.mxu2 }
 0x439   :  { %v6064_v26 = vpop.f32.mrf.mxu1 }
 0x43a   :  { %v13563_v23 = vadd.f32 %v6064_v26, %v5829_v32  ;;  %v5390_v32 = vpop.f32.mrf.mxu3  ;;  %v5808_v26 = vpop.f32.mrf.mxu0 }
 0x43c   :  { %v6118_v58 = vadd.f32 %v13563_v23, %v13560_v16 }
 0x441   :  { %v6067_v22 = vpop.f32.mrf.mxu1 }
 0x442   :  { %v13570_v39 = vadd.f32 %v6067_v22, %v5830_v44  ;;  %v5392_v43 = vpop.f32.mrf.mxu3  ;;  %v5810_v5 = vpop.f32.mrf.mxu0 }
 0x444   :  { %v6119_v51 = vadd.f32 %v6118_v58, %v13570_v39  ;;  %v4055_v58 = vadd.f32 %v13362_v55, %v13354_v8 }
 0x446   :  { %v4339_v22 = vadd.f32 %v13369_v61, %v4055_v58 }
 0x448   :  { %v4533_v54 = vadd.f32 %v13458_v28, %v4339_v22 }
 0x449   :  { %v6069_v17 = vpop.f32.mrf.mxu1 }
 0x44a   :  { %v13574_v3 = vadd.f32 %v6069_v17, %v5831_v41  ;;  %v5418_v17 = vadd.f32 %v5390_v32, %v5224_v34  ;;  %v4951_v8 = vadd.f32 %v13522_v25, %v4533_v54  ;;  %v5395_v50 = vpop.f32.mrf.mxu3 }
 0x44c   :  { %v6120_v4 = vadd.f32 %v6119_v51, %v13574_v3  ;;  %v5835_v51 = vadd.f32 %v5805_v63, %v5417_v15  ;;  %v5836_v30 = vadd.f32 %v5808_v26, %v5418_v17  ;;  %v14830_v63 = vld [vmem:[#allocation9_spill] sm:$0xff] }
 0x451   :  { %v6072_v42 = vpop.f32.mrf.mxu1 }
 0x452   :  { %v13578_v49 = vadd.f32 %v6072_v42, %v5832_v21  ;;  %v5834_v21 = vadd.f32 %v5803_v10, %v5416_v11  ;;  %v5225_v10 = vadd.f32 %v5198_v46, %v4951_v8  ;;  %v14829_v42 = vld [vmem:[#allocation8_spill] sm:$0xff]  ;;  %v5397_v32 = vpop.f32.mrf.mxu3 }
 0x453   :  { %v4060_v0 = vadd.f32 %v14829_v42, %v13385_v35 }
 0x454   :  { %v6121_v2 = vadd.f32 %v6120_v4, %v13578_v49  ;;  %v5201_v4 = vpop.f32.mrf.mxu2  ;;  %v5419_v31 = vadd.f32 %v5392_v43, %v5225_v10 }
 0x455   :  { %v4341_v48 = vadd.f32 %v14830_v63, %v4060_v0  ;;  %v5226_v25 = vadd.f32 %v5201_v4, %v13530_v62  ;;  %v4065_v62 = vadd.f32 %v13426_v9, %v13414_v12 }
 0x456   :  { %v5837_v6 = vadd.f32 %v5810_v5, %v5419_v31 }
 0x457   :  { %v4535_v11 = vadd.f32 %v13484_v60, %v4341_v48  ;;  %v5420_v33 = vadd.f32 %v5395_v50, %v5226_v25  ;;  %v4343_v34 = vadd.f32 %v13428_v45, %v4065_v62  ;;  %v4070_v45 = vadd.f32 %v13440_v1, %v13434_v20 }
 0x459   :  { %v6074_v52 = vpop.f32.mrf.mxu1  ;;  %v4953_v35 = vadd.f32 %v13534_v27, %v4535_v11  ;;  %v4537_v5 = vadd.f32 %v13502_v19, %v4343_v34  ;;  %v4345_v19 = vadd.f32 %v13442_v59, %v4070_v45 }
 0x45a   :  { %v13582_v57 = vadd.f32 %v6074_v52, %v5833_v40  ;;  %v5400_v43 = vpop.f32.mrf.mxu3 }
 0x45b   :  { %v4955_v12 = vadd.f32 %v13545_v53, %v4537_v5  ;;  %v4539_v48 = vadd.f32 %v13520_v13, %v4345_v19 }
 0x45c   :  { %v6122_v24 = vadd.f32 %v6121_v2, %v13582_v57  ;;  %v5813_v2 = vpop.f32.mrf.mxu0  ;;  %v5203_v40 = vpop.f32.mrf.mxu2 }
 0x45d   :  { %v5838_v58 = vadd.f32 %v5813_v2, %v5420_v33 }
 0x461   :  { %v6077_v47 = vpop.f32.mrf.mxu1 }
 0x462   :  { %v13588_v18 = vadd.f32 %v6077_v47, %v5834_v21  ;;  %v5227_v47 = vadd.f32 %v5203_v40, %v4953_v35  ;;  %v5402_v4 = vpop.f32.mrf.mxu3 }
 0x464   :  { %v6123_v44 = vadd.f32 %v6122_v24, %v13588_v18  ;;  %v5815_v26 = vpop.f32.mrf.mxu0  ;;  %v5206_v46 = vpop.f32.mrf.mxu2  ;;  %v5421_v22 = vadd.f32 %v5397_v32, %v5227_v47 }
 0x465   :  { %v5228_v27 = vadd.f32 %v5206_v46, %v13541_v7 }
 0x469   :  { %v6079_v29 = vpop.f32.mrf.mxu1 }
 0x46a   :  { %v13594_v41 = vadd.f32 %v6079_v29, %v5835_v51  ;;  %v5839_v51 = vadd.f32 %v5815_v26, %v5421_v22  ;;  %v5405_v63 = vpop.f32.mrf.mxu3 }
 0x46c   :  { %v6124_v55 = vadd.f32 %v6123_v44, %v13594_v41  ;;  %v5818_v29 = vpop.f32.mrf.mxu0  ;;  %v5208_v8 = vpop.f32.mrf.mxu2 }
 0x46d   :  { %v5229_v10 = vadd.f32 %v5208_v8, %v4955_v12 }
 0x46f   :  { %v5423_v42 = vadd.f32 %v5402_v4, %v5229_v10 }
 0x471   :  { %v6082_v61 = vpop.f32.mrf.mxu1 }
 0x472   :  { %v13600_v14 = vadd.f32 %v6082_v61, %v5836_v30 }
 0x474   :  { %v6125_v28 = vadd.f32 %v6124_v55, %v13600_v14  ;;  %v5422_v55 = vadd.f32 %v5400_v43, %v5228_v27  ;;  %v5820_v7 = vpop.f32.mrf.mxu0  ;;  %v5211_v31 = vpop.f32.mrf.mxu2 }
 0x475   :  { %v5841_v2 = vadd.f32 %v5820_v7, %v5423_v42 }
 0x476   :  { %v5840_v30 = vadd.f32 %v5818_v29, %v5422_v55 }
 0x479   :  { %v6084_v52 = vpop.f32.mrf.mxu1 }
 0x47a   :  { %v13606_v24 = vadd.f32 %v6084_v52, %v5837_v6  ;;  %v4957_v6 = vadd.f32 %v13554_v37, %v4539_v48 }
 0x47c   :  { %v6126_v21 = vadd.f32 %v6125_v28, %v13606_v24  ;;  %v5230_v28 = vadd.f32 %v5211_v31, %v13552_v36  ;;  %v5823_v20 = vpop.f32.mrf.mxu0  ;;  %v5213_v1 = vpop.f32.mrf.mxu2 }
 0x47d   :  { %v5231_v11 = vadd.f32 %v5213_v1, %v4957_v6 }
 0x47e   :  { %v5424_v25 = vadd.f32 %v5405_v63, %v5230_v28 }
 0x480   :  { %v5842_v32 = vadd.f32 %v5823_v20, %v5424_v25 }
 0x481   :  { %v6087_v15 = vpop.f32.mrf.mxu1 }
 0x482   :  { %v13612_v44 = vadd.f32 %v6087_v15, %v5838_v58 }
 0x484   :  { %v6127_v60 = vadd.f32 %v6126_v21, %v13612_v44  ;;  %v5407_v21 = vpop.f32.mrf.mxu3  ;;  %v5825_v36 = vpop.f32.mrf.mxu0 }
 0x485   :  { %v5425_v59 = vadd.f32 %v5407_v21, %v5231_v11 }
 0x487   :  { %v5843_v47 = vadd.f32 %v5825_v36, %v5425_v59 }
 0x489   :  { %v6089_v54 = vpop.f32.mrf.mxu1 }
 0x48a   :  { %v6113_v17 = vadd.f32 %v6089_v54, %v5839_v51 }
 0x48c   :  { %v6128_v9 = vadd.f32 %v6127_v60, %v6113_v17 }
 0x491   :  { %v6092_v50 = vpop.f32.mrf.mxu1 }
 0x492   :  { %v6114_v61 = vadd.f32 %v6092_v50, %v5840_v30 }
 0x494   :  { %v6129_v0 = vadd.f32 %v6128_v9, %v6114_v61 }
 0x499   :  { %v6094_v53 = vpop.f32.mrf.mxu1 }
 0x49a   :  { %v6115_v40 = vadd.f32 %v6094_v53, %v5841_v2 }
 0x49c   :  { %v6130_v52 = vadd.f32 %v6129_v0, %v6115_v40 }
 0x4a1   :  { %v6097_v33 = vpop.f32.mrf.mxu1 }
 0x4a2   :  { %v6116_v35 = vadd.f32 %v6097_v33, %v5842_v32 }
 0x4a4   :  { %v6131_v26 = vadd.f32 %v6130_v52, %v6116_v35 }
 0x4a9   :  { %v6099_v58 = vpop.f32.mrf.mxu1 }
 0x4aa   :  { %v6117_v46 = vadd.f32 %v6099_v58, %v5843_v47 }
 0x4ac   :  { %v6132_v15 = vadd.f32 %v6131_v26, %v6117_v46 }
 0x4ae   :  { %v6133_v13 = vrot.slane %v6132_v15, 4 }
 0x4b0   :  { %v6134_v62 = vadd.f32 %v6133_v13, %v6132_v15 }
 0x4b2   :  { %v6135_v22 = vrot.slane %v6134_v62, 2 }
 0x4b4   :  { %v6136_v60 = vadd.f32 %v6135_v22, %v6134_v62 }
 0x4b6   :  { %v6137_v37 = vrot.slane %v6136_v60, 1 }
 0x4b8   :  { %v6138_v43 = vadd.f32 %v6137_v37, %v6136_v60 }
 0x4ba   :  { %v6139_v34 = vmul.f32 0.0078125, %v6138_v43 }
 0x4bc   :  { %v13626_v27 = vsub.f32 %v13560_v16, %v6139_v34  ;;  %v13629_v51 = vsub.f32 %v13563_v23, %v6139_v34  ;;  %v13632_v29 = vsub.f32 %v13570_v39, %v6139_v34  ;;  %v13635_v54 = vsub.f32 %v13574_v3, %v6139_v34 }
 0x4bd   :  { %v13638_v5 = vsub.f32 %v13578_v49, %v6139_v34  ;;  %v13641_v8 = vsub.f32 %v13582_v57, %v6139_v34  ;;  %v13644_v55 = vsub.f32 %v13588_v18, %v6139_v34  ;;  %v13647_v16 = vsub.f32 %v13594_v41, %v6139_v34 }
 0x4be   :  { %v13650_v23 = vsub.f32 %v13600_v14, %v6139_v34  ;;  %v13653_v39 = vsub.f32 %v13606_v24, %v6139_v34  ;;  %v13656_v3 = vsub.f32 %v13612_v44, %v6139_v34  ;;  %v13658_v49 = vsub.f32 %v6113_v17, %v6139_v34 }
 0x4bf   :  { %v13660_v12 = vsub.f32 %v6114_v61, %v6139_v34  ;;  %v13662_v57 = vsub.f32 %v6115_v40, %v6139_v34  ;;  %v13664_v18 = vsub.f32 %v6116_v35, %v6139_v34  ;;  %v13666_v9 = vsub.f32 %v6117_v46, %v6139_v34  ;;  %v6194_v34 = vld [vmem:[%s14803_s5] sm:$0x1] }
 0x4c0   :  { %v6156_v41 = vmul.f32 %v13626_v27, %v13626_v27  ;;  %v6157_v14 = vmul.f32 %v13629_v51, %v13629_v51  ;;  %v6158_v24 = vmul.f32 %v13632_v29, %v13632_v29  ;;  %v6159_v17 = vmul.f32 %v13635_v54, %v13635_v54 }
 0x4c1   :  { %v6160_v10 = vmul.f32 %v13638_v5, %v13638_v5  ;;  %v6161_v50 = vmul.f32 %v13641_v8, %v13641_v8  ;;  %v6162_v61 = vmul.f32 %v13644_v55, %v13644_v55  ;;  %v6163_v42 = vmul.f32 %v13647_v16, %v13647_v16 }
 0x4c2   :  { %v6172_v44 = vadd.f32 %v6157_v14, %v6156_v41  ;;  %v6164_v31 = vmul.f32 %v13650_v23, %v13650_v23  ;;  %v6165_v28 = vmul.f32 %v13653_v39, %v13653_v39  ;;  %v6166_v63 = vmul.f32 %v13656_v3, %v13656_v3 }
 0x4c3   :  { %v6167_v48 = vmul.f32 %v13658_v49, %v13658_v49  ;;  %v6168_v25 = vmul.f32 %v13660_v12, %v13660_v12  ;;  %v6169_v52 = vmul.f32 %v13662_v57, %v13662_v57  ;;  %v6170_v1 = vmul.f32 %v13664_v18, %v13664_v18 }
 0x4c4   :  { %v6173_v4 = vadd.f32 %v6172_v44, %v6158_v24  ;;  %v6171_v32 = vmul.f32 %v13666_v9, %v13666_v9 }
 0x4c6   :  { %v6174_v30 = vadd.f32 %v6173_v4, %v6159_v17  ;;  %v11381_v17 = vld [vmem:[%s14804_s6] ss:$0 sm:$0xff] }
 0x4c8   :  { %v6175_v45 = vadd.f32 %v6174_v30, %v6160_v10 }
 0x4ca   :  { %v6176_v7 = vadd.f32 %v6175_v45, %v6161_v50 }
 0x4cc   :  { %v6177_v0 = vadd.f32 %v6176_v7, %v6162_v61 }
 0x4ce   :  { %v6178_v19 = vadd.f32 %v6177_v0, %v6163_v42 }
 0x4d0   :  { %v6179_v2 = vadd.f32 %v6178_v19, %v6164_v31 }
 0x4d2   :  { %v6180_v53 = vadd.f32 %v6179_v2, %v6165_v28 }
 0x4d4   :  { %v6181_v40 = vadd.f32 %v6180_v53, %v6166_v63 }
 0x4d6   :  { %v6182_v6 = vadd.f32 %v6181_v40, %v6167_v48 }
 0x4d8   :  { %v6183_v20 = vadd.f32 %v6182_v6, %v6168_v25 }
 0x4da   :  { %v6184_v11 = vadd.f32 %v6183_v20, %v6169_v52 }
 0x4dc   :  { %v6185_v33 = vadd.f32 %v6184_v11, %v6170_v1 }
 0x4de   :  { %v6186_v35 = vadd.f32 %v6185_v33, %v6171_v32 }
 0x4e0   :  { %v6187_v21 = vrot.slane %v6186_v35, 4 }
 0x4e2   :  { %v6188_v59 = vadd.f32 %v6187_v21, %v6186_v35 }
 0x4e4   :  { %v6189_v26 = vrot.slane %v6188_v59, 2 }
 0x4e6   :  { %v6190_v36 = vadd.f32 %v6189_v26, %v6188_v59 }
 0x4e8   :  { %v6191_v47 = vrot.slane %v6190_v36, 1 }
 0x4ea   :  { %v6192_v58 = vadd.f32 %v6191_v47, %v6190_v36 }
 0x4ec   :  { %v6193_v46 = vmul.f32 0.0078125, %v6192_v58 }
 0x4ee   :  { %v6195_v15 = vadd.f32 1e-05, %v6193_v46 }
 0x4f0   :  { %11385 = vrsqrt.f32 %v6195_v15  ;;  %vm6202_vm1 = vweird.f32 %v6195_v15 }
 0x4f6   :  { %v11386_v13 = vpop.eup %11385 }
 0x4f7   :  { %v6197_v62 = vmul.f32 %v11386_v13, %v6195_v15  ;;  %vm6203_vm0 = vweird.f32 %v11386_v13 }
 0x4f8   :  { %vm6204_vm2 = vmor %vm6202_vm1, %vm6203_vm0 }
 0x4f9   :  { %v6198_v22 = vmul.f32 %v11386_v13, %v6197_v62 }
 0x4fb   :  { %v6199_v60 = vmul.f32 0.5, %v6198_v22 }
 0x4fd   :  { %v6200_v37 = vsub.f32 1.5, %v6199_v60 }
 0x4ff   :  { %v6201_v43 = vmul.f32 %v11386_v13, %v6200_v37 }
 0x501   :  { %v6205_v41 = vsel %vm6204_vm2, %v11386_v13, %v6201_v43 }
 0x502   :  { %v6206_v14 = vmul.f32 %v6205_v41, %v6194_v34 }
 0x504   :  { %v6208_v24 = vperm.slane %v6206_v14, 0 }
 0x506   :  { %v6210_v44 = vmul.f32 %v6208_v24, %v13626_v27  ;;  %v6211_v4 = vmul.f32 %v6208_v24, %v13629_v51  ;;  %v6212_v10 = vmul.f32 %v6208_v24, %v13632_v29  ;;  %v6213_v30 = vmul.f32 %v6208_v24, %v13635_v54 }
 0x507   :  { %v6214_v50 = vmul.f32 %v6208_v24, %v13638_v5  ;;  %v6215_v42 = vmul.f32 %v6208_v24, %v13641_v8  ;;  %v6216_v27 = vmul.f32 %v6208_v24, %v13644_v55  ;;  %v6217_v31 = vmul.f32 %v6208_v24, %v13647_v16 }
 0x508   :  { %v6230_v45 = vadd.f32 %v11381_v17, %v6210_v44  ;;  %v6231_v61 = vadd.f32 %v11381_v17, %v6211_v4  ;;  %v6232_v7 = vadd.f32 %v11381_v17, %v6212_v10  ;;  %v6233_v0 = vadd.f32 %v11381_v17, %v6213_v30 }
 0x509   :  { %v6234_v19 = vadd.f32 %v11381_v17, %v6214_v50  ;;  %v6218_v28 = vmul.f32 %v6208_v24, %v13650_v23  ;;  %v6219_v51 = vmul.f32 %v6208_v24, %v13653_v39  ;;  %v6220_v29 = vmul.f32 %v6208_v24, %v13656_v3 }
 0x50a   :  { %v6246_v54 = vmul.f32 0.1, %v6230_v45  ;;  %v6221_v5 = vmul.f32 %v6208_v24, %v13658_v49  ;;  %v6222_v2 = vmul.f32 %v6208_v24, %v13660_v12  ;;  %v6247_v63 = vmul.f32 0.1, %v6231_v61 }
 0x50b   :  { %v6248_v53 = vmul.f32 0.1, %v6232_v7  ;;  %v6223_v8 = vmul.f32 %v6208_v24, %v13662_v57  ;;  %v6224_v55 = vmul.f32 %v6208_v24, %v13664_v18  ;;  %v6235_v48 = vadd.f32 %v11381_v17, %v6215_v42 }
 0x50c   :  { %v6249_v16 = vmul.f32 0.1, %v6233_v0  ;;  %v6225_v40 = vmul.f32 %v6208_v24, %v13666_v9  ;;  %v6236_v23 = vadd.f32 %v11381_v17, %v6216_v27  ;;  %v6237_v25 = vadd.f32 %v11381_v17, %v6217_v31 }
 0x50d   :  { %v6250_v39 = vmul.f32 0.1, %v6234_v19  ;;  %v6238_v6 = vadd.f32 %v11381_v17, %v6218_v28  ;;  %v6239_v3 = vadd.f32 %v11381_v17, %v6219_v51  ;;  %v6240_v52 = vadd.f32 %v11381_v17, %v6220_v29 }
 0x50e   :  { %v6262_v20 = vmax.f32 %v6230_v45, %v6246_v54  ;;  %v6241_v49 = vadd.f32 %v11381_v17, %v6221_v5  ;;  %v6242_v1 = vadd.f32 %v11381_v17, %v6222_v2  ;;  %v6263_v12 = vmax.f32 %v6231_v61, %v6247_v63 }
 0x50f   :  { %v6264_v11 = vmax.f32 %v6232_v7, %v6248_v53  ;;  %v6243_v32 = vadd.f32 %v11381_v17, %v6223_v8  ;;  %v6244_v33 = vadd.f32 %v11381_v17, %v6224_v55  ;;  %v6251_v57 = vmul.f32 0.1, %v6235_v48 }
 0x510   :  { %v6265_v35 = vmax.f32 %v6233_v0, %v6249_v16  ;;  %v6245_v18 = vadd.f32 %v11381_v17, %v6225_v40  ;;  %v6252_v21 = vmul.f32 0.1, %v6236_v23  ;;  %v6253_v59 = vmul.f32 0.1, %v6237_v25 }
 0x511   :  { %v6266_v26 = vmax.f32 %v6234_v19, %v6250_v39  ;;  %v6254_v9 = vmul.f32 0.1, %v6238_v6  ;;  %v6255_v36 = vmul.f32 0.1, %v6239_v3  ;;  %v6256_v47 = vmul.f32 0.1, %v6240_v52 }
 0x512   :  { %v6278_v58 = vpack.c.bf16 %v6262_v20, %v6262_v20  ;;  %v6257_v46 = vmul.f32 0.1, %v6241_v49  ;;  %v6258_v15 = vmul.f32 0.1, %v6242_v1  ;;  %v6279_v13 = vpack.c.bf16 %v6263_v12, %v6263_v12 }
 0x513   :  { %v6280_v62 = vpack.c.bf16 %v6264_v11, %v6264_v11  ;;  %v6259_v22 = vmul.f32 0.1, %v6243_v32  ;;  %v6260_v60 = vmul.f32 0.1, %v6244_v33  ;;  %v6267_v37 = vmax.f32 %v6235_v48, %v6251_v57  ;;  %v6456_v57 = vld [vmem:[#allocation2 + $0xc] sm:$0x1] }
 0x514   :  { %v6281_v43 = vpack.c.bf16 %v6265_v35, %v6265_v35  ;;  %v6261_v34 = vmul.f32 0.1, %v6245_v18  ;;  %v6268_v41 = vmax.f32 %v6236_v23, %v6252_v21  ;;  %v6269_v14 = vmax.f32 %v6237_v25, %v6253_v59 }
 0x515   :  { %v6282_v24 = vpack.c.bf16 %v6266_v26, %v6266_v26  ;;  %v6270_v44 = vmax.f32 %v6238_v6, %v6254_v9  ;;  %v6271_v17 = vmax.f32 %v6239_v3, %v6255_v36  ;;  %v6272_v4 = vmax.f32 %v6240_v52, %v6256_v47  ;;  %v6459_v26 = vld [vmem:[#allocation2 + $0x10] sm:$0xf]  ;;  %v6462_v9 = vld [vmem:[#allocation2 + $0x14] sm:$0x1] }
 0x516   :  { %v6295_v10 = vshrl.u32 %v6278_v58, 16  ;;  %v6273_v30 = vmax.f32 %v6241_v49, %v6257_v46  ;;  %v6274_v50 = vmax.f32 %v6242_v1, %v6258_v15  ;;  %v6303_v45 = vshrl.u32 %v6279_v13, 16  ;;  %v6465_v15 = vld [vmem:[#allocation2 + $0x18] sm:$0xf] }
 0x517   :  { %v6311_v61 = vshrl.u32 %v6280_v62, 16  ;;  %v6275_v7 = vmax.f32 %v6243_v32, %v6259_v22  ;;  %v6276_v42 = vmax.f32 %v6244_v33, %v6260_v60  ;;  %v6283_v0 = vpack.c.bf16 %v6267_v37, %v6267_v37  ;;  %v11396_v22 = vld [vmem:[#allocation2 + $0x8] sm:$0xf] }
 0x518   :  { %v6319_v27 = vshrl.u32 %v6281_v43, 16  ;;  %v13722_v31 = vmax.f32 %v6245_v18, %v6261_v34  ;;  %v13724_v19 = vpack.c.bf16 %v6268_v41, %v6268_v41  ;;  %v13726_v28 = vpack.c.bf16 %v6269_v14, %v6269_v14  ;;  %v6468_v41 = vld [vmem:[#allocation2 + $0x1c] sm:$0x1] }
 0x519   :  { %v6327_v51 = vshrl.u32 %v6282_v24, 16  ;;  %v13728_v29 = vpack.c.bf16 %v6270_v44, %v6270_v44  ;;  %v13730_v54 = vpack.c.bf16 %v6271_v17, %v6271_v17  ;;  %v13732_v5 = vpack.c.bf16 %v6272_v4, %v6272_v4  ;;  %v11279_v14 = vld [vmem:[%s14805_s7 + $0x78] sm:$0xff] }
 0x51a   :  { %v6297_v2 = vrot.slane %v6295_v10, 7  ;;  %v13734_v63 = vpack.c.bf16 %v6273_v30, %v6273_v30  ;;  %v13736_v53 = vpack.c.bf16 %v6274_v50, %v6274_v50  ;;  %v6305_v8 = vrot.slane %v6303_v45, 7  ;;  %v6471_v10 = vld [vmem:[#allocation2 + $0x20] sm:$0xf]  ;;  %6918 = vmatpush.bf16.msra.mxu2 %v11279_v14  ;;  %v11302_v14 = vld [vmem:[%s14805_s7 + $0xf0] sm:$0xff] }
 0x51b   :  { %v6313_v55 = vrot.slane %v6311_v61, 7  ;;  %v13738_v48 = vpack.c.bf16 %v6275_v7, %v6275_v7  ;;  %v6298_v16 = vshll.u32 %v6278_v58, 16  ;;  %v13740_v40 = vrot.slane %v6319_v27, 7  ;;  %v6474_v7 = vld [vmem:[#allocation2 + $0x24] sm:$0x1] }
 0x51c   :  { %v6335_v23 = vshrl.u32 %v6283_v0, 16  ;;  %v13742_v25 = vpack.c.bf16 %v6276_v42, %v6276_v42  ;;  %v6306_v39 = vshll.u32 %v6279_v13, 16  ;;  %v6314_v6 = vshll.u32 %v6280_v62, 16 }
 0x51d   :  { %v13744_v3 = vrot.slane %v6327_v51, 7  ;;  %v6300_v52 = vor.u32 %v6298_v16, %v6297_v2  ;;  %v6301_v20 = vrot.slane %v6297_v2, 4  ;;  %v6322_v49 = vshll.u32 %v6281_v43, 16  ;;  %v6477_v51 = vld [vmem:[#allocation2 + $0x28] sm:$0xf] }
 0x51e   :  { %v6330_v1 = vshll.u32 %v6282_v24, 16  ;;  %v6308_v12 = vor.u32 %v6306_v39, %v6305_v8  ;;  %v6309_v11 = vrot.slane %v6305_v8, 4  ;;  %v6316_v32 = vor.u32 %v6314_v6, %v6313_v55  ;;  %v11278_v6 = vld [vmem:[%s14805_s7 + $0x70] sm:$0xff] }
 0x51f   :  { %v6343_v33 = vshrl.u32 %v13724_v19, 16  ;;  %v6317_v35 = vrot.slane %v6313_v55, 4  ;;  %v13748_v18 = vor.u32 %v6322_v49, %v13740_v40  ;;  %v6325_v21 = vrot.slane %v13740_v40, 4  ;;  %v6480_v55 = vld [vmem:[#allocation2 + $0x2c] sm:$0x1]  ;;  %6919 = vmatpush.bf16.msra.mxu2 %v11278_v6 }
 0x520   :  { %v13751_v59 = vrot.slane %v6335_v23, 7  ;;  %v13754_v36 = vor.u32 %v6330_v1, %v13744_v3  ;;  %v6333_v47 = vrot.slane %v13744_v3, 4  ;;  %v6351_v58 = vshrl.u32 %v13726_v28, 16  ;;  %v11271_v3 = vld [vmem:[%s14805_s7 + $0x38] sm:$0xff]  ;;  %v6486_v1 = vld [vmem:[#allocation2 + $0x34] sm:$0x1] }
 0x521   :  { %v6359_v46 = vshrl.u32 %v13728_v29, 16  ;;  %v6338_v13 = vshll.u32 %v6283_v0, 16  ;;  %v6367_v62 = vshrl.u32 %v13730_v54, 16  ;;  %v6454_v37 = vsel %vm11612_vm8, %v6300_v52, %v11396_v22  ;;  %7063 = vmatpush.bf16.msrb.mxu3 %v11271_v3  ;;  %v6513_v3 = vld [vmem:[#allocation2 + $0x68] sm:$0xf] }
 0x522   :  { %v6457_v34 = vsel %vm11535_vm3, %v6301_v20, %v6456_v57  ;;  %v13767_v24 = vrot.slane %v6343_v33, 7  ;;  %v6346_v44 = vshll.u32 %v13724_v19, 16  ;;  %v6460_v17 = vsel %vm11612_vm8, %v6308_v12, %v6459_v26  ;;  %6455 = vst [vmem:[#allocation2 + $0x8] sm:$0xf] %v6454_v37  ;;  %v11303_v12 = vld [vmem:[%s14805_s7 + $0xf8] sm:$0xff] }
 0x523   :  { %v6463_v4 = vsel %vm11535_vm3, %v6309_v11, %v6462_v9  ;;  %v13775_v30 = vor.u32 %v6338_v13, %v13751_v59  ;;  %v6354_v50 = vshll.u32 %v13726_v28, 16  ;;  %v6362_v45 = vshll.u32 %v13728_v29, 16  ;;  %6458 = vst [vmem:[#allocation2 + $0xc] sm:$0x1] %v6457_v34  ;;  %v11287_v11 = vld [vmem:[%s14805_s7 + $0xb8] sm:$0xff]  ;;  %v11277_v13 = vld [vmem:[%s14805_s7 + $0x68] sm:$0xff]  ;;  %7515 = vmatpush.bf16.msrb.mxu1 %v11303_v12 }
 0x524   :  { %v6466_v61 = vsel %vm11612_vm8, %v6316_v32, %v6465_v15  ;;  %v6341_v42 = vrot.slane %v13751_v59, 4  ;;  %v13782_v0 = vrot.slane %v6351_v58, 7  ;;  %v13784_v27 = vrot.slane %v6359_v46, 7  ;;  %6461 = vst [vmem:[#allocation2 + $0x10] sm:$0xf] %v6460_v17  ;;  %7321 = vmatpush.bf16.msrb.mxu0 %v11287_v11  ;;  %6920 = vmatpush.bf16.msra.mxu2 %v11277_v13  ;;  %v11300_v12 = vld [vmem:[%s14805_s7 + $0xe0] sm:$0xff] }
 0x525   :  { %v6469_v19 = vsel %vm11535_vm3, %v6317_v35, %v6468_v41  ;;  %v13788_v28 = vrot.slane %v6367_v62, 7  ;;  %v6370_v29 = vshll.u32 %v13730_v54, 16  ;;  %v6375_v2 = vshrl.u32 %v13732_v5, 16  ;;  %6464 = vst [vmem:[#allocation2 + $0x14] sm:$0x1] %v6463_v4  ;;  %v11270_v62 = vld [vmem:[%s14805_s7 + $0x30] sm:$0xff] }
 0x526   :  { %v6472_v8 = vsel %vm11612_vm8, %v13748_v18, %v6471_v10  ;;  %v13797_v16 = vpack.c.bf16 %v13722_v31, %v13722_v31  ;;  %v6349_v40 = vrot.slane %v13767_v24, 4  ;;  %v6383_v23 = vshrl.u32 %v13734_v63, 16  ;;  %v6483_v54 = vld [vmem:[#allocation2 + $0x30] sm:$0xf]  ;;  %6467 = vst [vmem:[#allocation2 + $0x18] sm:$0xf] %v6466_v61  ;;  %7064 = vmatpush.bf16.msrb.mxu3 %v11270_v62 }
 0x527   :  { %v6475_v39 = vsel %vm11535_vm3, %v6325_v21, %v6474_v7  ;;  %v6348_v31 = vor.u32 %v6346_v44, %v13767_v24  ;;  %v6391_v52 = vshrl.u32 %v13736_v53, 16  ;;  %v6399_v20 = vshrl.u32 %v13738_v48, 16  ;;  %6470 = vst [vmem:[#allocation2 + $0x1c] sm:$0x1] %v6469_v19  ;;  %v6489_v18 = vld [vmem:[#allocation2 + $0x38] sm:$0xf]  ;;  %7516 = vmatpush.bf16.msrb.mxu1 %v11302_v14 }
 0x528   :  { %v6478_v49 = vsel %vm11612_vm8, %v13754_v36, %v6477_v51  ;;  %v13822_v32 = vor.u32 %v6354_v50, %v13782_v0  ;;  %v6357_v33 = vrot.slane %v13782_v0, 4  ;;  %v6378_v57 = vshll.u32 %v13732_v5, 16  ;;  %6473 = vst [vmem:[#allocation2 + $0x20] sm:$0xf] %v6472_v8  ;;  %v6492_v36 = vld [vmem:[#allocation2 + $0x3c] sm:$0x1] }
 0x529   :  { %v6481_v35 = vsel %vm11535_vm3, %v6333_v47, %v6480_v55  ;;  %v6365_v21 = vrot.slane %v13784_v27, 4  ;;  %v6373_v59 = vrot.slane %v13788_v28, 4  ;;  %v13830_v26 = vrot.slane %v6375_v2, 7  ;;  %6476 = vst [vmem:[#allocation2 + $0x24] sm:$0x1] %v6475_v39  ;;  %v11286_v24 = vld [vmem:[%s14805_s7 + $0xb0] sm:$0xff] }
 0x52a   :  { %v6484_v9 = vsel %vm11612_vm8, %v13775_v30, %v6483_v54  ;;  %v13836_v58 = vor.u32 %v6362_v45, %v13784_v27  ;;  %v13838_v5 = vrot.slane %v6383_v23, 7  ;;  %v6386_v47 = vshll.u32 %v13734_v63, 16  ;;  %v6495_v15 = vld [vmem:[#allocation2 + $0x40] sm:$0xf]  ;;  %6479 = vst [vmem:[#allocation2 + $0x28] sm:$0xf] %v6478_v49  ;;  %7322 = vmatpush.bf16.msrb.mxu0 %v11286_v24 }
 0x52b   :  { %v6487_v46 = vsel %vm11535_vm3, %v6341_v42, %v6486_v1  ;;  %v13850_v22 = vor.u32 %v6370_v29, %v13788_v28  ;;  %v13852_v37 = vrot.slane %v6391_v52, 7  ;;  %v13854_v63 = vrot.slane %v6399_v20, 7  ;;  %v6498_v41 = vld [vmem:[#allocation2 + $0x44] sm:$0x1]  ;;  %6482 = vst [vmem:[#allocation2 + $0x2c] sm:$0x1] %v6481_v35 }
 0x52c   :  { %v6490_v34 = vsel %vm11612_vm8, %v6348_v31, %v6489_v18  ;;  %v6394_v44 = vshll.u32 %v13736_v53, 16  ;;  %v6407_v17 = vshrl.u32 %v13742_v25, 16  ;;  %v6415_v4 = vshrl.u32 %v13797_v16, 16  ;;  %v6501_v30 = vld [vmem:[#allocation2 + $0x58] sm:$0xf]  ;;  %v11285_v23 = vld [vmem:[%s14805_s7 + $0xa8] sm:$0xff] }
 0x52d   :  { %v6493_v10 = vsel %vm11535_vm3, %v6349_v40, %v6492_v36  ;;  %6485 = vst [vmem:[#allocation2 + $0x30] sm:$0xf] %v6484_v9  ;;  %v6381_v50 = vrot.slane %v13830_v26, 4  ;;  %v6402_v45 = vshll.u32 %v13738_v48, 16  ;;  %v6410_v61 = vshll.u32 %v13742_v25, 16  ;;  %v11276_v48 = vld [vmem:[%s14805_s7 + $0x60] sm:$0xff] }
 0x52e   :  { %v6496_v7 = vsel %vm11612_vm8, %v13822_v32, %v6495_v15  ;;  %v6504_v53 = vld [vmem:[#allocation2 + $0x5c] sm:$0x1]  ;;  %6488 = vst [vmem:[#allocation2 + $0x34] sm:$0x1] %v6487_v46  ;;  %v6389_v42 = vrot.slane %v13838_v5, 4  ;;  %v6418_v0 = vshll.u32 %v13797_v16, 16  ;;  %v6499_v27 = vsel %vm11535_vm3, %v6357_v33, %v6498_v41  ;;  %6921 = vmatpush.bf16.msra.mxu2 %v11276_v48  ;;  %7323 = vmatpush.bf16.msrb.mxu0 %v11285_v23 }
 0x52f   :  { %v6507_v19 = vld [vmem:[#allocation2 + $0x60] sm:$0xf]  ;;  %6491 = vst [vmem:[#allocation2 + $0x38] sm:$0xf] %v6490_v34  ;;  %v11269_v25 = vld [vmem:[%s14805_s7 + $0x28] sm:$0xff]  ;;  %v6380_v51 = vor.u32 %v6378_v57, %v13830_v26  ;;  %v6397_v29 = vrot.slane %v13852_v37, 4  ;;  %v6502_v8 = vsel %vm11612_vm8, %v13836_v58, %v6501_v30  ;;  %v6505_v6 = vsel %vm11535_vm3, %v6365_v21, %v6504_v53 }
 0x530   :  { %v6405_v2 = vrot.slane %v13854_v63, 4  ;;  %v6510_v55 = vld [vmem:[#allocation2 + $0x64] sm:$0x1]  ;;  %6494 = vst [vmem:[#allocation2 + $0x3c] sm:$0x1] %v6493_v10  ;;  %v11301_v40 = vld [vmem:[%s14805_s7 + $0xe8] sm:$0xff]  ;;  %v6388_v20 = vor.u32 %v6386_v47, %v13838_v5  ;;  %v6508_v49 = vsel %vm11612_vm8, %v13850_v22, %v6507_v19  ;;  %v13920_v57 = vor.u32 %v6394_v44, %v13852_v37  ;;  %7065 = vmatpush.bf16.msrb.mxu3 %v11269_v25 }
 0x531   :  { %v13897_v39 = vrot.slane %v6407_v17, 7  ;;  %v13899_v54 = vrot.slane %v6415_v4, 7  ;;  %6497 = vst [vmem:[#allocation2 + $0x40] sm:$0xf] %v6496_v7  ;;  %v11275_v31 = vld [vmem:[%s14805_s7 + $0x58] sm:$0xff]  ;;  %v11268_v52 = vld [vmem:[%s14805_s7 + $0x20] sm:$0xff]  ;;  %v6511_v35 = vsel %vm11535_vm3, %v6373_v59, %v6510_v55  ;;  %v13929_v58 = vor.u32 %v6402_v45, %v13854_v63  ;;  %7517 = vmatpush.bf16.msrb.mxu1 %v11301_v40 }
 0x532   :  { %v6516_v1 = vld [vmem:[#allocation2 + $0x6c] sm:$0x1]  ;;  %6500 = vst [vmem:[#allocation2 + $0x44] sm:$0x1] %v6499_v27  ;;  %v11284_v11 = vld [vmem:[%s14805_s7 + $0xa0] sm:$0xff]  ;;  %v6514_v5 = vsel %vm11612_vm8, %v6380_v51, %v6513_v3  ;;  %v11274_v44 = vld [vmem:[%s14805_s7 + $0x50] sm:$0xff]  ;;  %6922 = vmatpush.bf16.msra.mxu2 %v11275_v31 }
 0x533   :  { %v6549_v32 = vld [vmem:[#allocation2] sm:$0xf]  ;;  %v6550_v33 = vld [vmem:[#allocation2 + $0x8] sm:$0xf]  ;;  %v6519_v18 = vld [vmem:[#allocation2 + $0x70] sm:$0xf]  ;;  %v6517_v46 = vsel %vm11535_vm3, %v6381_v50, %v6516_v1  ;;  %v13939_v34 = vor.u32 %v6410_v61, %v13897_v39  ;;  %7324 = vmatpush.bf16.msrb.mxu0 %v11284_v11  ;;  %v6420_v23 = vor.u32 %v6418_v0, %v13899_v54 }
 0x534   :  { %v6522_v21 = vld [vmem:[#allocation2 + $0x74] sm:$0x1]  ;;  %6503 = vst [vmem:[#allocation2 + $0x58] sm:$0xf] %v6502_v8  ;;  %v13926_v26 = vld [vmem:[#allocation2 + $0x4] sm:$0x1]  ;;  %v6520_v41 = vsel %vm11612_vm8, %v6388_v20, %v6519_v18  ;;  %7066 = vmatpush.bf16.msrb.mxu3 %v11268_v52 }
 0x535   :  { %v6598_v9 = vshrl.u32 %v6549_v32, 16  ;;  %v6601_v36 = vshll.u32 %v6549_v32, 16  ;;  %6506 = vst [vmem:[#allocation2 + $0x5c] sm:$0x1] %v6505_v6  ;;  %v13933_v28 = vld [vmem:[#allocation2 + $0xc] sm:$0x1]  ;;  %v6523_v14 = vsel %vm11535_vm3, %v6389_v42, %v6522_v21  ;;  %7518 = vmatpush.bf16.msrb.mxu1 %v11300_v12 }
 0x536   :  { %v6607_v59 = vshll.u32 %v13926_v26, 16  ;;  %v6612_v47 = vshrl.u32 %v6550_v33, 16  ;;  %v6525_v15 = vld [vmem:[#allocation2 + $0x78] sm:$0xf]  ;;  %6509 = vst [vmem:[#allocation2 + $0x60] sm:$0xf] %v6508_v49  ;;  %6923 = vmatpush.bf16.msra.mxu2 %v11274_v44 }
 0x537   :  { %v6600_v13 = vrot.slane %v6598_v9, 4  ;;  %v6603_v62 = vrot.slane %v6601_v36, 5  ;;  %v6615_v22 = vshll.u32 %v6550_v33, 16  ;;  %v6528_v24 = vld [vmem:[#allocation2 + $0x7c] sm:$0x1]  ;;  %v6621_v7 = vshll.u32 %v13933_v28, 16 }
 0x538   :  { %6512 = vst [vmem:[#allocation2 + $0x64] sm:$0x1] %v6511_v35  ;;  %v6614_v17 = vrot.slane %v6612_v47, 4  ;;  %v6531_v4 = vld [vmem:[#allocation2 + $0x80] sm:$0xf]  ;;  %v11267_v30 = vld [vmem:[%s14805_s7 + $0x18] sm:$0xff]  ;;  %v6526_v53 = vsel %vm11612_vm8, %v13920_v57, %v6525_v15  ;;  %v6529_v51 = vsel %vm11535_vm3, %v6397_v29, %v6528_v24 }
 0x539   :  { %v6534_v10 = vld [vmem:[#allocation2 + $0x84] sm:$0x1]  ;;  %6515 = vst [vmem:[#allocation2 + $0x68] sm:$0xf] %v6514_v5  ;;  %v6604_v50 = vor.u32 %v6603_v62, %v6600_v13  ;;  %v6609_v45 = vrot.slane %v6607_v59, 5  ;;  %v6617_v61 = vrot.slane %v6615_v22, 5  ;;  %v6532_v3 = vsel %vm11612_vm8, %v13929_v58, %v6531_v4  ;;  %7067 = vmatpush.bf16.msrb.mxu3 %v11267_v30 }
 0x53a   :  { %v6537_v42 = vld [vmem:[#allocation2 + $0x88] sm:$0xf]  ;;  %6518 = vst [vmem:[#allocation2 + $0x6c] sm:$0x1] %v6517_v46  ;;  %v11299_v27 = vld [vmem:[%s14805_s7 + $0xd8] sm:$0xff]  ;;  %v6413_v25 = vrot.slane %v13897_v39, 4  ;;  %v6535_v37 = vsel %vm11535_vm3, %v6405_v2, %v6534_v10 }
 0x53b   :  { %v11283_v19 = vld [vmem:[%s14805_s7 + $0x98] sm:$0xff]  ;;  %v7112_v48 = vld [vmem:[#allocation2] sm:$0xe]  ;;  %6521 = vst [vmem:[#allocation2 + $0x70] sm:$0xf] %v6520_v41  ;;  %v6605_v55 = vrot.slane %v6604_v50, 4  ;;  %v6618_v40 = vor.u32 %v6617_v61, %v6614_v17  ;;  %v6538_v0 = vsel %vm11612_vm8, %v13939_v34, %v6537_v42  ;;  %7519 = vmatpush.bf16.msrb.mxu1 %v11299_v27 }
 0x53c   :  { %v7113_v8 = vld [vmem:[#allocation2 + $0x8] sm:$0xe]  ;;  %v6421_v6 = vrot.slane %v13899_v54, 4  ;;  %v6540_v29 = vld [vmem:[#allocation2 + $0x8c] sm:$0x1]  ;;  %v11266_v16 = vld [vmem:[%s14805_s7 + $0x10] sm:$0xff]  ;;  %7325 = vmatpush.bf16.msrb.mxu0 %v11283_v19 }
 0x53d   :  { %6524 = vst [vmem:[#allocation2 + $0x74] sm:$0x1] %v6523_v14  ;;  %v11273_v39 = vld [vmem:[%s14805_s7 + $0x48] sm:$0xff]  ;;  %v11298_v63 = vld [vmem:[%s14805_s7 + $0xd0] sm:$0xff]  ;;  %v6610_v54 = vsel %vm11695_vm9, %v6605_v55, %v6609_v45  ;;  %v6619_v31 = vrot.slane %v6618_v40, 4  ;;  %v6623_v52 = vrot.slane %v6621_v7, 5  ;;  %v6541_v11 = vsel %vm11535_vm3, %v6413_v25, %v6540_v29  ;;  %7068 = vmatpush.bf16.msrb.mxu3 %v11266_v16 }
 0x53e   :  { %6527 = vst [vmem:[#allocation2 + $0x78] sm:$0xf] %v6526_v53  ;;  %v11282_v2 = vld [vmem:[%s14805_s7 + $0x90] sm:$0xff]  ;;  %v10616_v20 = vrot.slane %v7112_v48, 9  ;;  %v7162_v49 = vrot.slane %v13926_v26, 5  ;;  %v10617_v1 = vrot.slane %v7113_v8, 9  ;;  %v6838_v26 = vunpack.c.l.b16 %v6610_v54  ;;  %6924 = vmatpush.bf16.msra.mxu2 %v11273_v39 }
 0x53f   :  { %6530 = vst [vmem:[#allocation2 + $0x7c] sm:$0x1] %v6529_v51  ;;  %v7166_v12 = vrot.slane %v13933_v28, 5  ;;  %v6543_v32 = vld [vmem:[#allocation2 + $0x90] sm:$0xf]  ;;  %v6624_v57 = vsel %vm11695_vm9, %v6619_v31, %v6623_v52  ;;  %v11265_v18 = vld [vmem:[%s14805_s7 + $0x8] sm:$0xff]  ;;  %7520 = vmatpush.bf16.msrb.mxu1 %v11298_v63 }
 0x540   :  { %v6546_v33 = vld [vmem:[#allocation2 + $0x94] sm:$0x1]  ;;  %6533 = vst [vmem:[#allocation2 + $0x80] sm:$0xf] %v6532_v3  ;;  %v6544_v35 = vsel %vm11612_vm8, %v6420_v23, %v6543_v32  ;;  %v11272_v21 = vld [vmem:[%s14805_s7 + $0x40] sm:$0xff]  ;;  %v6839_v9 = vunpack.c.l.b16 %v6624_v57  ;;  %v11297_v59 = vld [vmem:[%s14805_s7 + $0xc8] sm:$0xff]  ;;  %7326 = vmatpush.bf16.msrb.mxu0 %v11282_v2  ;;  %v7163_v43 = vsel %vm11750_vm12, %v10616_v20, %v7162_v49 }
 0x541   :  { %6536 = vst [vmem:[#allocation2 + $0x84] sm:$0x1] %v6535_v37  ;;  %v6551_v36 = vld [vmem:[#allocation2 + $0x10] sm:$0xf]  ;;  %v6547_v58 = vsel %vm11535_vm3, %v6421_v6, %v6546_v33  ;;  %v6552_v60 = vld [vmem:[#allocation2 + $0x18] sm:$0xf]  ;;  %v7167_v46 = vsel %vm11750_vm12, %v10617_v1, %v7166_v12  ;;  %7069 = vmatpush.bf16.msrb.mxu3 %v11265_v18  ;;  %v7241_v30 = vunpack.c.l.b16 %v7163_v43 }
 0x542   :  { %6539 = vst [vmem:[#allocation2 + $0x88] sm:$0xf] %v6538_v0  ;;  %v6626_v5 = vshrl.u32 %v6551_v36, 16  ;;  %v6629_v28 = vshll.u32 %v6551_v36, 16  ;;  %v11281_v47 = vld [vmem:[%s14805_s7 + $0x88] sm:$0xff]  ;;  %v11311_v13 = vld [vmem:[%s14805_s7 + $0x138] sm:$0xff]  ;;  %v6854_v24 = vpack.c.b16 %v6839_v9, %v6838_v26  ;;  %6925 = vmatpush.bf16.msra.mxu2 %v11272_v21  ;;  %v7242_v50 = vunpack.c.l.b16 %v7167_v46 }
 0x543   :  { %6542 = vst [vmem:[#allocation2 + $0x8c] sm:$0x1] %v6541_v11  ;;  %v10554_v15 = vld [vmem:[#allocation2] sm:$0xf]  ;;  %v6640_v34 = vshrl.u32 %v6552_v60, 16  ;;  %v6643_v44 = vshll.u32 %v6552_v60, 16  ;;  %7521 = vmatpush.bf16.msrb.mxu1 %v11297_v59 }
 0x544   :  { %6545 = vst [vmem:[#allocation2 + $0x90] sm:$0xf] %v6544_v35  ;;  %v6628_v62 = vrot.slane %v6626_v5, 4  ;;  %v6631_v22 = vrot.slane %v6629_v28, 5  ;;  %v11264_v41 = vld [vmem:[%s14805_s7] sm:$0xff]  ;;  %7327 = vmatpush.bf16.msrb.mxu0 %v11281_v47  ;;  %v11310_v19 = vld [vmem:[%s14805_s7 + $0x130] sm:$0xff]  ;;  %v7257_v8 = vpack.c.b16 %v7242_v50, %v7241_v30 }
 0x545   :  { %6548 = vst [vmem:[#allocation2 + $0x94] sm:$0x1] %v6547_v58  ;;  %v11256_v14 = vld [vmem:[#allocation2 + $0x4] sm:$0xf0]  ;;  %v11296_v17 = vld [vmem:[%s14805_s7 + $0xc0] sm:$0xff]  ;;  %v6642_v45 = vrot.slane %v6640_v34, 4  ;;  %6926 = vmatmul.bf16.vlgmr.msra.gmra.mxu2 %v6854_v24  ;;  %7070 = vmatpush.bf16.msrb.mxu3 %v11264_v41 }
 0x546   :  { %v10698_v4 = vld [vmem:[#allocation2 + $0x8] sm:$0xf]  ;;  %v11288_v10 = vld [vmem:[#allocation2 + $0xc] sm:$0xf0]  ;;  %v11280_v61 = vld [vmem:[%s14805_s7 + $0x80] sm:$0xff]  ;;  %v6645_v42 = vrot.slane %v6643_v44, 5  ;;  %7933 = vmatpush.bf16.msrb.mxu2 %v11311_v13  ;;  %v6632_v27 = vor.u32 %v6631_v22, %v6628_v62  ;;  %v10555_v48 = vor.u32 %v11256_v14, %v10554_v15 }
 0x547   :  { %v6583_v7 = vld [vmem:[#allocation2 + $0x14] sm:$0x1]  ;;  %v6584_v53 = vld [vmem:[#allocation2 + $0x1c] sm:$0x1]  ;;  %v10699_v51 = vor.u32 %v11288_v10, %v10698_v4  ;;  %7522 = vmatpush.bf16.msrb.mxu1 %v11296_v17  ;;  %v7114_v3 = vld [vmem:[#allocation2 + $0x10] sm:$0xe] }
 0x548   :  { %v6646_v25 = vor.u32 %v6645_v42, %v6642_v45  ;;  %v6635_v55 = vshll.u32 %v6583_v7, 16  ;;  %v6649_v40 = vshll.u32 %v6584_v53, 16  ;;  %7328 = vmatpush.bf16.msrb.mxu0 %v11280_v61  ;;  %v6633_v23 = vrot.slane %v6632_v27, 4  ;;  %7071 = vmatmul.bf16.vlgmr.msrb.gmra.mxu3 %v10555_v48  ;;  %v7115_v37 = vld [vmem:[#allocation2 + $0x18] sm:$0xe]  ;;  %v11309_v12 = vld [vmem:[%s14805_s7 + $0x128] sm:$0xff] }
 0x549   :  { %v10618_v16 = vrot.slane %v7114_v3, 9  ;;  %v7170_v0 = vrot.slane %v6583_v7, 5  ;;  %v6553_v54 = vld [vmem:[#allocation2 + $0x20] sm:$0xf]  ;;  %v6554_v31 = vld [vmem:[#allocation2 + $0x28] sm:$0xf] }
 0x54a   :  { %v6647_v6 = vrot.slane %v6646_v25, 4  ;;  %7934 = vmatpush.bf16.msrb.mxu2 %v11310_v19  ;;  %7523 = vmatmul.bf16.vlgmr.msrb.gmra.mxu1 %v10699_v51  ;;  %v6637_v29 = vrot.slane %v6635_v55, 5  ;;  %v6651_v39 = vrot.slane %v6649_v40, 5  ;;  %v10619_v52 = vrot.slane %v7115_v37, 9  ;;  %v6585_v60 = vld [vmem:[#allocation2 + $0x24] sm:$0x1] }
 0x54b   :  { %7329 = vmatmul.bf16.vlgmr.msrb.gmra.mxu0 %v7257_v8  ;;  %v7174_v20 = vrot.slane %v6584_v53, 5  ;;  %v6654_v49 = vshrl.u32 %v6553_v54, 16  ;;  %v6657_v1 = vshll.u32 %v6553_v54, 16  ;;  %v6668_v11 = vshrl.u32 %v6554_v31, 16  ;;  %v6586_v5 = vld [vmem:[#allocation2 + $0x2c] sm:$0x1] }
 0x54c   :  { %v6638_v63 = vsel %vm11695_vm9, %v6633_v23, %v6637_v29  ;;  %v6652_v2 = vsel %vm11695_vm9, %v6647_v6, %v6651_v39  ;;  %v6671_v32 = vshll.u32 %v6554_v31, 16  ;;  %v7171_v9 = vsel %vm11750_vm12, %v10618_v16, %v7170_v0  ;;  %v10558_v28 = vld [vmem:[#allocation2 + $0x10] sm:$0xf]  ;;  %v11257_v59 = vld [vmem:[#allocation2 + $0x14] sm:$0xf0]  ;;  %v11308_v8 = vld [vmem:[%s14805_s7 + $0x120] sm:$0xff] }
 0x54d   :  { %v6840_v33 = vunpack.c.l.b16 %v6638_v63  ;;  %v6841_v57 = vunpack.c.l.b16 %v6652_v2  ;;  %v6656_v35 = vrot.slane %v6654_v49, 4  ;;  %v6659_v18 = vrot.slane %v6657_v1, 5  ;;  %v10702_v13 = vld [vmem:[#allocation2 + $0x18] sm:$0xf]  ;;  %v11289_v62 = vld [vmem:[#allocation2 + $0x1c] sm:$0xf0] }
 0x54e   :  { %7935 = vmatpush.bf16.msrb.mxu2 %v11309_v12  ;;  %v6670_v21 = vrot.slane %v6668_v11, 4  ;;  %v6673_v26 = vrot.slane %v6671_v32, 5  ;;  %v7175_v36 = vsel %vm11750_vm12, %v10619_v52, %v7174_v20  ;;  %v7243_v47 = vunpack.c.l.b16 %v7171_v9  ;;  %v7116_v4 = vld [vmem:[#allocation2 + $0x20] sm:$0xe]  ;;  %v7117_v10 = vld [vmem:[#allocation2 + $0x28] sm:$0xe] }
 0x54f   :  { %v6855_v58 = vpack.c.b16 %v6841_v57, %v6840_v33  ;;  %v7244_v43 = vunpack.c.l.b16 %v7175_v36  ;;  %v6660_v46 = vor.u32 %v6659_v18, %v6656_v35  ;;  %v6663_v22 = vshll.u32 %v6585_v60, 16  ;;  %v6555_v42 = vld [vmem:[#allocation2 + $0x30] sm:$0xf]  ;;  %v6556_v27 = vld [vmem:[#allocation2 + $0x38] sm:$0xf] }
 0x550   :  { %v6674_v15 = vor.u32 %v6673_v26, %v6670_v21  ;;  %v6677_v34 = vshll.u32 %v6586_v5, 16  ;;  %v10559_v41 = vor.u32 %v11257_v59, %v10558_v28  ;;  %v10703_v14 = vor.u32 %v11289_v62, %v10702_v13  ;;  %v6587_v2 = vld [vmem:[#allocation2 + $0x34] sm:$0x1]  ;;  %v6588_v54 = vld [vmem:[#allocation2 + $0x3c] sm:$0x1] }
 0x551   :  { %v7258_v24 = vpack.c.b16 %v7244_v43, %v7243_v47  ;;  %v6661_v44 = vrot.slane %v6660_v46, 4  ;;  %v6665_v30 = vrot.slane %v6663_v22, 5  ;;  %v10620_v45 = vrot.slane %v7116_v4, 9  ;;  %v10562_v31 = vld [vmem:[#allocation2 + $0x20] sm:$0xf] }
 0x552   :  { %v6675_v17 = vrot.slane %v6674_v15, 4  ;;  %v6679_v50 = vrot.slane %v6677_v34, 5  ;;  %v7178_v61 = vrot.slane %v6585_v60, 5  ;;  %v10621_v19 = vrot.slane %v7117_v10, 9  ;;  %7936 = vmatpush.bf16.msrb.mxu2 %v11308_v8  ;;  %v11258_v52 = vld [vmem:[#allocation2 + $0x24] sm:$0xf0] }
 0x553   :  { %v6666_v7 = vsel %vm11695_vm9, %v6661_v44, %v6665_v30  ;;  %v7182_v48 = vrot.slane %v6586_v5, 5  ;;  %v6682_v25 = vshrl.u32 %v6555_v42, 16  ;;  %v6685_v51 = vshll.u32 %v6555_v42, 16  ;;  %v10706_v11 = vld [vmem:[#allocation2 + $0x28] sm:$0xf] }
 0x554   :  { %v6680_v53 = vsel %vm11695_vm9, %v6675_v17, %v6679_v50  ;;  %v6696_v55 = vshrl.u32 %v6556_v27, 16  ;;  %v6699_v40 = vshll.u32 %v6556_v27, 16  ;;  %v6842_v23 = vunpack.c.l.b16 %v6666_v7  ;;  %v11290_v32 = vld [vmem:[#allocation2 + $0x2c] sm:$0xf0]  ;;  %v6558_v15 = vld [vmem:[#allocation2 + $0x58] sm:$0xf] }
 0x555   :  { %6931 = vmatmul.bf16.gmra.mxu2 %v6855_v58  ;;  %v6843_v6 = vunpack.c.l.b16 %v6680_v53  ;;  %v6684_v3 = vrot.slane %v6682_v25, 4  ;;  %v6687_v37 = vrot.slane %v6685_v51, 5  ;;  %v7179_v16 = vsel %vm11750_vm12, %v10620_v45, %v7178_v61  ;;  %v7118_v26 = vld [vmem:[#allocation2 + $0x30] sm:$0xe]  ;;  %v7119_v58 = vld [vmem:[#allocation2 + $0x38] sm:$0xe] }
 0x556   :  { %v6698_v29 = vrot.slane %v6696_v55, 4  ;;  %v6701_v39 = vrot.slane %v6699_v40, 5  ;;  %v7183_v0 = vsel %vm11750_vm12, %v10621_v19, %v7182_v48  ;;  %v7245_v20 = vunpack.c.l.b16 %v7179_v16  ;;  %v6557_v46 = vld [vmem:[#allocation2 + $0x50] sm:$0xf]  ;;  %v11259_v53 = vld [vmem:[#allocation2 + $0x34] sm:$0xf0] }
 0x557   :  { %v6856_v63 = vpack.c.b16 %v6843_v6, %v6842_v23  ;;  %v7246_v49 = vunpack.c.l.b16 %v7183_v0  ;;  %v6688_v1 = vor.u32 %v6687_v37, %v6684_v3  ;;  %v6691_v33 = vshll.u32 %v6587_v2, 16  ;;  %v10566_v7 = vld [vmem:[#allocation2 + $0x30] sm:$0xf]  ;;  %v6589_v19 = vld [vmem:[#allocation2 + $0x54] sm:$0x1] }
 0x558   :  { %7076 = vmatmul.bf16.gmra.mxu3 %v10559_v41  ;;  %v6702_v12 = vor.u32 %v6701_v39, %v6698_v29  ;;  %v6705_v57 = vshll.u32 %v6588_v54, 16  ;;  %v10563_v35 = vor.u32 %v11258_v52, %v10562_v31  ;;  %v10707_v18 = vor.u32 %v11290_v32, %v10706_v11  ;;  %v11307_v41 = vld [vmem:[%s14805_s7 + $0x118] sm:$0xff]  ;;  %v11291_v51 = vld [vmem:[#allocation2 + $0x3c] sm:$0xf0] }
 0x559   :  { %v7259_v21 = vpack.c.b16 %v7246_v49, %v7245_v20  ;;  %v6689_v9 = vrot.slane %v6688_v1, 4  ;;  %v6693_v60 = vrot.slane %v6691_v33, 5  ;;  %v10622_v28 = vrot.slane %v7118_v26, 9  ;;  %7937 = vmatpush.bf16.msrb.mxu2 %v11307_v41  ;;  %v6590_v48 = vld [vmem:[#allocation2 + $0x5c] sm:$0x1] }
 0x55a   :  { %7528 = vmatmul.bf16.gmra.mxu1 %v10703_v14  ;;  %v6703_v36 = vrot.slane %v6702_v12, 4  ;;  %v6707_v5 = vrot.slane %v6705_v57, 5  ;;  %v7186_v59 = vrot.slane %v6587_v2, 5  ;;  %v10623_v13 = vrot.slane %v7119_v58, 9  ;;  %v10710_v25 = vld [vmem:[#allocation2 + $0x38] sm:$0xf] }
 0x55b   :  { %7334 = vmatmul.bf16.gmra.mxu0 %v7258_v24  ;;  %v6694_v47 = vsel %vm11695_vm9, %v6689_v9, %v6693_v60  ;;  %v7190_v62 = vrot.slane %v6588_v54, 5  ;;  %v6710_v22 = vshrl.u32 %v6557_v46, 16  ;;  %v6713_v34 = vshll.u32 %v6557_v46, 16  ;;  %v7121_v2 = vld [vmem:[#allocation2 + $0x58] sm:$0xe] }
 0x55c   :  { %v6708_v43 = vsel %vm11695_vm9, %v6703_v36, %v6707_v5  ;;  %v6724_v14 = vshrl.u32 %v6558_v15, 16  ;;  %v6727_v24 = vshll.u32 %v6558_v15, 16  ;;  %v7187_v44 = vsel %vm11750_vm12, %v10622_v28, %v7186_v59  ;;  %v6559_v1 = vld [vmem:[#allocation2 + $0x60] sm:$0xf]  ;;  %v6560_v12 = vld [vmem:[#allocation2 + $0x68] sm:$0xf] }
 0x55d   :  { %v6844_v17 = vunpack.c.l.b16 %v6694_v47  ;;  %v6845_v4 = vunpack.c.l.b16 %v6708_v43  ;;  %v6712_v10 = vrot.slane %v6710_v22, 4  ;;  %v6715_v30 = vrot.slane %v6713_v34, 5  ;;  %v6591_v43 = vld [vmem:[#allocation2 + $0x64] sm:$0x1]  ;;  %v6592_v46 = vld [vmem:[#allocation2 + $0x6c] sm:$0x1] }
 0x55e   :  { %v6726_v50 = vrot.slane %v6724_v14, 4  ;;  %v6729_v45 = vrot.slane %v6727_v24, 5  ;;  %v7191_v61 = vsel %vm11750_vm12, %v10623_v13, %v7190_v62  ;;  %v7247_v42 = vunpack.c.l.b16 %v7187_v44  ;;  %v10570_v15 = vld [vmem:[#allocation2 + $0x50] sm:$0xf]  ;;  %v11260_v13 = vld [vmem:[#allocation2 + $0x54] sm:$0xf0] }
 0x55f   :  { %v6857_v27 = vpack.c.b16 %v6845_v4, %v6844_v17  ;;  %v7248_v8 = vunpack.c.l.b16 %v7191_v61  ;;  %v6716_v55 = vor.u32 %v6715_v30, %v6712_v10  ;;  %v6719_v40 = vshll.u32 %v6589_v19, 16  ;;  %v10714_v14 = vld [vmem:[#allocation2 + $0x58] sm:$0xf]  ;;  %v11292_v24 = vld [vmem:[#allocation2 + $0x5c] sm:$0xf0] }
 0x560   :  { %v6730_v23 = vor.u32 %v6729_v45, %v6726_v50  ;;  %v6733_v6 = vshll.u32 %v6590_v48, 16  ;;  %v10567_v3 = vor.u32 %v11259_v53, %v10566_v7  ;;  %v10711_v37 = vor.u32 %v11291_v51, %v10710_v25  ;;  %v7122_v61 = vld [vmem:[#allocation2 + $0x60] sm:$0xe]  ;;  %v7123_v7 = vld [vmem:[#allocation2 + $0x68] sm:$0xe]  ;;  %v11318_v51 = vld [vmem:[%s14805_s7 + $0x170] sm:$0xff] }
 0x561   :  { %v7260_v29 = vpack.c.b16 %v7248_v8, %v7247_v42  ;;  %v6717_v39 = vrot.slane %v6716_v55, 4  ;;  %v6721_v16 = vrot.slane %v6719_v40, 5  ;;  %v7194_v52 = vrot.slane %v6589_v19, 5  ;;  %v11343_v19 = vld [vmem:[%s14805_s7 + $0x1f8] sm:$0xff]  ;;  %v11342_v8 = vld [vmem:[%s14805_s7 + $0x1f0] sm:$0xff] }
 0x562   :  { %v6731_v0 = vrot.slane %v6730_v23, 4  ;;  %v6735_v54 = vrot.slane %v6733_v6, 5  ;;  %v10625_v11 = vrot.slane %v7121_v2, 9  ;;  %v7198_v32 = vrot.slane %v6590_v48, 5  ;;  %8819 = vmatpush.bf16.msra.mxu1 %v11343_v19 }
 0x563   :  { %v6722_v20 = vsel %vm11695_vm9, %v6717_v39, %v6721_v16  ;;  %v6738_v33 = vshrl.u32 %v6559_v1, 16  ;;  %v6741_v57 = vshll.u32 %v6559_v1, 16  ;;  %v6747_v44 = vshll.u32 %v6591_v43, 16 }
 0x564   :  { %v6736_v49 = vsel %vm11695_vm9, %v6731_v0, %v6735_v54  ;;  %v6846_v26 = vunpack.c.l.b16 %v6722_v20  ;;  %v7199_v59 = vsel %vm11750_vm12, %v10625_v11, %v7198_v32  ;;  %v6761_v17 = vshll.u32 %v6592_v46, 16  ;;  %v11334_v0 = vld [vmem:[%s14805_s7 + $0x1b0] sm:$0xff]  ;;  %v11305_v54 = vld [vmem:[%s14805_s7 + $0x108] sm:$0xff] }
 0x565   :  { %6936 = vmatmul.bf16.gmra.mxu2 %v6856_v63  ;;  %v7120_v63 = vld [vmem:[#allocation2 + $0x50] sm:$0xe]  ;;  %v6847_v9 = vunpack.c.l.b16 %v6736_v49  ;;  %v6740_v36 = vrot.slane %v6738_v33, 4  ;;  %v6743_v58 = vrot.slane %v6741_v57, 5  ;;  %v7250_v22 = vunpack.c.l.b16 %v7199_v59  ;;  %v10574_v33 = vld [vmem:[#allocation2 + $0x60] sm:$0xf] }
 0x566   :  { %v10624_v31 = vrot.slane %v7120_v63, 9  ;;  %v10571_v4 = vor.u32 %v11260_v13, %v10570_v15  ;;  %v10715_v10 = vor.u32 %v11292_v24, %v10714_v14  ;;  %v6749_v53 = vrot.slane %v6747_v44, 5  ;;  %8820 = vmatpush.bf16.msra.mxu1 %v11342_v8  ;;  %v11316_v59 = vld [vmem:[%s14805_s7 + $0x160] sm:$0xff]  ;;  %v7124_v24 = vld [vmem:[#allocation2 + $0x70] sm:$0xe] }
 0x567   :  { %v6858_v47 = vpack.c.b16 %v6847_v9, %v6846_v26  ;;  %v6744_v34 = vor.u32 %v6743_v58, %v6740_v36  ;;  %v6763_v42 = vrot.slane %v6761_v17, 5  ;;  %v10626_v55 = vrot.slane %v7122_v61, 9  ;;  %v14116_v26 = vld [vmem:[#allocation2 + $0x7c] sm:$0x1]  ;;  %v11333_v9 = vld [vmem:[%s14805_s7 + $0x1a8] sm:$0xff] }
 0x568   :  { %7081 = vmatmul.bf16.gmra.mxu3 %v10563_v35  ;;  %v11306_v35 = vld [vmem:[%s14805_s7 + $0x110] sm:$0xff]  ;;  %v7195_v28 = vsel %vm11750_vm12, %v10624_v31, %v7194_v52  ;;  %v7202_v40 = vrot.slane %v6591_v43, 5  ;;  %v10627_v23 = vrot.slane %v7123_v7, 9  ;;  %v7206_v6 = vrot.slane %v6592_v46, 5  ;;  %v11317_v31 = vld [vmem:[%s14805_s7 + $0x168] sm:$0xff] }
 0x569   :  { %7938 = vmatpush.bf16.msrb.mxu2 %v11306_v35  ;;  %v7249_v62 = vunpack.c.l.b16 %v7195_v28  ;;  %v6745_v50 = vrot.slane %v6744_v34, 4  ;;  %v11341_v52 = vld [vmem:[%s14805_s7 + $0x1e8] sm:$0xff]  ;;  %v11293_v46 = vld [vmem:[#allocation2 + $0x6c] sm:$0xf0]  ;;  %v6789_v13 = vshll.u32 %v14116_v26, 16  ;;  %v7214_v19 = vrot.slane %v14116_v26, 5 }
 0x56a   :  { %7533 = vmatmul.bf16.gmra.mxu1 %v10707_v18  ;;  %v6752_v18 = vshrl.u32 %v6560_v12, 16  ;;  %v7203_v1 = vsel %vm11750_vm12, %v10626_v55, %v7202_v40  ;;  %v11261_v36 = vld [vmem:[#allocation2 + $0x64] sm:$0xf0]  ;;  %v7125_v44 = vld [vmem:[#allocation2 + $0x78] sm:$0xe]  ;;  %v11314_v7 = vld [vmem:[%s14805_s7 + $0x150] sm:$0xff] }
 0x56b   :  { %7339 = vmatmul.bf16.gmra.mxu0 %v7259_v21  ;;  %v6755_v21 = vshll.u32 %v6560_v12, 16  ;;  %v7261_v30 = vpack.c.b16 %v7250_v22, %v7249_v62  ;;  %v6750_v48 = vsel %vm11695_vm9, %v6745_v50, %v6749_v53  ;;  %v7207_v12 = vsel %vm11750_vm12, %v10627_v23, %v7206_v6  ;;  %8821 = vmatpush.bf16.msra.mxu1 %v11341_v52  ;;  %v10718_v43 = vld [vmem:[#allocation2 + $0x68] sm:$0xf]  ;;  %v11332_v50 = vld [vmem:[%s14805_s7 + $0x1a0] sm:$0xff] }
 0x56c   :  { %v6754_v60 = vrot.slane %v6752_v18, 4  ;;  %v6848_v39 = vunpack.c.l.b16 %v6750_v48  ;;  %v7251_v58 = vunpack.c.l.b16 %v7203_v1  ;;  %v10575_v62 = vor.u32 %v11261_v36, %v10574_v33  ;;  %v11338_v48 = vld [vmem:[%s14805_s7 + $0x1d0] sm:$0xff]  ;;  %v6564_v40 = vld [vmem:[#allocation2 + $0x88] sm:$0xf]  ;;  %v6595_v1 = vld [vmem:[#allocation2 + $0x84] sm:$0x1] }
 0x56d   :  { %v6757_v5 = vrot.slane %v6755_v21, 5  ;;  %7939 = vmatpush.bf16.msrb.mxu2 %v11305_v54  ;;  %v14114_v21 = vld [vmem:[#allocation2 + $0x74] sm:$0x1]  ;;  %v10719_v22 = vor.u32 %v11293_v46, %v10718_v43  ;;  %v10628_v53 = vrot.slane %v7124_v24, 9  ;;  %v11294_v26 = vld [vmem:[#allocation2 + $0x7c] sm:$0xf0] }
 0x56e   :  { %v6775_v15 = vshll.u32 %v14114_v21, 16  ;;  %v6803_v36 = vshll.u32 %v6595_v1, 16  ;;  %v7127_v46 = vld [vmem:[#allocation2 + $0x88] sm:$0xe] }
 0x56f   :  { %v6758_v41 = vor.u32 %v6757_v5, %v6754_v60  ;;  %v7252_v60 = vunpack.c.l.b16 %v7207_v12  ;;  %v6596_v12 = vld [vmem:[#allocation2 + $0x8c] sm:$0x1] }
 0x570   :  { %v6777_v17 = vrot.slane %v6775_v15, 5  ;;  %v7222_v24 = vrot.slane %v6596_v12, 5 }
 0x571   :  { %v6759_v45 = vrot.slane %v6758_v41, 4  ;;  %v7262_v34 = vpack.c.b16 %v7252_v60, %v7251_v58  ;;  %v6817_v58 = vshll.u32 %v6596_v12, 16 }
 0x573   :  { %v6764_v25 = vsel %vm11695_vm9, %v6759_v45, %v6763_v42  ;;  %v7210_v42 = vrot.slane %v14114_v21, 5  ;;  %v10722_v21 = vld [vmem:[#allocation2 + $0x78] sm:$0xf] }
 0x574   :  { %v6849_v16 = vunpack.c.l.b16 %v6764_v25  ;;  %v11331_v25 = vld [vmem:[%s14805_s7 + $0x198] sm:$0xff] }
 0x575   :  { %6941 = vmatmul.bf16.gmra.mxu2 %v6857_v27  ;;  %v11319_v27 = vld [vmem:[%s14805_s7 + $0x178] sm:$0xff] }
 0x576   :  { %8207 = vmatpush.bf16.msra.mxu3 %v11319_v27  ;;  %v6859_v18 = vpack.c.b16 %v6849_v16, %v6848_v39  ;;  %v10629_v27 = vrot.slane %v7125_v44, 9  ;;  %v6808_v39 = vshrl.u32 %v6564_v40, 16  ;;  %v6811_v16 = vshll.u32 %v6564_v40, 16  ;;  %v11328_v44 = vld [vmem:[%s14805_s7 + $0x180] sm:$0xff] }
 0x578   :  { %7086 = vmatmul.bf16.gmra.mxu3 %v10567_v3  ;;  %v11335_v3 = vld [vmem:[%s14805_s7 + $0x1b8] sm:$0xff]  ;;  %v6810_v52 = vrot.slane %v6808_v39, 4 }
 0x579   :  { %8401 = vmatpush.bf16.msra.mxu0 %v11335_v3  ;;  %v11304_v3 = vld [vmem:[%s14805_s7 + $0x100] sm:$0xff] }
 0x57a   :  { %7538 = vmatmul.bf16.gmra.mxu1 %v10711_v37  ;;  %v6561_v37 = vld [vmem:[#allocation2 + $0x70] sm:$0xf]  ;;  %8208 = vmatpush.bf16.msra.mxu3 %v11318_v51  ;;  %v6563_v51 = vld [vmem:[#allocation2 + $0x80] sm:$0xf] }
 0x57b   :  { %7344 = vmatmul.bf16.gmra.mxu0 %v7260_v29  ;;  %v6562_v29 = vld [vmem:[#allocation2 + $0x78] sm:$0xf]  ;;  %v6766_v63 = vshrl.u32 %v6561_v37, 16  ;;  %v6769_v2 = vshll.u32 %v6561_v37, 16  ;;  %v6794_v23 = vshrl.u32 %v6563_v51, 16  ;;  %v6797_v6 = vshll.u32 %v6563_v51, 16  ;;  %7940 = vmatpush.bf16.msrb.mxu2 %v11304_v3 }
 0x57c   :  { %v6780_v20 = vshrl.u32 %v6562_v29, 16  ;;  %v6783_v49 = vshll.u32 %v6562_v29, 16  ;;  %v11313_v37 = vld [vmem:[%s14805_s7 + $0x148] sm:$0xff] }
 0x57d   :  { %v6768_v11 = vrot.slane %v6766_v63, 4  ;;  %v6771_v32 = vrot.slane %v6769_v2, 5  ;;  %8402 = vmatpush.bf16.msra.mxu0 %v11334_v0  ;;  %v11337_v29 = vld [vmem:[%s14805_s7 + $0x1c8] sm:$0xff]  ;;  %v7211_v0 = vsel %vm11750_vm12, %v10628_v53, %v7210_v42  ;;  %v7215_v63 = vsel %vm11750_vm12, %v10629_v27, %v7214_v19  ;;  %v11330_v2 = vld [vmem:[%s14805_s7 + $0x190] sm:$0xff] }
 0x57e   :  { %v6782_v57 = vrot.slane %v6780_v20, 4  ;;  %v6785_v35 = vrot.slane %v6783_v49, 5  ;;  %8209 = vmatpush.bf16.msra.mxu3 %v11317_v31  ;;  %v6796_v54 = vrot.slane %v6794_v23, 4  ;;  %v6799_v31 = vrot.slane %v6797_v6, 5 }
 0x57f   :  { %v6772_v5 = vor.u32 %v6771_v32, %v6768_v11  ;;  %v6813_v20 = vrot.slane %v6811_v16, 5  ;;  %v10578_v11 = vld [vmem:[#allocation2 + $0x70] sm:$0xf]  ;;  %v11262_v32 = vld [vmem:[#allocation2 + $0x74] sm:$0xf0]  ;;  %v7253_v33 = vunpack.c.l.b16 %v7211_v0 }
 0x580   :  { %v6786_v28 = vor.u32 %v6785_v35, %v6782_v57  ;;  %v7254_v57 = vunpack.c.l.b16 %v7215_v63  ;;  %v6800_v35 = vor.u32 %v6799_v31, %v6796_v54  ;;  %v10579_v60 = vor.u32 %v11262_v32, %v10578_v11  ;;  %v7581_v63 = vld [vmem:[#allocation2 + $0xc] sm:$0x1]  ;;  %v11351_v11 = vld [vmem:[%s14805_s7 + $0x238] sm:$0xff]  ;;  %v8467_v32 = vld [vmem:[#allocation2 + $0x14] sm:$0x1] }
 0x581   :  { %8403 = vmatpush.bf16.msra.mxu0 %v11333_v9  ;;  %v6773_v41 = vrot.slane %v6772_v5, 4  ;;  %v7126_v9 = vld [vmem:[#allocation2 + $0x80] sm:$0xe]  ;;  %9093 = vmatpush.bf16.msra.mxu2 %v11351_v11 }
 0x582   :  { %v6787_v14 = vrot.slane %v6786_v28, 4  ;;  %8210 = vmatpush.bf16.msra.mxu3 %v11316_v59  ;;  %v11312_v5 = vld [vmem:[%s14805_s7 + $0x140] sm:$0xff]  ;;  %v11329_v59 = vld [vmem:[%s14805_s7 + $0x188] sm:$0xff]  ;;  %v7263_v43 = vpack.c.b16 %v7254_v57, %v7253_v33  ;;  %v6801_v15 = vrot.slane %v6800_v35, 4 }
 0x583   :  { %v6778_v45 = vsel %vm11695_vm9, %v6773_v41, %v6777_v17  ;;  %v11336_v28 = vld [vmem:[%s14805_s7 + $0x1c0] sm:$0xff]  ;;  %v6819_v41 = vrot.slane %v6817_v58, 5 }
 0x584   :  { %v6850_v8 = vunpack.c.l.b16 %v6778_v45  ;;  %v8468_v45 = vld [vmem:[#allocation2 + $0x18] sm:$0xf] }
 0x585   :  { %6946 = vmatmul.bf16.gmra.mxu2 %v6858_v47  ;;  %v11340_v47 = vld [vmem:[%s14805_s7 + $0x1e0] sm:$0xff]  ;;  %8404 = vmatpush.bf16.msra.mxu0 %v11332_v50  ;;  %v8513_v40 = vshrl.u32 %v8468_v45, 16  ;;  %v8516_v23 = vshll.u32 %v8468_v45, 16 }
 0x586   :  { %8822 = vmatpush.bf16.msra.mxu1 %v11340_v47  ;;  %v10723_v47 = vor.u32 %v11294_v26, %v10722_v21 }
 0x587   :  { %v8515_v57 = vrot.slane %v8513_v40, 4  ;;  %v8518_v35 = vrot.slane %v8516_v23, 5 }
 0x588   :  { %7091 = vmatmul.bf16.gmra.mxu3 %v10571_v4  ;;  %v6791_v4 = vrot.slane %v6789_v13, 5 }
 0x589   :  { %8405 = vmatpush.bf16.msra.mxu0 %v11331_v25 }
 0x58a   :  { %7543 = vmatmul.bf16.gmra.mxu1 %v10715_v10  ;;  %v11315_v10 = vld [vmem:[%s14805_s7 + $0x158] sm:$0xff]  ;;  %v6792_v61 = vsel %vm11695_vm9, %v6787_v14, %v6791_v4  ;;  %v10631_v14 = vrot.slane %v7127_v46, 9 }
 0x58b   :  { %7349 = vmatmul.bf16.gmra.mxu0 %v7261_v30  ;;  %v11339_v30 = vld [vmem:[%s14805_s7 + $0x1d8] sm:$0xff]  ;;  %8211 = vmatpush.bf16.msra.mxu3 %v11315_v10  ;;  %v6851_v55 = vunpack.c.l.b16 %v6792_v61  ;;  %v8466_v10 = vld [vmem:[#allocation2 + $0x10] sm:$0xf] }
 0x58c   :  { %8823 = vmatpush.bf16.msra.mxu1 %v11339_v30  ;;  %v7580_v30 = vld [vmem:[#allocation2 + $0x8] sm:$0xf]  ;;  %v7582_v61 = vld [vmem:[#allocation2 + $0x10] sm:$0xf]  ;;  %v8499_v19 = vshrl.u32 %v8466_v10, 16 }
 0x58d   :  { %v6860_v49 = vpack.c.b16 %v6851_v55, %v6850_v8  ;;  %8406 = vmatpush.bf16.msra.mxu0 %v11330_v2  ;;  %v7613_v27 = vshrl.u32 %v7580_v30, 16  ;;  %v7616_v25 = vshll.u32 %v7580_v30, 16  ;;  %v7627_v51 = vshrl.u32 %v7582_v61, 16  ;;  %v10582_v8 = vld [vmem:[#allocation2 + $0x80] sm:$0xf] }
 0x58e   :  { %v11263_v55 = vld [vmem:[#allocation2 + $0x84] sm:$0xf0]  ;;  %v7630_v3 = vshll.u32 %v7582_v61, 16  ;;  %v7583_v2 = vld [vmem:[#allocation2 + $0x14] sm:$0x1] }
 0x58f   :  { %8212 = vmatpush.bf16.msra.mxu3 %v11314_v7  ;;  %v7223_v7 = vsel %vm11750_vm12, %v10631_v14, %v7222_v24  ;;  %v7615_v6 = vrot.slane %v7613_v27, 4  ;;  %v7618_v39 = vrot.slane %v7616_v25, 5  ;;  %v7629_v16 = vrot.slane %v7627_v51, 4  ;;  %v8472_v27 = vld [vmem:[#allocation2 + $0x28] sm:$0xf] }
 0x590   :  { %8824 = vmatpush.bf16.msra.mxu1 %v11338_v48  ;;  %v8502_v48 = vshll.u32 %v8466_v10, 16  ;;  %v7632_v54 = vrot.slane %v7630_v3, 5  ;;  %v10583_v21 = vor.u32 %v11263_v55, %v10582_v8  ;;  %v7636_v58 = vshll.u32 %v7583_v2, 16 }
 0x591   :  { %8407 = vmatpush.bf16.msra.mxu0 %v11329_v59  ;;  %v7619_v12 = vor.u32 %v7618_v39, %v7615_v6  ;;  %v8052_v59 = vrot.slane %v7583_v2, 5  ;;  %v8541_v39 = vshrl.u32 %v8472_v27, 16  ;;  %v7585_v2 = vld [vmem:[#allocation2 + $0x1c] sm:$0x1] }
 0x592   :  { %v8504_v33 = vrot.slane %v8502_v48, 5  ;;  %v7638_v14 = vrot.slane %v7636_v58, 5  ;;  %v8001_v58 = vld [vmem:[#allocation2 + $0x20] sm:$0xe] }
 0x593   :  { %8213 = vmatpush.bf16.msra.mxu3 %v11313_v37  ;;  %v10726_v37 = vld [vmem:[#allocation2 + $0x88] sm:$0xf]  ;;  %v7620_v46 = vrot.slane %v7619_v12, 4 }
 0x594   :  { %8825 = vmatpush.bf16.msra.mxu1 %v11337_v29  ;;  %v11295_v29 = vld [vmem:[#allocation2 + $0x8c] sm:$0xf0] }
 0x595   :  { %6951 = vmatmul.bf16.gmra.mxu2 %v6859_v18  ;;  %v6814_v18 = vor.u32 %v6813_v20, %v6810_v52  ;;  %8408 = vmatpush.bf16.msra.mxu0 %v11328_v44  ;;  %v7256_v52 = vunpack.c.l.b16 %v7223_v7  ;;  %v7998_v20 = vld [vmem:[#allocation2 + $0x8] sm:$0xe]  ;;  %v10727_v26 = vor.u32 %v11295_v29, %v10726_v37 }
 0x597   :  { %v6815_v13 = vrot.slane %v6814_v18, 4  ;;  %8214 = vmatpush.bf16.msra.mxu3 %v11312_v5  ;;  %v7633_v18 = vor.u32 %v7632_v54, %v7629_v16  ;;  %v8048_v5 = vrot.slane %v7581_v63, 5  ;;  %v8544_v16 = vshll.u32 %v8472_v27, 16  ;;  %v7587_v54 = vld [vmem:[#allocation2 + $0x24] sm:$0x1] }
 0x598   :  { %7096 = vmatmul.bf16.gmra.mxu3 %v10575_v62  ;;  %8826 = vmatpush.bf16.msra.mxu1 %v11336_v28  ;;  %v10630_v62 = vrot.slane %v7126_v9, 9  ;;  %v8469_v9 = vld [vmem:[#allocation2 + $0x1c] sm:$0x1]  ;;  %v8476_v27 = vld [vmem:[#allocation2 + $0x38] sm:$0xf] }
 0x599   :  { %v6820_v4 = vsel %vm11695_vm9, %v6815_v13, %v6819_v41 }
 0x59a   :  { %7548 = vmatmul.bf16.gmra.mxu1 %v10719_v22  ;;  %v7218_v22 = vrot.slane %v6595_v1, 5  ;;  %v6853_v42 = vunpack.c.l.b16 %v6820_v4  ;;  %v8501_v1 = vrot.slane %v8499_v19, 4  ;;  %v7586_v4 = vld [vmem:[#allocation2 + $0x20] sm:$0xf] }
 0x59b   :  { %7354 = vmatmul.bf16.gmra.mxu0 %v7262_v34  ;;  %v6805_v34 = vrot.slane %v6803_v36, 5  ;;  %v7622_v36 = vshll.u32 %v7581_v63, 16  ;;  %v7655_v25 = vshrl.u32 %v7586_v4, 16  ;;  %v7658_v51 = vshll.u32 %v7586_v4, 16 }
 0x59c   :  { %v7219_v50 = vsel %vm11750_vm12, %v10630_v62, %v7218_v22  ;;  %v8505_v13 = vor.u32 %v8504_v33, %v8501_v1  ;;  %v8519_v62 = vor.u32 %v8518_v35, %v8515_v57  ;;  %v8522_v22 = vshll.u32 %v8469_v9, 16  ;;  %v10890_v33 = vld [vmem:[#allocation2 + $0x10] sm:$0xf]  ;;  %v11320_v35 = vld [vmem:[#allocation2 + $0x14] sm:$0xf0] }
 0x59d   :  { %v6806_v17 = vsel %vm11695_vm9, %v6801_v15, %v6805_v34  ;;  %v7255_v31 = vunpack.c.l.b16 %v7219_v50  ;;  %v7634_v15 = vrot.slane %v7633_v18, 4  ;;  %v7584_v34 = vld [vmem:[#allocation2 + $0x18] sm:$0xf]  ;;  %v7624_v41 = vrot.slane %v7622_v36, 5  ;;  %v11350_v57 = vld [vmem:[%s14805_s7 + $0x230] sm:$0xff] }
 0x59e   :  { %v6852_v53 = vunpack.c.l.b16 %v6806_v17  ;;  %v8470_v17 = vld [vmem:[#allocation2 + $0x20] sm:$0xf]  ;;  %v7641_v45 = vshrl.u32 %v7584_v34, 16  ;;  %v8506_v61 = vrot.slane %v8505_v13, 4  ;;  %v8520_v7 = vrot.slane %v8519_v62, 4  ;;  %9094 = vmatpush.bf16.msra.mxu2 %v11350_v57 }
 0x59f   :  { %v7625_v30 = vsel %vm11695_vm9, %v7620_v46, %v7624_v41  ;;  %v7639_v50 = vsel %vm11695_vm9, %v7634_v15, %v7638_v14  ;;  %v8527_v19 = vshrl.u32 %v8470_v17, 16  ;;  %v8530_v48 = vshll.u32 %v8470_v17, 16 }
 0x5a0   :  { %v6861_v0 = vpack.c.b16 %v6853_v42, %v6852_v53  ;;  %v8524_v53 = vrot.slane %v8522_v22, 5  ;;  %v7644_v42 = vshll.u32 %v7584_v34, 16  ;;  %v7853_v8 = vunpack.c.l.b16 %v7625_v30 }
 0x5a1   :  { %v7854_v55 = vunpack.c.l.b16 %v7639_v50  ;;  %v7643_v40 = vrot.slane %v7641_v45, 4  ;;  %v7657_v6 = vrot.slane %v7655_v25, 4  ;;  %v7660_v3 = vrot.slane %v7658_v51, 5  ;;  %v8474_v50 = vld [vmem:[#allocation2 + $0x30] sm:$0xf] }
 0x5a2   :  { %v7646_v23 = vrot.slane %v7644_v42, 5  ;;  %v8525_v29 = vsel %vm11695_vm9, %v8520_v7, %v8524_v53  ;;  %v8543_v18 = vrot.slane %v8541_v39, 4  ;;  %v7664_v9 = vshll.u32 %v7587_v54, 16 }
 0x5a3   :  { %v7661_v12 = vor.u32 %v7660_v3, %v7657_v6  ;;  %v10891_v62 = vor.u32 %v11320_v35, %v10890_v33  ;;  %v10811_v17 = vrot.slane %v8001_v58, 9  ;;  %v8060_v4 = vrot.slane %v7587_v54, 5  ;;  %v7589_v35 = vld [vmem:[#allocation2 + $0x2c] sm:$0x1] }
 0x5a4   :  { %v7647_v1 = vor.u32 %v7646_v23, %v7643_v40  ;;  %v7666_v14 = vrot.slane %v7664_v9, 5  ;;  %v8555_v40 = vshrl.u32 %v8474_v50, 16  ;;  %v8558_v23 = vshll.u32 %v8474_v50, 16  ;;  %v8003_v9 = vld [vmem:[#allocation2 + $0x30] sm:$0xe] }
 0x5a5   :  { %6956 = vmatmul.bf16.gmra.mxu2 %v6860_v49  ;;  %v7999_v49 = vld [vmem:[#allocation2 + $0x10] sm:$0xe]  ;;  %v7662_v15 = vrot.slane %v7661_v12, 4  ;;  %v8061_v6 = vsel %vm11750_vm12, %v10811_v17, %v8060_v4  ;;  %v7678_v17 = vshll.u32 %v7589_v35, 16 }
 0x5a6   :  { %v10809_v28 = vrot.slane %v7999_v49, 9  ;;  %v8532_v49 = vrot.slane %v8530_v48, 5  ;;  %v7648_v46 = vrot.slane %v7647_v1, 4  ;;  %v8130_v57 = vunpack.c.l.b16 %v8061_v6 }
 0x5a7   :  { %v7667_v53 = vsel %vm11695_vm9, %v7662_v15, %v7666_v14  ;;  %v10894_v15 = vld [vmem:[#allocation2 + $0x20] sm:$0xf] }
 0x5a8   :  { %7101 = vmatmul.bf16.gmra.mxu3 %v10579_v60  ;;  %v10808_v60 = vrot.slane %v7998_v20, 9  ;;  %v8053_v44 = vsel %vm11750_vm12, %v10809_v28, %v8052_v59  ;;  %v8000_v20 = vld [vmem:[#allocation2 + $0x18] sm:$0xe]  ;;  %v8056_v59 = vrot.slane %v7585_v2, 5 }
 0x5a9   :  { %v8128_v63 = vunpack.c.l.b16 %v8053_v44  ;;  %v7590_v44 = vld [vmem:[#allocation2 + $0x30] sm:$0xf] }
 0x5aa   :  { %7553 = vmatmul.bf16.gmra.mxu1 %v10723_v47  ;;  %v7264_v47 = vpack.c.b16 %v7256_v52, %v7255_v31  ;;  %v8049_v24 = vsel %vm11750_vm12, %v10808_v60, %v8048_v5  ;;  %v8529_v31 = vrot.slane %v8527_v19, 4  ;;  %v7869_v52 = vpack.c.b16 %v7854_v55, %v7853_v8  ;;  %v8471_v5 = vld [vmem:[#allocation2 + $0x24] sm:$0x1] }
 0x5ab   :  { %7359 = vmatmul.bf16.gmra.mxu0 %v7263_v43  ;;  %v8508_v43 = vshll.u32 %v8467_v32, 16  ;;  %v8740_v32 = vunpack.c.l.b16 %v8525_v29  ;;  %v10810_v60 = vrot.slane %v8000_v20, 9  ;;  %v7683_v25 = vshrl.u32 %v7590_v44, 16 }
 0x5ac   :  { %v7686_v51 = vshll.u32 %v7590_v44, 16  ;;  %v8477_v44 = vld [vmem:[#allocation2 + $0x3c] sm:$0x1] }
 0x5ad   :  { %v8510_v10 = vrot.slane %v8508_v43, 5  ;;  %v8533_v43 = vor.u32 %v8532_v49, %v8529_v31  ;;  %v8057_v45 = vsel %vm11750_vm12, %v10810_v60, %v8056_v59  ;;  %v7685_v20 = vrot.slane %v7683_v25, 4  ;;  %v8475_v59 = vld [vmem:[#allocation2 + $0x34] sm:$0x1] }
 0x5ae   :  { %v7688_v49 = vrot.slane %v7686_v51, 5  ;;  %v8129_v33 = vunpack.c.l.b16 %v8057_v45  ;;  %v8564_v45 = vshll.u32 %v8475_v59, 16  ;;  %v7593_v59 = vld [vmem:[#allocation2 + $0x3c] sm:$0x1] }
 0x5af   :  { %v8511_v37 = vsel %vm11695_vm9, %v8506_v61, %v8510_v10  ;;  %v8536_v10 = vshll.u32 %v8471_v5, 16  ;;  %v8534_v61 = vrot.slane %v8533_v43, 4 }
 0x5b0   :  { %v8739_v11 = vunpack.c.l.b16 %v8511_v37  ;;  %v7689_v43 = vor.u32 %v7688_v49, %v7685_v20  ;;  %v8144_v14 = vpack.c.b16 %v8130_v57, %v8129_v33 }
 0x5b1   :  { %v8538_v3 = vrot.slane %v8536_v10, 5 }
 0x5b2   :  { %v8755_v13 = vpack.c.b16 %v8740_v32, %v8739_v11  ;;  %v8557_v11 = vrot.slane %v8555_v40, 4  ;;  %v8560_v32 = vrot.slane %v8558_v23, 5  ;;  %v7680_v40 = vrot.slane %v7678_v17, 5 }
 0x5b3   :  { %v8539_v1 = vsel %vm11695_vm9, %v8534_v61, %v8538_v3 }
 0x5b4   :  { %v8741_v5 = vunpack.c.l.b16 %v8539_v1  ;;  %v8478_v1 = vld [vmem:[#allocation2 + $0x40] sm:$0xf] }
 0x5b5   :  { %6961 = vmatmul.bf16.gmra.mxu2 %v6861_v0  ;;  %v8127_v0 = vunpack.c.l.b16 %v8049_v24  ;;  %v7588_v24 = vld [vmem:[#allocation2 + $0x28] sm:$0xf] }
 0x5b6   :  { %v7669_v19 = vshrl.u32 %v7588_v24, 16  ;;  %v7672_v48 = vshll.u32 %v7588_v24, 16  ;;  %v10813_v24 = vrot.slane %v8003_v9, 9 }
 0x5b7   :  { %v8143_v36 = vpack.c.b16 %v8128_v63, %v8127_v0  ;;  %v7856_v0 = vunpack.c.l.b16 %v7667_v53  ;;  %v8569_v63 = vshrl.u32 %v8476_v27, 16 }
 0x5b8   :  { %7106 = vmatmul.bf16.gmra.mxu3 %v10583_v21  ;;  %v8546_v21 = vrot.slane %v8544_v16, 5  ;;  %v7671_v31 = vrot.slane %v7669_v19, 4 }
 0x5ba   :  { %7558 = vmatmul.bf16.gmra.mxu1 %v10727_v26  ;;  %v7650_v26 = vshll.u32 %v7585_v2, 16  ;;  %v8547_v34 = vor.u32 %v8546_v21, %v8543_v18  ;;  %v8572_v2 = vshll.u32 %v8476_v27, 16  ;;  %v8002_v18 = vld [vmem:[#allocation2 + $0x28] sm:$0xe] }
 0x5bb   :  { %7364 = vmatmul.bf16.gmra.mxu0 %v7264_v47  ;;  %v8473_v47 = vld [vmem:[#allocation2 + $0x2c] sm:$0x1] }
 0x5bc   :  { %v7652_v41 = vrot.slane %v7650_v26, 5  ;;  %v8550_v30 = vshll.u32 %v8473_v47, 16  ;;  %v8548_v55 = vrot.slane %v8547_v34, 4  ;;  %v7591_v26 = vld [vmem:[#allocation2 + $0x34] sm:$0x1]  ;;  %v8574_v58 = vrot.slane %v8572_v2, 5 }
 0x5bd   :  { %v8064_v34 = vrot.slane %v7589_v35, 5  ;;  %v7692_v4 = vshll.u32 %v7591_v26, 16  ;;  %v8068_v50 = vrot.slane %v7591_v26, 5 }
 0x5be   :  { %v7653_v7 = vsel %vm11695_vm9, %v7648_v46, %v7652_v41  ;;  %v8552_v37 = vrot.slane %v8550_v30, 5  ;;  %v11349_v46 = vld [vmem:[%s14805_s7 + $0x228] sm:$0xff]  ;;  %v8561_v41 = vor.u32 %v8560_v32, %v8557_v11 }
 0x5bf   :  { %v7855_v29 = vunpack.c.l.b16 %v7653_v7  ;;  %9095 = vmatpush.bf16.msra.mxu2 %v11349_v46  ;;  %v7592_v7 = vld [vmem:[#allocation2 + $0x38] sm:$0xf]  ;;  %v7694_v23 = vrot.slane %v7692_v4, 5  ;;  %v8480_v32 = vld [vmem:[#allocation2 + $0x48] sm:$0xf] }
 0x5c0   :  { %v8553_v12 = vsel %vm11695_vm9, %v8548_v55, %v8552_v37  ;;  %v8562_v51 = vrot.slane %v8561_v41, 4  ;;  %v7594_v55 = vld [vmem:[#allocation2 + $0x40] sm:$0xf]  ;;  %v7697_v6 = vshrl.u32 %v7592_v7, 16  ;;  %v7700_v3 = vshll.u32 %v7592_v7, 16 }
 0x5c1   :  { %v7870_v21 = vpack.c.b16 %v7856_v0, %v7855_v29  ;;  %v8069_v37 = vsel %vm11750_vm12, %v10813_v24, %v8068_v50  ;;  %v8566_v29 = vrot.slane %v8564_v45, 5  ;;  %v10898_v46 = vld [vmem:[#allocation2 + $0x30] sm:$0xf]  ;;  %v11322_v41 = vld [vmem:[#allocation2 + $0x34] sm:$0xf0]  ;;  %v7706_v45 = vshll.u32 %v7593_v59, 16 }
 0x5c2   :  { %v7699_v33 = vrot.slane %v7697_v6, 4  ;;  %v7702_v57 = vrot.slane %v7700_v3, 5  ;;  %v8004_v24 = vld [vmem:[#allocation2 + $0x38] sm:$0xe]  ;;  %v8479_v4 = vld [vmem:[#allocation2 + $0x44] sm:$0x1] }
 0x5c3   :  { %v8567_v11 = vsel %vm11695_vm9, %v8562_v51, %v8566_v29  ;;  %v11348_v7 = vld [vmem:[%s14805_s7 + $0x220] sm:$0xff]  ;;  %v8072_v51 = vrot.slane %v7593_v59, 5  ;;  %v8484_v29 = vld [vmem:[#allocation2 + $0x68] sm:$0xf] }
 0x5c4   :  { %9096 = vmatpush.bf16.msra.mxu2 %v11348_v7 }
 0x5c5   :  { %7941 = vmatmul.bf16.vlgmr.msrb.gmra.mxu2 %v7869_v52  ;;  %v7674_v52 = vrot.slane %v7672_v48, 5  ;;  %v7690_v48 = vrot.slane %v7689_v43, 4  ;;  %v8600_v43 = vshll.u32 %v8480_v32, 16 }
 0x5c7   :  { %v7675_v47 = vor.u32 %v7674_v52, %v7671_v31  ;;  %v7695_v2 = vsel %vm11695_vm9, %v7690_v48, %v7694_v23  ;;  %v7714_v31 = vshll.u32 %v7594_v55, 16  ;;  %v10899_v48 = vor.u32 %v11322_v41, %v10898_v46 }
 0x5c8   :  { %v7330_v28 = vpop.f32.mrf.mxu0  ;;  %v6927_v22 = vpop.f32.mrf.mxu2  ;;  %8215 = vmatmul.bf16.vlgmr.msra.gmra.mxu3 %v8143_v36  ;;  %v8571_v36 = vrot.slane %v8569_v63, 4  ;;  %v7858_v9 = vunpack.c.l.b16 %v7695_v2 }
 0x5c9   :  { %v7676_v19 = vrot.slane %v7675_v47, 4  ;;  %v8597_v47 = vshrl.u32 %v8480_v32, 16 }
 0x5ca   :  { %8827 = vmatmul.bf16.vlgmr.msra.gmra.mxu1 %v8755_v13  ;;  %v11321_v13 = vld [vmem:[#allocation2 + $0x24] sm:$0xf0]  ;;  %v8575_v61 = vor.u32 %v8574_v58, %v8571_v36  ;;  %v8583_v58 = vshrl.u32 %v8478_v1, 16 }
 0x5cb   :  { %8409 = vmatmul.bf16.vlgmr.msra.gmra.mxu0 %v10891_v62  ;;  %v7072_v42 = vpop.f32.mrf.mxu3  ;;  %v7681_v63 = vsel %vm11695_vm9, %v7676_v19, %v7680_v40 }
 0x5cc   :  { %v7073_v8 = vadd.f32 %v7072_v42, %v6927_v22  ;;  %v10812_v22 = vrot.slane %v8002_v18, 9  ;;  %v10895_v42 = vor.u32 %v11321_v13, %v10894_v15  ;;  %v7857_v26 = vunpack.c.l.b16 %v7681_v63  ;;  %v14240_v15 = vld [vmem:[#allocation2 + $0x44] sm:$0x1]  ;;  %v14252_v63 = vld [vmem:[#allocation2 + $0x4c] sm:$0x1] }
 0x5cd   :  { %v7703_v13 = vor.u32 %v7702_v57, %v7699_v33  ;;  %v7720_v19 = vshll.u32 %v14240_v15, 16  ;;  %v8076_v3 = vrot.slane %v14240_v15, 5  ;;  %v8625_v57 = vshrl.u32 %v8484_v29, 16 }
 0x5ce   :  { %v14215_v16 = vadd.f32 %v7330_v28, %v7073_v8  ;;  %v8742_v28 = vunpack.c.l.b16 %v8553_v12  ;;  %v8065_v25 = vsel %vm11750_vm12, %v10812_v22, %v8064_v34  ;;  %v8578_v8 = vshll.u32 %v8477_v44, 16  ;;  %v14242_v44 = vld [vmem:[#allocation2 + $0x40] sm:$0xe] }
 0x5cf   :  { %v8131_v20 = vunpack.c.l.b16 %v8065_v25  ;;  %v8132_v12 = vunpack.c.l.b16 %v8069_v37  ;;  %v8743_v22 = vunpack.c.l.b16 %v8567_v11  ;;  %v10814_v25 = vrot.slane %v8004_v24, 9  ;;  %v7598_v11 = vld [vmem:[#allocation2 + $0x60] sm:$0xf] }
 0x5d0   :  { %v7332_v39 = vpop.f32.mrf.mxu0  ;;  %v6929_v54 = vpop.f32.mrf.mxu2  ;;  %v8756_v53 = vpack.c.b16 %v8742_v28, %v8741_v5  ;;  %v8580_v49 = vrot.slane %v8578_v8, 5  ;;  %v7716_v28 = vrot.slane %v7714_v31, 5  ;;  %v7704_v8 = vrot.slane %v7703_v13, 4  ;;  %v14263_v13 = vld [vmem:[#allocation2 + $0x5c] sm:$0x1] }
 0x5d1   :  { %v10815_v6 = vrot.slane %v14242_v44, 9  ;;  %v8592_v37 = vshll.u32 %v8479_v4, 16  ;;  %v7742_v59 = vshll.u32 %v7598_v11, 16  ;;  %v8627_v41 = vrot.slane %v8625_v57, 4  ;;  %v14267_v4 = vld [vmem:[#allocation2 + $0x64] sm:$0x1] }
 0x5d3   :  { %v7074_v60 = vpop.f32.mrf.mxu3 }
 0x5d4   :  { %v7075_v62 = vadd.f32 %v7074_v60, %v6929_v54  ;;  %v7711_v54 = vshrl.u32 %v7594_v55, 16  ;;  %v8586_v60 = vshll.u32 %v8478_v1, 16  ;;  %v8482_v55 = vld [vmem:[#allocation2 + $0x60] sm:$0xf]  ;;  %v7722_v1 = vrot.slane %v7720_v19, 5 }
 0x5d5   :  { %7946 = vmatmul.bf16.gmra.mxu2 %v7870_v21  ;;  %v8614_v33 = vshll.u32 %v8482_v55, 16 }
 0x5d6   :  { %v14224_v30 = vadd.f32 %v7332_v39, %v7075_v62  ;;  %v8576_v39 = vrot.slane %v8575_v61, 4  ;;  %v7713_v5 = vrot.slane %v7711_v54, 4  ;;  %v8145_v62 = vpack.c.b16 %v8132_v12, %v8131_v20 }
 0x5d7   :  { %v8588_v50 = vrot.slane %v8586_v60, 5  ;;  %v7708_v54 = vrot.slane %v7706_v45, 5  ;;  %v8611_v12 = vshrl.u32 %v8482_v55, 16  ;;  %v14279_v55 = vld [vmem:[#allocation2 + $0x6c] sm:$0x1] }
 0x5d8   :  { %v7335_v10 = vpop.f32.mrf.mxu0  ;;  %v6932_v27 = vpop.f32.mrf.mxu2  ;;  %8220 = vmatmul.bf16.gmra.mxu3 %v8144_v14  ;;  %v8581_v21 = vsel %vm11695_vm9, %v8576_v39, %v8580_v49  ;;  %v7871_v14 = vpack.c.b16 %v7858_v9, %v7857_v26  ;;  %v7717_v61 = vor.u32 %v7716_v28, %v7713_v5  ;;  %v8606_v49 = vshll.u32 %v14252_v63, 16 }
 0x5d9   :  { %v8744_v34 = vunpack.c.l.b16 %v8581_v21  ;;  %v7709_v32 = vsel %vm11695_vm9, %v7704_v8, %v7708_v54  ;;  %v14259_v21 = vsel %vm11750_vm12, %v10814_v25, %v8072_v51  ;;  %v8594_v26 = vrot.slane %v8592_v37, 5  ;;  %v14277_v8 = vld [vmem:[#allocation2 + $0x64] sm:$0x1] }
 0x5da   :  { %8832 = vmatmul.bf16.gmra.mxu1 %v8756_v53  ;;  %v7718_v31 = vrot.slane %v7717_v61, 4  ;;  %v7739_v28 = vshrl.u32 %v7598_v11, 16  ;;  %v8608_v46 = vrot.slane %v8606_v49, 5  ;;  %v7859_v15 = vunpack.c.l.b16 %v7709_v32  ;;  %v11323_v49 = vld [vmem:[#allocation2 + $0x44] sm:$0xf0]  ;;  %v11347_v32 = vld [vmem:[%s14805_s7 + $0x218] sm:$0xff] }
 0x5db   :  { %8414 = vmatmul.bf16.gmra.mxu0 %v10895_v42  ;;  %v7077_v0 = vpop.f32.mrf.mxu3  ;;  %v8599_v42 = vrot.slane %v8597_v47, 4  ;;  %v8757_v39 = vpack.c.b16 %v8744_v34, %v8743_v22  ;;  %v8613_v22 = vrot.slane %v8611_v12, 4  ;;  %v8616_v34 = vrot.slane %v8614_v33, 5  ;;  %9097 = vmatpush.bf16.msra.mxu2 %v11347_v32  ;;  %v14325_v32 = vld [vmem:[#allocation2 + $0x74] sm:$0x1] }
 0x5dc   :  { %v7078_v52 = vadd.f32 %v7077_v0, %v6932_v27  ;;  %v8602_v27 = vrot.slane %v8600_v43, 5  ;;  %v7723_v5 = vsel %vm11695_vm9, %v7718_v31, %v7722_v1  ;;  %v8077_v61 = vsel %vm11750_vm12, %v10815_v6, %v8076_v3  ;;  %v14282_v31 = vpop.f32.mrf.mxu1 }
 0x5dd   :  { %v8133_v19 = vunpack.c.l.b16 %v14259_v21  ;;  %v8080_v51 = vrot.slane %v14263_v13, 5  ;;  %v8084_v6 = vrot.slane %v14267_v4, 5  ;;  %v8617_v3 = vor.u32 %v8616_v34, %v8613_v22  ;;  %v7600_v22 = vld [vmem:[#allocation2 + $0x68] sm:$0xf] }
 0x5de   :  { %v14236_v18 = vadd.f32 %v7335_v10, %v7078_v52  ;;  %v8585_v10 = vrot.slane %v8583_v58, 4  ;;  %v7596_v52 = vld [vmem:[#allocation2 + $0x58] sm:$0xf]  ;;  %v8603_v20 = vor.u32 %v8602_v27, %v8599_v42  ;;  %v7741_v42 = vrot.slane %v7739_v28, 4 }
 0x5df   :  { %v7725_v9 = vshrl.u32 %v7596_v52, 16  ;;  %v7744_v27 = vrot.slane %v7742_v59, 5  ;;  %v8620_v1 = vshll.u32 %v14277_v8, 16  ;;  %v8634_v12 = vshll.u32 %v14279_v55, 16 }
 0x5e0   :  { %v7337_v35 = vpop.f32.mrf.mxu0  ;;  %v6934_v36 = vpop.f32.mrf.mxu2  ;;  %v8589_v2 = vor.u32 %v8588_v50, %v8585_v10  ;;  %v8604_v43 = vrot.slane %v8603_v20, 4  ;;  %v8007_v10 = vld [vmem:[#allocation2 + $0x60] sm:$0xe] }
 0x5e1   :  { %v7727_v50 = vrot.slane %v7725_v9, 4  ;;  %v7745_v11 = vor.u32 %v7744_v27, %v7741_v42 }
 0x5e2   :  { %v8590_v60 = vrot.slane %v8589_v2, 4 }
 0x5e3   :  { %v7079_v17 = vpop.f32.mrf.mxu3 }
 0x5e4   :  { %v7080_v53 = vadd.f32 %v7079_v17, %v6934_v36  ;;  %v7728_v36 = vshll.u32 %v7596_v52, 16  ;;  %v7860_v17 = vunpack.c.l.b16 %v7723_v5  ;;  %v8595_v7 = vsel %vm11695_vm9, %v8590_v60, %v8594_v26 }
 0x5e5   :  { %7951 = vmatmul.bf16.gmra.mxu2 %v7871_v14  ;;  %v8618_v26 = vrot.slane %v8617_v3, 4  ;;  %v14309_v3 = vld [vmem:[#allocation2 + $0x60] sm:$0xf] }
 0x5e6   :  { %v14248_v23 = vadd.f32 %v7337_v35, %v7080_v53  ;;  %v8628_v35 = vshll.u32 %v8484_v29, 16  ;;  %v7730_v45 = vrot.slane %v7728_v36, 5  ;;  %v8134_v29 = vunpack.c.l.b16 %v8077_v61 }
 0x5e7   :  { %v7872_v2 = vpack.c.b16 %v7860_v17, %v7859_v15  ;;  %v7748_v36 = vshll.u32 %v14267_v4, 16  ;;  %v8622_v15 = vrot.slane %v8620_v1, 5  ;;  %v7602_v17 = vld [vmem:[#allocation2 + $0x70] sm:$0xf] }
 0x5e8   :  { %v7340_v40 = vpop.f32.mrf.mxu0  ;;  %v6937_v0 = vpop.f32.mrf.mxu2  ;;  %8225 = vmatmul.bf16.gmra.mxu3 %v8145_v62  ;;  %v8006_v62 = vld [vmem:[#allocation2 + $0x58] sm:$0xe]  ;;  %v8630_v14 = vrot.slane %v8628_v35, 5  ;;  %v7731_v54 = vor.u32 %v7730_v45, %v7727_v50  ;;  %v7734_v35 = vshll.u32 %v14263_v13, 16  ;;  %v7746_v13 = vrot.slane %v7745_v11, 4 }
 0x5e9   :  { %v10816_v25 = vrot.slane %v8006_v62, 9  ;;  %v8636_v62 = vrot.slane %v8634_v12, 5  ;;  %v8623_v4 = vsel %vm11695_vm9, %v8618_v26, %v8622_v15  ;;  %v8488_v45 = vld [vmem:[#allocation2 + $0x78] sm:$0xf]  ;;  %v14329_v26 = vld [vmem:[#allocation2 + $0x7c] sm:$0x1] }
 0x5ea   :  { %8837 = vmatmul.bf16.gmra.mxu1 %v8757_v39  ;;  %v8631_v37 = vor.u32 %v8630_v14, %v8627_v41  ;;  %v8745_v39 = vunpack.c.l.b16 %v8595_v7  ;;  %v7732_v59 = vrot.slane %v7731_v54, 4  ;;  %v7736_v14 = vrot.slane %v7734_v35, 5  ;;  %v14319_v54 = vld [vmem:[#allocation2 + $0x68] sm:$0xe] }
 0x5eb   :  { %8419 = vmatmul.bf16.gmra.mxu0 %v10899_v48  ;;  %v7082_v58 = vpop.f32.mrf.mxu3  ;;  %v8609_v48 = vsel %vm11695_vm9, %v8604_v43, %v8608_v46  ;;  %v8081_v57 = vsel %vm11750_vm12, %v10816_v25, %v8080_v51  ;;  %v7753_v7 = vshrl.u32 %v7600_v22, 16  ;;  %v7770_v25 = vshll.u32 %v7602_v17, 16 }
 0x5ec   :  { %v7083_v47 = vadd.f32 %v7082_v58, %v6937_v0  ;;  %v10902_v0 = vld [vmem:[#allocation2 + $0x40] sm:$0xf]  ;;  %v8746_v20 = vunpack.c.l.b16 %v8609_v48  ;;  %v8632_v9 = vrot.slane %v8631_v37, 4  ;;  %v8146_v58 = vpack.c.b16 %v8134_v29, %v8133_v19  ;;  %v14311_v37 = vld [vmem:[#allocation2 + $0x64] sm:$0xf0] }
 0x5ed   :  { %v10903_v5 = vor.u32 %v11323_v49, %v10902_v0  ;;  %v8135_v34 = vunpack.c.l.b16 %v8081_v57  ;;  %v7737_v50 = vsel %vm11695_vm9, %v7732_v59, %v7736_v14  ;;  %v7767_v48 = vshrl.u32 %v7602_v17, 16  ;;  %v14313_v29 = vld [vmem:[#allocation2 + $0x6c] sm:$0x1] }
 0x5ee   :  { %v14265_v44 = vadd.f32 %v7340_v40, %v7083_v47  ;;  %v10817_v40 = vrot.slane %v8007_v10, 9  ;;  %v8486_v47 = vld [vmem:[#allocation2 + $0x70] sm:$0xf]  ;;  %v8758_v43 = vpack.c.b16 %v8746_v20, %v8745_v39  ;;  %v7750_v10 = vrot.slane %v7748_v36, 5  ;;  %v14315_v39 = vpop.f32.mrf.mxu1 }
 0x5ef   :  { %v8639_v61 = vshrl.u32 %v8486_v47, 16  ;;  %v8642_v19 = vshll.u32 %v8486_v47, 16  ;;  %v8653_v20 = vshrl.u32 %v8488_v45, 16  ;;  %v8656_v49 = vshll.u32 %v8488_v45, 16 }
 0x5f0   :  { %v7342_v24 = vpop.f32.mrf.mxu0  ;;  %v6939_v53 = vpop.f32.mrf.mxu2  ;;  %v8085_v21 = vsel %vm11750_vm12, %v10817_v40, %v8084_v6  ;;  %v7751_v27 = vsel %vm11695_vm9, %v7746_v13, %v7750_v10  ;;  %v14307_v6 = vunpack.c.l.b16 %v8623_v4  ;;  %v7755_v57 = vrot.slane %v7753_v7, 4  ;;  %v11346_v7 = vld [vmem:[%s14805_s7 + $0x210] sm:$0xff] }
 0x5f1   :  { %v8136_v41 = vunpack.c.l.b16 %v8085_v21  ;;  %v7862_v11 = vunpack.c.l.b16 %v7751_v27  ;;  %v8644_v36 = vrot.slane %v8642_v19, 5  ;;  %v10907_v59 = vor.u32 %v14311_v37, %v14309_v3  ;;  %9098 = vmatpush.bf16.msra.mxu2 %v11346_v7  ;;  %v8011_v7 = vld [vmem:[#allocation2 + $0x80] sm:$0xe] }
 0x5f2   :  { %v8088_v47 = vrot.slane %v14313_v29, 5  ;;  %v8655_v13 = vrot.slane %v8653_v20, 4  ;;  %v8662_v17 = vshll.u32 %v14329_v26, 16  ;;  %v7762_v45 = vshll.u32 %v14313_v29, 16 }
 0x5f3   :  { %v7084_v52 = vpop.f32.mrf.mxu3  ;;  %v14305_v40 = vpack.c.b16 %v8136_v41, %v8135_v34  ;;  %v8492_v34 = vld [vmem:[#allocation2 + $0x88] sm:$0xf] }
 0x5f4   :  { %v7085_v33 = vadd.f32 %v7084_v52, %v6939_v53  ;;  %v7756_v53 = vshll.u32 %v7600_v22, 16  ;;  %v14321_v52 = vld [vmem:[#allocation2 + $0x70] sm:$0xe]  ;;  %v8658_v22 = vrot.slane %v8656_v49, 5 }
 0x5f5   :  { %7956 = vmatmul.bf16.gmra.mxu2 %v7872_v2  ;;  %v7861_v2 = vunpack.c.l.b16 %v7737_v50 }
 0x5f6   :  { %v14295_v28 = vadd.f32 %v7342_v24, %v7085_v33  ;;  %v8637_v24 = vsel %vm11695_vm9, %v8632_v9, %v8636_v62  ;;  %v14327_v33 = vld [vmem:[#allocation2 + $0x74] sm:$0x1]  ;;  %v7758_v35 = vrot.slane %v7756_v53, 5  ;;  %v8641_v9 = vrot.slane %v8639_v61, 4  ;;  %v14348_v20 = vpop.f32.mrf.mxu1 }
 0x5f7   :  { %v14317_v0 = vunpack.c.l.b16 %v8637_v24  ;;  %v8092_v62 = vrot.slane %v14325_v32, 5  ;;  %v7873_v41 = vpack.c.b16 %v7862_v11, %v7861_v2  ;;  %v8648_v14 = vshll.u32 %v14327_v33, 16  ;;  %v7604_v24 = vld [vmem:[#allocation2 + $0x78] sm:$0xf] }
 0x5f8   :  { %v7345_v60 = vpop.f32.mrf.mxu0  ;;  %v6942_v46 = vpop.f32.mrf.mxu2  ;;  %8230 = vmatmul.bf16.gmra.mxu3 %v8146_v58  ;;  %v7769_v58 = vrot.slane %v7767_v48, 4  ;;  %v7759_v4 = vor.u32 %v7758_v35, %v7755_v57  ;;  %v8645_v50 = vor.u32 %v8644_v36, %v8641_v9  ;;  %v8681_v48 = vshrl.u32 %v8492_v34, 16 }
 0x5f9   :  { %v8759_v15 = vpack.c.b16 %v14317_v0, %v14307_v6  ;;  %v7776_v6 = vshll.u32 %v14325_v32, 16  ;;  %v7781_v3 = vshrl.u32 %v7604_v24, 16  ;;  %v7784_v37 = vshll.u32 %v7604_v24, 16 }
 0x5fa   :  { %8842 = vmatmul.bf16.gmra.mxu1 %v8758_v43  ;;  %v10819_v43 = vrot.slane %v14321_v52, 9  ;;  %v7760_v2 = vrot.slane %v7759_v4, 4  ;;  %v8646_v11 = vrot.slane %v8645_v50, 4  ;;  %v8650_v57 = vrot.slane %v8648_v14, 5  ;;  %v14355_v14 = vld [vmem:[#allocation2 + $0x84] sm:$0x1] }
 0x5fb   :  { %8424 = vmatmul.bf16.gmra.mxu0 %v10903_v5  ;;  %v7087_v42 = vpop.f32.mrf.mxu3  ;;  %v7772_v5 = vrot.slane %v7770_v25, 5  ;;  %v8684_v25 = vshll.u32 %v8492_v34, 16  ;;  %v7764_v35 = vrot.slane %v7762_v45, 5  ;;  %v8683_v36 = vrot.slane %v8681_v48, 4  ;;  %v7605_v45 = vld [vmem:[#allocation2 + $0x7c] sm:$0x1] }
 0x5fc   :  { %v7088_v51 = vadd.f32 %v7087_v42, %v6942_v46  ;;  %v8490_v46 = vld [vmem:[#allocation2 + $0x80] sm:$0xf] }
 0x5fd   :  { %v7773_v61 = vor.u32 %v7772_v5, %v7769_v58  ;;  %v8667_v53 = vshrl.u32 %v8490_v46, 16  ;;  %v7606_v42 = vld [vmem:[#allocation2 + $0x80] sm:$0xf]  ;;  %v8670_v19 = vshll.u32 %v8490_v46, 16  ;;  %v8686_v58 = vrot.slane %v8684_v25, 5 }
 0x5fe   :  { %v14323_v12 = vadd.f32 %v7345_v60, %v7088_v51  ;;  %v10818_v60 = vrot.slane %v14319_v54, 9  ;;  %v8659_v51 = vor.u32 %v8658_v22, %v8655_v13  ;;  %v7795_v54 = vshrl.u32 %v7606_v42, 16  ;;  %v8010_v46 = vld [vmem:[#allocation2 + $0x78] sm:$0xe] }
 0x5ff   :  { %v7798_v52 = vshll.u32 %v7606_v42, 16  ;;  %v8669_v9 = vrot.slane %v8667_v53, 4  ;;  %v8672_v32 = vrot.slane %v8670_v19, 5  ;;  %v7778_v5 = vrot.slane %v7776_v6, 5 }
 0x600   :  { %v7347_v1 = vpop.f32.mrf.mxu0  ;;  %v6944_v21 = vpop.f32.mrf.mxu2  ;;  %v7783_v13 = vrot.slane %v7781_v3, 4  ;;  %v7786_v22 = vrot.slane %v7784_v37, 5  ;;  %v8089_v34 = vsel %vm11750_vm12, %v10818_v60, %v8088_v47  ;;  %v14363_v60 = vld [vmem:[#allocation2 + $0x8c] sm:$0x1]  ;;  %v10820_v53 = vrot.slane %v8010_v46, 9 }
 0x601   :  { %v7800_v4 = vrot.slane %v7798_v52, 5  ;;  %v8673_v42 = vor.u32 %v8672_v32, %v8669_v9  ;;  %v8690_v6 = vshll.u32 %v14363_v60, 16  ;;  %v14371_v9 = vpop.f32.mrf.mxu1 }
 0x602   :  { %v7787_v48 = vor.u32 %v7786_v22, %v7783_v13 }
 0x603   :  { %v7089_v10 = vpop.f32.mrf.mxu3  ;;  %v8692_v22 = vrot.slane %v8690_v6, 5  ;;  %v8496_v6 = vld [vmem:[#allocation2 + $0x98] sm:$0xf] }
 0x604   :  { %v7090_v27 = vadd.f32 %v7089_v10, %v6944_v21  ;;  %v7774_v21 = vrot.slane %v7773_v61, 4  ;;  %v8664_v10 = vrot.slane %v8662_v17, 5  ;;  %v7607_v61 = vld [vmem:[#allocation2 + $0x84] sm:$0x1] }
 0x605   :  { %7961 = vmatmul.bf16.gmra.mxu2 %v7873_v41  ;;  %v7765_v41 = vsel %vm11695_vm9, %v7760_v2, %v7764_v35  ;;  %v8096_v2 = vrot.slane %v7605_v45, 5  ;;  %v8100_v52 = vrot.slane %v7607_v61, 5 }
 0x606   :  { %v14346_v29 = vadd.f32 %v7347_v1, %v7090_v27  ;;  %v8660_v1 = vrot.slane %v8659_v51, 4  ;;  %v7779_v50 = vsel %vm11695_vm9, %v7774_v21, %v7778_v5  ;;  %v8687_v27 = vor.u32 %v8686_v58, %v8683_v36  ;;  %v11325_v5 = vld [vmem:[#allocation2 + $0x74] sm:$0xf0] }
 0x607   :  { %v7864_v51 = vunpack.c.l.b16 %v7779_v50  ;;  %v7804_v21 = vshll.u32 %v7607_v61, 16 }
 0x608   :  { %v7350_v0 = vpop.f32.mrf.mxu0  ;;  %v6947_v49 = vpop.f32.mrf.mxu2  ;;  %8235 = vmatmul.bf16.gmra.mxu3 %v14305_v40  ;;  %v7797_v40 = vrot.slane %v7795_v54, 4  ;;  %v8665_v19 = vsel %vm11695_vm9, %v8660_v1, %v8664_v10  ;;  %v10821_v54 = vrot.slane %v8011_v7, 9  ;;  %v8688_v35 = vrot.slane %v8687_v27, 4  ;;  %v8494_v27 = vld [vmem:[#allocation2 + $0x90] sm:$0xf] }
 0x609   :  { %v8750_v58 = vunpack.c.l.b16 %v8665_v19  ;;  %v7788_v1 = vrot.slane %v7787_v48, 4 }
 0x60a   :  { %8847 = vmatmul.bf16.gmra.mxu1 %v8759_v15  ;;  %v8093_v15 = vsel %vm11750_vm12, %v10819_v43, %v8092_v62  ;;  %v7863_v43 = vunpack.c.l.b16 %v7765_v41  ;;  %v8676_v62 = vshll.u32 %v14355_v14, 16  ;;  %v7801_v3 = vor.u32 %v7800_v4, %v7797_v40 }
 0x60b   :  { %8429 = vmatmul.bf16.gmra.mxu0 %v10907_v59  ;;  %v7092_v24 = vpop.f32.mrf.mxu3  ;;  %v8651_v59 = vsel %vm11695_vm9, %v8646_v11, %v8650_v57  ;;  %v8137_v11 = vunpack.c.l.b16 %v8089_v34  ;;  %v8674_v57 = vrot.slane %v8673_v42, 4  ;;  %v8138_v32 = vunpack.c.l.b16 %v8093_v15  ;;  %v11345_v15 = vld [vmem:[%s14805_s7 + $0x208] sm:$0xff] }
 0x60c   :  { %v7093_v47 = vadd.f32 %v7092_v24, %v6947_v49  ;;  %v7790_v49 = vshll.u32 %v7605_v45, 16  ;;  %v8749_v36 = vunpack.c.l.b16 %v8651_v59  ;;  %v7874_v46 = vpack.c.b16 %v7864_v51, %v7863_v43  ;;  %9099 = vmatpush.bf16.msra.mxu2 %v11345_v15  ;;  %v14414_v15 = vld [vmem:[#allocation2 + $0x94] sm:$0x1] }
 0x60d   :  { %v8678_v13 = vrot.slane %v8676_v62, 5  ;;  %v7802_v41 = vrot.slane %v7801_v3, 4  ;;  %v8097_v4 = vsel %vm11750_vm12, %v10820_v53, %v8096_v2  ;;  %v8101_v34 = vsel %vm11750_vm12, %v10821_v54, %v8100_v52  ;;  %v7610_v3 = vld [vmem:[#allocation2 + $0x90] sm:$0xf]  ;;  %v14394_v52 = vld [vmem:[#allocation2 + $0x80] sm:$0xf] }
 0x60e   :  { %v14368_v25 = vadd.f32 %v7350_v0, %v7093_v47  ;;  %v10910_v0 = vld [vmem:[#allocation2 + $0x70] sm:$0xf]  ;;  %v7792_v24 = vrot.slane %v7790_v49, 5  ;;  %v8693_v50 = vsel %vm11695_vm9, %v8688_v35, %v8692_v22  ;;  %v7806_v45 = vrot.slane %v7804_v21, 5  ;;  %v7608_v47 = vld [vmem:[#allocation2 + $0x88] sm:$0xf] }
 0x60f   :  { %v8679_v10 = vsel %vm11695_vm9, %v8674_v57, %v8678_v13  ;;  %v8148_v61 = vpack.c.b16 %v8138_v32, %v8137_v11  ;;  %v8760_v7 = vpack.c.b16 %v8750_v58, %v8749_v36  ;;  %v10911_v53 = vor.u32 %v11325_v5, %v10910_v0  ;;  %v14396_v49 = vld [vmem:[#allocation2 + $0x84] sm:$0xf0]  ;;  %v14402_v58 = vld [vmem:[#allocation2 + $0x8c] sm:$0x1]  ;;  %v14408_v22 = vld [vmem:[#allocation2 + $0x9c] sm:$0x1] }
 0x610   :  { %v7352_v17 = vpop.f32.mrf.mxu0  ;;  %v6949_v37 = vpop.f32.mrf.mxu2  ;;  %v7793_v42 = vsel %vm11695_vm9, %v7788_v1, %v7792_v24  ;;  %v8139_v62 = vunpack.c.l.b16 %v8097_v4  ;;  %v8140_v48 = vunpack.c.l.b16 %v8101_v34  ;;  %v7807_v51 = vsel %vm11695_vm9, %v7802_v41, %v7806_v45  ;;  %v14400_v35 = vld [vmem:[#allocation2 + $0x88] sm:$0xe]  ;;  %v8898_v24 = vld [vmem:[#allocation2 + $0x90] sm:$0xe] }
 0x611   :  { %v14390_v2 = vunpack.c.l.b16 %v8679_v10  ;;  %v14392_v54 = vunpack.c.l.b16 %v8693_v50  ;;  %v7809_v11 = vshrl.u32 %v7608_v47, 16  ;;  %v7812_v57 = vshll.u32 %v7608_v47, 16  ;;  %v14410_v4 = vpop.f32.mrf.mxu1  ;;  %v8893_v45 = vld [vmem:[#allocation2 + $0x68] sm:$0xe] }
 0x612   :  { %v8695_v21 = vshrl.u32 %v8494_v27, 16  ;;  %v8698_v32 = vshll.u32 %v8494_v27, 16  ;;  %v7866_v36 = vunpack.c.l.b16 %v7807_v51  ;;  %v8709_v0 = vshrl.u32 %v8496_v6, 16 }
 0x613   :  { %v7094_v40 = vpop.f32.mrf.mxu3  ;;  %v7823_v1 = vshrl.u32 %v7610_v3, 16  ;;  %v7826_v5 = vshll.u32 %v7610_v3, 16  ;;  %v8712_v41 = vshll.u32 %v8496_v6, 16  ;;  %v7811_v10 = vrot.slane %v7809_v11, 4  ;;  %v8895_v6 = vld [vmem:[#allocation2 + $0x78] sm:$0xe] }
 0x614   :  { %v7095_v59 = vadd.f32 %v7094_v40, %v6949_v37  ;;  %v8892_v40 = vld [vmem:[#allocation2 + $0x60] sm:$0xe]  ;;  %v7814_v50 = vrot.slane %v7812_v57, 5 }
 0x615   :  { %7966 = vmatmul.bf16.gmra.mxu2 %v7874_v46  ;;  %v14404_v46 = vpack.c.b16 %v8140_v48, %v8139_v62  ;;  %v14423_v62 = vrot.slane %v8709_v0, 4  ;;  %v7825_v48 = vrot.slane %v7823_v1, 4  ;;  %v7828_v51 = vrot.slane %v7826_v5, 5 }
 0x616   :  { %v14386_v43 = vadd.f32 %v7352_v17, %v7095_v59  ;;  %v14398_v17 = vunpack.c.l.b16 %v7793_v42  ;;  %v8894_v42 = vld [vmem:[#allocation2 + $0x70] sm:$0xe]  ;;  %v14427_v11 = vrot.slane %v8712_v41, 5  ;;  %v11008_v57 = vrot.slane %v8892_v40, 9 }
 0x617   :  { %v7832_v0 = vshll.u32 %v14414_v15, 16  ;;  %v11010_v1 = vrot.slane %v8894_v42, 9  ;;  %v8974_v5 = vrot.slane %v14327_v33, 5 }
 0x618   :  { %v7355_v19 = vpop.f32.mrf.mxu0  ;;  %v6952_v37 = vpop.f32.mrf.mxu2  ;;  %8240 = vmatmul.bf16.gmra.mxu3 %v8148_v61  ;;  %v14417_v61 = vrot.slane %v8695_v21, 4  ;;  %v7875_v27 = vpack.c.b16 %v7866_v36, %v14398_v17  ;;  %v8970_v17 = vrot.slane %v14279_v55, 5  ;;  %v8896_v36 = vld [vmem:[#allocation2 + $0x80] sm:$0xe] }
 0x619   :  { %v8975_v13 = vsel %vm11750_vm12, %v11010_v1, %v8974_v5  ;;  %v11012_v42 = vrot.slane %v8896_v36, 9  ;;  %v14449_v5 = vpop.f32.mrf.mxu1 }
 0x61a   :  { %8852 = vmatmul.bf16.gmra.mxu1 %v8760_v7  ;;  %v14419_v7 = vrot.slane %v8698_v32, 5  ;;  %v7815_v32 = vor.u32 %v7814_v50, %v7811_v10  ;;  %v8978_v10 = vrot.slane %v14329_v26, 5  ;;  %v8495_v50 = vld [vmem:[#allocation2 + $0x94] sm:$0x1]  ;;  %v8982_v26 = vrot.slane %v14355_v14, 5 }
 0x61b   :  { %8434 = vmatmul.bf16.gmra.mxu0 %v10911_v53  ;;  %v7097_v34 = vpop.f32.mrf.mxu3  ;;  %v11009_v53 = vrot.slane %v8893_v45, 9 }
 0x61c   :  { %v7098_v47 = vadd.f32 %v7097_v34, %v6952_v37  ;;  %v7818_v37 = vshll.u32 %v14402_v58, 16  ;;  %v8966_v34 = vrot.slane %v14277_v8, 5  ;;  %v8897_v8 = vld [vmem:[#allocation2 + $0x88] sm:$0xe] }
 0x61d   :  { %v8971_v40 = vsel %vm11750_vm12, %v11009_v53, %v8970_v17  ;;  %v11013_v36 = vrot.slane %v8897_v8, 9 }
 0x61e   :  { %v14425_v59 = vadd.f32 %v7355_v19, %v7098_v47  ;;  %v11011_v19 = vrot.slane %v8895_v6, 9  ;;  %v7829_v47 = vor.u32 %v7828_v51, %v7825_v48  ;;  %v8967_v41 = vsel %vm11750_vm12, %v11008_v57, %v8966_v34  ;;  %v11344_v48 = vld [vmem:[%s14805_s7 + $0x200] sm:$0xff]  ;;  %v8899_v57 = vld [vmem:[#allocation2 + $0x98] sm:$0xe] }
 0x61f   :  { %v9021_v45 = vunpack.c.l.b16 %v8967_v41  ;;  %v9022_v55 = vunpack.c.l.b16 %v8971_v40  ;;  %v7816_v6 = vrot.slane %v7815_v32, 4  ;;  %v9023_v51 = vunpack.c.l.b16 %v8975_v13  ;;  %9100 = vmatpush.bf16.msra.mxu2 %v11344_v48 }
 0x620   :  { %v7357_v3 = vpop.f32.mrf.mxu0  ;;  %v6954_v21 = vpop.f32.mrf.mxu2  ;;  %v8979_v53 = vsel %vm11750_vm12, %v11011_v19, %v8978_v10  ;;  %v8983_v32 = vsel %vm11750_vm12, %v11012_v42, %v8982_v26  ;;  %v8986_v41 = vrot.slane %v14363_v60, 5  ;;  %v11014_v40 = vrot.slane %v8898_v24, 9 }
 0x621   :  { %v14447_v17 = vpack.c.b16 %v9022_v55, %v9021_v45  ;;  %v9024_v1 = vunpack.c.l.b16 %v8979_v53  ;;  %v8990_v19 = vrot.slane %v8495_v50, 5  ;;  %v8013_v55 = vld [vmem:[#allocation2 + $0x90] sm:$0xe]  ;;  %v7830_v8 = vrot.slane %v7829_v47, 4 }
 0x622   :  { %v8994_v60 = vrot.slane %v14408_v22, 5  ;;  %v8701_v24 = vor.u32 %v14419_v7, %v14417_v61  ;;  %v14833_v47 = vpack.c.b16 %v14392_v54, %v14390_v2  ;;  %v8104_v26 = vrot.slane %v14402_v58, 5 }
 0x623   :  { %v7099_v33 = vpop.f32.mrf.mxu3  ;;  %v14456_v14 = vpack.c.b16 %v9024_v1, %v9023_v51  ;;  %v8991_v42 = vsel %vm11750_vm12, %v11014_v40, %v8990_v19  ;;  %v14834_v51 = vor.u32 %v14396_v49, %v14394_v52  ;;  %v10823_v7 = vrot.slane %v8013_v55, 9 }
 0x624   :  { %v7100_v34 = vadd.f32 %v7099_v33, %v6954_v21  ;;  %v9025_v21 = vunpack.c.l.b16 %v8983_v32  ;;  %v8987_v33 = vsel %vm11750_vm12, %v11013_v36, %v8986_v41  ;;  %v9027_v53 = vunpack.c.l.b16 %v8991_v42 }
 0x625   :  { %7971 = vmatmul.bf16.gmra.mxu2 %v7875_v27  ;;  %v11015_v27 = vrot.slane %v8899_v57, 9  ;;  %v9026_v48 = vunpack.c.l.b16 %v8987_v33  ;;  %v7820_v57 = vrot.slane %v7818_v37, 5  ;;  %v8108_v2 = vrot.slane %v14414_v15, 5  ;;  %v14490_v15 = vpop.f32.mrf.mxu1 }
 0x626   :  { %v14454_v13 = vadd.f32 %v7357_v3, %v7100_v34  ;;  %v8715_v3 = vor.u32 %v14427_v11, %v14423_v62  ;;  %v8704_v34 = vshll.u32 %v8495_v50, 16  ;;  %v14835_v54 = vshll.u32 %v14408_v22, 16 }
 0x627   :  { %v8995_v61 = vsel %vm11750_vm12, %v11015_v27, %v8994_v60  ;;  %v14477_v62 = vpack.c.b16 %v9026_v48, %v9025_v21  ;;  %v7821_v52 = vsel %vm11695_vm9, %v7816_v6, %v7820_v57  ;;  %v8702_v37 = vrot.slane %v8701_v24, 4  ;;  %v11327_v48 = vld [vmem:[#allocation2 + $0x94] sm:$0xf0] }
 0x628   :  { %v7360_v10 = vpop.f32.mrf.mxu0  ;;  %v6957_v45 = vpop.f32.mrf.mxu2  ;;  %8245 = vmatmul.bf16.gmra.mxu3 %v14404_v46  ;;  %v7834_v46 = vrot.slane %v7832_v0, 5  ;;  %v9028_v11 = vunpack.c.l.b16 %v8995_v61  ;;  %v8720_v36 = vrot.slane %v14835_v54, 5  ;;  %v8716_v0 = vrot.slane %v8715_v3, 4  ;;  %v10918_v3 = vld [vmem:[#allocation2 + $0x90] sm:$0xf] }
 0x629   :  { %v8706_v41 = vrot.slane %v8704_v34, 5  ;;  %v7867_v40 = vunpack.c.l.b16 %v7821_v52  ;;  %v14836_v22 = vrot.slane %v14400_v35, 9  ;;  %v8109_v21 = vsel %vm11750_vm12, %v10823_v7, %v8108_v2  ;;  %v11397_v34 = vld [vmem:[#allocation2 + $0x14] sm:$0x1]  ;;  %v11398_v2 = vld [vmem:[#allocation2 + $0x1c] sm:$0x1] }
 0x62a   :  { %8857 = vmatmul.bf16.gmra.mxu1 %v14833_v47  ;;  %v7835_v49 = vsel %vm11695_vm9, %v7830_v8, %v7834_v46  ;;  %v14486_v32 = vpack.c.b16 %v9028_v11, %v9027_v53  ;;  %v8142_v33 = vunpack.c.l.b16 %v8109_v21  ;;  %v8884_v53 = vld [vmem:[#allocation2 + $0x10] sm:$0xe]  ;;  %v10919_v57 = vor.u32 %v11327_v48, %v10918_v3  ;;  %v11400_v48 = vld [vmem:[#allocation2 + $0x2c] sm:$0x1] }
 0x62b   :  { %8439 = vmatmul.bf16.gmra.mxu0 %v14834_v51  ;;  %v7102_v1 = vpop.f32.mrf.mxu3  ;;  %v7868_v19 = vunpack.c.l.b16 %v7835_v49  ;;  %v8105_v6 = vsel %vm11750_vm12, %v14836_v22, %v8104_v26  ;;  %v8885_v51 = vld [vmem:[#allocation2 + $0x18] sm:$0xe]  ;;  %v11000_v61 = vrot.slane %v8884_v53, 9  ;;  %v8934_v11 = vrot.slane %v11397_v34, 5 }
 0x62c   :  { %v7103_v58 = vadd.f32 %v7102_v1, %v6957_v45  ;;  %v8707_v45 = vsel %vm11695_vm9, %v8702_v37, %v8706_v41  ;;  %v8141_v8 = vunpack.c.l.b16 %v8105_v6  ;;  %v11001_v1 = vrot.slane %v8885_v51, 9 }
 0x62d   :  { %v7876_v42 = vpack.c.b16 %v7868_v19, %v7867_v40  ;;  %v8753_v24 = vunpack.c.l.b16 %v8707_v45  ;;  %v8938_v54 = vrot.slane %v11398_v2, 5  ;;  %v8886_v45 = vld [vmem:[#allocation2 + $0x20] sm:$0xe]  ;;  %v8946_v53 = vrot.slane %v11400_v48, 5 }
 0x62e   :  { %v14488_v50 = vadd.f32 %v7360_v10, %v7103_v58  ;;  %v8721_v10 = vsel %vm11695_vm9, %v8716_v0, %v8720_v36  ;;  %v8150_v26 = vpack.c.b16 %v8142_v33, %v8141_v8  ;;  %v14504_v36 = vpop.f32.mrf.mxu1  ;;  %v8935_v58 = vsel %vm11750_vm12, %v11000_v61, %v8934_v11 }
 0x62f   :  { %v8754_v35 = vunpack.c.l.b16 %v8721_v10  ;;  %v8939_v37 = vsel %vm11750_vm12, %v11001_v1, %v8938_v54  ;;  %v9013_v40 = vunpack.c.l.b16 %v8935_v58  ;;  %v8887_v10 = vld [vmem:[#allocation2 + $0x28] sm:$0xe]  ;;  %v7564_v33 = vadd.f32 %v14282_v31, %v14215_v16 }
 0x630   :  { %v6959_v27 = vpop.f32.mrf.mxu2  ;;  %v7362_v55 = vpop.f32.mrf.mxu0  ;;  %v9014_v19 = vunpack.c.l.b16 %v8939_v37  ;;  %v11003_v3 = vrot.slane %v8887_v10, 9  ;;  %v7565_v16 = vadd.f32 %v14315_v39, %v14224_v30  ;;  %v7566_v37 = vadd.f32 %v14348_v20, %v14236_v18  ;;  %v11402_v39 = vld [vmem:[#allocation2 + $0x3c] sm:$0x1] }
 0x631   :  { %v8762_v38 = vpack.c.b16 %v8754_v35, %v8753_v24  ;;  %v11399_v24 = vld [vmem:[#allocation2 + $0x24] sm:$0x1]  ;;  %v7567_v18 = vadd.f32 %v14371_v9, %v14248_v23  ;;  %v8962_v9 = vrot.slane %v14252_v63, 5 }
 0x632   :  { %v9029_v6 = vpack.c.b16 %v9014_v19, %v9013_v40  ;;  %v8942_v35 = vrot.slane %v11399_v24, 5  ;;  %v8947_v61 = vsel %vm11750_vm12, %v11003_v3, %v8946_v53  ;;  %v11401_v19 = vld [vmem:[#allocation2 + $0x34] sm:$0x1]  ;;  %v8890_v53 = vld [vmem:[#allocation2 + $0x40] sm:$0xe] }
 0x633   :  { %v7104_v60 = vpop.f32.mrf.mxu3 }
 0x634   :  { %v7105_v47 = vadd.f32 %v7104_v60, %v6959_v27  ;;  %v11002_v60 = vrot.slane %v8886_v45, 9 }
 0x635   :  { %7976 = vmatmul.bf16.gmra.mxu2 %v7876_v42 }
 0x636   :  { %v14502_v46 = vadd.f32 %v7362_v55, %v7105_v47  ;;  %v14516_v51 = vpop.f32.mrf.mxu1 }
 0x638   :  { %v6962_v7 = vpop.f32.mrf.mxu2  ;;  %8250 = vmatmul.bf16.gmra.mxu3 %v8150_v26  ;;  %v7365_v52 = vpop.f32.mrf.mxu0 }
 0x63a   :  { %8862 = vmatmul.bf16.gmra.mxu1 %v8762_v38 }
 0x63b   :  { %8444 = vmatmul.bf16.gmra.mxu0 %v10919_v57  ;;  %v7107_v49 = vpop.f32.mrf.mxu3  ;;  %v8943_v57 = vsel %vm11750_vm12, %v11002_v60, %v8942_v35 }
 0x63c   :  { %v7108_v0 = vadd.f32 %v7107_v49, %v6962_v7  ;;  %v9015_v31 = vunpack.c.l.b16 %v8943_v57  ;;  %v9016_v7 = vunpack.c.l.b16 %v8947_v61  ;;  %v8889_v49 = vld [vmem:[#allocation2 + $0x38] sm:$0xe]  ;;  %v11006_v61 = vrot.slane %v8890_v53, 9 }
 0x63d   :  { %v11005_v30 = vrot.slane %v8889_v49, 9 }
 0x63e   :  { %v14510_v41 = vadd.f32 %v7365_v52, %v7108_v0  ;;  %v9030_v1 = vpack.c.b16 %v9016_v7, %v9015_v31  ;;  %v8888_v52 = vld [vmem:[#allocation2 + $0x30] sm:$0xe]  ;;  %v7546_v58 = vpop.f32.mrf.mxu1 }
 0x63f   :  { %v11004_v40 = vrot.slane %v8888_v52, 9 }
 0x640   :  { %v6964_v22 = vpop.f32.mrf.mxu2  ;;  %v7367_v55 = vpop.f32.mrf.mxu0 }
 0x643   :  { %v7109_v21 = vpop.f32.mrf.mxu3 }
 0x644   :  { %v7110_v27 = vadd.f32 %v7109_v21, %v6964_v22  ;;  %v8950_v22 = vrot.slane %v11401_v19, 5  ;;  %v7570_v19 = vadd.f32 %v14490_v15, %v14323_v12  ;;  %v7573_v12 = vadd.f32 %v7546_v58, %v14386_v43 }
 0x645   :  { %9101 = vmatmul.bf16.vlgmr.msra.gmra.mxu2 %v9029_v6  ;;  %v8954_v6 = vrot.slane %v11402_v39, 5  ;;  %v7571_v39 = vadd.f32 %v14504_v36, %v14346_v29 }
 0x646   :  { %v14512_v8 = vadd.f32 %v7367_v55, %v7110_v27  ;;  %v8951_v45 = vsel %vm11750_vm12, %v11004_v40, %v8950_v22 }
 0x647   :  { %v8955_v10 = vsel %vm11750_vm12, %v11005_v30, %v8954_v6  ;;  %v9017_v20 = vunpack.c.l.b16 %v8951_v45 }
 0x648   :  { %v7942_v42 = vpop.f32.mrf.mxu2 }
 0x649   :  { %v7982_v47 = vadd.f32 %v7942_v42, %v7564_v33  ;;  %v9018_v33 = vunpack.c.l.b16 %v8955_v10  ;;  %v7549_v42 = vpop.f32.mrf.mxu1 }
 0x64a   :  { %v7574_v29 = vadd.f32 %v7549_v42, %v14425_v59 }
 0x64b   :  { %v8216_v26 = vpop.f32.mrf.mxu3  ;;  %v9031_v35 = vpack.c.b16 %v9018_v33, %v9017_v20 }
 0x64c   :  { %v14522_v38 = vadd.f32 %v8216_v26, %v7982_v47  ;;  %v8891_v47 = vld [vmem:[#allocation2 + $0x48] sm:$0xe]  ;;  %v7568_v26 = vadd.f32 %v14410_v4, %v14265_v44  ;;  %v7569_v44 = vadd.f32 %v14449_v5, %v14295_v28  ;;  %v7572_v5 = vadd.f32 %v14516_v51, %v14368_v25 }
 0x64d   :  { %v11007_v23 = vrot.slane %v8891_v47, 9 }
 0x650   :  { %v7944_v34 = vpop.f32.mrf.mxu2 }
 0x651   :  { %v7983_v11 = vadd.f32 %v7944_v34, %v7565_v16  ;;  %v11403_v16 = vld [vmem:[#allocation2 + $0x44] sm:$0x1]  ;;  %v7551_v34 = vpop.f32.mrf.mxu1 }
 0x652   :  { %v8958_v31 = vrot.slane %v11403_v16, 5  ;;  %v7575_v25 = vadd.f32 %v7551_v34, %v14454_v13 }
 0x653   :  { %v8218_v2 = vpop.f32.mrf.mxu3 }
 0x654   :  { %v14526_v54 = vadd.f32 %v8218_v2, %v7983_v11  ;;  %v8963_v2 = vsel %vm11750_vm12, %v11007_v23, %v8962_v9 }
 0x655   :  { %9106 = vmatmul.bf16.gmra.mxu2 %v9030_v1  ;;  %v8959_v1 = vsel %vm11750_vm12, %v11006_v61, %v8958_v31  ;;  %v9020_v49 = vunpack.c.l.b16 %v8963_v2 }
 0x656   :  { %v9019_v4 = vunpack.c.l.b16 %v8959_v1 }
 0x658   :  { %v7947_v0 = vpop.f32.mrf.mxu2  ;;  %v9032_v40 = vpack.c.b16 %v9020_v49, %v9019_v4 }
 0x659   :  { %v7984_v21 = vadd.f32 %v7947_v0, %v7566_v37  ;;  %v7554_v63 = vpop.f32.mrf.mxu1 }
 0x65a   :  { %v7576_v58 = vadd.f32 %v7554_v63, %v14488_v50 }
 0x65b   :  { %v8221_v27 = vpop.f32.mrf.mxu3 }
 0x65c   :  { %v14534_v55 = vadd.f32 %v8221_v27, %v7984_v21 }
 0x660   :  { %v7949_v60 = vpop.f32.mrf.mxu2 }
 0x661   :  { %v7985_v24 = vadd.f32 %v7949_v60, %v7567_v18  ;;  %v7556_v56 = vpop.f32.mrf.mxu1 }
 0x662   :  { %v7577_v42 = vadd.f32 %v7556_v56, %v14502_v46 }
 0x663   :  { %v8223_v3 = vpop.f32.mrf.mxu3 }
 0x664   :  { %v14538_v48 = vadd.f32 %v8223_v3, %v7985_v24 }
 0x665   :  { %9111 = vmatmul.bf16.gmra.mxu2 %v9031_v35 }
 0x668   :  { %v7952_v57 = vpop.f32.mrf.mxu2 }
 0x669   :  { %v7986_v7 = vadd.f32 %v7952_v57, %v7568_v26  ;;  %v7559_v21 = vpop.f32.mrf.mxu1 }
 0x66a   :  { %v7578_v13 = vadd.f32 %v7559_v21, %v14510_v41 }
 0x66b   :  { %v8226_v11 = vpop.f32.mrf.mxu3 }
 0x66c   :  { %v8260_v52 = vadd.f32 %v8226_v11, %v7986_v7 }
 0x670   :  { %v7954_v37 = vpop.f32.mrf.mxu2 }
 0x671   :  { %v14549_v0 = vadd.f32 %v7954_v37, %v7569_v44  ;;  %v7561_v18 = vpop.f32.mrf.mxu1 }
 0x672   :  { %v7579_v50 = vadd.f32 %v7561_v18, %v14512_v8 }
 0x673   :  { %v8228_v8 = vpop.f32.mrf.mxu3 }
 0x675   :  { %9116 = vmatmul.bf16.gmra.mxu2 %v9032_v40 }
 0x678   :  { %v7957_v22 = vpop.f32.mrf.mxu2 }
 0x679   :  { %v14553_v30 = vadd.f32 %v7957_v22, %v7570_v19  ;;  %v8828_v33 = vpop.f32.mrf.mxu1 }
 0x67b   :  { %v8231_v56 = vpop.f32.mrf.mxu3 }
 0x680   :  { %v7959_v6 = vpop.f32.mrf.mxu2 }
 0x681   :  { %v14557_v28 = vadd.f32 %v7959_v6, %v7571_v39  ;;  %v8830_v43 = vpop.f32.mrf.mxu1 }
 0x685   :  { %9121 = vmatmul.bf16.gmra.mxu2 %v14447_v17  ;;  %v8410_v17 = vpop.f32.mrf.mxu0 }
 0x686   :  { %v8450_v46 = vadd.f32 %v8410_v17, %v14522_v38 }
 0x688   :  { %v7962_v27 = vpop.f32.mrf.mxu2  ;;  %v8868_v11 = vadd.f32 %v8828_v33, %v8450_v46 }
 0x689   :  { %v14562_v45 = vadd.f32 %v7962_v27, %v7572_v5  ;;  %v8833_v3 = vpop.f32.mrf.mxu1 }
 0x68d   :  { %v8412_v24 = vpop.f32.mrf.mxu0 }
 0x68e   :  { %v8451_v41 = vadd.f32 %v8412_v24, %v14526_v54 }
 0x690   :  { %v7964_v15 = vpop.f32.mrf.mxu2  ;;  %v8869_v2 = vadd.f32 %v8830_v43, %v8451_v41 }
 0x691   :  { %v14565_v10 = vadd.f32 %v7964_v15, %v7573_v12  ;;  %v8835_v61 = vpop.f32.mrf.mxu1  ;;  %v8261_v15 = vadd.f32 %v8228_v8, %v14549_v0 }
 0x695   :  { %9126 = vmatmul.bf16.gmra.mxu2 %v14456_v14  ;;  %v8415_v59 = vpop.f32.mrf.mxu0 }
 0x696   :  { %v8452_v37 = vadd.f32 %v8415_v59, %v14534_v55  ;;  %v8233_v55 = vpop.f32.mrf.mxu3 }
 0x697   :  { %v8263_v0 = vadd.f32 %v8233_v55, %v14557_v28 }
 0x698   :  { %v7967_v36 = vpop.f32.mrf.mxu2 }
 0x699   :  { %v14569_v20 = vadd.f32 %v7967_v36, %v7574_v29  ;;  %v8838_v7 = vpop.f32.mrf.mxu1 }
 0x69d   :  { %v8417_v26 = vpop.f32.mrf.mxu0 }
 0x69e   :  { %v8453_v54 = vadd.f32 %v8417_v26, %v14538_v48  ;;  %v8236_v24 = vpop.f32.mrf.mxu3 }
 0x6a0   :  { %v7969_v51 = vpop.f32.mrf.mxu2  ;;  %v8871_v39 = vadd.f32 %v8835_v61, %v8453_v54 }
 0x6a1   :  { %v14572_v60 = vadd.f32 %v7969_v51, %v7575_v25  ;;  %v8840_v19 = vpop.f32.mrf.mxu1  ;;  %v8262_v25 = vadd.f32 %v8231_v56, %v14553_v30 }
 0x6a5   :  { %9131 = vmatmul.bf16.gmra.mxu2 %v14477_v62  ;;  %v8420_v23 = vpop.f32.mrf.mxu0 }
 0x6a6   :  { %v8454_v9 = vadd.f32 %v8420_v23, %v8260_v52  ;;  %v8870_v52 = vadd.f32 %v8833_v3, %v8452_v37 }
 0x6a8   :  { %v7972_v35 = vpop.f32.mrf.mxu2  ;;  %v8872_v34 = vadd.f32 %v8838_v7, %v8454_v9 }
 0x6a9   :  { %v14576_v14 = vadd.f32 %v7972_v35, %v7576_v58  ;;  %v8843_v12 = vpop.f32.mrf.mxu1 }
 0x6ad   :  { %v8422_v38 = vpop.f32.mrf.mxu0 }
 0x6ae   :  { %v8455_v33 = vadd.f32 %v8422_v38, %v8261_v15 }
 0x6b0   :  { %v7974_v53 = vpop.f32.mrf.mxu2  ;;  %v8873_v51 = vadd.f32 %v8840_v19, %v8455_v33 }
 0x6b1   :  { %v14579_v47 = vadd.f32 %v7974_v53, %v7577_v42  ;;  %v8845_v48 = vpop.f32.mrf.mxu1 }
 0x6b5   :  { %9136 = vmatmul.bf16.gmra.mxu2 %v14486_v32  ;;  %v8425_v6 = vpop.f32.mrf.mxu0 }
 0x6b6   :  { %v8456_v59 = vadd.f32 %v8425_v6, %v8262_v25 }
 0x6b8   :  { %v7977_v57 = vpop.f32.mrf.mxu2  ;;  %v8874_v3 = vadd.f32 %v8843_v12, %v8456_v59 }
 0x6b9   :  { %v14583_v62 = vadd.f32 %v7977_v57, %v7578_v13  ;;  %v8848_v53 = vpop.f32.mrf.mxu1  ;;  %v8238_v57 = vpop.f32.mrf.mxu3 }
 0x6bd   :  { %v8427_v36 = vpop.f32.mrf.mxu0 }
 0x6be   :  { %v8457_v30 = vadd.f32 %v8427_v36, %v8263_v0 }
 0x6c0   :  { %v7979_v16 = vpop.f32.mrf.mxu2  ;;  %v8875_v23 = vadd.f32 %v8845_v48, %v8457_v30 }
 0x6c1   :  { %v14586_v31 = vadd.f32 %v7979_v16, %v7579_v50  ;;  %v8264_v16 = vadd.f32 %v8236_v24, %v14562_v45  ;;  %v8850_v7 = vpop.f32.mrf.mxu1 }
 0x6c5   :  { %v8430_v42 = vpop.f32.mrf.mxu0 }
 0x6c6   :  { %v8458_v28 = vadd.f32 %v8430_v42, %v8264_v16 }
 0x6c8   :  { %v9102_v32 = vpop.f32.mrf.mxu2  ;;  %v8876_v41 = vadd.f32 %v8848_v53, %v8458_v28 }
 0x6c9   :  { %v14589_v1 = vadd.f32 %v9102_v32, %v8868_v11  ;;  %v8241_v11 = vpop.f32.mrf.mxu3  ;;  %v8265_v32 = vadd.f32 %v8238_v57, %v14565_v10  ;;  %v8853_v45 = vpop.f32.mrf.mxu1 }
 0x6cd   :  { %v8432_v50 = vpop.f32.mrf.mxu0 }
 0x6ce   :  { %v8459_v37 = vadd.f32 %v8432_v50, %v8265_v32 }
 0x6d0   :  { %v9104_v44 = vpop.f32.mrf.mxu2 }
 0x6d1   :  { %v14592_v4 = vadd.f32 %v9104_v44, %v8869_v2  ;;  %v8243_v38 = vpop.f32.mrf.mxu3 }
 0x6d2   :  { %v8267_v6 = vadd.f32 %v8243_v38, %v14572_v60 }
 0x6d3   :  { %v9158_v49 = vadd.f32 %v14592_v4, %v14589_v1 }
 0x6d5   :  { %v8435_v2 = vpop.f32.mrf.mxu0 }
 0x6d8   :  { %v9107_v40 = vpop.f32.mrf.mxu2 }
 0x6d9   :  { %v14597_v63 = vadd.f32 %v9107_v40, %v8870_v52  ;;  %v8266_v52 = vadd.f32 %v8241_v11, %v14569_v20  ;;  %v8877_v40 = vadd.f32 %v8850_v7, %v8459_v37 }
 0x6db   :  { %v9159_v22 = vadd.f32 %v9158_v49, %v14597_v63  ;;  %v8460_v10 = vadd.f32 %v8435_v2, %v8266_v52 }
 0x6dd   :  { %v8437_v54 = vpop.f32.mrf.mxu0 }
 0x6e0   :  { %v9109_v5 = vpop.f32.mrf.mxu2 }
 0x6e1   :  { %v14601_v21 = vadd.f32 %v9109_v5, %v8871_v39  ;;  %v8855_v39 = vpop.f32.mrf.mxu1  ;;  %v8878_v5 = vadd.f32 %v8853_v45, %v8460_v10 }
 0x6e3   :  { %v9160_v27 = vadd.f32 %v9159_v22, %v14601_v21 }
 0x6e5   :  { %v8440_v36 = vpop.f32.mrf.mxu0 }
 0x6e8   :  { %v9112_v18 = vpop.f32.mrf.mxu2 }
 0x6e9   :  { %v14605_v29 = vadd.f32 %v9112_v18, %v8872_v34  ;;  %v8461_v18 = vadd.f32 %v8437_v54, %v8267_v6  ;;  %v8858_v33 = vpop.f32.mrf.mxu1 }
 0x6eb   :  { %v9161_v17 = vadd.f32 %v9160_v27, %v14605_v29  ;;  %v8246_v27 = vpop.f32.mrf.mxu3 }
 0x6ec   :  { %v8268_v20 = vadd.f32 %v8246_v27, %v14576_v14 }
 0x6f0   :  { %v9114_v43 = vpop.f32.mrf.mxu2 }
 0x6f1   :  { %v14609_v58 = vadd.f32 %v9114_v43, %v8873_v51  ;;  %v8462_v43 = vadd.f32 %v8440_v36, %v8268_v20 }
 0x6f3   :  { %v9162_v35 = vadd.f32 %v9161_v17, %v14609_v58  ;;  %v8879_v17 = vadd.f32 %v8855_v39, %v8461_v18  ;;  %v8248_v51 = vpop.f32.mrf.mxu3  ;;  %v8880_v60 = vadd.f32 %v8858_v33, %v8462_v43 }
 0x6f4   :  { %v8269_v59 = vadd.f32 %v8248_v51, %v14579_v47 }
 0x6f8   :  { %v9117_v13 = vpop.f32.mrf.mxu2 }
 0x6f9   :  { %v14613_v26 = vadd.f32 %v9117_v13, %v8874_v3  ;;  %v8860_v3 = vpop.f32.mrf.mxu1 }
 0x6fb   :  { %v9163_v61 = vadd.f32 %v9162_v35, %v14613_v26  ;;  %v8442_v35 = vpop.f32.mrf.mxu0  ;;  %v8251_v57 = vpop.f32.mrf.mxu3 }
 0x6fc   :  { %v8463_v13 = vadd.f32 %v8442_v35, %v8269_v59 }
 0x6fe   :  { %v8881_v14 = vadd.f32 %v8860_v3, %v8463_v13 }
 0x700   :  { %v9119_v46 = vpop.f32.mrf.mxu2 }
 0x701   :  { %v14617_v9 = vadd.f32 %v9119_v46, %v8875_v23  ;;  %v8863_v7 = vpop.f32.mrf.mxu1 }
 0x703   :  { %v9164_v34 = vadd.f32 %v9163_v61, %v14617_v9  ;;  %v8270_v61 = vadd.f32 %v8251_v57, %v14583_v62  ;;  %v8445_v30 = vpop.f32.mrf.mxu0 }
 0x705   :  { %v8464_v46 = vadd.f32 %v8445_v30, %v8270_v61 }
 0x707   :  { %v8882_v47 = vadd.f32 %v8863_v7, %v8464_v46 }
 0x708   :  { %v9122_v44 = vpop.f32.mrf.mxu2 }
 0x709   :  { %v14621_v8 = vadd.f32 %v9122_v44, %v8876_v41 }
 0x70b   :  { %v9165_v49 = vadd.f32 %v9164_v34, %v14621_v8  ;;  %v8253_v34 = vpop.f32.mrf.mxu3  ;;  %v8447_v41 = vpop.f32.mrf.mxu0 }
 0x70c   :  { %v8271_v28 = vadd.f32 %v8253_v34, %v14586_v31 }
 0x70e   :  { %v8465_v44 = vadd.f32 %v8447_v41, %v8271_v28 }
 0x710   :  { %v9124_v19 = vpop.f32.mrf.mxu2 }
 0x711   :  { %v14625_v22 = vadd.f32 %v9124_v19, %v8877_v40 }
 0x713   :  { %v9166_v56 = vadd.f32 %v9165_v49, %v14625_v22  ;;  %v8865_v49 = vpop.f32.mrf.mxu1 }
 0x714   :  { %v8883_v37 = vadd.f32 %v8865_v49, %v8465_v44 }
 0x718   :  { %v9127_v12 = vpop.f32.mrf.mxu2 }
 0x719   :  { %v9152_v55 = vadd.f32 %v9127_v12, %v8878_v5 }
 0x71b   :  { %v9167_v15 = vadd.f32 %v9166_v56, %v9152_v55 }
 0x720   :  { %v9129_v48 = vpop.f32.mrf.mxu2 }
 0x721   :  { %v9153_v25 = vadd.f32 %v9129_v48, %v8879_v17 }
 0x723   :  { %v9168_v24 = vadd.f32 %v9167_v15, %v9153_v25 }
 0x728   :  { %v9132_v42 = vpop.f32.mrf.mxu2 }
 0x729   :  { %v9154_v0 = vadd.f32 %v9132_v42, %v8880_v60 }
 0x72b   :  { %v9169_v53 = vadd.f32 %v9168_v24, %v9154_v0 }
 0x730   :  { %v9134_v50 = vpop.f32.mrf.mxu2 }
 0x731   :  { %v9155_v16 = vadd.f32 %v9134_v50, %v8881_v14 }
 0x733   :  { %v9170_v23 = vadd.f32 %v9169_v53, %v9155_v16 }
 0x738   :  { %v9137_v11 = vpop.f32.mrf.mxu2 }
 0x739   :  { %v9156_v32 = vadd.f32 %v9137_v11, %v8882_v47 }
 0x73b   :  { %v9171_v2 = vadd.f32 %v9170_v23, %v9156_v32 }
 0x740   :  { %v9139_v45 = vpop.f32.mrf.mxu2 }
 0x741   :  { %v9157_v62 = vadd.f32 %v9139_v45, %v8883_v37 }
 0x743   :  { %v9172_v38 = vadd.f32 %v9171_v2, %v9157_v62 }
 0x745   :  { %v9173_v52 = vrot.slane %v9172_v38, 4 }
 0x747   :  { %v9174_v40 = vadd.f32 %v9173_v52, %v9172_v38 }
 0x749   :  { %v9175_v19 = vrot.slane %v9174_v40, 2 }
 0x74b   :  { %v9176_v54 = vadd.f32 %v9175_v19, %v9174_v40 }
 0x74d   :  { %v9177_v56 = vrot.slane %v9176_v54, 1 }
 0x74f   :  { %v9178_v10 = vadd.f32 %v9177_v56, %v9176_v54  ;;  %v9234_v54 = vld [vmem:[%s14806_s8] sm:$0x1] }
 0x751   :  { %v9179_v39 = vmul.f32 0.0078125, %v9178_v10 }
 0x753   :  { %v14634_v31 = vsub.f32 %v14589_v1, %v9179_v39  ;;  %v14637_v6 = vsub.f32 %v14592_v4, %v9179_v39  ;;  %v14640_v5 = vsub.f32 %v14597_v63, %v9179_v39  ;;  %v14643_v27 = vsub.f32 %v14601_v21, %v9179_v39 }
 0x754   :  { %v14646_v12 = vsub.f32 %v14605_v29, %v9179_v39  ;;  %v14649_v15 = vsub.f32 %v14609_v58, %v9179_v39  ;;  %v14652_v18 = vsub.f32 %v14613_v26, %v9179_v39  ;;  %v14655_v1 = vsub.f32 %v14617_v9, %v9179_v39 }
 0x755   :  { %v14658_v4 = vsub.f32 %v14621_v8, %v9179_v39  ;;  %v14661_v63 = vsub.f32 %v14625_v22, %v9179_v39  ;;  %v14663_v21 = vsub.f32 %v9152_v55, %v9179_v39  ;;  %v14665_v36 = vsub.f32 %v9153_v25, %v9179_v39 }
 0x756   :  { %v14667_v29 = vsub.f32 %v9154_v0, %v9179_v39  ;;  %v14669_v58 = vsub.f32 %v9155_v16, %v9179_v39  ;;  %v14671_v20 = vsub.f32 %v9156_v32, %v9179_v39  ;;  %v14673_v26 = vsub.f32 %v9157_v62, %v9179_v39 }
 0x757   :  { %v9196_v9 = vmul.f32 %v14634_v31, %v14634_v31  ;;  %v9197_v8 = vmul.f32 %v14637_v6, %v14637_v6  ;;  %v9198_v22 = vmul.f32 %v14640_v5, %v14640_v5  ;;  %v9199_v17 = vmul.f32 %v14643_v27, %v14643_v27 }
 0x758   :  { %v9200_v48 = vmul.f32 %v14646_v12, %v14646_v12  ;;  %v9201_v51 = vmul.f32 %v14649_v15, %v14649_v15  ;;  %v9202_v43 = vmul.f32 %v14652_v18, %v14652_v18  ;;  %v9203_v59 = vmul.f32 %v14655_v1, %v14655_v1 }
 0x759   :  { %v9212_v55 = vadd.f32 %v9197_v8, %v9196_v9  ;;  %v9204_v42 = vmul.f32 %v14658_v4, %v14658_v4  ;;  %v9205_v3 = vmul.f32 %v14661_v63, %v14661_v63  ;;  %v9206_v13 = vmul.f32 %v14663_v21, %v14663_v21 }
 0x75a   :  { %v9207_v61 = vmul.f32 %v14665_v36, %v14665_v36  ;;  %v9208_v30 = vmul.f32 %v14667_v29, %v14667_v29  ;;  %v9209_v16 = vmul.f32 %v14669_v58, %v14669_v58  ;;  %v9210_v46 = vmul.f32 %v14671_v20, %v14671_v20 }
 0x75b   :  { %v9213_v33 = vadd.f32 %v9212_v55, %v9198_v22  ;;  %v9211_v34 = vmul.f32 %v14673_v26, %v14673_v26 }
 0x75d   :  { %v9214_v25 = vadd.f32 %v9213_v33, %v9199_v17  ;;  %v14716_v17 = vld [vmem:[%s14807_s9] ss:$0 sm:$0xff] }
 0x75f   :  { %v9215_v24 = vadd.f32 %v9214_v25, %v9200_v48 }
 0x761   :  { %v9216_v35 = vadd.f32 %v9215_v24, %v9201_v51 }
 0x763   :  { %v9217_v60 = vadd.f32 %v9216_v35, %v9202_v43 }
 0x765   :  { %v9218_v0 = vadd.f32 %v9217_v60, %v9203_v59  ;;  %v9290_v59 = vld [vmem:[%s14798_s0 + $0x20] sm:$0xff] }
 0x767   :  { %v9219_v53 = vadd.f32 %v9218_v0, %v9204_v42  ;;  %v9291_v42 = vld [vmem:[%s14798_s0 + $0x28] sm:$0xff] }
 0x769   :  { %v9220_v57 = vadd.f32 %v9219_v53, %v9205_v3  ;;  %v9292_v3 = vld [vmem:[%s14798_s0 + $0x30] sm:$0xff] }
 0x76b   :  { %v9221_v14 = vadd.f32 %v9220_v57, %v9206_v13 }
 0x76d   :  { %v9222_v50 = vadd.f32 %v9221_v14, %v9207_v61  ;;  %v9293_v14 = vld [vmem:[%s14798_s0 + $0x38] sm:$0xff] }
 0x76f   :  { %v9223_v23 = vadd.f32 %v9222_v50, %v9208_v30 }
 0x771   :  { %v9224_v7 = vadd.f32 %v9223_v23, %v9209_v16  ;;  %v9294_v23 = vld [vmem:[%s14798_s0 + $0x40] sm:$0xff] }
 0x773   :  { %v9225_v28 = vadd.f32 %v9224_v7, %v9210_v46 }
 0x775   :  { %v9226_v47 = vadd.f32 %v9225_v28, %v9211_v34  ;;  %v9295_v28 = vld [vmem:[%s14798_s0 + $0x48] sm:$0xff] }
 0x777   :  { %v9227_v11 = vrot.slane %v9226_v47, 4 }
 0x779   :  { %v9228_v32 = vadd.f32 %v9227_v11, %v9226_v47  ;;  %v9296_v47 = vld [vmem:[%s14798_s0 + $0x50] sm:$0xff] }
 0x77b   :  { %v9229_v41 = vrot.slane %v9228_v32, 2 }
 0x77d   :  { %v9230_v2 = vadd.f32 %v9229_v41, %v9228_v32 }
 0x77f   :  { %v9231_v44 = vrot.slane %v9230_v2, 1 }
 0x781   :  { %v9232_v49 = vadd.f32 %v9231_v44, %v9230_v2 }
 0x783   :  { %v9233_v37 = vmul.f32 0.0078125, %v9232_v49 }
 0x785   :  { %v9235_v45 = vadd.f32 1e-05, %v9233_v37  ;;  %v9297_v37 = vld [vmem:[%s14798_s0 + $0x58] sm:$0xff] }
 0x787   :  { %11387 = vrsqrt.f32 %v9235_v45  ;;  %vm9242_vm4 = vweird.f32 %v9235_v45 }
 0x78d   :  { %v11388_v62 = vpop.eup %11387 }
 0x78e   :  { %v9237_v38 = vmul.f32 %v11388_v62, %v9235_v45  ;;  %vm9243_vm3 = vweird.f32 %v11388_v62 }
 0x78f   :  { %vm9244_vm5 = vmor %vm9242_vm4, %vm9243_vm3 }
 0x790   :  { %v9238_v52 = vmul.f32 %v11388_v62, %v9237_v38 }
 0x792   :  { %v9239_v40 = vmul.f32 0.5, %v9238_v52 }
 0x794   :  { %v9240_v19 = vsub.f32 1.5, %v9239_v40  ;;  %v9298_v40 = vld [vmem:[%s14798_s0 + $0x60] sm:$0xff] }
 0x796   :  { %v9241_v56 = vmul.f32 %v11388_v62, %v9240_v19 }
 0x798   :  { %v9245_v10 = vsel %vm9244_vm5, %v11388_v62, %v9241_v56 }
 0x799   :  { %v9246_v39 = vmul.f32 %v9245_v10, %v9234_v54 }
 0x79b   :  { %v9248_v9 = vperm.slane %v9246_v39, 0  ;;  %v9299_v39 = vld [vmem:[%s14798_s0 + $0x68] sm:$0xff] }
 0x79d   :  { %v9250_v8 = vmul.f32 %v9248_v9, %v14634_v31  ;;  %v9251_v22 = vmul.f32 %v9248_v9, %v14637_v6  ;;  %v9252_v55 = vmul.f32 %v9248_v9, %v14640_v5  ;;  %v9253_v33 = vmul.f32 %v9248_v9, %v14643_v27 }
 0x79e   :  { %v9254_v48 = vmul.f32 %v9248_v9, %v14646_v12  ;;  %v9255_v25 = vmul.f32 %v9248_v9, %v14649_v15  ;;  %v9256_v51 = vmul.f32 %v9248_v9, %v14652_v18  ;;  %v9258_v24 = vmul.f32 %v9248_v9, %v14658_v4 }
 0x79f   :  { %v9259_v31 = vmul.f32 %v9248_v9, %v14661_v63  ;;  %v9260_v6 = vmul.f32 %v9248_v9, %v14663_v21  ;;  %v9261_v5 = vmul.f32 %v9248_v9, %v14665_v36  ;;  %v9262_v43 = vmul.f32 %v9248_v9, %v14667_v29  ;;  %v9286_v29 = vld [vmem:[%s14798_s0] sm:$0xff] }
 0x7a0   :  { %v9263_v35 = vmul.f32 %v9248_v9, %v14669_v58  ;;  %v9264_v27 = vmul.f32 %v9248_v9, %v14671_v20  ;;  %v9265_v12 = vmul.f32 %v9248_v9, %v14673_v26  ;;  %v9257_v15 = vmul.f32 %v9248_v9, %v14655_v1  ;;  %v9287_v58 = vld [vmem:[%s14798_s0 + $0x8] sm:$0xff]  ;;  %v9288_v1 = vld [vmem:[%s14798_s0 + $0x10] sm:$0xff]  ;;  %v9289_v26 = vld [vmem:[%s14798_s0 + $0x18] sm:$0xff] }
 0x7a1   :  { %v9270_v18 = vadd.f32 %v14716_v17, %v9250_v8  ;;  %v9271_v4 = vadd.f32 %v14716_v17, %v9251_v22  ;;  %v9272_v63 = vadd.f32 %v14716_v17, %v9252_v55  ;;  %v9273_v21 = vadd.f32 %v14716_v17, %v9253_v33  ;;  %v9300_v33 = vld [vmem:[%s14798_s0 + $0x70] sm:$0xff] }
 0x7a2   :  { %v9274_v36 = vadd.f32 %v14716_v17, %v9254_v48  ;;  %v9275_v20 = vadd.f32 %v14716_v17, %v9255_v25  ;;  %v9276_v60 = vadd.f32 %v14716_v17, %v9256_v51  ;;  %v9277_v0 = vadd.f32 %v14716_v17, %v9257_v15 }
 0x7a3   :  { %v9302_v53 = vadd.f32 %v9286_v29, %v9270_v18  ;;  %v9303_v13 = vadd.f32 %v9287_v58, %v9271_v4  ;;  %v9304_v57 = vadd.f32 %v9288_v1, %v9272_v63  ;;  %v9278_v61 = vadd.f32 %v14716_v17, %v9258_v24  ;;  %v9301_v24 = vld [vmem:[%s14798_s0 + $0x78] sm:$0xff]  ;;  %s11431_s0 = smov [#allocation3]  }
 0x7a4   :  { %v9305_v30 = vadd.f32 %v9289_v26, %v9273_v21  ;;  %v9306_v50 = vadd.f32 %v9290_v59, %v9274_v36  ;;  %v9279_v16 = vadd.f32 %v14716_v17, %v9259_v31  ;;  %v9307_v46 = vadd.f32 %v9291_v42, %v9275_v20  ;;  %s9370_s12 = sshll.u32 %s11431_s0, 4  ;;  %s9371_s12 = int_to_ptr.vmem [resolvable:$true] %s9370_s12 }
 0x7a5   :  { %v9280_v7 = vadd.f32 %v14716_v17, %v9260_v6  ;;  %v9281_v34 = vadd.f32 %v14716_v17, %v9261_v5  ;;  %v9308_v11 = vadd.f32 %v9292_v3, %v9276_v60  ;;  %v9309_v32 = vadd.f32 %v9293_v14, %v9277_v0 }
 0x7a6   :  { %v9318_v41 = vmul.f32 0.1, %v9302_v53  ;;  %v9319_v2 = vmul.f32 0.1, %v9303_v13  ;;  %v9320_v44 = vmul.f32 0.1, %v9304_v57  ;;  %v9282_v49 = vadd.f32 %v14716_v17, %v9262_v43 }
 0x7a7   :  { %v9310_v45 = vadd.f32 %v9294_v23, %v9278_v61  ;;  %v9321_v62 = vmul.f32 0.1, %v9305_v30  ;;  %v9322_v38 = vmul.f32 0.1, %v9306_v50  ;;  %v9283_v52 = vadd.f32 %v14716_v17, %v9263_v35 }
 0x7a8   :  { %v9311_v19 = vadd.f32 %v9295_v28, %v9279_v16  ;;  %v9323_v54 = vmul.f32 0.1, %v9307_v46  ;;  %v9334_v56 = vmax.f32 %v9302_v53, %v9318_v41  ;;  %v9284_v10 = vadd.f32 %v14716_v17, %v9264_v27 }
 0x7a9   :  { %v9312_v9 = vadd.f32 %v9296_v47, %v9280_v7  ;;  %v9324_v8 = vmul.f32 0.1, %v9308_v11  ;;  %v9335_v22 = vmax.f32 %v9303_v13, %v9319_v2  ;;  %v9285_v55 = vadd.f32 %v14716_v17, %v9265_v12 }
 0x7aa   :  { %v9313_v48 = vadd.f32 %v9297_v37, %v9281_v34  ;;  %v9325_v25 = vmul.f32 0.1, %v9309_v32  ;;  %v9336_v51 = vmax.f32 %v9304_v57, %v9320_v44  ;;  %v9314_v31 = vadd.f32 %v9298_v40, %v9282_v49  ;;  %9350 = vst [vmem:[#allocation3] sm:$0xff] %v9334_v56 }
 0x7ab   :  { %v9326_v6 = vmul.f32 0.1, %v9310_v45  ;;  %v9337_v5 = vmax.f32 %v9305_v30, %v9321_v62  ;;  %v9338_v43 = vmax.f32 %v9306_v50, %v9322_v38  ;;  %v9315_v35 = vadd.f32 %v9299_v39, %v9283_v52  ;;  %9351 = vst [vmem:[#allocation3 + $0x8] sm:$0xff] %v9335_v22 }
 0x7ac   :  { %v9327_v27 = vmul.f32 0.1, %v9311_v19  ;;  %v9339_v15 = vmax.f32 %v9307_v46, %v9323_v54  ;;  %v9316_v17 = vadd.f32 %v9300_v33, %v9284_v10  ;;  %v9328_v12 = vmul.f32 0.1, %v9312_v9  ;;  %9352 = vst [vmem:[#allocation3 + $0x10] sm:$0xff] %v9336_v51 }
 0x7ad   :  { %v9340_v18 = vmax.f32 %v9308_v11, %v9324_v8  ;;  %v9317_v4 = vadd.f32 %v9301_v24, %v9285_v55  ;;  %v9329_v63 = vmul.f32 0.1, %v9313_v48  ;;  %v9341_v21 = vmax.f32 %v9309_v32, %v9325_v25  ;;  %9353 = vst [vmem:[#allocation3 + $0x18] sm:$0xff] %v9337_v5 }
 0x7ae   :  { %v9330_v36 = vmul.f32 0.1, %v9314_v31  ;;  %v9342_v29 = vmax.f32 %v9310_v45, %v9326_v6  ;;  %9354 = vst [vmem:[#allocation3 + $0x20] sm:$0xff] %v9338_v43  ;;  %v9331_v58 = vmul.f32 0.1, %v9315_v35  ;;  %v9343_v1 = vmax.f32 %v9311_v19, %v9327_v27 }
 0x7af   :  { %9355 = vst [vmem:[#allocation3 + $0x28] sm:$0xff] %v9339_v15  ;;  %v9332_v20 = vmul.f32 0.1, %v9316_v17  ;;  %v9344_v26 = vmax.f32 %v9312_v9, %v9328_v12  ;;  %v9333_v59 = vmul.f32 0.1, %v9317_v4  ;;  %v9345_v60 = vmax.f32 %v9313_v48, %v9329_v63 }
 0x7b0   :  { %9356 = vst [vmem:[#allocation3 + $0x30] sm:$0xff] %v9340_v18  ;;  %v9346_v42 = vmax.f32 %v9314_v31, %v9330_v36  ;;  %v9347_v0 = vmax.f32 %v9315_v35, %v9331_v58 }
 0x7b1   :  { %9357 = vst [vmem:[#allocation3 + $0x38] sm:$0xff] %v9341_v21  ;;  %v9348_v3 = vmax.f32 %v9316_v17, %v9332_v20  ;;  %v9349_v53 = vmax.f32 %v9317_v4, %v9333_v59 }
 0x7b2   :  { %9358 = vst [vmem:[#allocation3 + $0x40] sm:$0xff] %v9342_v29 }
 0x7b3   :  { %9359 = vst [vmem:[#allocation3 + $0x48] sm:$0xff] %v9343_v1 }
 0x7b4   :  { %9360 = vst [vmem:[#allocation3 + $0x50] sm:$0xff] %v9344_v26 }
 0x7b5   :  { %9361 = vst [vmem:[#allocation3 + $0x58] sm:$0xff] %v9345_v60 }
 0x7b6   :  { %9362 = vst [vmem:[#allocation3 + $0x60] sm:$0xff] %v9346_v42 }
 0x7b7   :  { %9363 = vst [vmem:[#allocation3 + $0x68] sm:$0xff] %v9347_v0 }
 0x7b8   :  { %9364 = vst [vmem:[#allocation3 + $0x70] sm:$0xff] %v9348_v3 }
 0x7b9   :  { %9365 = vst [vmem:[#allocation3 + $0x78] sm:$0xff] %v9349_v53 }
 0x7ba   :  { %9378 = dma.vmem_to_hbm [thread:$0]  %s9371_s12, 2048, %s9373_s15, [#allocation4], %s11432_s4, %s11432_s4, %s11433_s16  }
 0x7bb   :  { %11428 = dma.done.wait [#allocation4], 2048  }
 0x7bc   :  { %11429 = vsyncadd [#allocation4], 4294965248 }
 0x7bd   :  { %9383 = vsyncpa [#allocation4], 1 }

</bundles_post_ra>
